<compile_context>
chip_gen: v6e
topology: v6e:2x2x1
jax: 0.10.0
libtpu: 0.0.40
codegen_flags: <defaults>
</compile_context>

<pallas_src>
import functools
import math

import jax
import jax.numpy as jnp
from jax.experimental import pallas as pl
from jax.experimental.pallas import tpu as pltpu

_VMEM_LIMIT = 48 * 1024 * 1024   # safe for v7x (64 MiB physical), fine on v5e/v6e
_TM = 512                        # row tile (sweepable 256..1024)
_TN = 512                        # col tile (multiple of 256 for v6e/v7x MXU)


# --------------------------------------------------------------------------
# Pallas kernels
# --------------------------------------------------------------------------
def _mm_bias_kernel(x_ref, w_ref, b_ref, o_ref):
    # x_ref: (tm, K) f32, w_ref: (K, tn) bf16, b_ref: (1, tn) f32, o: (tm, tn)
    x = x_ref[...].astype(jnp.bfloat16)
    acc = jnp.dot(x, w_ref[...], preferred_element_type=jnp.float32)
    acc = acc + b_ref[...]
    o_ref[...] = acc.astype(o_ref.dtype)


def _geglu_kernel(x_ref, w_ref, b_ref, o_ref, *, tn):
    # One MXU dot per tile against the interleaved [hidden | gate] weight block,
    # then a lane-aligned split (tn is a multiple of 128 at real sizes).
    x = x_ref[...].astype(jnp.bfloat16)
    p = jnp.dot(x, w_ref[...], preferred_element_type=jnp.float32) + b_ref[...]
    h = p[:, :tn]
    g = p[:, tn:]
    # exact erf-based GELU in f32 (matches torch F.gelu(approximate='none'))
    gelu_g = 0.5 * g * (1.0 + jax.lax.erf(g * (1.0 / math.sqrt(2.0))))
    o_ref[...] = (h * gelu_g).astype(o_ref.dtype)


def _sdpa_math(q, k, v, scale):
    # Shared by the Pallas kernel and the pure-JAX reference path so both use
    # the exact same precision policy (bf16 MXU operands, f32 accumulation).
    s = jax.lax.dot_general(
        q.astype(jnp.bfloat16), k.astype(jnp.bfloat16),
        dimension_numbers=(((1,), (1,)), ((), ())),
        preferred_element_type=jnp.float32) * scale
    s = s - jnp.max(s, axis=-1, keepdims=True)
    p = jnp.exp(s)
    l = jnp.sum(p, axis=-1, keepdims=True)
    o = jnp.dot(p.astype(jnp.bfloat16), v.astype(jnp.bfloat16),
                preferred_element_type=jnp.float32)
    return o / l


def _attn_kernel(q_ref, k_ref, v_ref, o_ref, *, scale):
    # blocks: (1, Sq, D), (1, Skv, D), (1, Skv, D) -> (1, Sq, D)
    q = q_ref[...][0]
    k = k_ref[...][0]
    v = v_ref[...][0]
    o = _sdpa_math(q, k, v, scale)
    o_ref[...] = o[None].astype(o_ref.dtype)


# --------------------------------------------------------------------------
# Pallas wrappers (with pure-JAX reference path selected by use_pallas)
# --------------------------------------------------------------------------
def mm_bias(x2d, w_kn, b, *, use_pallas=True, tm=_TM, tn=_TN):
    """y = x2d @ w_kn + b  (bf16 MXU operands, f32 accumulation)."""
    M, K = x2d.shape
    K2, N = w_kn.shape
    assert K2 == K
    w_bf = w_kn.astype(jnp.bfloat16)
    b2d = b.reshape(1, N).astype(jnp.float32)

    if not use_pallas:
        acc = jnp.dot(x2d.astype(jnp.bfloat16), w_bf,
                      preferred_element_type=jnp.float32) + b2d
        return acc.astype(x2d.dtype)

    tm_eff = tm if M >= tm else M
    tn_eff = tn if N >= tn else N
    grid = (pl.cdiv(M, tm_eff), pl.cdiv(N, tn_eff))
    return pl.pallas_call(
        _mm_bias_kernel,
        out_shape=jax.ShapeDtypeStruct((M, N), x2d.dtype),
        grid_spec=pltpu.PrefetchScalarGridSpec(
            num_scalar_prefetch=0,
            grid=grid,
            in_specs=[
                pl.BlockSpec((tm_eff, K), lambda i, j: (i, 0)),
                pl.BlockSpec((K, tn_eff), lambda i, j: (0, j)),
                pl.BlockSpec((1, tn_eff), lambda i, j: (0, j)),
            ],
            out_specs=pl.BlockSpec((tm_eff, tn_eff), lambda i, j: (i, j)),
        ),
        compiler_params=pltpu.CompilerParams(
            dimension_semantics=("parallel", "parallel"),
            vmem_limit_bytes=_VMEM_LIMIT),
    )(x2d, w_bf, b2d)


def geglu(x2d, w_k2n, b_2n, *, use_pallas=True, tm=_TM, tn=_TN):
    """GEGLU: split proj into hidden|gate halves, return hidden * gelu(gate).

    w_k2n: (K, 2*dout) matmul layout; first dout columns = hidden half,
           last dout columns = gate half (== torch .chunk(2, dim=1)).
    """
    M, K = x2d.shape
    two_dout = w_k2n.shape[1]
    dout = two_dout // 2
    w_h, w_g = w_k2n[:, :dout], w_k2n[:, dout:]
    b_h, b_g = b_2n[:dout], b_2n[dout:]

    if not use_pallas:
        xb = x2d.astype(jnp.bfloat16)
        h = jnp.dot(xb, w_h.astype(jnp.bfloat16),
                    preferred_element_type=jnp.float32) + b_h[None, :]
        g = jnp.dot(xb, w_g.astype(jnp.bfloat16),
                    preferred_element_type=jnp.float32) + b_g[None, :]
        gelu_g = 0.5 * g * (1.0 + jax.lax.erf(g * (1.0 / math.sqrt(2.0))))
        return (h * gelu_g).astype(x2d.dtype)

    tm_eff = tm if M >= tm else M
    tn_eff = tn if dout >= tn else dout
    nt = pl.cdiv(dout, tn_eff)
    dout_p = nt * tn_eff
    if dout_p != dout:   # pad only the (small) weights, never the activations
        pad = dout_p - dout
        w_h = jnp.pad(w_h, ((0, 0), (0, pad)))
        w_g = jnp.pad(w_g, ((0, 0), (0, pad)))
        b_h = jnp.pad(b_h, (0, pad))
        b_g = jnp.pad(b_g, (0, pad))

    # Per-N-tile interleave so each grid step does a single MXU dot whose
    # output lanes are [hidden(tn) | gate(tn)] for that tile.
    w_cat = jnp.stack(
        [w_h.reshape(K, nt, tn_eff), w_g.reshape(K, nt, tn_eff)], axis=2
    ).reshape(K, 2 * dout_p).astype(jnp.bfloat16)
    b_cat = jnp.stack(
        [b_h.reshape(nt, tn_eff), b_g.reshape(nt, tn_eff)], axis=1
    ).reshape(1, 2 * dout_p).astype(jnp.float32)

    grid = (pl.cdiv(M, tm_eff), nt)
    out = pl.pallas_call(
        functools.partial(_geglu_kernel, tn=tn_eff),
        out_shape=jax.ShapeDtypeStruct((M, dout_p), x2d.dtype),
        grid_spec=pltpu.PrefetchScalarGridSpec(
            num_scalar_prefetch=0,
            grid=grid,
            in_specs=[
                pl.BlockSpec((tm_eff, K), lambda i, j: (i, 0)),
                pl.BlockSpec((K, 2 * tn_eff), lambda i, j: (0, j)),
                pl.BlockSpec((1, 2 * tn_eff), lambda i, j: (0, j)),
            ],
            out_specs=pl.BlockSpec((tm_eff, tn_eff), lambda i, j: (i, j)),
        ),
        compiler_params=pltpu.CompilerParams(
            dimension_semantics=("parallel", "parallel"),
            vmem_limit_bytes=_VMEM_LIMIT),
    )(x2d, w_cat, b_cat)
    if dout_p != dout:
        out = out[:, :dout]
    return out


def sdpa(q, k, v, *, use_pallas=True):
    """softmax(q k^T / sqrt(d)) v over (batch*heads, seq, d_head)."""
    BH, Sq, D = q.shape
    Skv = k.shape[1]
    scale = 1.0 / math.sqrt(D)
    if not use_pallas:
        return jax.vmap(
            lambda qq, kk, vv: _sdpa_math(qq, kk, vv, scale))(q, k, v
        ).astype(q.dtype)
    # TODO(synk): a production kernel would tile Skv flash-style; whole-sequence
    # blocks are fine at mid-block sizes (Skv <= a few thousand).
    return pl.pallas_call(
        functools.partial(_attn_kernel, scale=scale),
        out_shape=jax.ShapeDtypeStruct((BH, Sq, D), q.dtype),
        grid_spec=pltpu.PrefetchScalarGridSpec(
            num_scalar_prefetch=0,
            grid=(BH,),
            in_specs=[
                pl.BlockSpec((1, Sq, D), lambda b: (b, 0, 0)),
                pl.BlockSpec((1, Skv, D), lambda b: (b, 0, 0)),
                pl.BlockSpec((1, Skv, D), lambda b: (b, 0, 0)),
            ],
            out_specs=pl.BlockSpec((1, Sq, D), lambda b: (b, 0, 0)),
        ),
        compiler_params=pltpu.CompilerParams(
            dimension_semantics=("parallel",),
            vmem_limit_bytes=_VMEM_LIMIT),
    )(q, k, v)


# --------------------------------------------------------------------------
# JAX glue (norms / activations / im2col) shared by both paths
# --------------------------------------------------------------------------
def silu(x):
    return x * jax.nn.sigmoid(x)


def group_norm(x_tok, gamma, beta, groups, eps):
    # x_tok: (N, S, C); stats per (sample, group) over (S, C//groups)
    N, S, C = x_tok.shape
    xg = x_tok.reshape(N, S, groups, C // groups)
    mean = jnp.mean(xg, axis=(1, 3), keepdims=True)
    var = jnp.mean((xg - mean) ** 2, axis=(1, 3), keepdims=True)
    xn = ((xg - mean) * jax.lax.rsqrt(var + eps)).reshape(N, S, C)
    return xn * gamma[None, None, :] + beta[None, None, :]


def layer_norm_ane(x_tok, gamma, beta, eps=1e-5):
    # ANE layer norm over the channel dim: (normed + bias) * weight
    mean = jnp.mean(x_tok, axis=-1, keepdims=True)
    zm = x_tok - mean
    var = jnp.mean(zm * zm, axis=-1, keepdims=True)
    return (zm * jax.lax.rsqrt(var + eps) + beta[None, None, :]) * gamma[None, None, :]


def conv3x3(x_tok, H, W, w_oihw, b, *, use_pallas):
    # TODO(synk): im2col is plain XLA data movement (9x activation expansion);
    # a halo-aware Pallas conv kernel would avoid it.
    N, S, Cin = x_tok.shape
    Cout = w_oihw.shape[0]
    x_img = x_tok.reshape(N, H, W, Cin)
    xp = jnp.pad(x_img, ((0, 0), (1, 1), (1, 1), (0, 0)))
    patches = jnp.concatenate(
        [xp[:, kh:kh + H, kw:kw + W, :] for kh in range(3) for kw in range(3)],
        axis=-1)                                              # (N, H, W, 9*Cin)
    w_kn = jnp.transpose(w_oihw, (2, 3, 1, 0)).reshape(9 * Cin, Cout)
    out = mm_bias(patches.reshape(N * H * W, 9 * Cin), w_kn, b,
                  use_pallas=use_pallas)
    return out.reshape(N, S, Cout)


# --------------------------------------------------------------------------
# Module forward (ResnetBlock2D -> SpatialTransformer -> ResnetBlock2D)
# --------------------------------------------------------------------------
def resnet_forward(p, tok, H, W, temb, groups, eps, use_pallas):
    h = silu(group_norm(tok, p["norm1_g"], p["norm1_b"], groups, eps))
    h = conv3x3(h, H, W, p["conv1_w"], p["conv1_b"], use_pallas=use_pallas)
    if temb is not None:
        t = mm_bias(silu(temb), p["temb_w"], p["temb_b"], use_pallas=use_pallas)
        h = h + t[:, None, :]
    h = silu(group_norm(h, p["norm2_g"], p["norm2_b"], groups, eps))
    h = conv3x3(h, H, W, p["conv2_w"], p["conv2_b"], use_pallas=use_pallas)
    return tok + h   # in_channels == out_channels -> no conv_shortcut


def attention(p, x_tok, ctx_tok, n_heads, use_pallas):
    N, Sq, C = x_tok.shape
    inner = p["wo"].shape[0]
    d = inner // n_heads
    if ctx_tok is None:          # self-attention: fuse q|k|v into one matmul
        wqkv = jnp.concatenate([p["wq"], p["wk"], p["wv"]], axis=1)
        qkv = mm_bias(x_tok.reshape(N * Sq, C), wqkv,
                      jnp.zeros((3 * inner,), jnp.float32), use_pallas=use_pallas)
        q = qkv[:, :inner]
        k = qkv[:, inner:2 * inner]
        v = qkv[:, 2 * inner:]
        Skv = Sq
    else:                        # cross-attention: q from hidden, fused k|v from context
        Skv = ctx_tok.shape[1]
        Cc = ctx_tok.shape[-1]
        q = mm_bias(x_tok.reshape(N * Sq, C), p["wq"],
                    jnp.zeros((inner,), jnp.float32), use_pallas=use_pallas)
        wkv = jnp.concatenate([p["wk"], p["wv"]], axis=1)
        kv = mm_bias(ctx_tok.reshape(N * Skv, Cc), wkv,
                     jnp.zeros((2 * inner,), jnp.float32), use_pallas=use_pallas)
        k = kv[:, :inner]
        v = kv[:, inner:]

    def to_heads(t, S):
        return t.reshape(N, S, n_heads, d).transpose(0, 2, 1, 3).reshape(
            N * n_heads, S, d)

    oh = sdpa(to_heads(q, Sq), to_heads(k, Skv), to_heads(v, Skv),
              use_pallas=use_pallas)
    o = oh.reshape(N, n_heads, Sq, d).transpose(0, 2, 1, 3).reshape(N * Sq, inner)
    o = mm_bias(o, p["wo"], p["bo"], use_pallas=use_pallas)
    return o.reshape(N, Sq, C)


def feed_forward(p, h, use_pallas):
    N, S, C = h.shape
    x2d = h.reshape(N * S, C)
    g = geglu(x2d, p["geglu_w"], p["geglu_b"], use_pallas=use_pallas)
    o = mm_bias(g, p["out_w"], p["out_b"], use_pallas=use_pallas)
    return o.reshape(N, S, C)


def basic_transformer_forward(p, h, ctx, n_heads, use_pallas):
    n1g, n1b = p["norm1"]
    n2g, n2b = p["norm2"]
    n3g, n3b = p["norm3"]
    h = attention(p["attn1"], layer_norm_ane(h, n1g, n1b), None, n_heads,
                  use_pallas) + h
    h = attention(p["attn2"], layer_norm_ane(h, n2g, n2b), ctx, n_heads,
                  use_pallas) + h
    h = feed_forward(p["ff"], layer_norm_ane(h, n3g, n3b), use_pallas) + h
    return h


def spatial_transformer_forward(p, tok, ctx, n_heads, use_pallas):
    N, S, C = tok.shape
    residual = tok
    h = group_norm(tok, p["norm_g"], p["norm_b"], 32, 1e-6)
    h = mm_bias(h.reshape(N * S, C), p["proj_in_w"], p["proj_in_b"],
                use_pallas=use_pallas).reshape(N, S, -1)
    for blk in p["blocks"]:
        h = basic_transformer_forward(blk, h, ctx, n_heads, use_pallas)
    h = mm_bias(h.reshape(N * S, h.shape[-1]), p["proj_out_w"], p["proj_out_b"],
                use_pallas=use_pallas).reshape(N, S, C)
    return h + residual


def unet_mid_block_forward(params, x_nchw, temb_nc11, ctx_nc1s, *,
                           resnet_groups, resnet_eps, n_heads, use_pallas=True):
    N, C, H, W = x_nchw.shape
    # Single layout change at the block boundary; everything inside stays
    # channels-last (lane-dense) so kernels see no extra transposes.
    tok = jnp.transpose(x_nchw, (0, 2, 3, 1)).reshape(N, H * W, C)
    temb = temb_nc11.reshape(N, -1)
    ctx = jnp.transpose(ctx_nc1s.reshape(N, ctx_nc1s.shape[1], -1), (0, 2, 1))

    h = resnet_forward(params["resnet0"], tok, H, W, temb,
                       resnet_groups, resnet_eps, use_pallas)
    h = spatial_transformer_forward(params["attn0"], h, ctx, n_heads, use_pallas)
    h = resnet_forward(params["resnet1"], h, H, W, temb,
                       resnet_groups, resnet_eps, use_pallas)
    return jnp.transpose(h.reshape(N, H, W, C), (0, 3, 1, 2))


# --------------------------------------------------------------------------
# Deterministic parameter init (torch Conv2d-style uniform bounds)
# --------------------------------------------------------------------------
def init_params(key, in_channels, temb_channels, n_heads, cross_dim, ff_mult=4):
    C = in_channels
    inner = n_heads * (C // n_heads)
    d_ff = ff_mult * inner
    keys = iter(jax.random.split(key, 256))

    def unif(shape, bound):
        return jax.random.uniform(next(keys), shape, minval=-bound,
                                  maxval=bound, dtype=jnp.float32)

    def conv1x1(cin, cout, bias=True):
        bound = 1.0 / math.sqrt(cin)
        w = unif((cin, cout), bound)                 # matmul layout (K, N)
        b = unif((cout,), bound) if bias else jnp.zeros((cout,), jnp.float32)
        return w, b

    def conv3(cin, cout):
        bound = 1.0 / math.sqrt(cin * 9)
        w = unif((cout, cin, 3, 3), bound)           # torch layout
        b = unif((cout,), bound)
        return w, b

    def norm_affine(c):
        return jnp.ones((c,), jnp.float32), jnp.zeros((c,), jnp.float32)

    def resnet():
        n1g, n1b = norm_affine(C)
        c1w, c1b = conv3(C, C)
        tw, tb = conv1x1(temb_channels, C)
        n2g, n2b = norm_affine(C)
        c2w, c2b = conv3(C, C)
        return dict(norm1_g=n1g, norm1_b=n1b, conv1_w=c1w, conv1_b=c1b,
                    temb_w=tw, temb_b=tb, norm2_g=n2g, norm2_b=n2b,
                    conv2_w=c2w, conv2_b=c2b)

    def attn_params(ctx_dim):
        kdim = ctx_dim if ctx_dim is not None else inner
        wq, _ = conv1x1(inner, inner, bias=False)
        wk, _ = conv1x1(kdim, inner, bias=False)
        wv, _ = conv1x1(kdim, inner, bias=False)
        wo, bo = conv1x1(inner, inner)
        return dict(wq=wq, wk=wk, wv=wv, wo=wo, bo=bo)

    def spatial_transformer():
        ng, nb = norm_affine(C)
        piw, pib = conv1x1(C, inner)
        gw, gb = conv1x1(inner, 2 * d_ff)            # GEGLU proj
        fow, fob = conv1x1(d_ff, inner)              # FF out proj
        blk = dict(norm1=norm_affine(inner), attn1=attn_params(None),
                   norm2=norm_affine(inner), attn2=attn_params(cross_dim),
                   norm3=norm_affine(inner),
                   ff=dict(geglu_w=gw, geglu_b=gb, out_w=fow, out_b=fob))
        pow_, pob = conv1x1(inner, C)
        return dict(norm_g=ng, norm_b=nb, proj_in_w=piw, proj_in_b=pib,
                    blocks=[blk], proj_out_w=pow_, proj_out_b=pob)

    return dict(resnet0=resnet(), attn0=spatial_transformer(), resnet1=resnet())


# --------------------------------------------------------------------------
# Smoke test
# --------------------------------------------------------------------------
if __name__ == "__main__":
    key = jax.random.PRNGKey(0)
    kp, kx, kt, kc = jax.random.split(key, 4)

    # Small shapes consistent with the module (in_channels must be a multiple
    # of 32 because SpatialTransformer hardcodes a 32-group norm).
    N, C, H, W = 2, 32, 16, 16
    temb_channels = 64
    cross_dim = 24          # cross_attention_dim (small for the test)
    seq_ctx = 8
    n_heads = 2             # attn_num_head_channels -> d_head = C // n_heads
    resnet_groups = 8
    resnet_eps = 1e-6

    params = init_params(kp, C, temb_channels, n_heads, cross_dim)
    x = jax.random.normal(kx, (N, C, H, W), dtype=jnp.float32)
    temb = jax.random.normal(kt, (N, temb_channels, 1, 1), dtype=jnp.float32)
    ctx = jax.random.normal(kc, (N, cross_dim, 1, seq_ctx), dtype=jnp.float32)

    fwd = jax.jit(functools.partial(
        unet_mid_block_forward, resnet_groups=resnet_groups,
        resnet_eps=resnet_eps, n_heads=n_heads, use_pallas=True))
    ref_fwd = jax.jit(functools.partial(
        unet_mid_block_forward, resnet_groups=resnet_groups,
        resnet_eps=resnet_eps, n_heads=n_heads, use_pallas=False))

    out = jax.block_until_ready(fwd(params, x, temb, ctx))
    ref = jax.block_until_ready(ref_fwd(params, x, temb, ctx))

    assert out.shape == (N, C, H, W), out.shape
    assert bool(jnp.all(jnp.isfinite(out)))
    max_err = float(jnp.max(jnp.abs(out - ref)))
    assert max_err < 2e-3, f"max_err={max_err}"

    print("KERNEL_OK")
</pallas_src>

<mosaic_0001>
module attributes {stable_mosaic.version = 11 : i64} {
  func.func @_mm_bias_kernel(%arg0: i32, %arg1: i32, %arg2: memref<512x288xf32, #tpu.memory_space<vmem>>, %arg3: memref<288x32xbf16, #tpu.memory_space<vmem>>, %arg4: memref<1x32xf32, #tpu.memory_space<vmem>>, %arg5: memref<512x32xf32, #tpu.memory_space<vmem>>) attributes {dimension_semantics = [#tpu.dimension_semantics<parallel>, #tpu.dimension_semantics<parallel>], iteration_bounds = array<i64: 1, 1>, scalar_prefetch = 0 : i64, scratch_operands = 0 : i64, tpu.core_type = #tpu.core_type<tc>, window_params = [{transform_indices = @transform_0, window_bounds = array<i64: 512, 288>}, {transform_indices = @transform_1, window_bounds = array<i64: 288, 32>}, {transform_indices = @transform_2, window_bounds = array<i64: 1, 32>}, {transform_indices = @transform_3, window_bounds = array<i64: 512, 32>}]} {
    %c0 = arith.constant 0 : index
    %c0_0 = arith.constant 0 : index
    %0 = vector.load %arg2[%c0, %c0_0] : memref<512x288xf32, #tpu.memory_space<vmem>>, vector<512x288xf32>
    %1 = arith.truncf %0 : vector<512x288xf32> to vector<512x288xbf16>
    %c0_1 = arith.constant 0 : index
    %c0_2 = arith.constant 0 : index
    %2 = vector.load %arg3[%c0_1, %c0_2] : memref<288x32xbf16, #tpu.memory_space<vmem>>, vector<288x32xbf16>
    %cst = arith.constant dense<0.000000e+00> : vector<512x32xf32>
    %3 = tpu.matmul %1, %2, %cst {dimension_numbers = #tpu.dot_dimension_numbers<[1], [0], [0], [1], [0, 0, 1, 1], [], []>} : vector<512x288xbf16>, vector<288x32xbf16>, vector<512x32xf32> -> vector<512x32xf32>
    %c0_3 = arith.constant 0 : index
    %c0_4 = arith.constant 0 : index
    %4 = vector.load %arg4[%c0_3, %c0_4] : memref<1x32xf32, #tpu.memory_space<vmem>>, vector<1x32xf32>
    %5 = vector.broadcast %4 : vector<1x32xf32> to vector<512x32xf32>
    %6 = arith.addf %3, %5 : vector<512x32xf32>
    %c0_5 = arith.constant 0 : index
    %c0_6 = arith.constant 0 : index
    %7 = vector.load %arg5[%c0_5, %c0_6] : memref<512x32xf32, #tpu.memory_space<vmem>>, vector<512x32xf32>
    tpu.vector_store %arg5[%c0_5, %c0_6], %6 {strides = array<i32>} : memref<512x32xf32, #tpu.memory_space<vmem>>, vector<512x32xf32>,
    return
  }
  func.func @transform_0(%arg0: i32, %arg1: i32) -> (i32, i32) {
    %c0_i32 = arith.constant 0 : i32
    %c0_i32_0 = arith.constant 0 : i32
    return %arg0, %c0_i32 : i32, i32
  }
  func.func @transform_1(%arg0: i32, %arg1: i32) -> (i32, i32) {
    %c0_i32 = arith.constant 0 : i32
    %c0_i32_0 = arith.constant 0 : i32
    return %c0_i32, %arg1 : i32, i32
  }
  func.func @transform_2(%arg0: i32, %arg1: i32) -> (i32, i32) {
    %c0_i32 = arith.constant 0 : i32
    %c0_i32_0 = arith.constant 0 : i32
    return %c0_i32, %arg1 : i32, i32
  }
  func.func @transform_3(%arg0: i32, %arg1: i32) -> (i32, i32) {
    %c0_i32 = arith.constant 0 : i32
    return %arg0, %arg1 : i32, i32
  }
}

module attributes {stable_mosaic.version = 11 : i64} {
  func.func @_mm_bias_kernel(%arg0: i32, %arg1: i32, %arg2: memref<2x64xf32, #tpu.memory_space<vmem>>, %arg3: memref<64x32xbf16, #tpu.memory_space<vmem>>, %arg4: memref<1x32xf32, #tpu.memory_space<vmem>>, %arg5: memref<2x32xf32, #tpu.memory_space<vmem>>) attributes {dimension_semantics = [#tpu.dimension_semantics<parallel>, #tpu.dimension_semantics<parallel>], iteration_bounds = array<i64: 1, 1>, scalar_prefetch = 0 : i64, scratch_operands = 0 : i64, tpu.core_type = #tpu.core_type<tc>, window_params = [{transform_indices = @transform_0, window_bounds = array<i64: 2, 64>}, {transform_indices = @transform_1, window_bounds = array<i64: 64, 32>}, {transform_indices = @transform_2, window_bounds = array<i64: 1, 32>}, {transform_indices = @transform_3, window_bounds = array<i64: 2, 32>}]} {
    %c0 = arith.constant 0 : index
    %c0_0 = arith.constant 0 : index
    %0 = vector.load %arg2[%c0, %c0_0] : memref<2x64xf32, #tpu.memory_space<vmem>>, vector<2x64xf32>
    %1 = arith.truncf %0 : vector<2x64xf32> to vector<2x64xbf16>
    %c0_1 = arith.constant 0 : index
    %c0_2 = arith.constant 0 : index
    %2 = vector.load %arg3[%c0_1, %c0_2] : memref<64x32xbf16, #tpu.memory_space<vmem>>, vector<64x32xbf16>
    %cst = arith.constant dense<0.000000e+00> : vector<2x32xf32>
    %3 = tpu.matmul %1, %2, %cst {dimension_numbers = #tpu.dot_dimension_numbers<[1], [0], [0], [1], [0, 0, 1, 1], [], []>} : vector<2x64xbf16>, vector<64x32xbf16>, vector<2x32xf32> -> vector<2x32xf32>
    %c0_3 = arith.constant 0 : index
    %c0_4 = arith.constant 0 : index
    %4 = vector.load %arg4[%c0_3, %c0_4] : memref<1x32xf32, #tpu.memory_space<vmem>>, vector<1x32xf32>
    %5 = vector.broadcast %4 : vector<1x32xf32> to vector<2x32xf32>
    %6 = arith.addf %3, %5 : vector<2x32xf32>
    %c0_5 = arith.constant 0 : index
    %c0_6 = arith.constant 0 : index
    %7 = vector.load %arg5[%c0_5, %c0_6] : memref<2x32xf32, #tpu.memory_space<vmem>>, vector<2x32xf32>
    tpu.vector_store %arg5[%c0_5, %c0_6], %6 {strides = array<i32>} : memref<2x32xf32, #tpu.memory_space<vmem>>, vector<2x32xf32>,
    return
  }
  func.func @transform_0(%arg0: i32, %arg1: i32) -> (i32, i32) {
    %c0_i32 = arith.constant 0 : i32
    %c0_i32_0 = arith.constant 0 : i32
    return %arg0, %c0_i32 : i32, i32
  }
  func.func @transform_1(%arg0: i32, %arg1: i32) -> (i32, i32) {
    %c0_i32 = arith.constant 0 : i32
    %c0_i32_0 = arith.constant 0 : i32
    return %c0_i32, %arg1 : i32, i32
  }
  func.func @transform_2(%arg0: i32, %arg1: i32) -> (i32, i32) {
    %c0_i32 = arith.constant 0 : i32
    %c0_i32_0 = arith.constant 0 : i32
    return %c0_i32, %arg1 : i32, i32
  }
  func.func @transform_3(%arg0: i32, %arg1: i32) -> (i32, i32) {
    %c0_i32 = arith.constant 0 : i32
    return %arg0, %arg1 : i32, i32
  }
}

module attributes {stable_mosaic.version = 11 : i64} {
  func.func @_mm_bias_kernel(%arg0: i32, %arg1: i32, %arg2: memref<512x32xf32, #tpu.memory_space<vmem>>, %arg3: memref<32x32xbf16, #tpu.memory_space<vmem>>, %arg4: memref<1x32xf32, #tpu.memory_space<vmem>>, %arg5: memref<512x32xf32, #tpu.memory_space<vmem>>) attributes {dimension_semantics = [#tpu.dimension_semantics<parallel>, #tpu.dimension_semantics<parallel>], iteration_bounds = array<i64: 1, 1>, scalar_prefetch = 0 : i64, scratch_operands = 0 : i64, tpu.core_type = #tpu.core_type<tc>, window_params = [{transform_indices = @transform_0, window_bounds = array<i64: 512, 32>}, {transform_indices = @transform_1, window_bounds = array<i64: 32, 32>}, {transform_indices = @transform_2, window_bounds = array<i64: 1, 32>}, {transform_indices = @transform_3, window_bounds = array<i64: 512, 32>}]} {
    %c0 = arith.constant 0 : index
    %c0_0 = arith.constant 0 : index
    %0 = vector.load %arg2[%c0, %c0_0] : memref<512x32xf32, #tpu.memory_space<vmem>>, vector<512x32xf32>
    %1 = arith.truncf %0 : vector<512x32xf32> to vector<512x32xbf16>
    %c0_1 = arith.constant 0 : index
    %c0_2 = arith.constant 0 : index
    %2 = vector.load %arg3[%c0_1, %c0_2] : memref<32x32xbf16, #tpu.memory_space<vmem>>, vector<32x32xbf16>
    %cst = arith.constant dense<0.000000e+00> : vector<512x32xf32>
    %3 = tpu.matmul %1, %2, %cst {dimension_numbers = #tpu.dot_dimension_numbers<[1], [0], [0], [1], [0, 0, 1, 1], [], []>} : vector<512x32xbf16>, vector<32x32xbf16>, vector<512x32xf32> -> vector<512x32xf32>
    %c0_3 = arith.constant 0 : index
    %c0_4 = arith.constant 0 : index
    %4 = vector.load %arg4[%c0_3, %c0_4] : memref<1x32xf32, #tpu.memory_space<vmem>>, vector<1x32xf32>
    %5 = vector.broadcast %4 : vector<1x32xf32> to vector<512x32xf32>
    %6 = arith.addf %3, %5 : vector<512x32xf32>
    %c0_5 = arith.constant 0 : index
    %c0_6 = arith.constant 0 : index
    %7 = vector.load %arg5[%c0_5, %c0_6] : memref<512x32xf32, #tpu.memory_space<vmem>>, vector<512x32xf32>
    tpu.vector_store %arg5[%c0_5, %c0_6], %6 {strides = array<i32>} : memref<512x32xf32, #tpu.memory_space<vmem>>, vector<512x32xf32>,
    return
  }
  func.func @transform_0(%arg0: i32, %arg1: i32) -> (i32, i32) {
    %c0_i32 = arith.constant 0 : i32
    %c0_i32_0 = arith.constant 0 : i32
    return %arg0, %c0_i32 : i32, i32
  }
  func.func @transform_1(%arg0: i32, %arg1: i32) -> (i32, i32) {
    %c0_i32 = arith.constant 0 : i32
    %c0_i32_0 = arith.constant 0 : i32
    return %c0_i32, %arg1 : i32, i32
  }
  func.func @transform_2(%arg0: i32, %arg1: i32) -> (i32, i32) {
    %c0_i32 = arith.constant 0 : i32
    %c0_i32_0 = arith.constant 0 : i32
    return %c0_i32, %arg1 : i32, i32
  }
  func.func @transform_3(%arg0: i32, %arg1: i32) -> (i32, i32) {
    %c0_i32 = arith.constant 0 : i32
    return %arg0, %arg1 : i32, i32
  }
}

module attributes {stable_mosaic.version = 11 : i64} {
  func.func @_mm_bias_kernel(%arg0: i32, %arg1: i32, %arg2: memref<512x32xf32, #tpu.memory_space<vmem>>, %arg3: memref<32x96xbf16, #tpu.memory_space<vmem>>, %arg4: memref<1x96xf32, #tpu.memory_space<vmem>>, %arg5: memref<512x96xf32, #tpu.memory_space<vmem>>) attributes {dimension_semantics = [#tpu.dimension_semantics<parallel>, #tpu.dimension_semantics<parallel>], iteration_bounds = array<i64: 1, 1>, scalar_prefetch = 0 : i64, scratch_operands = 0 : i64, tpu.core_type = #tpu.core_type<tc>, window_params = [{transform_indices = @transform_0, window_bounds = array<i64: 512, 32>}, {transform_indices = @transform_1, window_bounds = array<i64: 32, 96>}, {transform_indices = @transform_2, window_bounds = array<i64: 1, 96>}, {transform_indices = @transform_3, window_bounds = array<i64: 512, 96>}]} {
    %c0 = arith.constant 0 : index
    %c0_0 = arith.constant 0 : index
    %0 = vector.load %arg2[%c0, %c0_0] : memref<512x32xf32, #tpu.memory_space<vmem>>, vector<512x32xf32>
    %1 = arith.truncf %0 : vector<512x32xf32> to vector<512x32xbf16>
    %c0_1 = arith.constant 0 : index
    %c0_2 = arith.constant 0 : index
    %2 = vector.load %arg3[%c0_1, %c0_2] : memref<32x96xbf16, #tpu.memory_space<vmem>>, vector<32x96xbf16>
    %cst = arith.constant dense<0.000000e+00> : vector<512x96xf32>
    %3 = tpu.matmul %1, %2, %cst {dimension_numbers = #tpu.dot_dimension_numbers<[1], [0], [0], [1], [0, 0, 1, 1], [], []>} : vector<512x32xbf16>, vector<32x96xbf16>, vector<512x96xf32> -> vector<512x96xf32>
    %c0_3 = arith.constant 0 : index
    %c0_4 = arith.constant 0 : index
    %4 = vector.load %arg4[%c0_3, %c0_4] : memref<1x96xf32, #tpu.memory_space<vmem>>, vector<1x96xf32>
    %5 = vector.broadcast %4 : vector<1x96xf32> to vector<512x96xf32>
    %6 = arith.addf %3, %5 : vector<512x96xf32>
    %c0_5 = arith.constant 0 : index
    %c0_6 = arith.constant 0 : index
    %7 = vector.load %arg5[%c0_5, %c0_6] : memref<512x96xf32, #tpu.memory_space<vmem>>, vector<512x96xf32>
    tpu.vector_store %arg5[%c0_5, %c0_6], %6 {strides = array<i32>} : memref<512x96xf32, #tpu.memory_space<vmem>>, vector<512x96xf32>,
    return
  }
  func.func @transform_0(%arg0: i32, %arg1: i32) -> (i32, i32) {
    %c0_i32 = arith.constant 0 : i32
    %c0_i32_0 = arith.constant 0 : i32
    return %arg0, %c0_i32 : i32, i32
  }
  func.func @transform_1(%arg0: i32, %arg1: i32) -> (i32, i32) {
    %c0_i32 = arith.constant 0 : i32
    %c0_i32_0 = arith.constant 0 : i32
    return %c0_i32, %arg1 : i32, i32
  }
  func.func @transform_2(%arg0: i32, %arg1: i32) -> (i32, i32) {
    %c0_i32 = arith.constant 0 : i32
    %c0_i32_0 = arith.constant 0 : i32
    return %c0_i32, %arg1 : i32, i32
  }
  func.func @transform_3(%arg0: i32, %arg1: i32) -> (i32, i32) {
    %c0_i32 = arith.constant 0 : i32
    return %arg0, %arg1 : i32, i32
  }
}

module attributes {stable_mosaic.version = 11 : i64} {
  func.func @_attn_kernel(%arg0: i32, %arg1: memref<1x256x16xf32, #tpu.memory_space<vmem>>, %arg2: memref<1x256x16xf32, #tpu.memory_space<vmem>>, %arg3: memref<1x256x16xf32, #tpu.memory_space<vmem>>, %arg4: memref<1x256x16xf32, #tpu.memory_space<vmem>>) attributes {dimension_semantics = [#tpu.dimension_semantics<parallel>], iteration_bounds = array<i64: 4>, scalar_prefetch = 0 : i64, scratch_operands = 0 : i64, tpu.core_type = #tpu.core_type<tc>, window_params = [{transform_indices = @transform_0, window_bounds = array<i64: 1, 256, 16>}, {transform_indices = @transform_1, window_bounds = array<i64: 1, 256, 16>}, {transform_indices = @transform_2, window_bounds = array<i64: 1, 256, 16>}, {transform_indices = @transform_3, window_bounds = array<i64: 1, 256, 16>}]} {
    %c0 = arith.constant 0 : index
    %c0_0 = arith.constant 0 : index
    %c0_1 = arith.constant 0 : index
    %0 = vector.load %arg1[%c0, %c0_0, %c0_1] : memref<1x256x16xf32, #tpu.memory_space<vmem>>, vector<1x256x16xf32>
    %1 = vector.shape_cast %0 : vector<1x256x16xf32> to vector<256x16xf32>
    %c0_2 = arith.constant 0 : index
    %c0_3 = arith.constant 0 : index
    %c0_4 = arith.constant 0 : index
    %2 = vector.load %arg2[%c0_2, %c0_3, %c0_4] : memref<1x256x16xf32, #tpu.memory_space<vmem>>, vector<1x256x16xf32>
    %3 = vector.shape_cast %2 : vector<1x256x16xf32> to vector<256x16xf32>
    %c0_5 = arith.constant 0 : index
    %c0_6 = arith.constant 0 : index
    %c0_7 = arith.constant 0 : index
    %4 = vector.load %arg3[%c0_5, %c0_6, %c0_7] : memref<1x256x16xf32, #tpu.memory_space<vmem>>, vector<1x256x16xf32>
    %5 = vector.shape_cast %4 : vector<1x256x16xf32> to vector<256x16xf32>
    %6 = arith.truncf %1 : vector<256x16xf32> to vector<256x16xbf16>
    %7 = arith.truncf %3 : vector<256x16xf32> to vector<256x16xbf16>
    %cst = arith.constant dense<0.000000e+00> : vector<256x256xf32>
    %8 = tpu.matmul %6, %7, %cst {dimension_numbers = #tpu.dot_dimension_numbers<[1], [1], [0], [0], [0, 0, 1, 0], [], []>} : vector<256x16xbf16>, vector<256x16xbf16>, vector<256x256xf32> -> vector<256x256xf32>
    %cst_8 = arith.constant 2.500000e-01 : f32
    %9 = vector.broadcast %cst_8 : f32 to vector<256x256xf32>
    %10 = arith.mulf %8, %9 : vector<256x256xf32>
    %cst_9 = arith.constant dense<0xFF800000> : vector<256xf32>
    %11 = vector.multi_reduction <maximumf>, %10, %cst_9 [1] : vector<256x256xf32> to vector<256xf32>
    %12 = vector.shape_cast %11 : vector<256xf32> to vector<256x1xf32>
    %13 = vector.broadcast %12 : vector<256x1xf32> to vector<256x256xf32>
    %14 = arith.subf %10, %13 : vector<256x256xf32>
    %15 = math.exp %14 : vector<256x256xf32>
    %cst_10 = arith.constant dense<0.000000e+00> : vector<256xf32>
    %16 = vector.multi_reduction <add>, %15, %cst_10 [1] : vector<256x256xf32> to vector<256xf32>
    %17 = vector.shape_cast %16 : vector<256xf32> to vector<256x1xf32>
    %18 = arith.truncf %15 : vector<256x256xf32> to vector<256x256xbf16>
    %19 = arith.truncf %5 : vector<256x16xf32> to vector<256x16xbf16>
    %cst_11 = arith.constant dense<0.000000e+00> : vector<256x16xf32>
    %20 = tpu.matmul %18, %19, %cst_11 {dimension_numbers = #tpu.dot_dimension_numbers<[1], [0], [0], [1], [0, 0, 1, 1], [], []>} : vector<256x256xbf16>, vector<256x16xbf16>, vector<256x16xf32> -> vector<256x16xf32>
    %21 = vector.broadcast %17 : vector<256x1xf32> to vector<256x16xf32>
    %22 = arith.divf %20, %21 : vector<256x16xf32>
    %23 = vector.shape_cast %22 : vector<256x16xf32> to vector<1x256x16xf32>
    %c0_12 = arith.constant 0 : index
    %c0_13 = arith.constant 0 : index
    %c0_14 = arith.constant 0 : index
    %24 = vector.load %arg4[%c0_12, %c0_13, %c0_14] : memref<1x256x16xf32, #tpu.memory_space<vmem>>, vector<1x256x16xf32>
    tpu.vector_store %arg4[%c0_12, %c0_13, %c0_14], %23 {strides = array<i32>} : memref<1x256x16xf32, #tpu.memory_space<vmem>>, vector<1x256x16xf32>,
    return
  }
  func.func @transform_0(%arg0: i32) -> (i32, i32, i32) {
    %c0_i32 = arith.constant 0 : i32
    %c0_i32_0 = arith.constant 0 : i32
    %c0_i32_1 = arith.constant 0 : i32
    return %arg0, %c0_i32, %c0_i32_0 : i32, i32, i32
  }
  func.func @transform_1(%arg0: i32) -> (i32, i32, i32) {
    %c0_i32 = arith.constant 0 : i32
    %c0_i32_0 = arith.constant 0 : i32
    %c0_i32_1 = arith.constant 0 : i32
    return %arg0, %c0_i32, %c0_i32_0 : i32, i32, i32
  }
  func.func @transform_2(%arg0: i32) -> (i32, i32, i32) {
    %c0_i32 = arith.constant 0 : i32
    %c0_i32_0 = arith.constant 0 : i32
    %c0_i32_1 = arith.constant 0 : i32
    return %arg0, %c0_i32, %c0_i32_0 : i32, i32, i32
  }
  func.func @transform_3(%arg0: i32) -> (i32, i32, i32) {
    %c0_i32 = arith.constant 0 : i32
    %c0_i32_0 = arith.constant 0 : i32
    %c0_i32_1 = arith.constant 0 : i32
    return %arg0, %c0_i32, %c0_i32_0 : i32, i32, i32
  }
}

module attributes {stable_mosaic.version = 11 : i64} {
  func.func @_mm_bias_kernel(%arg0: i32, %arg1: i32, %arg2: memref<16x24xf32, #tpu.memory_space<vmem>>, %arg3: memref<24x64xbf16, #tpu.memory_space<vmem>>, %arg4: memref<1x64xf32, #tpu.memory_space<vmem>>, %arg5: memref<16x64xf32, #tpu.memory_space<vmem>>) attributes {dimension_semantics = [#tpu.dimension_semantics<parallel>, #tpu.dimension_semantics<parallel>], iteration_bounds = array<i64: 1, 1>, scalar_prefetch = 0 : i64, scratch_operands = 0 : i64, tpu.core_type = #tpu.core_type<tc>, window_params = [{transform_indices = @transform_0, window_bounds = array<i64: 16, 24>}, {transform_indices = @transform_1, window_bounds = array<i64: 24, 64>}, {transform_indices = @transform_2, window_bounds = array<i64: 1, 64>}, {transform_indices = @transform_3, window_bounds = array<i64: 16, 64>}]} {
    %c0 = arith.constant 0 : index
    %c0_0 = arith.constant 0 : index
    %0 = vector.load %arg2[%c0, %c0_0] : memref<16x24xf32, #tpu.memory_space<vmem>>, vector<16x24xf32>
    %1 = arith.truncf %0 : vector<16x24xf32> to vector<16x24xbf16>
    %c0_1 = arith.constant 0 : index
    %c0_2 = arith.constant 0 : index
    %2 = vector.load %arg3[%c0_1, %c0_2] : memref<24x64xbf16, #tpu.memory_space<vmem>>, vector<24x64xbf16>
    %cst = arith.constant dense<0.000000e+00> : vector<16x64xf32>
    %3 = tpu.matmul %1, %2, %cst {dimension_numbers = #tpu.dot_dimension_numbers<[1], [0], [0], [1], [0, 0, 1, 1], [], []>} : vector<16x24xbf16>, vector<24x64xbf16>, vector<16x64xf32> -> vector<16x64xf32>
    %c0_3 = arith.constant 0 : index
    %c0_4 = arith.constant 0 : index
    %4 = vector.load %arg4[%c0_3, %c0_4] : memref<1x64xf32, #tpu.memory_space<vmem>>, vector<1x64xf32>
    %5 = vector.broadcast %4 : vector<1x64xf32> to vector<16x64xf32>
    %6 = arith.addf %3, %5 : vector<16x64xf32>
    %c0_5 = arith.constant 0 : index
    %c0_6 = arith.constant 0 : index
    %7 = vector.load %arg5[%c0_5, %c0_6] : memref<16x64xf32, #tpu.memory_space<vmem>>, vector<16x64xf32>
    tpu.vector_store %arg5[%c0_5, %c0_6], %6 {strides = array<i32>} : memref<16x64xf32, #tpu.memory_space<vmem>>, vector<16x64xf32>,
    return
  }
  func.func @transform_0(%arg0: i32, %arg1: i32) -> (i32, i32) {
    %c0_i32 = arith.constant 0 : i32
    %c0_i32_0 = arith.constant 0 : i32
    return %arg0, %c0_i32 : i32, i32
  }
  func.func @transform_1(%arg0: i32, %arg1: i32) -> (i32, i32) {
    %c0_i32 = arith.constant 0 : i32
    %c0_i32_0 = arith.constant 0 : i32
    return %c0_i32, %arg1 : i32, i32
  }
  func.func @transform_2(%arg0: i32, %arg1: i32) -> (i32, i32) {
    %c0_i32 = arith.constant 0 : i32
    %c0_i32_0 = arith.constant 0 : i32
    return %c0_i32, %arg1 : i32, i32
  }
  func.func @transform_3(%arg0: i32, %arg1: i32) -> (i32, i32) {
    %c0_i32 = arith.constant 0 : i32
    return %arg0, %arg1 : i32, i32
  }
}

module attributes {stable_mosaic.version = 11 : i64} {
  func.func @_attn_kernel(%arg0: i32, %arg1: memref<1x256x16xf32, #tpu.memory_space<vmem>>, %arg2: memref<1x8x16xf32, #tpu.memory_space<vmem>>, %arg3: memref<1x8x16xf32, #tpu.memory_space<vmem>>, %arg4: memref<1x256x16xf32, #tpu.memory_space<vmem>>) attributes {dimension_semantics = [#tpu.dimension_semantics<parallel>], iteration_bounds = array<i64: 4>, scalar_prefetch = 0 : i64, scratch_operands = 0 : i64, tpu.core_type = #tpu.core_type<tc>, window_params = [{transform_indices = @transform_0, window_bounds = array<i64: 1, 256, 16>}, {transform_indices = @transform_1, window_bounds = array<i64: 1, 8, 16>}, {transform_indices = @transform_2, window_bounds = array<i64: 1, 8, 16>}, {transform_indices = @transform_3, window_bounds = array<i64: 1, 256, 16>}]} {
    %c0 = arith.constant 0 : index
    %c0_0 = arith.constant 0 : index
    %c0_1 = arith.constant 0 : index
    %0 = vector.load %arg1[%c0, %c0_0, %c0_1] : memref<1x256x16xf32, #tpu.memory_space<vmem>>, vector<1x256x16xf32>
    %1 = vector.shape_cast %0 : vector<1x256x16xf32> to vector<256x16xf32>
    %c0_2 = arith.constant 0 : index
    %c0_3 = arith.constant 0 : index
    %c0_4 = arith.constant 0 : index
    %2 = vector.load %arg2[%c0_2, %c0_3, %c0_4] : memref<1x8x16xf32, #tpu.memory_space<vmem>>, vector<1x8x16xf32>
    %3 = vector.shape_cast %2 : vector<1x8x16xf32> to vector<8x16xf32>
    %c0_5 = arith.constant 0 : index
    %c0_6 = arith.constant 0 : index
    %c0_7 = arith.constant 0 : index
    %4 = vector.load %arg3[%c0_5, %c0_6, %c0_7] : memref<1x8x16xf32, #tpu.memory_space<vmem>>, vector<1x8x16xf32>
    %5 = vector.shape_cast %4 : vector<1x8x16xf32> to vector<8x16xf32>
    %6 = arith.truncf %1 : vector<256x16xf32> to vector<256x16xbf16>
    %7 = arith.truncf %3 : vector<8x16xf32> to vector<8x16xbf16>
    %cst = arith.constant dense<0.000000e+00> : vector<256x8xf32>
    %8 = tpu.matmul %6, %7, %cst {dimension_numbers = #tpu.dot_dimension_numbers<[1], [1], [0], [0], [0, 0, 1, 0], [], []>} : vector<256x16xbf16>, vector<8x16xbf16>, vector<256x8xf32> -> vector<256x8xf32>
    %cst_8 = arith.constant 2.500000e-01 : f32
    %9 = vector.broadcast %cst_8 : f32 to vector<256x8xf32>
    %10 = arith.mulf %8, %9 : vector<256x8xf32>
    %cst_9 = arith.constant dense<0xFF800000> : vector<256xf32>
    %11 = vector.multi_reduction <maximumf>, %10, %cst_9 [1] : vector<256x8xf32> to vector<256xf32>
    %12 = vector.shape_cast %11 : vector<256xf32> to vector<256x1xf32>
    %13 = vector.broadcast %12 : vector<256x1xf32> to vector<256x8xf32>
    %14 = arith.subf %10, %13 : vector<256x8xf32>
    %15 = math.exp %14 : vector<256x8xf32>
    %cst_10 = arith.constant dense<0.000000e+00> : vector<256xf32>
    %16 = vector.multi_reduction <add>, %15, %cst_10 [1] : vector<256x8xf32> to vector<256xf32>
    %17 = vector.shape_cast %16 : vector<256xf32> to vector<256x1xf32>
    %18 = arith.truncf %15 : vector<256x8xf32> to vector<256x8xbf16>
    %19 = arith.truncf %5 : vector<8x16xf32> to vector<8x16xbf16>
    %cst_11 = arith.constant dense<0.000000e+00> : vector<256x16xf32>
    %20 = tpu.matmul %18, %19, %cst_11 {dimension_numbers = #tpu.dot_dimension_numbers<[1], [0], [0], [1], [0, 0, 1, 1], [], []>} : vector<256x8xbf16>, vector<8x16xbf16>, vector<256x16xf32> -> vector<256x16xf32>
    %21 = vector.broadcast %17 : vector<256x1xf32> to vector<256x16xf32>
    %22 = arith.divf %20, %21 : vector<256x16xf32>
    %23 = vector.shape_cast %22 : vector<256x16xf32> to vector<1x256x16xf32>
    %c0_12 = arith.constant 0 : index
    %c0_13 = arith.constant 0 : index
    %c0_14 = arith.constant 0 : index
    %24 = vector.load %arg4[%c0_12, %c0_13, %c0_14] : memref<1x256x16xf32, #tpu.memory_space<vmem>>, vector<1x256x16xf32>
    tpu.vector_store %arg4[%c0_12, %c0_13, %c0_14], %23 {strides = array<i32>} : memref<1x256x16xf32, #tpu.memory_space<vmem>>, vector<1x256x16xf32>,
    return
  }
  func.func @transform_0(%arg0: i32) -> (i32, i32, i32) {
    %c0_i32 = arith.constant 0 : i32
    %c0_i32_0 = arith.constant 0 : i32
    %c0_i32_1 = arith.constant 0 : i32
    return %arg0, %c0_i32, %c0_i32_0 : i32, i32, i32
  }
  func.func @transform_1(%arg0: i32) -> (i32, i32, i32) {
    %c0_i32 = arith.constant 0 : i32
    %c0_i32_0 = arith.constant 0 : i32
    %c0_i32_1 = arith.constant 0 : i32
    return %arg0, %c0_i32, %c0_i32_0 : i32, i32, i32
  }
  func.func @transform_2(%arg0: i32) -> (i32, i32, i32) {
    %c0_i32 = arith.constant 0 : i32
    %c0_i32_0 = arith.constant 0 : i32
    %c0_i32_1 = arith.constant 0 : i32
    return %arg0, %c0_i32, %c0_i32_0 : i32, i32, i32
  }
  func.func @transform_3(%arg0: i32) -> (i32, i32, i32) {
    %c0_i32 = arith.constant 0 : i32
    %c0_i32_0 = arith.constant 0 : i32
    %c0_i32_1 = arith.constant 0 : i32
    return %arg0, %c0_i32, %c0_i32_0 : i32, i32, i32
  }
}

module attributes {stable_mosaic.version = 11 : i64} {
  func.func @_geglu_kernel(%arg0: i32, %arg1: i32, %arg2: memref<512x32xf32, #tpu.memory_space<vmem>>, %arg3: memref<32x256xbf16, #tpu.memory_space<vmem>>, %arg4: memref<1x256xf32, #tpu.memory_space<vmem>>, %arg5: memref<512x128xf32, #tpu.memory_space<vmem>>) attributes {dimension_semantics = [#tpu.dimension_semantics<parallel>, #tpu.dimension_semantics<parallel>], iteration_bounds = array<i64: 1, 1>, scalar_prefetch = 0 : i64, scratch_operands = 0 : i64, tpu.core_type = #tpu.core_type<tc>, window_params = [{transform_indices = @transform_0, window_bounds = array<i64: 512, 32>}, {transform_indices = @transform_1, window_bounds = array<i64: 32, 256>}, {transform_indices = @transform_2, window_bounds = array<i64: 1, 256>}, {transform_indices = @transform_3, window_bounds = array<i64: 512, 128>}]} {
    %c0 = arith.constant 0 : index
    %c0_0 = arith.constant 0 : index
    %0 = vector.load %arg2[%c0, %c0_0] : memref<512x32xf32, #tpu.memory_space<vmem>>, vector<512x32xf32>
    %1 = arith.truncf %0 : vector<512x32xf32> to vector<512x32xbf16>
    %c0_1 = arith.constant 0 : index
    %c0_2 = arith.constant 0 : index
    %2 = vector.load %arg3[%c0_1, %c0_2] : memref<32x256xbf16, #tpu.memory_space<vmem>>, vector<32x256xbf16>
    %cst = arith.constant dense<0.000000e+00> : vector<512x256xf32>
    %3 = tpu.matmul %1, %2, %cst {dimension_numbers = #tpu.dot_dimension_numbers<[1], [0], [0], [1], [0, 0, 1, 1], [], []>} : vector<512x32xbf16>, vector<32x256xbf16>, vector<512x256xf32> -> vector<512x256xf32>
    %c0_3 = arith.constant 0 : index
    %c0_4 = arith.constant 0 : index
    %4 = vector.load %arg4[%c0_3, %c0_4] : memref<1x256xf32, #tpu.memory_space<vmem>>, vector<1x256xf32>
    %5 = vector.broadcast %4 : vector<1x256xf32> to vector<512x256xf32>
    %6 = arith.addf %3, %5 : vector<512x256xf32>
    %7 = vector.extract_strided_slice %6 {offsets = [0, 0], sizes = [512, 128], strides = [1, 1]} : vector<512x256xf32> to vector<512x128xf32>
    %8 = vector.extract_strided_slice %6 {offsets = [0, 128], sizes = [512, 128], strides = [1, 1]} : vector<512x256xf32> to vector<512x128xf32>
    %cst_5 = arith.constant 5.000000e-01 : f32
    %9 = vector.broadcast %cst_5 : f32 to vector<512x128xf32>
    %10 = arith.mulf %9, %8 : vector<512x128xf32>
    %cst_6 = arith.constant 0.707106769 : f32
    %11 = vector.broadcast %cst_6 : f32 to vector<512x128xf32>
    %12 = arith.mulf %8, %11 : vector<512x128xf32>
    %13 = math.erf %12 : vector<512x128xf32>
    %cst_7 = arith.constant 1.000000e+00 : f32
    %14 = vector.broadcast %cst_7 : f32 to vector<512x128xf32>
    %15 = arith.addf %14, %13 : vector<512x128xf32>
    %16 = arith.mulf %10, %15 : vector<512x128xf32>
    %17 = arith.mulf %7, %16 : vector<512x128xf32>
    %c0_8 = arith.constant 0 : index
    %c0_9 = arith.constant 0 : index
    %18 = vector.load %arg5[%c0_8, %c0_9] : memref<512x128xf32, #tpu.memory_space<vmem>>, vector<512x128xf32>
    tpu.vector_store %arg5[%c0_8, %c0_9], %17 {strides = array<i32>} : memref<512x128xf32, #tpu.memory_space<vmem>>, vector<512x128xf32>,
    return
  }
  func.func @transform_0(%arg0: i32, %arg1: i32) -> (i32, i32) {
    %c0_i32 = arith.constant 0 : i32
    %c0_i32_0 = arith.constant 0 : i32
    return %arg0, %c0_i32 : i32, i32
  }
  func.func @transform_1(%arg0: i32, %arg1: i32) -> (i32, i32) {
    %c0_i32 = arith.constant 0 : i32
    %c0_i32_0 = arith.constant 0 : i32
    return %c0_i32, %arg1 : i32, i32
  }
  func.func @transform_2(%arg0: i32, %arg1: i32) -> (i32, i32) {
    %c0_i32 = arith.constant 0 : i32
    %c0_i32_0 = arith.constant 0 : i32
    return %c0_i32, %arg1 : i32, i32
  }
  func.func @transform_3(%arg0: i32, %arg1: i32) -> (i32, i32) {
    %c0_i32 = arith.constant 0 : i32
    return %arg0, %arg1 : i32, i32
  }
}

module attributes {stable_mosaic.version = 11 : i64} {
  func.func @_mm_bias_kernel(%arg0: i32, %arg1: i32, %arg2: memref<512x128xf32, #tpu.memory_space<vmem>>, %arg3: memref<128x32xbf16, #tpu.memory_space<vmem>>, %arg4: memref<1x32xf32, #tpu.memory_space<vmem>>, %arg5: memref<512x32xf32, #tpu.memory_space<vmem>>) attributes {dimension_semantics = [#tpu.dimension_semantics<parallel>, #tpu.dimension_semantics<parallel>], iteration_bounds = array<i64: 1, 1>, scalar_prefetch = 0 : i64, scratch_operands = 0 : i64, tpu.core_type = #tpu.core_type<tc>, window_params = [{transform_indices = @transform_0, window_bounds = array<i64: 512, 128>}, {transform_indices = @transform_1, window_bounds = array<i64: 128, 32>}, {transform_indices = @transform_2, window_bounds = array<i64: 1, 32>}, {transform_indices = @transform_3, window_bounds = array<i64: 512, 32>}]} {
    %c0 = arith.constant 0 : index
    %c0_0 = arith.constant 0 : index
    %0 = vector.load %arg2[%c0, %c0_0] : memref<512x128xf32, #tpu.memory_space<vmem>>, vector<512x128xf32>
    %1 = arith.truncf %0 : vector<512x128xf32> to vector<512x128xbf16>
    %c0_1 = arith.constant 0 : index
    %c0_2 = arith.constant 0 : index
    %2 = vector.load %arg3[%c0_1, %c0_2] : memref<128x32xbf16, #tpu.memory_space<vmem>>, vector<128x32xbf16>
    %cst = arith.constant dense<0.000000e+00> : vector<512x32xf32>
    %3 = tpu.matmul %1, %2, %cst {dimension_numbers = #tpu.dot_dimension_numbers<[1], [0], [0], [1], [0, 0, 1, 1], [], []>} : vector<512x128xbf16>, vector<128x32xbf16>, vector<512x32xf32> -> vector<512x32xf32>
    %c0_3 = arith.constant 0 : index
    %c0_4 = arith.constant 0 : index
    %4 = vector.load %arg4[%c0_3, %c0_4] : memref<1x32xf32, #tpu.memory_space<vmem>>, vector<1x32xf32>
    %5 = vector.broadcast %4 : vector<1x32xf32> to vector<512x32xf32>
    %6 = arith.addf %3, %5 : vector<512x32xf32>
    %c0_5 = arith.constant 0 : index
    %c0_6 = arith.constant 0 : index
    %7 = vector.load %arg5[%c0_5, %c0_6] : memref<512x32xf32, #tpu.memory_space<vmem>>, vector<512x32xf32>
    tpu.vector_store %arg5[%c0_5, %c0_6], %6 {strides = array<i32>} : memref<512x32xf32, #tpu.memory_space<vmem>>, vector<512x32xf32>,
    return
  }
  func.func @transform_0(%arg0: i32, %arg1: i32) -> (i32, i32) {
    %c0_i32 = arith.constant 0 : i32
    %c0_i32_0 = arith.constant 0 : i32
    return %arg0, %c0_i32 : i32, i32
  }
  func.func @transform_1(%arg0: i32, %arg1: i32) -> (i32, i32) {
    %c0_i32 = arith.constant 0 : i32
    %c0_i32_0 = arith.constant 0 : i32
    return %c0_i32, %arg1 : i32, i32
  }
  func.func @transform_2(%arg0: i32, %arg1: i32) -> (i32, i32) {
    %c0_i32 = arith.constant 0 : i32
    %c0_i32_0 = arith.constant 0 : i32
    return %c0_i32, %arg1 : i32, i32
  }
  func.func @transform_3(%arg0: i32, %arg1: i32) -> (i32, i32) {
    %c0_i32 = arith.constant 0 : i32
    return %arg0, %arg1 : i32, i32
  }
}

</mosaic_0001>

<bundles_post_ra>
// kernel: unet_mid_block_forward.18
= control target key start
LH: loop header
LB: loop body
LE: loop exit
PB: predicated region body
PF: predicated region fallthrough
CT: control target
= control target key end

     0   :  { %v135_v0 = vmov 0.0   ;;  %vm136_vm0 = vmmov 0   ;;  %vm56_vm1 = vcmask 523264   ;;  %vm100_vm2 = vcmask 254976   ;;  %s178_s1 = inlined_call_operand.vmem [shape: bf16[64,32], index: 1, kind: input, shape index: {}]   ;;  %s179_s0 = inlined_call_operand.vmem [shape: f32[2,64], index: 0, kind: input, shape index: {}]   ;;  %s180_s2 = inlined_call_operand.vmem [shape: f32[1,32], index: 2, kind: input, shape index: {}]   ;;  %s181_s3 = inlined_call_operand.vmem [shape: f32[2,32], index: 3, kind: output, shape index: {}]  }
   0x1   :  { %117 = vmatprep.subr.bf16.mxu0 %v135_v0  ;;  %v131_v1 = vld [vmem:[%s178_s1 + $0x18] sm:$0xff]   ;;  %125 = vmatprep.mubr.msk.bf16.mxu0 %vm136_vm0, %v135_v0  ;;  %v132_v2 = vld [vmem:[%s178_s1 + $0x10] sm:$0xff]   ;;  %v133_v3 = vld [vmem:[%s178_s1 + $0x8] sm:$0xff]  }
   0x2   :  { %118 = vmatpush3.bf16.msra.mxu0 %v131_v1  ;;  %v134_v4 = vld [vmem:[%s178_s1] sm:$0xff]  }
   0x3   :  { %119 = vmatprep.subr.bf16.mxu0 %v135_v0  ;;  %v15_v5 = vld [vmem:[%s179_s0] sm:$0x3] }
   0x4   :  { %v16_v6 = vpack.c.bf16 %v15_v5, %v15_v5  ;;  %v106_v7 = vld [vmem:[%s180_s2] ss:$0 sm:$0xff] }
   0x6   :  { %120 = vmatpush3.bf16.msra.mxu0 %v132_v2 }
   0x7   :  { %121 = vmatprep.subr.bf16.mxu0 %v135_v0 }
   0xa   :  { %122 = vmatpush3.bf16.msra.mxu0 %v133_v3 }
   0xb   :  { %123 = vmatprep.subr.bf16.mxu0 %v135_v0 }
   0xe   :  { %124 = vmatpush3.bf16.msra.mxu0 %v134_v4 }
  0x11   :  { %126 = vmatmul.mubr.msk.bf16.vlgmr.msra.gmra.mxu0 %vm56_vm1, %v16_v6 }
  0xd1   :  { %v94_v8 = vpop.f32.mrf.mxu0 }
  0xd2   :  { %v95_v9 = vadd.f32 %v106_v7, %v94_v8 }
  0xd3   :  { %v127_v10 = vpop.f32.mrf.mxu0 }
  0xd4   :  { %101 = vst.msk [vmem:[%s181_s3] sm:$0x3] %vm100_vm2, %v95_v9 }
  0xd5   :  { %v97_v11 = vpop.f32.mrf.mxu0 }
  0xd7   :  { %v128_v12 = vpop.f32.mrf.mxu0 }

// kernel: unet_mid_block_forward.17
= control target key start
LH: loop header
LB: loop body
LE: loop exit
PB: predicated region body
PF: predicated region fallthrough
CT: control target
= control target key end

     0   :  { %v1401_v0 = vmov 0   ;;  %vm454_vm0 = vcmask 261120   ;;  %s2552_s1 = inlined_call_operand.vmem [shape: bf16[288,32], index: 1, kind: input, shape index: {}]   ;;  %s2553_s0 = inlined_call_operand.vmem [shape: f32[512,288], index: 0, kind: input, shape index: {}]   ;;  %s2554_s2 = inlined_call_operand.vmem [shape: f32[1,32], index: 2, kind: input, shape index: {}]   ;;  %s2555_s3 = inlined_call_operand.vmem [shape: f32[512,32], index: 3, kind: output, shape index: {}]  }
   0x1   :  { %551 = vmatprep.subr.bf16.mxu0 %v1401_v0  ;;  %1350 = vmatprep.subr.bf16.mxu1 %v1401_v0  ;;  %v1383_v1 = vld [vmem:[%s2552_s1 + $0x38] sm:$0xff]   ;;  %v1384_v2 = vld [vmem:[%s2552_s1 + $0x30] sm:$0xff]   ;;  %v1385_v3 = vld [vmem:[%s2552_s1 + $0x28] sm:$0xff]  }
   0x2   :  { %552 = vmatpush1.bf16.msra.mxu0 %v1383_v1  ;;  %1366 = vmatpush1.bf16.msra.mxu1 %v1383_v1  ;;  %v1386_v4 = vld [vmem:[%s2552_s1 + $0x20] sm:$0xff]   ;;  %v1387_v5 = vld [vmem:[%s2552_s1 + $0x18] sm:$0xff]   ;;  %v16_v6 = vld [vmem:[%s2553_s0 + $0x8] sm:$0xff] }
   0x3   :  { %553 = vmatprep.subr.bf16.mxu0 %v1401_v0  ;;  %1351 = vmatprep.subr.bf16.mxu1 %v1401_v0  ;;  %v19_v7 = vld [vmem:[%s2553_s0 + $0x20] sm:$0xff]  ;;  %v160_v8 = vld [vmem:[%s2553_s0 + $0x488] sm:$0xff]  ;;  %v1388_v11 = vld [vmem:[%s2552_s1 + $0x10] sm:$0xff]  }
   0x4   :  { %v208_v9 = vpack.c.bf16 %v19_v7, %v16_v6  ;;  %v163_v10 = vld [vmem:[%s2553_s0 + $0x4a0] sm:$0xff]  ;;  %v1389_v13 = vld [vmem:[%s2552_s1 + $0x8] sm:$0xff]   ;;  %v1391_v15 = vld [vmem:[%s2552_s1 + $0x78] sm:$0xff]  }
   0x5   :  { %v280_v12 = vpack.c.bf16 %v163_v10, %v160_v8  ;;  %v1390_v14 = vld [vmem:[%s2552_s1] sm:$0xff]   ;;  %v1392_v16 = vld [vmem:[%s2552_s1 + $0x70] sm:$0xff]   ;;  %v1393_v17 = vld [vmem:[%s2552_s1 + $0x68] sm:$0xff]  }
   0x6   :  { %554 = vmatpush1.bf16.msra.mxu0 %v1384_v2  ;;  %1367 = vmatpush1.bf16.msra.mxu1 %v1384_v2  ;;  %v1394_v18 = vld [vmem:[%s2552_s1 + $0x60] sm:$0xff]   ;;  %v1395_v19 = vld [vmem:[%s2552_s1 + $0x58] sm:$0xff]   ;;  %v1396_v20 = vld [vmem:[%s2552_s1 + $0x50] sm:$0xff]  }
   0x7   :  { %555 = vmatprep.subr.bf16.mxu0 %v1401_v0  ;;  %1352 = vmatprep.subr.bf16.mxu1 %v1401_v0  ;;  %v1397_v21 = vld [vmem:[%s2552_s1 + $0x48] sm:$0xff]   ;;  %v1398_v22 = vld [vmem:[%s2552_s1 + $0x40] sm:$0xff]   ;;  %v18_v24 = vld [vmem:[%s2553_s0 + $0x18] sm:$0xff] }
   0x8   :  { %583 = vmatprep.mubr.bf16.mxu0 %v208_v9  ;;  %775 = vmatprep.mubr.bf16.mxu1 %v280_v12  ;;  %v15_v23 = vld [vmem:[%s2553_s0] sm:$0xff]  ;;  %v162_v26 = vld [vmem:[%s2553_s0 + $0x498] sm:$0xff]  ;;  %v1399_v27 = vld [vmem:[%s2552_s1 + $0x88] sm:$0xff]  }
   0x9   :  { %v159_v25 = vld [vmem:[%s2553_s0 + $0x480] sm:$0xff]  ;;  %v22_v28 = vld [vmem:[%s2553_s0 + $0x38] sm:$0xff]  ;;  %v25_v29 = vld [vmem:[%s2553_s0 + $0x50] sm:$0xff]  ;;  %v207_v32 = vpack.c.bf16 %v18_v24, %v15_v23 }
   0xa   :  { %556 = vmatpush1.bf16.msra.mxu0 %v1385_v3  ;;  %1368 = vmatpush1.bf16.msra.mxu1 %v1385_v3  ;;  %v166_v30 = vld [vmem:[%s2553_s0 + $0x4b8] sm:$0xff]  ;;  %v169_v31 = vld [vmem:[%s2553_s0 + $0x4d0] sm:$0xff]  ;;  %v279_v33 = vpack.c.bf16 %v162_v26, %v159_v25  ;;  %v211_v34 = vpack.c.bf16 %v25_v29, %v22_v28  ;;  %v1400_v36 = vld [vmem:[%s2552_s1 + $0x80] sm:$0xff]  }
   0xb   :  { %557 = vmatprep.subr.bf16.mxu0 %v1401_v0  ;;  %1353 = vmatprep.subr.bf16.mxu1 %v1401_v0  ;;  %v283_v35 = vpack.c.bf16 %v169_v31, %v166_v30  ;;  %v21_v37 = vld [vmem:[%s2553_s0 + $0x30] sm:$0xff]  ;;  %v24_v38 = vld [vmem:[%s2553_s0 + $0x48] sm:$0xff]  ;;  %v31_v42 = vld [vmem:[%s2553_s0 + $0x80] sm:$0xff] }
   0xc   :  { %v165_v39 = vld [vmem:[%s2553_s0 + $0x4b0] sm:$0xff]  ;;  %v168_v40 = vld [vmem:[%s2553_s0 + $0x4c8] sm:$0xff]  ;;  %v175_v44 = vld [vmem:[%s2553_s0 + $0x500] sm:$0xff]  ;;  %v210_v45 = vpack.c.bf16 %v24_v38, %v21_v37 }
   0xd   :  { %v28_v41 = vld [vmem:[%s2553_s0 + $0x68] sm:$0xff]  ;;  %v282_v46 = vpack.c.bf16 %v168_v40, %v165_v39  ;;  %v27_v49 = vld [vmem:[%s2553_s0 + $0x60] sm:$0xff]  ;;  %v30_v50 = vld [vmem:[%s2553_s0 + $0x78] sm:$0xff] }
   0xe   :  { %558 = vmatpush1.bf16.msra.mxu0 %v1386_v4  ;;  %1369 = vmatpush1.bf16.msra.mxu1 %v1386_v4  ;;  %v172_v43 = vld [vmem:[%s2553_s0 + $0x4e8] sm:$0xff]  ;;  %v214_v47 = vpack.c.bf16 %v31_v42, %v28_v41  ;;  %v171_v51 = vld [vmem:[%s2553_s0 + $0x4e0] sm:$0xff]  ;;  %v174_v52 = vld [vmem:[%s2553_s0 + $0x4f8] sm:$0xff]  ;;  %v213_v57 = vpack.c.bf16 %v30_v50, %v27_v49 }
   0xf   :  { %559 = vmatprep.subr.bf16.mxu0 %v1401_v0  ;;  %1354 = vmatprep.subr.bf16.mxu1 %v1401_v0  ;;  %v286_v48 = vpack.c.bf16 %v175_v44, %v172_v43  ;;  %v34_v53 = vld [vmem:[%s2553_s0 + $0x98] sm:$0xff]  ;;  %v37_v54 = vld [vmem:[%s2553_s0 + $0xb0] sm:$0xff]  ;;  %v285_v58 = vpack.c.bf16 %v174_v52, %v171_v51  ;;  %v36_v62 = vld [vmem:[%s2553_s0 + $0xa8] sm:$0xff] }
  0x10   :  { %v178_v55 = vld [vmem:[%s2553_s0 + $0x518] sm:$0xff]  ;;  %v181_v56 = vld [vmem:[%s2553_s0 + $0x530] sm:$0xff]  ;;  %v217_v59 = vpack.c.bf16 %v37_v54, %v34_v53  ;;  %v40_v1 = vld [vmem:[%s2553_s0 + $0xc8] sm:$0xff] }
  0x11   :  { %v289_v60 = vpack.c.bf16 %v181_v56, %v178_v55  ;;  %v33_v61 = vld [vmem:[%s2553_s0 + $0x90] sm:$0xff]  ;;  %v43_v2 = vld [vmem:[%s2553_s0 + $0xe0] sm:$0xff]  ;;  %v184_v3 = vld [vmem:[%s2553_s0 + $0x548] sm:$0xff] }
  0x12   :  { %560 = vmatpush1.bf16.msra.mxu0 %v1387_v5  ;;  %1370 = vmatpush1.bf16.msra.mxu1 %v1387_v5  ;;  %v177_v63 = vld [vmem:[%s2553_s0 + $0x510] sm:$0xff]  ;;  %v187_v4 = vld [vmem:[%s2553_s0 + $0x560] sm:$0xff]  ;;  %v216_v5 = vpack.c.bf16 %v36_v62, %v33_v61  ;;  %v220_v7 = vpack.c.bf16 %v43_v2, %v40_v1  ;;  %v42_v10 = vld [vmem:[%s2553_s0 + $0xd8] sm:$0xff] }
  0x13   :  { %561 = vmatprep.subr.bf16.mxu0 %v1401_v0  ;;  %1355 = vmatprep.subr.bf16.mxu1 %v1401_v0  ;;  %v292_v8 = vpack.c.bf16 %v187_v4, %v184_v3  ;;  %v39_v9 = vld [vmem:[%s2553_s0 + $0xc0] sm:$0xff]  ;;  %v186_v12 = vld [vmem:[%s2553_s0 + $0x558] sm:$0xff]  ;;  %v189_v23 = vld [vmem:[%s2553_s0 + $0x570] sm:$0xff] }
  0x14   :  { %v192_v24 = vld [vmem:[%s2553_s0 + $0x588] sm:$0xff]  ;;  %v55_v26 = vld [vmem:[%s2553_s0 + $0x140] sm:$0xff]  ;;  %v58_v37 = vld [vmem:[%s2553_s0 + $0x158] sm:$0xff] }
  0x15   :  { %v52_v25 = vld [vmem:[%s2553_s0 + $0x128] sm:$0xff]  ;;  %v199_v28 = vld [vmem:[%s2553_s0 + $0x5c0] sm:$0xff]  ;;  %v294_v30 = vpack.c.bf16 %v192_v24, %v189_v23  ;;  %v61_v38 = vld [vmem:[%s2553_s0 + $0x170] sm:$0xff] }
  0x16   :  { %562 = vmatpush1.bf16.msra.mxu0 %v1388_v11  ;;  %1371 = vmatpush1.bf16.msra.mxu1 %v1388_v11  ;;  %v183_v11 = vld [vmem:[%s2553_s0 + $0x540] sm:$0xff]  ;;  %v226_v31 = vpack.c.bf16 %v55_v26, %v52_v25  ;;  %v202_v39 = vld [vmem:[%s2553_s0 + $0x5d8] sm:$0xff]  ;;  %v205_v40 = vld [vmem:[%s2553_s0 + $0x5f0] sm:$0xff]  ;;  %v229_v43 = vpack.c.bf16 %v61_v38, %v58_v37 }
  0x17   :  { %563 = vmatprep.subr.bf16.mxu0 %v1401_v0  ;;  %1356 = vmatprep.subr.bf16.mxu1 %v1401_v0  ;;  %v301_v44 = vpack.c.bf16 %v205_v40, %v202_v39  ;;  %v64_v49 = vld [vmem:[%s2553_s0 + $0x188] sm:$0xff]  ;;  %v67_v50 = vld [vmem:[%s2553_s0 + $0x1a0] sm:$0xff]  ;;  %v17_v51 = vld [vmem:[%s2553_s0 + $0x10] sm:$0xff] }
  0x18   :  { %v20_v52 = vld [vmem:[%s2553_s0 + $0x28] sm:$0xff]  ;;  %v232_v55 = vpack.c.bf16 %v67_v50, %v64_v49  ;;  %v70_v61 = vld [vmem:[%s2553_s0 + $0x1b8] sm:$0xff]  ;;  %v73_v62 = vld [vmem:[%s2553_s0 + $0x1d0] sm:$0xff] }
  0x19   :  { %v209_v56 = vpack.c.bf16 %v20_v52, %v17_v51  ;;  %v235_v3 = vpack.c.bf16 %v73_v62, %v70_v61  ;;  %v53_v23 = vld [vmem:[%s2553_s0 + $0x130] sm:$0xff]  ;;  %v56_v24 = vld [vmem:[%s2553_s0 + $0x148] sm:$0xff] }
  0x1a   :  { %564 = vmatpush1.bf16.msra.mxu0 %v1389_v13  ;;  %1372 = vmatpush1.bf16.msra.mxu1 %v1389_v13  ;;  %v46_v13 = vld [vmem:[%s2553_s0 + $0xf8] sm:$0xff] }
  0x1b   :  { %565 = vmatprep.subr.bf16.mxu0 %v1401_v0  ;;  %1357 = vmatprep.subr.bf16.mxu1 %v1401_v0 }
  0x1e   :  { %566 = vmatpush1.bf16.msra.mxu0 %v1390_v14  ;;  %1373 = vmatpush1.bf16.msra.mxu1 %v1390_v14  ;;  %v49_v14 = vld [vmem:[%s2553_s0 + $0x110] sm:$0xff] }
  0x1f   :  { %567 = vmatprep.subr.bf16.mxu0 %v1401_v0  ;;  %1358 = vmatprep.subr.bf16.mxu1 %v1401_v0 }
  0x22   :  { %568 = vmatpush2.bf16.msra.mxu0 %v1391_v15  ;;  %1374 = vmatpush2.bf16.msra.mxu1 %v1391_v15  ;;  %v190_v15 = vld [vmem:[%s2553_s0 + $0x578] sm:$0xff] }
  0x23   :  { %569 = vmatprep.subr.bf16.mxu0 %v1401_v0  ;;  %1359 = vmatprep.subr.bf16.mxu1 %v1401_v0 }
  0x26   :  { %570 = vmatpush2.bf16.msra.mxu0 %v1392_v16  ;;  %1375 = vmatpush2.bf16.msra.mxu1 %v1392_v16  ;;  %v193_v16 = vld [vmem:[%s2553_s0 + $0x590] sm:$0xff] }
  0x27   :  { %571 = vmatprep.subr.bf16.mxu0 %v1401_v0  ;;  %1360 = vmatprep.subr.bf16.mxu1 %v1401_v0 }
  0x2a   :  { %572 = vmatpush2.bf16.msra.mxu0 %v1393_v17  ;;  %1376 = vmatpush2.bf16.msra.mxu1 %v1393_v17  ;;  %v219_v17 = vpack.c.bf16 %v42_v10, %v39_v9  ;;  %v76_v9 = vld [vmem:[%s2553_s0 + $0x1e8] sm:$0xff]  ;;  %v79_v10 = vld [vmem:[%s2553_s0 + $0x200] sm:$0xff] }
  0x2b   :  { %573 = vmatprep.subr.bf16.mxu0 %v1401_v0  ;;  %1361 = vmatprep.subr.bf16.mxu1 %v1401_v0 }
  0x2e   :  { %574 = vmatpush2.bf16.msra.mxu0 %v1394_v18  ;;  %1377 = vmatpush2.bf16.msra.mxu1 %v1394_v18  ;;  %v291_v18 = vpack.c.bf16 %v186_v12, %v183_v11  ;;  %v41_v11 = vld [vmem:[%s2553_s0 + $0xd0] sm:$0xff]  ;;  %v44_v12 = vld [vmem:[%s2553_s0 + $0xe8] sm:$0xff] }
  0x2f   :  { %575 = vmatprep.subr.bf16.mxu0 %v1401_v0  ;;  %1362 = vmatprep.subr.bf16.mxu1 %v1401_v0 }
  0x32   :  { %576 = vmatpush2.bf16.msra.mxu0 %v1395_v19  ;;  %1378 = vmatpush2.bf16.msra.mxu1 %v1395_v19  ;;  %v223_v19 = vpack.c.bf16 %v49_v14, %v46_v13 }
  0x33   :  { %577 = vmatprep.subr.bf16.mxu0 %v1401_v0  ;;  %1363 = vmatprep.subr.bf16.mxu1 %v1401_v0 }
  0x36   :  { %578 = vmatpush2.bf16.msra.mxu0 %v1396_v20  ;;  %1379 = vmatpush2.bf16.msra.mxu1 %v1396_v20  ;;  %v295_v20 = vpack.c.bf16 %v193_v16, %v190_v15  ;;  %v238_v15 = vpack.c.bf16 %v79_v10, %v76_v9  ;;  %v221_v16 = vpack.c.bf16 %v44_v12, %v41_v11 }
  0x37   :  { %579 = vmatprep.subr.bf16.mxu0 %v1401_v0  ;;  %1364 = vmatprep.subr.bf16.mxu1 %v1401_v0 }
  0x3a   :  { %580 = vmatpush2.bf16.msra.mxu0 %v1397_v21  ;;  %1380 = vmatpush2.bf16.msra.mxu1 %v1397_v21  ;;  %v45_v21 = vld [vmem:[%s2553_s0 + $0xf0] sm:$0xff] }
  0x3b   :  { %581 = vmatprep.subr.bf16.mxu0 %v1401_v0  ;;  %1365 = vmatprep.subr.bf16.mxu1 %v1401_v0  ;;  %v180_v0 = vld [vmem:[%s2553_s0 + $0x528] sm:$0xff] }
  0x3c   :  { %v288_v6 = vpack.c.bf16 %v180_v0, %v177_v63  ;;  %v29_v63 = vld [vmem:[%s2553_s0 + $0x70] sm:$0xff]  ;;  %v32_v0 = vld [vmem:[%s2553_s0 + $0x88] sm:$0xff] }
  0x3d   :  { %v215_v4 = vpack.c.bf16 %v32_v0, %v29_v63 }
  0x3e   :  { %582 = vmatpush2.bf16.msra.mxu0 %v1398_v22  ;;  %1381 = vmatpush2.bf16.msra.mxu1 %v1398_v22  ;;  %v48_v22 = vld [vmem:[%s2553_s0 + $0x108] sm:$0xff] }
  0x3f   :  { %1282 = vmatprep.subr.bf16.mxu1 %v1399_v27  ;;  %v222_v29 = vpack.c.bf16 %v48_v22, %v45_v21  ;;  %v82_v21 = vld [vmem:[%s2553_s0 + $0x218] sm:$0xff]  ;;  %v85_v22 = vld [vmem:[%s2553_s0 + $0x230] sm:$0xff] }
  0x41   :  { %584 = vmatmul.mubr.bf16.vlgmr.msra.gmra.mxu0 %v207_v32  ;;  %776 = vmatmul.mubr.bf16.vlgmr.msra.gmra.mxu1 %v279_v33  ;;  %v51_v33 = vld [vmem:[%s2553_s0 + $0x120] sm:$0xff] }
  0x42   :  { %1283 = vmatpush3.bf16.msra.mxu1 %v1399_v27  ;;  %591 = vmatprep.mubr.bf16.mxu0 %v211_v34  ;;  %v196_v27 = vld [vmem:[%s2553_s0 + $0x5a8] sm:$0xff]  ;;  %v54_v34 = vld [vmem:[%s2553_s0 + $0x138] sm:$0xff] }
  0x43   :  { %783 = vmatprep.mubr.bf16.mxu1 %v283_v35  ;;  %1284 = vmatprep.subr.bf16.mxu1 %v1400_v36  ;;  %v298_v32 = vpack.c.bf16 %v199_v28, %v196_v27  ;;  %v195_v35 = vld [vmem:[%s2553_s0 + $0x5a0] sm:$0xff]  ;;  %v225_v41 = vpack.c.bf16 %v54_v34, %v51_v33  ;;  %v241_v27 = vpack.c.bf16 %v85_v22, %v82_v21  ;;  %v88_v33 = vld [vmem:[%s2553_s0 + $0x248] sm:$0xff] }
  0x44   :  { %v227_v28 = vpack.c.bf16 %v56_v24, %v53_v23  ;;  %v91_v34 = vld [vmem:[%s2553_s0 + $0x260] sm:$0xff] }
  0x45   :  { %v244_v39 = vpack.c.bf16 %v91_v34, %v88_v33 }
  0x46   :  { %1285 = vmatpush3.bf16.msra.mxu1 %v1400_v36  ;;  %v198_v36 = vld [vmem:[%s2553_s0 + $0x5b8] sm:$0xff] }
  0x47   :  { %v297_v42 = vpack.c.bf16 %v198_v36, %v195_v35  ;;  %v65_v35 = vld [vmem:[%s2553_s0 + $0x190] sm:$0xff]  ;;  %v68_v36 = vld [vmem:[%s2553_s0 + $0x1a8] sm:$0xff] }
  0x48   :  { %v233_v40 = vpack.c.bf16 %v68_v36, %v65_v35 }
  0x49   :  { %592 = vmatmul.mubr.bf16.gmra.mxu0 %v210_v45  ;;  %784 = vmatmul.mubr.bf16.gmra.mxu1 %v282_v46  ;;  %v57_v45 = vld [vmem:[%s2553_s0 + $0x150] sm:$0xff]  ;;  %v60_v46 = vld [vmem:[%s2553_s0 + $0x168] sm:$0xff] }
  0x4a   :  { %599 = vmatprep.mubr.bf16.mxu0 %v214_v47  ;;  %791 = vmatprep.mubr.bf16.mxu1 %v286_v48  ;;  %v201_v47 = vld [vmem:[%s2553_s0 + $0x5d0] sm:$0xff]  ;;  %v204_v48 = vld [vmem:[%s2553_s0 + $0x5e8] sm:$0xff]  ;;  %v228_v53 = vpack.c.bf16 %v60_v46, %v57_v45  ;;  %v94_v45 = vld [vmem:[%s2553_s0 + $0x278] sm:$0xff] }
  0x4b   :  { %v300_v54 = vpack.c.bf16 %v204_v48, %v201_v47  ;;  %v97_v46 = vld [vmem:[%s2553_s0 + $0x290] sm:$0xff]  ;;  %v80_v48 = vld [vmem:[%s2553_s0 + $0x208] sm:$0xff] }
  0x4c   :  { %v77_v47 = vld [vmem:[%s2553_s0 + $0x1f0] sm:$0xff]  ;;  %v247_v51 = vpack.c.bf16 %v97_v46, %v94_v45 }
  0x4d   :  { %v239_v52 = vpack.c.bf16 %v80_v48, %v77_v47 }
  0x51   :  { %600 = vmatmul.mubr.bf16.gmra.mxu0 %v213_v57  ;;  %792 = vmatmul.mubr.bf16.gmra.mxu1 %v285_v58  ;;  %v63_v57 = vld [vmem:[%s2553_s0 + $0x180] sm:$0xff]  ;;  %v66_v58 = vld [vmem:[%s2553_s0 + $0x198] sm:$0xff] }
  0x52   :  { %607 = vmatprep.mubr.bf16.mxu0 %v217_v59  ;;  %799 = vmatprep.mubr.bf16.mxu1 %v289_v60  ;;  %v23_v59 = vld [vmem:[%s2553_s0 + $0x40] sm:$0xff]  ;;  %v26_v60 = vld [vmem:[%s2553_s0 + $0x58] sm:$0xff]  ;;  %v231_v1 = vpack.c.bf16 %v66_v58, %v63_v57  ;;  %v100_v57 = vld [vmem:[%s2553_s0 + $0x2a8] sm:$0xff] }
  0x53   :  { %v212_v2 = vpack.c.bf16 %v26_v60, %v23_v59  ;;  %v103_v58 = vld [vmem:[%s2553_s0 + $0x2c0] sm:$0xff]  ;;  %v89_v59 = vld [vmem:[%s2553_s0 + $0x250] sm:$0xff]  ;;  %v92_v60 = vld [vmem:[%s2553_s0 + $0x268] sm:$0xff] }
  0x54   :  { %v250_v63 = vpack.c.bf16 %v103_v58, %v100_v57  ;;  %v245_v0 = vpack.c.bf16 %v92_v60, %v89_v59 }
  0x59   :  { %608 = vmatmul.mubr.bf16.gmra.mxu0 %v216_v5  ;;  %800 = vmatmul.mubr.bf16.gmra.mxu1 %v288_v6  ;;  %v69_v5 = vld [vmem:[%s2553_s0 + $0x1b0] sm:$0xff]  ;;  %v72_v6 = vld [vmem:[%s2553_s0 + $0x1c8] sm:$0xff] }
  0x5a   :  { %615 = vmatprep.mubr.bf16.mxu0 %v220_v7  ;;  %807 = vmatprep.mubr.bf16.mxu1 %v292_v8  ;;  %v35_v7 = vld [vmem:[%s2553_s0 + $0xa0] sm:$0xff]  ;;  %v38_v8 = vld [vmem:[%s2553_s0 + $0xb8] sm:$0xff]  ;;  %v234_v13 = vpack.c.bf16 %v72_v6, %v69_v5  ;;  %v109_v6 = vld [vmem:[%s2553_s0 + $0x2f0] sm:$0xff] }
  0x5b   :  { %v218_v14 = vpack.c.bf16 %v38_v8, %v35_v7  ;;  %v106_v5 = vld [vmem:[%s2553_s0 + $0x2d8] sm:$0xff]  ;;  %v101_v7 = vld [vmem:[%s2553_s0 + $0x2b0] sm:$0xff]  ;;  %v104_v8 = vld [vmem:[%s2553_s0 + $0x2c8] sm:$0xff] }
  0x5c   :  { %v253_v11 = vpack.c.bf16 %v109_v6, %v106_v5  ;;  %v251_v12 = vpack.c.bf16 %v104_v8, %v101_v7 }
  0x61   :  { %616 = vmatmul.mubr.bf16.gmra.mxu0 %v219_v17  ;;  %808 = vmatmul.mubr.bf16.gmra.mxu1 %v291_v18  ;;  %v75_v17 = vld [vmem:[%s2553_s0 + $0x1e0] sm:$0xff]  ;;  %v78_v18 = vld [vmem:[%s2553_s0 + $0x1f8] sm:$0xff] }
  0x62   :  { %623 = vmatprep.mubr.bf16.mxu0 %v223_v19  ;;  %815 = vmatprep.mubr.bf16.mxu1 %v295_v20  ;;  %v47_v19 = vld [vmem:[%s2553_s0 + $0x100] sm:$0xff]  ;;  %v50_v20 = vld [vmem:[%s2553_s0 + $0x118] sm:$0xff]  ;;  %v237_v25 = vpack.c.bf16 %v78_v18, %v75_v17  ;;  %v112_v17 = vld [vmem:[%s2553_s0 + $0x308] sm:$0xff] }
  0x63   :  { %v224_v26 = vpack.c.bf16 %v50_v20, %v47_v19  ;;  %v115_v18 = vld [vmem:[%s2553_s0 + $0x320] sm:$0xff]  ;;  %v113_v19 = vld [vmem:[%s2553_s0 + $0x310] sm:$0xff]  ;;  %v116_v20 = vld [vmem:[%s2553_s0 + $0x328] sm:$0xff] }
  0x64   :  { %v256_v23 = vpack.c.bf16 %v115_v18, %v112_v17  ;;  %v257_v24 = vpack.c.bf16 %v116_v20, %v113_v19 }
  0x69   :  { %624 = vmatmul.mubr.bf16.gmra.mxu0 %v222_v29  ;;  %816 = vmatmul.mubr.bf16.gmra.mxu1 %v294_v30  ;;  %v81_v29 = vld [vmem:[%s2553_s0 + $0x210] sm:$0xff]  ;;  %v84_v30 = vld [vmem:[%s2553_s0 + $0x228] sm:$0xff] }
  0x6a   :  { %631 = vmatprep.mubr.bf16.mxu0 %v226_v31  ;;  %823 = vmatprep.mubr.bf16.mxu1 %v298_v32  ;;  %v59_v31 = vld [vmem:[%s2553_s0 + $0x160] sm:$0xff]  ;;  %v62_v32 = vld [vmem:[%s2553_s0 + $0x178] sm:$0xff]  ;;  %v240_v37 = vpack.c.bf16 %v84_v30, %v81_v29  ;;  %v121_v30 = vld [vmem:[%s2553_s0 + $0x350] sm:$0xff] }
  0x6b   :  { %v230_v38 = vpack.c.bf16 %v62_v32, %v59_v31  ;;  %v118_v29 = vld [vmem:[%s2553_s0 + $0x338] sm:$0xff]  ;;  %v125_v31 = vld [vmem:[%s2553_s0 + $0x370] sm:$0xff]  ;;  %v128_v32 = vld [vmem:[%s2553_s0 + $0x388] sm:$0xff] }
  0x6c   :  { %v259_v35 = vpack.c.bf16 %v121_v30, %v118_v29  ;;  %v263_v36 = vpack.c.bf16 %v128_v32, %v125_v31 }
  0x71   :  { %632 = vmatmul.mubr.bf16.gmra.mxu0 %v225_v41  ;;  %824 = vmatmul.mubr.bf16.gmra.mxu1 %v297_v42  ;;  %v87_v41 = vld [vmem:[%s2553_s0 + $0x240] sm:$0xff]  ;;  %v90_v42 = vld [vmem:[%s2553_s0 + $0x258] sm:$0xff] }
  0x72   :  { %639 = vmatprep.mubr.bf16.mxu0 %v229_v43  ;;  %831 = vmatprep.mubr.bf16.mxu1 %v301_v44  ;;  %v71_v43 = vld [vmem:[%s2553_s0 + $0x1c0] sm:$0xff]  ;;  %v74_v44 = vld [vmem:[%s2553_s0 + $0x1d8] sm:$0xff]  ;;  %v243_v49 = vpack.c.bf16 %v90_v42, %v87_v41  ;;  %v124_v41 = vld [vmem:[%s2553_s0 + $0x368] sm:$0xff] }
  0x73   :  { %v236_v50 = vpack.c.bf16 %v74_v44, %v71_v43  ;;  %v127_v42 = vld [vmem:[%s2553_s0 + $0x380] sm:$0xff]  ;;  %v137_v43 = vld [vmem:[%s2553_s0 + $0x3d0] sm:$0xff]  ;;  %v140_v44 = vld [vmem:[%s2553_s0 + $0x3e8] sm:$0xff] }
  0x74   :  { %v262_v47 = vpack.c.bf16 %v127_v42, %v124_v41  ;;  %v269_v48 = vpack.c.bf16 %v140_v44, %v137_v43 }
  0x79   :  { %640 = vmatmul.mubr.bf16.gmra.mxu0 %v228_v53  ;;  %832 = vmatmul.mubr.bf16.gmra.mxu1 %v300_v54  ;;  %v93_v53 = vld [vmem:[%s2553_s0 + $0x270] sm:$0xff]  ;;  %v96_v54 = vld [vmem:[%s2553_s0 + $0x288] sm:$0xff] }
  0x7a   :  { %647 = vmatprep.mubr.bf16.mxu0 %v232_v55  ;;  %1286 = vmatprep.mubr.msk.bf16.mxu1 %vm454_vm0, %v209_v56  ;;  %v83_v55 = vld [vmem:[%s2553_s0 + $0x220] sm:$0xff]  ;;  %v86_v56 = vld [vmem:[%s2553_s0 + $0x238] sm:$0xff]  ;;  %v246_v61 = vpack.c.bf16 %v96_v54, %v93_v53  ;;  %v133_v54 = vld [vmem:[%s2553_s0 + $0x3b0] sm:$0xff] }
  0x7b   :  { %v242_v62 = vpack.c.bf16 %v86_v56, %v83_v55  ;;  %v130_v53 = vld [vmem:[%s2553_s0 + $0x398] sm:$0xff]  ;;  %v149_v55 = vld [vmem:[%s2553_s0 + $0x430] sm:$0xff]  ;;  %v152_v56 = vld [vmem:[%s2553_s0 + $0x448] sm:$0xff] }
  0x7c   :  { %v265_v59 = vpack.c.bf16 %v133_v54, %v130_v53  ;;  %v275_v60 = vpack.c.bf16 %v152_v56, %v149_v55 }
  0x81   :  { %648 = vmatmul.mubr.bf16.gmra.mxu0 %v231_v1  ;;  %1287 = vmatmul.mubr.msk.bf16.vlgmr.msra.gmra.mxu1 %vm454_vm0, %v212_v2  ;;  %v99_v1 = vld [vmem:[%s2553_s0 + $0x2a0] sm:$0xff]  ;;  %v102_v2 = vld [vmem:[%s2553_s0 + $0x2b8] sm:$0xff] }
  0x82   :  { %655 = vmatprep.mubr.bf16.mxu0 %v235_v3  ;;  %1290 = vmatprep.mubr.msk.bf16.mxu1 %vm454_vm0, %v215_v4  ;;  %v95_v3 = vld [vmem:[%s2553_s0 + $0x280] sm:$0xff]  ;;  %v98_v4 = vld [vmem:[%s2553_s0 + $0x298] sm:$0xff]  ;;  %v249_v9 = vpack.c.bf16 %v102_v2, %v99_v1  ;;  %v136_v1 = vld [vmem:[%s2553_s0 + $0x3c8] sm:$0xff] }
  0x83   :  { %v248_v10 = vpack.c.bf16 %v98_v4, %v95_v3  ;;  %v139_v2 = vld [vmem:[%s2553_s0 + $0x3e0] sm:$0xff]  ;;  %v161_v3 = vld [vmem:[%s2553_s0 + $0x490] sm:$0xff]  ;;  %v164_v4 = vld [vmem:[%s2553_s0 + $0x4a8] sm:$0xff] }
  0x84   :  { %v268_v7 = vpack.c.bf16 %v139_v2, %v136_v1  ;;  %v281_v8 = vpack.c.bf16 %v164_v4, %v161_v3 }
  0x89   :  { %656 = vmatmul.mubr.bf16.gmra.mxu0 %v234_v13  ;;  %1291 = vmatmul.mubr.msk.bf16.gmra.mxu1 %vm454_vm0, %v218_v14  ;;  %v105_v13 = vld [vmem:[%s2553_s0 + $0x2d0] sm:$0xff]  ;;  %v108_v14 = vld [vmem:[%s2553_s0 + $0x2e8] sm:$0xff] }
  0x8a   :  { %663 = vmatprep.mubr.bf16.mxu0 %v238_v15  ;;  %1294 = vmatprep.mubr.msk.bf16.mxu1 %vm454_vm0, %v221_v16  ;;  %v107_v15 = vld [vmem:[%s2553_s0 + $0x2e0] sm:$0xff]  ;;  %v110_v16 = vld [vmem:[%s2553_s0 + $0x2f8] sm:$0xff]  ;;  %v252_v21 = vpack.c.bf16 %v108_v14, %v105_v13  ;;  %v145_v14 = vld [vmem:[%s2553_s0 + $0x410] sm:$0xff] }
  0x8b   :  { %v254_v22 = vpack.c.bf16 %v110_v16, %v107_v15  ;;  %v142_v13 = vld [vmem:[%s2553_s0 + $0x3f8] sm:$0xff]  ;;  %v173_v15 = vld [vmem:[%s2553_s0 + $0x4f0] sm:$0xff]  ;;  %v176_v16 = vld [vmem:[%s2553_s0 + $0x508] sm:$0xff] }
  0x8c   :  { %v271_v19 = vpack.c.bf16 %v145_v14, %v142_v13  ;;  %v287_v20 = vpack.c.bf16 %v176_v16, %v173_v15 }
  0x91   :  { %664 = vmatmul.mubr.bf16.gmra.mxu0 %v237_v25  ;;  %1295 = vmatmul.mubr.msk.bf16.gmra.mxu1 %vm454_vm0, %v224_v26  ;;  %v111_v25 = vld [vmem:[%s2553_s0 + $0x300] sm:$0xff]  ;;  %v114_v26 = vld [vmem:[%s2553_s0 + $0x318] sm:$0xff] }
  0x92   :  { %671 = vmatprep.mubr.bf16.mxu0 %v241_v27  ;;  %1298 = vmatprep.mubr.msk.bf16.mxu1 %vm454_vm0, %v227_v28  ;;  %v119_v27 = vld [vmem:[%s2553_s0 + $0x340] sm:$0xff]  ;;  %v122_v28 = vld [vmem:[%s2553_s0 + $0x358] sm:$0xff]  ;;  %v255_v33 = vpack.c.bf16 %v114_v26, %v111_v25  ;;  %v148_v25 = vld [vmem:[%s2553_s0 + $0x428] sm:$0xff] }
  0x93   :  { %v260_v34 = vpack.c.bf16 %v122_v28, %v119_v27  ;;  %v151_v26 = vld [vmem:[%s2553_s0 + $0x440] sm:$0xff]  ;;  %v185_v27 = vld [vmem:[%s2553_s0 + $0x550] sm:$0xff]  ;;  %v188_v28 = vld [vmem:[%s2553_s0 + $0x568] sm:$0xff] }
  0x94   :  { %v274_v31 = vpack.c.bf16 %v151_v26, %v148_v25  ;;  %v293_v32 = vpack.c.bf16 %v188_v28, %v185_v27 }
  0x99   :  { %672 = vmatmul.mubr.bf16.gmra.mxu0 %v240_v37  ;;  %1299 = vmatmul.mubr.msk.bf16.gmra.mxu1 %vm454_vm0, %v230_v38  ;;  %v117_v37 = vld [vmem:[%s2553_s0 + $0x330] sm:$0xff]  ;;  %v120_v38 = vld [vmem:[%s2553_s0 + $0x348] sm:$0xff] }
  0x9a   :  { %679 = vmatprep.mubr.bf16.mxu0 %v244_v39  ;;  %1302 = vmatprep.mubr.msk.bf16.mxu1 %vm454_vm0, %v233_v40  ;;  %v131_v39 = vld [vmem:[%s2553_s0 + $0x3a0] sm:$0xff]  ;;  %v134_v40 = vld [vmem:[%s2553_s0 + $0x3b8] sm:$0xff]  ;;  %v258_v45 = vpack.c.bf16 %v120_v38, %v117_v37  ;;  %v157_v38 = vld [vmem:[%s2553_s0 + $0x470] sm:$0xff] }
  0x9b   :  { %v266_v46 = vpack.c.bf16 %v134_v40, %v131_v39  ;;  %v154_v37 = vld [vmem:[%s2553_s0 + $0x458] sm:$0xff]  ;;  %v197_v39 = vld [vmem:[%s2553_s0 + $0x5b0] sm:$0xff]  ;;  %v200_v40 = vld [vmem:[%s2553_s0 + $0x5c8] sm:$0xff] }
  0x9c   :  { %v277_v43 = vpack.c.bf16 %v157_v38, %v154_v37  ;;  %v299_v44 = vpack.c.bf16 %v200_v40, %v197_v39 }
  0xa1   :  { %680 = vmatmul.mubr.bf16.gmra.mxu0 %v243_v49  ;;  %1303 = vmatmul.mubr.msk.bf16.gmra.mxu1 %vm454_vm0, %v236_v50  ;;  %v123_v49 = vld [vmem:[%s2553_s0 + $0x360] sm:$0xff]  ;;  %v126_v50 = vld [vmem:[%s2553_s0 + $0x378] sm:$0xff] }
  0xa2   :  { %687 = vmatprep.mubr.bf16.mxu0 %v247_v51  ;;  %1306 = vmatprep.mubr.msk.bf16.mxu1 %vm454_vm0, %v239_v52  ;;  %v143_v51 = vld [vmem:[%s2553_s0 + $0x400] sm:$0xff]  ;;  %v146_v52 = vld [vmem:[%s2553_s0 + $0x418] sm:$0xff]  ;;  %v261_v57 = vpack.c.bf16 %v126_v50, %v123_v49 }
  0xa3   :  { %v272_v58 = vpack.c.bf16 %v146_v52, %v143_v51 }
  0xa9   :  { %688 = vmatmul.mubr.bf16.gmra.mxu0 %v246_v61  ;;  %1307 = vmatmul.mubr.msk.bf16.gmra.mxu1 %vm454_vm0, %v242_v62  ;;  %v129_v61 = vld [vmem:[%s2553_s0 + $0x390] sm:$0xff]  ;;  %v132_v62 = vld [vmem:[%s2553_s0 + $0x3a8] sm:$0xff] }
  0xaa   :  { %695 = vmatprep.mubr.bf16.mxu0 %v250_v63  ;;  %1310 = vmatprep.mubr.msk.bf16.mxu1 %vm454_vm0, %v245_v0  ;;  %v155_v63 = vld [vmem:[%s2553_s0 + $0x460] sm:$0xff]  ;;  %v158_v0 = vld [vmem:[%s2553_s0 + $0x478] sm:$0xff]  ;;  %v264_v5 = vpack.c.bf16 %v132_v62, %v129_v61 }
  0xab   :  { %v278_v6 = vpack.c.bf16 %v158_v0, %v155_v63 }
  0xb1   :  { %696 = vmatmul.mubr.bf16.gmra.mxu0 %v249_v9  ;;  %1311 = vmatmul.mubr.msk.bf16.gmra.mxu1 %vm454_vm0, %v248_v10  ;;  %v135_v9 = vld [vmem:[%s2553_s0 + $0x3c0] sm:$0xff]  ;;  %v138_v10 = vld [vmem:[%s2553_s0 + $0x3d8] sm:$0xff] }
  0xb2   :  { %703 = vmatprep.mubr.bf16.mxu0 %v253_v11  ;;  %1314 = vmatprep.mubr.msk.bf16.mxu1 %vm454_vm0, %v251_v12  ;;  %v167_v11 = vld [vmem:[%s2553_s0 + $0x4c0] sm:$0xff]  ;;  %v170_v12 = vld [vmem:[%s2553_s0 + $0x4d8] sm:$0xff]  ;;  %v267_v17 = vpack.c.bf16 %v138_v10, %v135_v9 }
  0xb3   :  { %v284_v18 = vpack.c.bf16 %v170_v12, %v167_v11 }
  0xb9   :  { %704 = vmatmul.mubr.bf16.gmra.mxu0 %v252_v21  ;;  %1315 = vmatmul.mubr.msk.bf16.gmra.mxu1 %vm454_vm0, %v254_v22  ;;  %v141_v21 = vld [vmem:[%s2553_s0 + $0x3f0] sm:$0xff]  ;;  %v144_v22 = vld [vmem:[%s2553_s0 + $0x408] sm:$0xff] }
  0xba   :  { %711 = vmatprep.mubr.bf16.mxu0 %v256_v23  ;;  %1318 = vmatprep.mubr.msk.bf16.mxu1 %vm454_vm0, %v257_v24  ;;  %v179_v23 = vld [vmem:[%s2553_s0 + $0x520] sm:$0xff]  ;;  %v182_v24 = vld [vmem:[%s2553_s0 + $0x538] sm:$0xff]  ;;  %v270_v29 = vpack.c.bf16 %v144_v22, %v141_v21 }
  0xbb   :  { %v290_v30 = vpack.c.bf16 %v182_v24, %v179_v23 }
  0xc1   :  { %712 = vmatmul.mubr.bf16.gmra.mxu0 %v255_v33  ;;  %1319 = vmatmul.mubr.msk.bf16.gmra.mxu1 %vm454_vm0, %v260_v34  ;;  %v147_v33 = vld [vmem:[%s2553_s0 + $0x420] sm:$0xff]  ;;  %v150_v34 = vld [vmem:[%s2553_s0 + $0x438] sm:$0xff] }
  0xc2   :  { %719 = vmatprep.mubr.bf16.mxu0 %v259_v35  ;;  %1322 = vmatprep.mubr.msk.bf16.mxu1 %vm454_vm0, %v263_v36  ;;  %v191_v35 = vld [vmem:[%s2553_s0 + $0x580] sm:$0xff]  ;;  %v194_v36 = vld [vmem:[%s2553_s0 + $0x598] sm:$0xff]  ;;  %v273_v41 = vpack.c.bf16 %v150_v34, %v147_v33 }
  0xc3   :  { %v296_v42 = vpack.c.bf16 %v194_v36, %v191_v35 }
  0xc9   :  { %720 = vmatmul.mubr.bf16.gmra.mxu0 %v258_v45  ;;  %1323 = vmatmul.mubr.msk.bf16.gmra.mxu1 %vm454_vm0, %v266_v46  ;;  %v153_v45 = vld [vmem:[%s2553_s0 + $0x450] sm:$0xff]  ;;  %v156_v46 = vld [vmem:[%s2553_s0 + $0x468] sm:$0xff] }
  0xca   :  { %727 = vmatprep.mubr.bf16.mxu0 %v262_v47  ;;  %1326 = vmatprep.mubr.msk.bf16.mxu1 %vm454_vm0, %v269_v48  ;;  %v203_v47 = vld [vmem:[%s2553_s0 + $0x5e0] sm:$0xff]  ;;  %v206_v48 = vld [vmem:[%s2553_s0 + $0x5f8] sm:$0xff]  ;;  %v276_v49 = vpack.c.bf16 %v156_v46, %v153_v45 }
  0xcb   :  { %v302_v50 = vpack.c.bf16 %v206_v48, %v203_v47 }
  0xd1   :  { %728 = vmatmul.mubr.bf16.gmra.mxu0 %v261_v57  ;;  %1327 = vmatmul.mubr.msk.bf16.gmra.mxu1 %vm454_vm0, %v272_v58 }
  0xd2   :  { %735 = vmatprep.mubr.bf16.mxu0 %v265_v59  ;;  %1330 = vmatprep.mubr.msk.bf16.mxu1 %vm454_vm0, %v275_v60 }
  0xd9   :  { %736 = vmatmul.mubr.bf16.gmra.mxu0 %v264_v5  ;;  %1331 = vmatmul.mubr.msk.bf16.gmra.mxu1 %vm454_vm0, %v278_v6 }
  0xda   :  { %743 = vmatprep.mubr.bf16.mxu0 %v268_v7  ;;  %1334 = vmatprep.mubr.msk.bf16.mxu1 %vm454_vm0, %v281_v8 }
  0xe1   :  { %744 = vmatmul.mubr.bf16.gmra.mxu0 %v267_v17  ;;  %1335 = vmatmul.mubr.msk.bf16.gmra.mxu1 %vm454_vm0, %v284_v18 }
  0xe2   :  { %751 = vmatprep.mubr.bf16.mxu0 %v271_v19  ;;  %1338 = vmatprep.mubr.msk.bf16.mxu1 %vm454_vm0, %v287_v20 }
  0xe9   :  { %752 = vmatmul.mubr.bf16.gmra.mxu0 %v270_v29  ;;  %1339 = vmatmul.mubr.msk.bf16.gmra.mxu1 %vm454_vm0, %v290_v30 }
  0xea   :  { %759 = vmatprep.mubr.bf16.mxu0 %v274_v31  ;;  %1342 = vmatprep.mubr.msk.bf16.mxu1 %vm454_vm0, %v293_v32 }
  0xf1   :  { %760 = vmatmul.mubr.bf16.gmra.mxu0 %v273_v41  ;;  %1343 = vmatmul.mubr.msk.bf16.gmra.mxu1 %vm454_vm0, %v296_v42 }
  0xf2   :  { %767 = vmatprep.mubr.bf16.mxu0 %v277_v43  ;;  %1346 = vmatprep.mubr.msk.bf16.mxu1 %vm454_vm0, %v299_v44 }
  0xf9   :  { %768 = vmatmul.mubr.bf16.gmra.mxu0 %v276_v49  ;;  %1347 = vmatmul.mubr.msk.bf16.gmra.mxu1 %vm454_vm0, %v302_v50  ;;  %v2177_v49 = vld [vmem:[%s2554_s2] ss:$0 sm:$0xff] }
 0x101   :  { %v2116_v51 = vpop.f32.mrf.mxu0  ;;  %v2118_v52 = vpop.f32.mrf.mxu1 }
 0x103   :  { %v587_v53 = vpop.f32.mrf.mxu0  ;;  %v779_v54 = vpop.f32.mrf.mxu1 }
 0x105   :  { %v2120_v55 = vpop.f32.mrf.mxu0  ;;  %v2122_v56 = vpop.f32.mrf.mxu1 }
 0x107   :  { %v590_v57 = vpop.f32.mrf.mxu0  ;;  %v782_v58 = vpop.f32.mrf.mxu1 }
 0x109   :  { %v593_v59 = vpop.f32.mrf.mxu0  ;;  %v2124_v60 = vpop.f32.mrf.mxu1 }
 0x10a   :  { %v594_v54 = vadd.f32 %v2177_v49, %v593_v59 }
 0x10b   :  { %v595_v61 = vpop.f32.mrf.mxu0  ;;  %v787_v62 = vpop.f32.mrf.mxu1 }
 0x10c   :  { %v586_v61 = vadd.f32 %v2177_v49, %v2116_v51 }
 0x10d   :  { %v596_v63 = vpop.f32.mrf.mxu0  ;;  %v2126_v0 = vpop.f32.mrf.mxu1 }
 0x10f   :  { %v598_v1 = vpop.f32.mrf.mxu0  ;;  %v790_v2 = vpop.f32.mrf.mxu1 }
 0x111   :  { %v2128_v3 = vpop.f32.mrf.mxu0  ;;  %v2130_v4 = vpop.f32.mrf.mxu1 }
 0x113   :  { %v603_v5 = vpop.f32.mrf.mxu0  ;;  %v795_v6 = vpop.f32.mrf.mxu1 }
 0x114   :  { %v597_v5 = vadd.f32 %v2177_v49, %v596_v63 }
 0x115   :  { %v2132_v7 = vpop.f32.mrf.mxu0  ;;  %v2134_v8 = vpop.f32.mrf.mxu1 }
 0x117   :  { %v606_v9 = vpop.f32.mrf.mxu0  ;;  %v798_v10 = vpop.f32.mrf.mxu1 }
 0x118   :  { %v589_v10 = vadd.f32 %v2177_v49, %v2120_v55  ;;  %v602_v55 = vadd.f32 %v2177_v49, %v2128_v3  ;;  %v605_v3 = vadd.f32 %v2177_v49, %v2132_v7 }
 0x119   :  { %v609_v11 = vpop.f32.mrf.mxu0  ;;  %v2136_v12 = vpop.f32.mrf.mxu1 }
 0x11b   :  { %v611_v13 = vpop.f32.mrf.mxu0  ;;  %v803_v14 = vpop.f32.mrf.mxu1 }
 0x11c   :  { %v610_v14 = vadd.f32 %v2177_v49, %v609_v11 }
 0x11d   :  { %v2138_v15 = vpop.f32.mrf.mxu0  ;;  %v2140_v16 = vpop.f32.mrf.mxu1 }
 0x11e   :  { %v613_v11 = vadd.f32 %v2177_v49, %v2138_v15 }
 0x11f   :  { %v614_v17 = vpop.f32.mrf.mxu0  ;;  %v806_v18 = vpop.f32.mrf.mxu1 }
 0x121   :  { %v2142_v19 = vpop.f32.mrf.mxu0  ;;  %v2144_v20 = vpop.f32.mrf.mxu1 }
 0x122   :  { %v618_v7 = vadd.f32 %v2177_v49, %v2142_v19 }
 0x123   :  { %v619_v21 = vpop.f32.mrf.mxu0  ;;  %v811_v22 = vpop.f32.mrf.mxu1 }
 0x125   :  { %v2146_v23 = vpop.f32.mrf.mxu0  ;;  %v2148_v24 = vpop.f32.mrf.mxu1 }
 0x126   :  { %v621_v19 = vadd.f32 %v2177_v49, %v2146_v23 }
 0x127   :  { %v622_v25 = vpop.f32.mrf.mxu0  ;;  %v814_v26 = vpop.f32.mrf.mxu1 }
 0x129   :  { %v2150_v27 = vpop.f32.mrf.mxu0  ;;  %v2152_v28 = vpop.f32.mrf.mxu1 }
 0x12a   :  { %v626_v15 = vadd.f32 %v2177_v49, %v2150_v27 }
 0x12b   :  { %v627_v29 = vpop.f32.mrf.mxu0  ;;  %v819_v30 = vpop.f32.mrf.mxu1 }
 0x12d   :  { %v2154_v31 = vpop.f32.mrf.mxu0  ;;  %v2156_v32 = vpop.f32.mrf.mxu1 }
 0x12e   :  { %v629_v27 = vadd.f32 %v2177_v49, %v2154_v31 }
 0x12f   :  { %v630_v33 = vpop.f32.mrf.mxu0  ;;  %v822_v34 = vpop.f32.mrf.mxu1 }
 0x131   :  { %v2158_v35 = vpop.f32.mrf.mxu0  ;;  %v2160_v36 = vpop.f32.mrf.mxu1 }
 0x132   :  { %v634_v23 = vadd.f32 %v2177_v49, %v2158_v35 }
 0x133   :  { %v635_v37 = vpop.f32.mrf.mxu0  ;;  %v827_v38 = vpop.f32.mrf.mxu1 }
 0x135   :  { %v2162_v39 = vpop.f32.mrf.mxu0  ;;  %v2164_v40 = vpop.f32.mrf.mxu1 }
 0x136   :  { %v637_v35 = vadd.f32 %v2177_v49, %v2162_v39 }
 0x137   :  { %v638_v41 = vpop.f32.mrf.mxu0  ;;  %v830_v42 = vpop.f32.mrf.mxu1 }
 0x139   :  { %v2166_v43 = vpop.f32.mrf.mxu0  ;;  %v2168_v44 = vpop.f32.mrf.mxu1 }
 0x13a   :  { %v642_v31 = vadd.f32 %v2177_v49, %v2166_v43 }
 0x13b   :  { %v643_v45 = vpop.f32.mrf.mxu0  ;;  %v835_v46 = vpop.f32.mrf.mxu1 }
 0x13d   :  { %v2170_v47 = vpop.f32.mrf.mxu0  ;;  %v2172_v48 = vpop.f32.mrf.mxu1 }
 0x13e   :  { %v645_v43 = vadd.f32 %v2177_v49, %v2170_v47 }
 0x13f   :  { %v646_v50 = vpop.f32.mrf.mxu0  ;;  %v838_v53 = vpop.f32.mrf.mxu1 }
 0x141   :  { %v2180_v57 = vpop.f32.mrf.mxu0  ;;  %v1288_v58 = vpop.f32.mrf.mxu1 }
 0x142   :  { %v883_v62 = vadd.f32 %v1288_v58, %v594_v54  ;;  %v650_v39 = vadd.f32 %v2177_v49, %v2180_v57 }
 0x143   :  { %v651_v1 = vpop.f32.mrf.mxu0  ;;  %v874_v2 = vpop.f32.mrf.mxu1 }
 0x144   :  { %1131 = vst.msk [vmem:[%s2555_s3 + $0x10] sm:$0xff] %vm454_vm0, %v883_v62  ;;  %v875_v6 = vadd.f32 %v874_v2, %v586_v61 }
 0x145   :  { %v2189_v9 = vpop.f32.mrf.mxu0  ;;  %v1289_v59 = vpop.f32.mrf.mxu1 }
 0x146   :  { %1129 = vst.msk [vmem:[%s2555_s3] sm:$0xff] %vm454_vm0, %v875_v6  ;;  %v886_v51 = vadd.f32 %v1289_v59, %v597_v5  ;;  %v653_v57 = vadd.f32 %v2177_v49, %v2189_v9 }
 0x147   :  { %v654_v13 = vpop.f32.mrf.mxu0  ;;  %v877_v63 = vpop.f32.mrf.mxu1 }
 0x148   :  { %1132 = vst.msk [vmem:[%s2555_s3 + $0x18] sm:$0xff] %vm454_vm0, %v886_v51  ;;  %v878_v17 = vadd.f32 %v877_v63, %v589_v10 }
 0x149   :  { %v657_v18 = vpop.f32.mrf.mxu0  ;;  %v1292_v21 = vpop.f32.mrf.mxu1 }
 0x14a   :  { %1130 = vst.msk [vmem:[%s2555_s3 + $0x8] sm:$0xff] %vm454_vm0, %v878_v17  ;;  %v899_v22 = vadd.f32 %v1292_v21, %v610_v14  ;;  %v658_v47 = vadd.f32 %v2177_v49, %v657_v18 }
 0x14b   :  { %v659_v25 = vpop.f32.mrf.mxu0  ;;  %v890_v26 = vpop.f32.mrf.mxu1 }
 0x14c   :  { %1135 = vst.msk [vmem:[%s2555_s3 + $0x30] sm:$0xff] %vm454_vm0, %v899_v22  ;;  %v891_v29 = vadd.f32 %v890_v26, %v602_v55 }
 0x14d   :  { %v660_v30 = vpop.f32.mrf.mxu0  ;;  %v1293_v33 = vpop.f32.mrf.mxu1 }
 0x14e   :  { %1133 = vst.msk [vmem:[%s2555_s3 + $0x20] sm:$0xff] %vm454_vm0, %v891_v29  ;;  %v902_v34 = vadd.f32 %v1293_v33, %v613_v11  ;;  %v661_v18 = vadd.f32 %v2177_v49, %v660_v30 }
 0x14f   :  { %v662_v37 = vpop.f32.mrf.mxu0  ;;  %v893_v38 = vpop.f32.mrf.mxu1 }
 0x150   :  { %1136 = vst.msk [vmem:[%s2555_s3 + $0x38] sm:$0xff] %vm454_vm0, %v902_v34  ;;  %v894_v41 = vadd.f32 %v893_v38, %v605_v3 }
 0x151   :  { %v665_v42 = vpop.f32.mrf.mxu0  ;;  %v1296_v45 = vpop.f32.mrf.mxu1 }
 0x152   :  { %1134 = vst.msk [vmem:[%s2555_s3 + $0x28] sm:$0xff] %vm454_vm0, %v894_v41  ;;  %v915_v46 = vadd.f32 %v1296_v45, %v626_v15  ;;  %v666_v9 = vadd.f32 %v2177_v49, %v665_v42 }
 0x153   :  { %v667_v50 = vpop.f32.mrf.mxu0  ;;  %v906_v53 = vpop.f32.mrf.mxu1 }
 0x154   :  { %1139 = vst.msk [vmem:[%s2555_s3 + $0x50] sm:$0xff] %vm454_vm0, %v915_v46  ;;  %v907_v54 = vadd.f32 %v906_v53, %v618_v7 }
 0x155   :  { %v668_v58 = vpop.f32.mrf.mxu0  ;;  %v1297_v61 = vpop.f32.mrf.mxu1 }
 0x156   :  { %1137 = vst.msk [vmem:[%s2555_s3 + $0x40] sm:$0xff] %vm454_vm0, %v907_v54  ;;  %v918_v62 = vadd.f32 %v1297_v61, %v629_v27  ;;  %v669_v42 = vadd.f32 %v2177_v49, %v668_v58 }
 0x157   :  { %v670_v1 = vpop.f32.mrf.mxu0  ;;  %v909_v2 = vpop.f32.mrf.mxu1 }
 0x158   :  { %1140 = vst.msk [vmem:[%s2555_s3 + $0x58] sm:$0xff] %vm454_vm0, %v918_v62  ;;  %v910_v5 = vadd.f32 %v909_v2, %v621_v19 }
 0x159   :  { %v673_v6 = vpop.f32.mrf.mxu0  ;;  %v1300_v59 = vpop.f32.mrf.mxu1 }
 0x15a   :  { %1138 = vst.msk [vmem:[%s2555_s3 + $0x48] sm:$0xff] %vm454_vm0, %v910_v5  ;;  %v931_v10 = vadd.f32 %v1300_v59, %v642_v31  ;;  %v674_v30 = vadd.f32 %v2177_v49, %v673_v6 }
 0x15b   :  { %v675_v51 = vpop.f32.mrf.mxu0  ;;  %v922_v13 = vpop.f32.mrf.mxu1 }
 0x15c   :  { %1143 = vst.msk [vmem:[%s2555_s3 + $0x70] sm:$0xff] %vm454_vm0, %v931_v10  ;;  %v923_v63 = vadd.f32 %v922_v13, %v634_v23 }
 0x15d   :  { %v676_v14 = vpop.f32.mrf.mxu0  ;;  %v1301_v17 = vpop.f32.mrf.mxu1 }
 0x15e   :  { %1141 = vst.msk [vmem:[%s2555_s3 + $0x60] sm:$0xff] %vm454_vm0, %v923_v63  ;;  %v934_v21 = vadd.f32 %v1301_v17, %v645_v43  ;;  %v677_v61 = vadd.f32 %v2177_v49, %v676_v14 }
 0x15f   :  { %v678_v55 = vpop.f32.mrf.mxu0  ;;  %v925_v22 = vpop.f32.mrf.mxu1 }
 0x160   :  { %1144 = vst.msk [vmem:[%s2555_s3 + $0x78] sm:$0xff] %vm454_vm0, %v934_v21  ;;  %v926_v25 = vadd.f32 %v925_v22, %v637_v35 }
 0x161   :  { %v681_v26 = vpop.f32.mrf.mxu0  ;;  %v1304_v11 = vpop.f32.mrf.mxu1 }
 0x162   :  { %1142 = vst.msk [vmem:[%s2555_s3 + $0x68] sm:$0xff] %vm454_vm0, %v926_v25  ;;  %v947_v29 = vadd.f32 %v1304_v11, %v658_v47  ;;  %v682_v58 = vadd.f32 %v2177_v49, %v681_v26 }
 0x163   :  { %v683_v33 = vpop.f32.mrf.mxu0  ;;  %v938_v3 = vpop.f32.mrf.mxu1 }
 0x164   :  { %1147 = vst.msk [vmem:[%s2555_s3 + $0x90] sm:$0xff] %vm454_vm0, %v947_v29  ;;  %v939_v34 = vadd.f32 %v938_v3, %v650_v39 }
 0x165   :  { %v684_v37 = vpop.f32.mrf.mxu0  ;;  %v1305_v38 = vpop.f32.mrf.mxu1 }
 0x166   :  { %1145 = vst.msk [vmem:[%s2555_s3 + $0x80] sm:$0xff] %vm454_vm0, %v939_v34  ;;  %v950_v15 = vadd.f32 %v1305_v38, %v661_v18  ;;  %v685_v21 = vadd.f32 %v2177_v49, %v684_v37 }
 0x167   :  { %v686_v41 = vpop.f32.mrf.mxu0  ;;  %v941_v45 = vpop.f32.mrf.mxu1 }
 0x168   :  { %1148 = vst.msk [vmem:[%s2555_s3 + $0x98] sm:$0xff] %vm454_vm0, %v950_v15  ;;  %v942_v7 = vadd.f32 %v941_v45, %v653_v57 }
 0x169   :  { %v689_v46 = vpop.f32.mrf.mxu0  ;;  %v1308_v50 = vpop.f32.mrf.mxu1 }
 0x16a   :  { %1146 = vst.msk [vmem:[%s2555_s3 + $0x88] sm:$0xff] %vm454_vm0, %v942_v7  ;;  %v963_v53 = vadd.f32 %v1308_v50, %v674_v30  ;;  %v690_v6 = vadd.f32 %v2177_v49, %v689_v46 }
 0x16b   :  { %v691_v27 = vpop.f32.mrf.mxu0  ;;  %v954_v54 = vpop.f32.mrf.mxu1 }
 0x16c   :  { %1151 = vst.msk [vmem:[%s2555_s3 + $0xb0] sm:$0xff] %vm454_vm0, %v963_v53  ;;  %v955_v19 = vadd.f32 %v954_v54, %v666_v9 }
 0x16d   :  { %v692_v62 = vpop.f32.mrf.mxu0  ;;  %v1309_v1 = vpop.f32.mrf.mxu1 }
 0x16e   :  { %1149 = vst.msk [vmem:[%s2555_s3 + $0xa0] sm:$0xff] %vm454_vm0, %v955_v19  ;;  %v966_v2 = vadd.f32 %v1309_v1, %v677_v61  ;;  %v693_v63 = vadd.f32 %v2177_v49, %v692_v62 }
 0x16f   :  { %v694_v31 = vpop.f32.mrf.mxu0  ;;  %v957_v5 = vpop.f32.mrf.mxu1 }
 0x170   :  { %1152 = vst.msk [vmem:[%s2555_s3 + $0xb8] sm:$0xff] %vm454_vm0, %v966_v2  ;;  %v958_v59 = vadd.f32 %v957_v5, %v669_v42 }
 0x171   :  { %v697_v23 = vpop.f32.mrf.mxu0  ;;  %v1312_v10 = vpop.f32.mrf.mxu1 }
 0x172   :  { %1150 = vst.msk [vmem:[%s2555_s3 + $0xa8] sm:$0xff] %vm454_vm0, %v958_v59  ;;  %v979_v51 = vadd.f32 %v1312_v10, %v690_v6  ;;  %v698_v39 = vadd.f32 %v2177_v49, %v697_v23 }
 0x173   :  { %v699_v13 = vpop.f32.mrf.mxu0  ;;  %v970_v43 = vpop.f32.mrf.mxu1 }
 0x174   :  { %1155 = vst.msk [vmem:[%s2555_s3 + $0xd0] sm:$0xff] %vm454_vm0, %v979_v51  ;;  %v971_v14 = vadd.f32 %v970_v43, %v682_v58 }
 0x175   :  { %v700_v17 = vpop.f32.mrf.mxu0  ;;  %v1313_v35 = vpop.f32.mrf.mxu1 }
 0x176   :  { %1153 = vst.msk [vmem:[%s2555_s3 + $0xc0] sm:$0xff] %vm454_vm0, %v971_v14  ;;  %v982_v55 = vadd.f32 %v1313_v35, %v693_v63  ;;  %v701_v57 = vadd.f32 %v2177_v49, %v700_v17 }
 0x177   :  { %v702_v22 = vpop.f32.mrf.mxu0  ;;  %v973_v47 = vpop.f32.mrf.mxu1 }
 0x178   :  { %1156 = vst.msk [vmem:[%s2555_s3 + $0xd8] sm:$0xff] %vm454_vm0, %v982_v55  ;;  %v974_v25 = vadd.f32 %v973_v47, %v685_v21 }
 0x179   :  { %v705_v26 = vpop.f32.mrf.mxu0  ;;  %v1316_v11 = vpop.f32.mrf.mxu1 }
 0x17a   :  { %1154 = vst.msk [vmem:[%s2555_s3 + $0xc8] sm:$0xff] %vm454_vm0, %v974_v25  ;;  %v706_v29 = vadd.f32 %v2177_v49, %v705_v26 }
 0x17b   :  { %v707_v33 = vpop.f32.mrf.mxu0  ;;  %v986_v3 = vpop.f32.mrf.mxu1 }
 0x17c   :  { %v995_v18 = vadd.f32 %v1316_v11, %v706_v29  ;;  %v987_v34 = vadd.f32 %v986_v3, %v698_v39 }
 0x17d   :  { %v708_v37 = vpop.f32.mrf.mxu0  ;;  %v1317_v38 = vpop.f32.mrf.mxu1 }
 0x17e   :  { %1159 = vst.msk [vmem:[%s2555_s3 + $0xf0] sm:$0xff] %vm454_vm0, %v995_v18  ;;  %1157 = vst.msk [vmem:[%s2555_s3 + $0xe0] sm:$0xff] %vm454_vm0, %v987_v34  ;;  %v709_v15 = vadd.f32 %v2177_v49, %v708_v37 }
 0x17f   :  { %v710_v41 = vpop.f32.mrf.mxu0  ;;  %v989_v45 = vpop.f32.mrf.mxu1 }
 0x180   :  { %v998_v30 = vadd.f32 %v1317_v38, %v709_v15  ;;  %v990_v7 = vadd.f32 %v989_v45, %v701_v57 }
 0x181   :  { %v713_v46 = vpop.f32.mrf.mxu0  ;;  %v1320_v50 = vpop.f32.mrf.mxu1 }
 0x182   :  { %1160 = vst.msk [vmem:[%s2555_s3 + $0xf8] sm:$0xff] %vm454_vm0, %v998_v30  ;;  %1158 = vst.msk [vmem:[%s2555_s3 + $0xe8] sm:$0xff] %vm454_vm0, %v990_v7  ;;  %v714_v9 = vadd.f32 %v2177_v49, %v713_v46  ;;  %v786_v46 = vadd.f32 %v2177_v49, %v2124_v60 }
 0x183   :  { %v715_v53 = vpop.f32.mrf.mxu0  ;;  %v1002_v27 = vpop.f32.mrf.mxu1 }
 0x184   :  { %v1003_v54 = vadd.f32 %v1002_v27, %v714_v9  ;;  %v778_v27 = vadd.f32 %v2177_v49, %v2118_v52 }
 0x185   :  { %v716_v61 = vpop.f32.mrf.mxu0  ;;  %v1321_v19 = vpop.f32.mrf.mxu1 }
 0x186   :  { %1161 = vst.msk [vmem:[%s2555_s3 + $0x100] sm:$0xff] %vm454_vm0, %v1003_v54  ;;  %v717_v62 = vadd.f32 %v2177_v49, %v716_v61 }
 0x187   :  { %v718_v1 = vpop.f32.mrf.mxu0  ;;  %v1005_v42 = vpop.f32.mrf.mxu1 }
 0x188   :  { %v1006_v2 = vadd.f32 %v1005_v42, %v717_v62  ;;  %v789_v1 = vadd.f32 %v2177_v49, %v2126_v0 }
 0x189   :  { %v721_v31 = vpop.f32.mrf.mxu0  ;;  %v1324_v5 = vpop.f32.mrf.mxu1 }
 0x18a   :  { %1162 = vst.msk [vmem:[%s2555_s3 + $0x108] sm:$0xff] %vm454_vm0, %v1006_v2  ;;  %v722_v6 = vadd.f32 %v2177_v49, %v721_v31  ;;  %v781_v31 = vadd.f32 %v2177_v49, %v2122_v56 }
 0x18b   :  { %v723_v59 = vpop.f32.mrf.mxu0  ;;  %v1018_v23 = vpop.f32.mrf.mxu1 }
 0x18c   :  { %v1011_v10 = vadd.f32 %v1320_v50, %v722_v6 }
 0x18d   :  { %v724_v58 = vpop.f32.mrf.mxu0  ;;  %v1325_v51 = vpop.f32.mrf.mxu1 }
 0x18e   :  { %1163 = vst.msk [vmem:[%s2555_s3 + $0x110] sm:$0xff] %vm454_vm0, %v1011_v10  ;;  %v725_v13 = vadd.f32 %v2177_v49, %v724_v58 }
 0x18f   :  { %v726_v43 = vpop.f32.mrf.mxu0  ;;  %v1021_v63 = vpop.f32.mrf.mxu1 }
 0x190   :  { %v1014_v14 = vadd.f32 %v1321_v19, %v725_v13  ;;  %v794_v13 = vadd.f32 %v2177_v49, %v2130_v4 }
 0x191   :  { %v729_v17 = vpop.f32.mrf.mxu0  ;;  %v2374_v35 = vpop.f32.mrf.mxu1 }
 0x192   :  { %1164 = vst.msk [vmem:[%s2555_s3 + $0x118] sm:$0xff] %vm454_vm0, %v1014_v14  ;;  %v730_v21 = vadd.f32 %v2177_v49, %v729_v17  ;;  %v805_v17 = vadd.f32 %v2177_v49, %v2140_v16 }
 0x193   :  { %v731_v55 = vpop.f32.mrf.mxu0  ;;  %v1034_v22 = vpop.f32.mrf.mxu1 }
 0x194   :  { %v1019_v47 = vadd.f32 %v1018_v23, %v730_v21  ;;  %v802_v23 = vadd.f32 %v2177_v49, %v2136_v12 }
 0x195   :  { %v732_v25 = vpop.f32.mrf.mxu0  ;;  %v2381_v26 = vpop.f32.mrf.mxu1 }
 0x196   :  { %1165 = vst.msk [vmem:[%s2555_s3 + $0x120] sm:$0xff] %vm454_vm0, %v1019_v47  ;;  %v733_v11 = vadd.f32 %v2177_v49, %v732_v25  ;;  %v797_v47 = vadd.f32 %v2177_v49, %v2134_v8 }
 0x197   :  { %v734_v39 = vpop.f32.mrf.mxu0  ;;  %v1037_v29 = vpop.f32.mrf.mxu1 }
 0x198   :  { %v1022_v33 = vadd.f32 %v1021_v63, %v733_v11  ;;  %v818_v39 = vadd.f32 %v2177_v49, %v2152_v28 }
 0x199   :  { %v737_v3 = vpop.f32.mrf.mxu0  ;;  %v2388_v18 = vpop.f32.mrf.mxu1 }
 0x19a   :  { %1166 = vst.msk [vmem:[%s2555_s3 + $0x128] sm:$0xff] %vm454_vm0, %v1022_v33  ;;  %v738_v34 = vadd.f32 %v2177_v49, %v737_v3 }
 0x19b   :  { %v739_v37 = vpop.f32.mrf.mxu0  ;;  %v2395_v38 = vpop.f32.mrf.mxu1 }
 0x19c   :  { %v1027_v57 = vadd.f32 %v1324_v5, %v738_v34  ;;  %v810_v34 = vadd.f32 %v2177_v49, %v2144_v20 }
 0x19d   :  { %v740_v15 = vpop.f32.mrf.mxu0  ;;  %v2397_v41 = vpop.f32.mrf.mxu1 }
 0x19e   :  { %1167 = vst.msk [vmem:[%s2555_s3 + $0x130] sm:$0xff] %vm454_vm0, %v1027_v57  ;;  %v741_v45 = vadd.f32 %v2177_v49, %v740_v15  ;;  %v821_v15 = vadd.f32 %v2177_v49, %v2156_v32 }
 0x19f   :  { %v742_v30 = vpop.f32.mrf.mxu0  ;;  %v2404_v7 = vpop.f32.mrf.mxu1 }
 0x1a0   :  { %v1030_v50 = vadd.f32 %v1325_v51, %v741_v45 }
 0x1a1   :  { %v745_v9 = vpop.f32.mrf.mxu0  ;;  %v1336_v53 = vpop.f32.mrf.mxu1 }
 0x1a2   :  { %1168 = vst.msk [vmem:[%s2555_s3 + $0x138] sm:$0xff] %vm454_vm0, %v1030_v50  ;;  %v746_v54 = vadd.f32 %v2177_v49, %v745_v9  ;;  %v1075_v61 = vadd.f32 %v1336_v53, %v786_v46  ;;  %v813_v50 = vadd.f32 %v2177_v49, %v2148_v24 }
 0x1a3   :  { %v747_v19 = vpop.f32.mrf.mxu0  ;;  %v1066_v62 = vpop.f32.mrf.mxu1 }
 0x1a4   :  { %v1035_v60 = vadd.f32 %v1034_v22, %v746_v54  ;;  %1179 = vst.msk [vmem:[%s2555_s3 + $0x190] sm:$0xff] %vm454_vm0, %v1075_v61  ;;  %v1067_v52 = vadd.f32 %v1066_v62, %v778_v27  ;;  %v834_v27 = vadd.f32 %v2177_v49, %v2168_v44  ;;  %v826_v62 = vadd.f32 %v2177_v49, %v2160_v36 }
 0x1a5   :  { %v748_v42 = vpop.f32.mrf.mxu0  ;;  %v1337_v2 = vpop.f32.mrf.mxu1 }
 0x1a6   :  { %1169 = vst.msk [vmem:[%s2555_s3 + $0x140] sm:$0xff] %vm454_vm0, %v1035_v60  ;;  %1177 = vst.msk [vmem:[%s2555_s3 + $0x180] sm:$0xff] %vm454_vm0, %v1067_v52  ;;  %v749_v0 = vadd.f32 %v2177_v49, %v748_v42  ;;  %v1078_v5 = vadd.f32 %v1337_v2, %v789_v1  ;;  %v837_v52 = vadd.f32 %v2177_v49, %v2172_v48 }
 0x1a7   :  { %v750_v6 = vpop.f32.mrf.mxu0  ;;  %v1069_v59 = vpop.f32.mrf.mxu1 }
 0x1a8   :  { %v1038_v10 = vadd.f32 %v1037_v29, %v749_v0  ;;  %1180 = vst.msk [vmem:[%s2555_s3 + $0x198] sm:$0xff] %vm454_vm0, %v1078_v5  ;;  %v1070_v56 = vadd.f32 %v1069_v59, %v781_v31  ;;  %v829_v0 = vadd.f32 %v2177_v49, %v2164_v40 }
 0x1a9   :  { %v753_v58 = vpop.f32.mrf.mxu0  ;;  %v1340_v51 = vpop.f32.mrf.mxu1 }
 0x1aa   :  { %1170 = vst.msk [vmem:[%s2555_s3 + $0x148] sm:$0xff] %vm454_vm0, %v1038_v10  ;;  %1178 = vst.msk [vmem:[%s2555_s3 + $0x188] sm:$0xff] %vm454_vm0, %v1070_v56  ;;  %v754_v12 = vadd.f32 %v2177_v49, %v753_v58  ;;  %v1091_v43 = vadd.f32 %v1340_v51, %v802_v23 }
 0x1ab   :  { %v755_v63 = vpop.f32.mrf.mxu0  ;;  %v1082_v14 = vpop.f32.mrf.mxu1 }
 0x1ac   :  { %v1043_v4 = vadd.f32 %v2374_v35, %v754_v12  ;;  %1183 = vst.msk [vmem:[%s2555_s3 + $0x1b0] sm:$0xff] %vm454_vm0, %v1091_v43  ;;  %v1083_v21 = vadd.f32 %v1082_v14, %v794_v13 }
 0x1ad   :  { %v756_v55 = vpop.f32.mrf.mxu0  ;;  %v1341_v22 = vpop.f32.mrf.mxu1 }
 0x1ae   :  { %1171 = vst.msk [vmem:[%s2555_s3 + $0x150] sm:$0xff] %vm454_vm0, %v1043_v4  ;;  %1181 = vst.msk [vmem:[%s2555_s3 + $0x1a0] sm:$0xff] %vm454_vm0, %v1083_v21  ;;  %v757_v16 = vadd.f32 %v2177_v49, %v756_v55  ;;  %v1094_v35 = vadd.f32 %v1341_v22, %v805_v17 }
 0x1af   :  { %v758_v25 = vpop.f32.mrf.mxu0  ;;  %v1085_v11 = vpop.f32.mrf.mxu1 }
 0x1b0   :  { %v1046_v8 = vadd.f32 %v2381_v26, %v757_v16  ;;  %1184 = vst.msk [vmem:[%s2555_s3 + $0x1b8] sm:$0xff] %vm454_vm0, %v1094_v35  ;;  %v1086_v29 = vadd.f32 %v1085_v11, %v797_v47 }
 0x1b1   :  { %v761_v33 = vpop.f32.mrf.mxu0  ;;  %v1344_v3 = vpop.f32.mrf.mxu1 }
 0x1b2   :  { %1172 = vst.msk [vmem:[%s2555_s3 + $0x158] sm:$0xff] %vm454_vm0, %v1046_v8  ;;  %1182 = vst.msk [vmem:[%s2555_s3 + $0x1a8] sm:$0xff] %vm454_vm0, %v1086_v29  ;;  %v762_v28 = vadd.f32 %v2177_v49, %v761_v33  ;;  %v1107_v26 = vadd.f32 %v1344_v3, %v818_v39 }
 0x1b3   :  { %v763_v37 = vpop.f32.mrf.mxu0  ;;  %v1098_v57 = vpop.f32.mrf.mxu1 }
 0x1b4   :  { %v1051_v20 = vadd.f32 %v2395_v38, %v762_v28  ;;  %1187 = vst.msk [vmem:[%s2555_s3 + $0x1d0] sm:$0xff] %vm454_vm0, %v1107_v26  ;;  %v1099_v45 = vadd.f32 %v1098_v57, %v810_v34 }
 0x1b5   :  { %v764_v30 = vpop.f32.mrf.mxu0  ;;  %v1345_v46 = vpop.f32.mrf.mxu1 }
 0x1b6   :  { %1173 = vst.msk [vmem:[%s2555_s3 + $0x160] sm:$0xff] %vm454_vm0, %v1051_v20  ;;  %1185 = vst.msk [vmem:[%s2555_s3 + $0x1c0] sm:$0xff] %vm454_vm0, %v1099_v45  ;;  %v765_v32 = vadd.f32 %v2177_v49, %v764_v30  ;;  %v1110_v38 = vadd.f32 %v1345_v46, %v821_v15 }
 0x1b7   :  { %v766_v9 = vpop.f32.mrf.mxu0  ;;  %v1101_v53 = vpop.f32.mrf.mxu1 }
 0x1b8   :  { %v1054_v24 = vadd.f32 %v2404_v7, %v765_v32  ;;  %1188 = vst.msk [vmem:[%s2555_s3 + $0x1d8] sm:$0xff] %vm454_vm0, %v1110_v38  ;;  %v1102_v54 = vadd.f32 %v1101_v53, %v813_v50 }
 0x1b9   :  { %v769_v61 = vpop.f32.mrf.mxu0  ;;  %v1348_v19 = vpop.f32.mrf.mxu1 }
 0x1ba   :  { %1174 = vst.msk [vmem:[%s2555_s3 + $0x168] sm:$0xff] %vm454_vm0, %v1054_v24  ;;  %1186 = vst.msk [vmem:[%s2555_s3 + $0x1c8] sm:$0xff] %vm454_vm0, %v1102_v54  ;;  %v770_v44 = vadd.f32 %v2177_v49, %v769_v61  ;;  %v1123_v7 = vadd.f32 %v1348_v19, %v834_v27 }
 0x1bb   :  { %v771_v1 = vpop.f32.mrf.mxu0  ;;  %v1114_v60 = vpop.f32.mrf.mxu1 }
 0x1bc   :  { %v1059_v36 = vadd.f32 %v2388_v18, %v770_v44  ;;  %1191 = vst.msk [vmem:[%s2555_s3 + $0x1f0] sm:$0xff] %vm454_vm0, %v1123_v7  ;;  %v1115_v42 = vadd.f32 %v1114_v60, %v826_v62 }
 0x1bd   :  { %v772_v2 = vpop.f32.mrf.mxu0  ;;  %v1349_v31 = vpop.f32.mrf.mxu1 }
 0x1be   :  { %1175 = vst.msk [vmem:[%s2555_s3 + $0x170] sm:$0xff] %vm454_vm0, %v1059_v36  ;;  %1189 = vst.msk [vmem:[%s2555_s3 + $0x1e0] sm:$0xff] %vm454_vm0, %v1115_v42  ;;  %v773_v48 = vadd.f32 %v2177_v49, %v772_v2  ;;  %v1126_v18 = vadd.f32 %v1349_v31, %v837_v52 }
 0x1bf   :  { %v774_v5 = vpop.f32.mrf.mxu0  ;;  %v1117_v6 = vpop.f32.mrf.mxu1 }
 0x1c0   :  { %v1062_v59 = vadd.f32 %v2397_v41, %v773_v48  ;;  %1192 = vst.msk [vmem:[%s2555_s3 + $0x1f8] sm:$0xff] %vm454_vm0, %v1126_v18  ;;  %v1118_v40 = vadd.f32 %v1117_v6, %v829_v0 }
 0x1c2   :  { %1176 = vst.msk [vmem:[%s2555_s3 + $0x178] sm:$0xff] %vm454_vm0, %v1062_v59  ;;  %1190 = vst.msk [vmem:[%s2555_s3 + $0x1e8] sm:$0xff] %vm454_vm0, %v1118_v40 }

// kernel: unet_mid_block_forward.20
= control target key start
LH: loop header
LB: loop body
LE: loop exit
PB: predicated region body
PF: predicated region fallthrough
CT: control target
= control target key end

     0   :  { %vm134_vm0 = vcmask 261120   ;;  %s1306_s1 = inlined_call_operand.vmem [shape: bf16[32,32], index: 1, kind: input, shape index: {}]   ;;  %s1307_s0 = inlined_call_operand.vmem [shape: f32[512,32], index: 0, kind: input, shape index: {}]   ;;  %s1308_s2 = inlined_call_operand.vmem [shape: f32[1,32], index: 2, kind: input, shape index: {}]   ;;  %s1309_s3 = inlined_call_operand.vmem [shape: f32[512,32], index: 3, kind: output, shape index: {}]  }
   0x1   :  { %v729_v0 = vld [vmem:[%s1306_s1 + $0x8] sm:$0xff]   ;;  %v730_v1 = vld [vmem:[%s1306_s1] sm:$0xff]   ;;  %v17_v7 = vld [vmem:[%s1307_s0 + $0x10] sm:$0xff] }
   0x2   :  { %657 = vmatprep.subr.bf16.mxu0 %v729_v0  ;;  %725 = vmatprep.subr.bf16.mxu1 %v729_v0  ;;  %v15_v2 = vld [vmem:[%s1307_s0] sm:$0xff]  ;;  %v16_v3 = vld [vmem:[%s1307_s0 + $0x8] sm:$0xff]  ;;  %v18_v8 = vld [vmem:[%s1307_s0 + $0x18] sm:$0xff] }
   0x3   :  { %v47_v4 = vld [vmem:[%s1307_s0 + $0x100] sm:$0xff]  ;;  %658 = vmatpush3.bf16.msra.mxu0 %v729_v0  ;;  %727 = vmatpush3.bf16.msra.mxu1 %v729_v0  ;;  %v79_v5 = vpack.c.bf16 %v16_v3, %v15_v2  ;;  %v48_v6 = vld [vmem:[%s1307_s0 + $0x108] sm:$0xff]  ;;  %v49_v10 = vld [vmem:[%s1307_s0 + $0x110] sm:$0xff]  ;;  %v80_v16 = vpack.c.bf16 %v18_v8, %v17_v7 }
   0x4   :  { %659 = vmatprep.subr.bf16.mxu0 %v730_v1  ;;  %726 = vmatprep.subr.bf16.mxu1 %v730_v1  ;;  %v95_v9 = vpack.c.bf16 %v48_v6, %v47_v4  ;;  %v50_v11 = vld [vmem:[%s1307_s0 + $0x118] sm:$0xff]  ;;  %v19_v12 = vld [vmem:[%s1307_s0 + $0x20] sm:$0xff]  ;;  %v20_v13 = vld [vmem:[%s1307_s0 + $0x28] sm:$0xff] }
   0x5   :  { %661 = vmatprep.mubr.msk.bf16.mxu0 %vm134_vm0, %v79_v5  ;;  %v51_v14 = vld [vmem:[%s1307_s0 + $0x120] sm:$0xff]  ;;  %v52_v15 = vld [vmem:[%s1307_s0 + $0x128] sm:$0xff]  ;;  %v96_v17 = vpack.c.bf16 %v50_v11, %v49_v10  ;;  %v81_v18 = vpack.c.bf16 %v20_v13, %v19_v12  ;;  %v21_v20 = vld [vmem:[%s1307_s0 + $0x30] sm:$0xff] }
   0x6   :  { %693 = vmatprep.mubr.msk.bf16.mxu1 %vm134_vm0, %v95_v9  ;;  %v97_v19 = vpack.c.bf16 %v52_v15, %v51_v14  ;;  %v22_v21 = vld [vmem:[%s1307_s0 + $0x38] sm:$0xff]  ;;  %v53_v22 = vld [vmem:[%s1307_s0 + $0x130] sm:$0xff]  ;;  %v23_v24 = vld [vmem:[%s1307_s0 + $0x40] sm:$0xff] }
   0x7   :  { %660 = vmatpush3.bf16.msra.mxu0 %v730_v1  ;;  %728 = vmatpush3.bf16.msra.mxu1 %v730_v1  ;;  %v54_v23 = vld [vmem:[%s1307_s0 + $0x138] sm:$0xff]  ;;  %v24_v25 = vld [vmem:[%s1307_s0 + $0x48] sm:$0xff]  ;;  %v55_v26 = vld [vmem:[%s1307_s0 + $0x140] sm:$0xff]  ;;  %v82_v28 = vpack.c.bf16 %v22_v21, %v21_v20 }
   0x8   :  { %v56_v27 = vld [vmem:[%s1307_s0 + $0x148] sm:$0xff]  ;;  %v98_v29 = vpack.c.bf16 %v54_v23, %v53_v22  ;;  %v83_v30 = vpack.c.bf16 %v24_v25, %v23_v24  ;;  %v25_v32 = vld [vmem:[%s1307_s0 + $0x50] sm:$0xff]  ;;  %v26_v33 = vld [vmem:[%s1307_s0 + $0x58] sm:$0xff] }
   0x9   :  { %v99_v31 = vpack.c.bf16 %v56_v27, %v55_v26  ;;  %v57_v34 = vld [vmem:[%s1307_s0 + $0x150] sm:$0xff]  ;;  %v58_v35 = vld [vmem:[%s1307_s0 + $0x158] sm:$0xff]  ;;  %v27_v36 = vld [vmem:[%s1307_s0 + $0x60] sm:$0xff]  ;;  %v84_v40 = vpack.c.bf16 %v26_v33, %v25_v32 }
   0xa   :  { %662 = vmatmul.mubr.msk.bf16.vlgmr.msra.gmra.mxu0 %vm134_vm0, %v80_v16  ;;  %694 = vmatmul.mubr.msk.bf16.vlgmr.msra.gmra.mxu1 %vm134_vm0, %v96_v17  ;;  %v28_v37 = vld [vmem:[%s1307_s0 + $0x68] sm:$0xff]  ;;  %v59_v38 = vld [vmem:[%s1307_s0 + $0x160] sm:$0xff]  ;;  %v100_v41 = vpack.c.bf16 %v58_v35, %v57_v34  ;;  %v29_v44 = vld [vmem:[%s1307_s0 + $0x70] sm:$0xff] }
   0xb   :  { %665 = vmatprep.mubr.msk.bf16.mxu0 %vm134_vm0, %v81_v18  ;;  %697 = vmatprep.mubr.msk.bf16.mxu1 %vm134_vm0, %v97_v19  ;;  %v60_v39 = vld [vmem:[%s1307_s0 + $0x168] sm:$0xff]  ;;  %v85_v42 = vpack.c.bf16 %v28_v37, %v27_v36  ;;  %v30_v45 = vld [vmem:[%s1307_s0 + $0x78] sm:$0xff]  ;;  %v61_v46 = vld [vmem:[%s1307_s0 + $0x170] sm:$0xff] }
   0xc   :  { %v101_v43 = vpack.c.bf16 %v60_v39, %v59_v38  ;;  %v62_v47 = vld [vmem:[%s1307_s0 + $0x178] sm:$0xff]  ;;  %v31_v48 = vld [vmem:[%s1307_s0 + $0x80] sm:$0xff]  ;;  %v32_v49 = vld [vmem:[%s1307_s0 + $0x88] sm:$0xff]  ;;  %v86_v52 = vpack.c.bf16 %v30_v45, %v29_v44 }
   0xd   :  { %v63_v50 = vld [vmem:[%s1307_s0 + $0x180] sm:$0xff]  ;;  %v64_v51 = vld [vmem:[%s1307_s0 + $0x188] sm:$0xff]  ;;  %v102_v53 = vpack.c.bf16 %v62_v47, %v61_v46  ;;  %v87_v54 = vpack.c.bf16 %v32_v49, %v31_v48  ;;  %v33_v56 = vld [vmem:[%s1307_s0 + $0x90] sm:$0xff] }
   0xe   :  { %v103_v55 = vpack.c.bf16 %v64_v51, %v63_v50  ;;  %v34_v57 = vld [vmem:[%s1307_s0 + $0x98] sm:$0xff]  ;;  %v65_v58 = vld [vmem:[%s1307_s0 + $0x190] sm:$0xff]  ;;  %v35_v60 = vld [vmem:[%s1307_s0 + $0xa0] sm:$0xff] }
   0xf   :  { %v66_v59 = vld [vmem:[%s1307_s0 + $0x198] sm:$0xff]  ;;  %v36_v61 = vld [vmem:[%s1307_s0 + $0xa8] sm:$0xff]  ;;  %v67_v62 = vld [vmem:[%s1307_s0 + $0x1a0] sm:$0xff]  ;;  %v88_v0 = vpack.c.bf16 %v34_v57, %v33_v56 }
  0x10   :  { %v68_v63 = vld [vmem:[%s1307_s0 + $0x1a8] sm:$0xff]  ;;  %v104_v1 = vpack.c.bf16 %v66_v59, %v65_v58  ;;  %v89_v2 = vpack.c.bf16 %v36_v61, %v35_v60  ;;  %v37_v4 = vld [vmem:[%s1307_s0 + $0xb0] sm:$0xff]  ;;  %v38_v5 = vld [vmem:[%s1307_s0 + $0xb8] sm:$0xff] }
  0x11   :  { %v105_v3 = vpack.c.bf16 %v68_v63, %v67_v62  ;;  %v69_v6 = vld [vmem:[%s1307_s0 + $0x1b0] sm:$0xff]  ;;  %v70_v7 = vld [vmem:[%s1307_s0 + $0x1b8] sm:$0xff]  ;;  %v39_v8 = vld [vmem:[%s1307_s0 + $0xc0] sm:$0xff]  ;;  %v90_v12 = vpack.c.bf16 %v38_v5, %v37_v4 }
  0x12   :  { %666 = vmatmul.mubr.msk.bf16.gmra.mxu0 %vm134_vm0, %v82_v28  ;;  %698 = vmatmul.mubr.msk.bf16.gmra.mxu1 %vm134_vm0, %v98_v29  ;;  %v40_v9 = vld [vmem:[%s1307_s0 + $0xc8] sm:$0xff]  ;;  %v71_v10 = vld [vmem:[%s1307_s0 + $0x1c0] sm:$0xff]  ;;  %v106_v13 = vpack.c.bf16 %v70_v7, %v69_v6  ;;  %v41_v16 = vld [vmem:[%s1307_s0 + $0xd0] sm:$0xff] }
  0x13   :  { %669 = vmatprep.mubr.msk.bf16.mxu0 %vm134_vm0, %v83_v30  ;;  %701 = vmatprep.mubr.msk.bf16.mxu1 %vm134_vm0, %v99_v31  ;;  %v72_v11 = vld [vmem:[%s1307_s0 + $0x1c8] sm:$0xff]  ;;  %v91_v14 = vpack.c.bf16 %v40_v9, %v39_v8  ;;  %v42_v17 = vld [vmem:[%s1307_s0 + $0xd8] sm:$0xff]  ;;  %v73_v18 = vld [vmem:[%s1307_s0 + $0x1d0] sm:$0xff] }
  0x14   :  { %v107_v15 = vpack.c.bf16 %v72_v11, %v71_v10  ;;  %v74_v19 = vld [vmem:[%s1307_s0 + $0x1d8] sm:$0xff]  ;;  %v43_v20 = vld [vmem:[%s1307_s0 + $0xe0] sm:$0xff]  ;;  %v44_v21 = vld [vmem:[%s1307_s0 + $0xe8] sm:$0xff]  ;;  %v92_v24 = vpack.c.bf16 %v42_v17, %v41_v16 }
  0x15   :  { %v75_v22 = vld [vmem:[%s1307_s0 + $0x1e0] sm:$0xff]  ;;  %v76_v23 = vld [vmem:[%s1307_s0 + $0x1e8] sm:$0xff]  ;;  %v108_v25 = vpack.c.bf16 %v74_v19, %v73_v18  ;;  %v93_v26 = vpack.c.bf16 %v44_v21, %v43_v20  ;;  %v45_v28 = vld [vmem:[%s1307_s0 + $0xf0] sm:$0xff] }
  0x16   :  { %v109_v27 = vpack.c.bf16 %v76_v23, %v75_v22  ;;  %v46_v29 = vld [vmem:[%s1307_s0 + $0xf8] sm:$0xff]  ;;  %v77_v30 = vld [vmem:[%s1307_s0 + $0x1f0] sm:$0xff]  ;;  %v984_v34 = vld [vmem:[%s1308_s2] ss:$0 sm:$0xff] }
  0x17   :  { %v78_v31 = vld [vmem:[%s1307_s0 + $0x1f8] sm:$0xff]  ;;  %v94_v32 = vpack.c.bf16 %v46_v29, %v45_v28 }
  0x18   :  { %v110_v33 = vpack.c.bf16 %v78_v31, %v77_v30 }
  0x1a   :  { %670 = vmatmul.mubr.msk.bf16.gmra.mxu0 %vm134_vm0, %v84_v40  ;;  %702 = vmatmul.mubr.msk.bf16.gmra.mxu1 %vm134_vm0, %v100_v41 }
  0x1b   :  { %673 = vmatprep.mubr.msk.bf16.mxu0 %vm134_vm0, %v85_v42  ;;  %705 = vmatprep.mubr.msk.bf16.mxu1 %vm134_vm0, %v101_v43 }
  0x22   :  { %674 = vmatmul.mubr.msk.bf16.gmra.mxu0 %vm134_vm0, %v86_v52  ;;  %706 = vmatmul.mubr.msk.bf16.gmra.mxu1 %vm134_vm0, %v102_v53 }
  0x23   :  { %677 = vmatprep.mubr.msk.bf16.mxu0 %vm134_vm0, %v87_v54  ;;  %709 = vmatprep.mubr.msk.bf16.mxu1 %vm134_vm0, %v103_v55 }
  0x2a   :  { %678 = vmatmul.mubr.msk.bf16.gmra.mxu0 %vm134_vm0, %v88_v0  ;;  %710 = vmatmul.mubr.msk.bf16.gmra.mxu1 %vm134_vm0, %v104_v1 }
  0x2b   :  { %681 = vmatprep.mubr.msk.bf16.mxu0 %vm134_vm0, %v89_v2  ;;  %713 = vmatprep.mubr.msk.bf16.mxu1 %vm134_vm0, %v105_v3 }
  0x32   :  { %682 = vmatmul.mubr.msk.bf16.gmra.mxu0 %vm134_vm0, %v90_v12  ;;  %714 = vmatmul.mubr.msk.bf16.gmra.mxu1 %vm134_vm0, %v106_v13 }
  0x33   :  { %685 = vmatprep.mubr.msk.bf16.mxu0 %vm134_vm0, %v91_v14  ;;  %717 = vmatprep.mubr.msk.bf16.mxu1 %vm134_vm0, %v107_v15 }
  0x3a   :  { %686 = vmatmul.mubr.msk.bf16.gmra.mxu0 %vm134_vm0, %v92_v24  ;;  %718 = vmatmul.mubr.msk.bf16.gmra.mxu1 %vm134_vm0, %v108_v25 }
  0x3b   :  { %689 = vmatprep.mubr.msk.bf16.mxu0 %vm134_vm0, %v93_v26  ;;  %721 = vmatprep.mubr.msk.bf16.mxu1 %vm134_vm0, %v109_v27 }
  0x42   :  { %690 = vmatmul.mubr.msk.bf16.gmra.mxu0 %vm134_vm0, %v94_v32  ;;  %722 = vmatmul.mubr.msk.bf16.gmra.mxu1 %vm134_vm0, %v110_v33 }
  0xca   :  { %v663_v35 = vpop.f32.mrf.mxu0  ;;  %v695_v36 = vpop.f32.mrf.mxu1 }
  0xcb   :  { %v274_v37 = vadd.f32 %v663_v35, %v984_v34  ;;  %v402_v38 = vadd.f32 %v695_v36, %v984_v34 }
  0xcc   :  { %v265_v39 = vpop.f32.mrf.mxu0  ;;  %v393_v40 = vpop.f32.mrf.mxu1 }
  0xcd   :  { %522 = vst.msk [vmem:[%s1309_s3 + $0x10] sm:$0xff] %vm134_vm0, %v274_v37  ;;  %554 = vst.msk [vmem:[%s1309_s3 + $0x110] sm:$0xff] %vm134_vm0, %v402_v38  ;;  %v266_v41 = vadd.f32 %v984_v34, %v265_v39  ;;  %v394_v42 = vadd.f32 %v984_v34, %v393_v40 }
  0xce   :  { %v664_v43 = vpop.f32.mrf.mxu0  ;;  %v696_v44 = vpop.f32.mrf.mxu1 }
  0xcf   :  { %520 = vst.msk [vmem:[%s1309_s3] sm:$0xff] %vm134_vm0, %v266_v41  ;;  %552 = vst.msk [vmem:[%s1309_s3 + $0x100] sm:$0xff] %vm134_vm0, %v394_v42  ;;  %v277_v45 = vadd.f32 %v664_v43, %v984_v34  ;;  %v405_v46 = vadd.f32 %v696_v44, %v984_v34 }
  0xd0   :  { %v268_v47 = vpop.f32.mrf.mxu0  ;;  %v396_v48 = vpop.f32.mrf.mxu1 }
  0xd1   :  { %523 = vst.msk [vmem:[%s1309_s3 + $0x18] sm:$0xff] %vm134_vm0, %v277_v45  ;;  %555 = vst.msk [vmem:[%s1309_s3 + $0x118] sm:$0xff] %vm134_vm0, %v405_v46  ;;  %v269_v49 = vadd.f32 %v984_v34, %v268_v47  ;;  %v397_v50 = vadd.f32 %v984_v34, %v396_v48 }
  0xd2   :  { %v667_v51 = vpop.f32.mrf.mxu0  ;;  %v699_v52 = vpop.f32.mrf.mxu1 }
  0xd3   :  { %521 = vst.msk [vmem:[%s1309_s3 + $0x8] sm:$0xff] %vm134_vm0, %v269_v49  ;;  %553 = vst.msk [vmem:[%s1309_s3 + $0x108] sm:$0xff] %vm134_vm0, %v397_v50  ;;  %v290_v53 = vadd.f32 %v667_v51, %v984_v34  ;;  %v418_v54 = vadd.f32 %v699_v52, %v984_v34 }
  0xd4   :  { %v281_v55 = vpop.f32.mrf.mxu0  ;;  %v409_v56 = vpop.f32.mrf.mxu1 }
  0xd5   :  { %526 = vst.msk [vmem:[%s1309_s3 + $0x30] sm:$0xff] %vm134_vm0, %v290_v53  ;;  %558 = vst.msk [vmem:[%s1309_s3 + $0x130] sm:$0xff] %vm134_vm0, %v418_v54  ;;  %v282_v57 = vadd.f32 %v984_v34, %v281_v55  ;;  %v410_v58 = vadd.f32 %v984_v34, %v409_v56 }
  0xd6   :  { %v668_v59 = vpop.f32.mrf.mxu0  ;;  %v700_v60 = vpop.f32.mrf.mxu1 }
  0xd7   :  { %524 = vst.msk [vmem:[%s1309_s3 + $0x20] sm:$0xff] %vm134_vm0, %v282_v57  ;;  %556 = vst.msk [vmem:[%s1309_s3 + $0x120] sm:$0xff] %vm134_vm0, %v410_v58  ;;  %v293_v61 = vadd.f32 %v668_v59, %v984_v34  ;;  %v421_v62 = vadd.f32 %v700_v60, %v984_v34 }
  0xd8   :  { %v284_v63 = vpop.f32.mrf.mxu0  ;;  %v412_v0 = vpop.f32.mrf.mxu1 }
  0xd9   :  { %527 = vst.msk [vmem:[%s1309_s3 + $0x38] sm:$0xff] %vm134_vm0, %v293_v61  ;;  %559 = vst.msk [vmem:[%s1309_s3 + $0x138] sm:$0xff] %vm134_vm0, %v421_v62  ;;  %v285_v1 = vadd.f32 %v984_v34, %v284_v63  ;;  %v413_v2 = vadd.f32 %v984_v34, %v412_v0 }
  0xda   :  { %v671_v3 = vpop.f32.mrf.mxu0  ;;  %v703_v4 = vpop.f32.mrf.mxu1 }
  0xdb   :  { %525 = vst.msk [vmem:[%s1309_s3 + $0x28] sm:$0xff] %vm134_vm0, %v285_v1  ;;  %557 = vst.msk [vmem:[%s1309_s3 + $0x128] sm:$0xff] %vm134_vm0, %v413_v2  ;;  %v306_v5 = vadd.f32 %v671_v3, %v984_v34  ;;  %v434_v6 = vadd.f32 %v703_v4, %v984_v34 }
  0xdc   :  { %v297_v7 = vpop.f32.mrf.mxu0  ;;  %v425_v8 = vpop.f32.mrf.mxu1 }
  0xdd   :  { %530 = vst.msk [vmem:[%s1309_s3 + $0x50] sm:$0xff] %vm134_vm0, %v306_v5  ;;  %562 = vst.msk [vmem:[%s1309_s3 + $0x150] sm:$0xff] %vm134_vm0, %v434_v6  ;;  %v298_v9 = vadd.f32 %v984_v34, %v297_v7  ;;  %v426_v10 = vadd.f32 %v984_v34, %v425_v8 }
  0xde   :  { %v672_v11 = vpop.f32.mrf.mxu0  ;;  %v704_v12 = vpop.f32.mrf.mxu1 }
  0xdf   :  { %528 = vst.msk [vmem:[%s1309_s3 + $0x40] sm:$0xff] %vm134_vm0, %v298_v9  ;;  %560 = vst.msk [vmem:[%s1309_s3 + $0x140] sm:$0xff] %vm134_vm0, %v426_v10  ;;  %v309_v13 = vadd.f32 %v672_v11, %v984_v34  ;;  %v437_v14 = vadd.f32 %v704_v12, %v984_v34 }
  0xe0   :  { %v300_v15 = vpop.f32.mrf.mxu0  ;;  %v428_v16 = vpop.f32.mrf.mxu1 }
  0xe1   :  { %531 = vst.msk [vmem:[%s1309_s3 + $0x58] sm:$0xff] %vm134_vm0, %v309_v13  ;;  %563 = vst.msk [vmem:[%s1309_s3 + $0x158] sm:$0xff] %vm134_vm0, %v437_v14  ;;  %v301_v17 = vadd.f32 %v984_v34, %v300_v15  ;;  %v429_v18 = vadd.f32 %v984_v34, %v428_v16 }
  0xe2   :  { %v675_v19 = vpop.f32.mrf.mxu0  ;;  %v707_v20 = vpop.f32.mrf.mxu1 }
  0xe3   :  { %529 = vst.msk [vmem:[%s1309_s3 + $0x48] sm:$0xff] %vm134_vm0, %v301_v17  ;;  %561 = vst.msk [vmem:[%s1309_s3 + $0x148] sm:$0xff] %vm134_vm0, %v429_v18  ;;  %v322_v21 = vadd.f32 %v675_v19, %v984_v34  ;;  %v450_v22 = vadd.f32 %v707_v20, %v984_v34 }
  0xe4   :  { %v313_v23 = vpop.f32.mrf.mxu0  ;;  %v441_v24 = vpop.f32.mrf.mxu1 }
  0xe5   :  { %534 = vst.msk [vmem:[%s1309_s3 + $0x70] sm:$0xff] %vm134_vm0, %v322_v21  ;;  %566 = vst.msk [vmem:[%s1309_s3 + $0x170] sm:$0xff] %vm134_vm0, %v450_v22  ;;  %v314_v25 = vadd.f32 %v984_v34, %v313_v23  ;;  %v442_v26 = vadd.f32 %v984_v34, %v441_v24 }
  0xe6   :  { %v676_v27 = vpop.f32.mrf.mxu0  ;;  %v708_v28 = vpop.f32.mrf.mxu1 }
  0xe7   :  { %532 = vst.msk [vmem:[%s1309_s3 + $0x60] sm:$0xff] %vm134_vm0, %v314_v25  ;;  %564 = vst.msk [vmem:[%s1309_s3 + $0x160] sm:$0xff] %vm134_vm0, %v442_v26  ;;  %v325_v29 = vadd.f32 %v676_v27, %v984_v34  ;;  %v453_v30 = vadd.f32 %v708_v28, %v984_v34 }
  0xe8   :  { %v316_v31 = vpop.f32.mrf.mxu0  ;;  %v444_v32 = vpop.f32.mrf.mxu1 }
  0xe9   :  { %535 = vst.msk [vmem:[%s1309_s3 + $0x78] sm:$0xff] %vm134_vm0, %v325_v29  ;;  %567 = vst.msk [vmem:[%s1309_s3 + $0x178] sm:$0xff] %vm134_vm0, %v453_v30  ;;  %v317_v33 = vadd.f32 %v984_v34, %v316_v31  ;;  %v445_v35 = vadd.f32 %v984_v34, %v444_v32 }
  0xea   :  { %v679_v36 = vpop.f32.mrf.mxu0  ;;  %v711_v37 = vpop.f32.mrf.mxu1 }
  0xeb   :  { %533 = vst.msk [vmem:[%s1309_s3 + $0x68] sm:$0xff] %vm134_vm0, %v317_v33  ;;  %565 = vst.msk [vmem:[%s1309_s3 + $0x168] sm:$0xff] %vm134_vm0, %v445_v35  ;;  %v338_v38 = vadd.f32 %v679_v36, %v984_v34  ;;  %v466_v39 = vadd.f32 %v711_v37, %v984_v34 }
  0xec   :  { %v329_v40 = vpop.f32.mrf.mxu0  ;;  %v457_v41 = vpop.f32.mrf.mxu1 }
  0xed   :  { %538 = vst.msk [vmem:[%s1309_s3 + $0x90] sm:$0xff] %vm134_vm0, %v338_v38  ;;  %570 = vst.msk [vmem:[%s1309_s3 + $0x190] sm:$0xff] %vm134_vm0, %v466_v39  ;;  %v330_v42 = vadd.f32 %v984_v34, %v329_v40  ;;  %v458_v43 = vadd.f32 %v984_v34, %v457_v41 }
  0xee   :  { %v680_v44 = vpop.f32.mrf.mxu0  ;;  %v712_v45 = vpop.f32.mrf.mxu1 }
  0xef   :  { %536 = vst.msk [vmem:[%s1309_s3 + $0x80] sm:$0xff] %vm134_vm0, %v330_v42  ;;  %568 = vst.msk [vmem:[%s1309_s3 + $0x180] sm:$0xff] %vm134_vm0, %v458_v43  ;;  %v341_v46 = vadd.f32 %v680_v44, %v984_v34  ;;  %v469_v47 = vadd.f32 %v712_v45, %v984_v34 }
  0xf0   :  { %v332_v48 = vpop.f32.mrf.mxu0  ;;  %v460_v49 = vpop.f32.mrf.mxu1 }
  0xf1   :  { %539 = vst.msk [vmem:[%s1309_s3 + $0x98] sm:$0xff] %vm134_vm0, %v341_v46  ;;  %571 = vst.msk [vmem:[%s1309_s3 + $0x198] sm:$0xff] %vm134_vm0, %v469_v47  ;;  %v333_v50 = vadd.f32 %v984_v34, %v332_v48  ;;  %v461_v51 = vadd.f32 %v984_v34, %v460_v49 }
  0xf2   :  { %v683_v52 = vpop.f32.mrf.mxu0  ;;  %v715_v53 = vpop.f32.mrf.mxu1 }
  0xf3   :  { %537 = vst.msk [vmem:[%s1309_s3 + $0x88] sm:$0xff] %vm134_vm0, %v333_v50  ;;  %569 = vst.msk [vmem:[%s1309_s3 + $0x188] sm:$0xff] %vm134_vm0, %v461_v51  ;;  %v354_v54 = vadd.f32 %v683_v52, %v984_v34  ;;  %v482_v55 = vadd.f32 %v715_v53, %v984_v34 }
  0xf4   :  { %v345_v56 = vpop.f32.mrf.mxu0  ;;  %v473_v57 = vpop.f32.mrf.mxu1 }
  0xf5   :  { %542 = vst.msk [vmem:[%s1309_s3 + $0xb0] sm:$0xff] %vm134_vm0, %v354_v54  ;;  %574 = vst.msk [vmem:[%s1309_s3 + $0x1b0] sm:$0xff] %vm134_vm0, %v482_v55  ;;  %v346_v58 = vadd.f32 %v984_v34, %v345_v56  ;;  %v474_v59 = vadd.f32 %v984_v34, %v473_v57 }
  0xf6   :  { %v684_v60 = vpop.f32.mrf.mxu0  ;;  %v716_v61 = vpop.f32.mrf.mxu1 }
  0xf7   :  { %540 = vst.msk [vmem:[%s1309_s3 + $0xa0] sm:$0xff] %vm134_vm0, %v346_v58  ;;  %572 = vst.msk [vmem:[%s1309_s3 + $0x1a0] sm:$0xff] %vm134_vm0, %v474_v59  ;;  %v357_v62 = vadd.f32 %v684_v60, %v984_v34  ;;  %v485_v63 = vadd.f32 %v716_v61, %v984_v34 }
  0xf8   :  { %v348_v0 = vpop.f32.mrf.mxu0  ;;  %v476_v1 = vpop.f32.mrf.mxu1 }
  0xf9   :  { %543 = vst.msk [vmem:[%s1309_s3 + $0xb8] sm:$0xff] %vm134_vm0, %v357_v62  ;;  %575 = vst.msk [vmem:[%s1309_s3 + $0x1b8] sm:$0xff] %vm134_vm0, %v485_v63  ;;  %v349_v2 = vadd.f32 %v984_v34, %v348_v0  ;;  %v477_v3 = vadd.f32 %v984_v34, %v476_v1 }
  0xfa   :  { %v687_v4 = vpop.f32.mrf.mxu0  ;;  %v719_v5 = vpop.f32.mrf.mxu1 }
  0xfb   :  { %541 = vst.msk [vmem:[%s1309_s3 + $0xa8] sm:$0xff] %vm134_vm0, %v349_v2  ;;  %573 = vst.msk [vmem:[%s1309_s3 + $0x1a8] sm:$0xff] %vm134_vm0, %v477_v3  ;;  %v370_v6 = vadd.f32 %v687_v4, %v984_v34  ;;  %v498_v7 = vadd.f32 %v719_v5, %v984_v34 }
  0xfc   :  { %v361_v8 = vpop.f32.mrf.mxu0  ;;  %v489_v9 = vpop.f32.mrf.mxu1 }
  0xfd   :  { %546 = vst.msk [vmem:[%s1309_s3 + $0xd0] sm:$0xff] %vm134_vm0, %v370_v6  ;;  %578 = vst.msk [vmem:[%s1309_s3 + $0x1d0] sm:$0xff] %vm134_vm0, %v498_v7  ;;  %v362_v10 = vadd.f32 %v984_v34, %v361_v8  ;;  %v490_v11 = vadd.f32 %v984_v34, %v489_v9 }
  0xfe   :  { %v688_v12 = vpop.f32.mrf.mxu0  ;;  %v720_v13 = vpop.f32.mrf.mxu1 }
  0xff   :  { %544 = vst.msk [vmem:[%s1309_s3 + $0xc0] sm:$0xff] %vm134_vm0, %v362_v10  ;;  %576 = vst.msk [vmem:[%s1309_s3 + $0x1c0] sm:$0xff] %vm134_vm0, %v490_v11  ;;  %v373_v14 = vadd.f32 %v688_v12, %v984_v34  ;;  %v501_v15 = vadd.f32 %v720_v13, %v984_v34 }
 0x100   :  { %v364_v16 = vpop.f32.mrf.mxu0  ;;  %v492_v17 = vpop.f32.mrf.mxu1 }
 0x101   :  { %547 = vst.msk [vmem:[%s1309_s3 + $0xd8] sm:$0xff] %vm134_vm0, %v373_v14  ;;  %579 = vst.msk [vmem:[%s1309_s3 + $0x1d8] sm:$0xff] %vm134_vm0, %v501_v15  ;;  %v365_v18 = vadd.f32 %v984_v34, %v364_v16  ;;  %v493_v19 = vadd.f32 %v984_v34, %v492_v17 }
 0x102   :  { %v691_v20 = vpop.f32.mrf.mxu0  ;;  %v723_v21 = vpop.f32.mrf.mxu1 }
 0x103   :  { %545 = vst.msk [vmem:[%s1309_s3 + $0xc8] sm:$0xff] %vm134_vm0, %v365_v18  ;;  %577 = vst.msk [vmem:[%s1309_s3 + $0x1c8] sm:$0xff] %vm134_vm0, %v493_v19  ;;  %v386_v22 = vadd.f32 %v691_v20, %v984_v34  ;;  %v514_v23 = vadd.f32 %v723_v21, %v984_v34 }
 0x104   :  { %v377_v24 = vpop.f32.mrf.mxu0  ;;  %v505_v25 = vpop.f32.mrf.mxu1 }
 0x105   :  { %550 = vst.msk [vmem:[%s1309_s3 + $0xf0] sm:$0xff] %vm134_vm0, %v386_v22  ;;  %582 = vst.msk [vmem:[%s1309_s3 + $0x1f0] sm:$0xff] %vm134_vm0, %v514_v23  ;;  %v378_v26 = vadd.f32 %v984_v34, %v377_v24  ;;  %v506_v27 = vadd.f32 %v984_v34, %v505_v25 }
 0x106   :  { %v692_v28 = vpop.f32.mrf.mxu0  ;;  %v724_v29 = vpop.f32.mrf.mxu1 }
 0x107   :  { %548 = vst.msk [vmem:[%s1309_s3 + $0xe0] sm:$0xff] %vm134_vm0, %v378_v26  ;;  %580 = vst.msk [vmem:[%s1309_s3 + $0x1e0] sm:$0xff] %vm134_vm0, %v506_v27  ;;  %v389_v30 = vadd.f32 %v692_v28, %v984_v34  ;;  %v517_v31 = vadd.f32 %v724_v29, %v984_v34 }
 0x108   :  { %v380_v32 = vpop.f32.mrf.mxu0  ;;  %v508_v33 = vpop.f32.mrf.mxu1 }
 0x109   :  { %551 = vst.msk [vmem:[%s1309_s3 + $0xf8] sm:$0xff] %vm134_vm0, %v389_v30  ;;  %583 = vst.msk [vmem:[%s1309_s3 + $0x1f8] sm:$0xff] %vm134_vm0, %v517_v31  ;;  %v381_v35 = vadd.f32 %v984_v34, %v380_v32  ;;  %v509_v36 = vadd.f32 %v984_v34, %v508_v33 }
 0x10b   :  { %549 = vst.msk [vmem:[%s1309_s3 + $0xe8] sm:$0xff] %vm134_vm0, %v381_v35  ;;  %581 = vst.msk [vmem:[%s1309_s3 + $0x1e8] sm:$0xff] %vm134_vm0, %v509_v36 }

// kernel: unet_mid_block_forward.21
= control target key start
LH: loop header
LB: loop body
LE: loop exit
PB: predicated region body
PF: predicated region fallthrough
CT: control target
= control target key end

     0   :  { %vm134_vm0 = vcmask 261120   ;;  %vm520_vm1 = vcmask 785408   ;;  %s1307_s1 = inlined_call_operand.vmem [shape: bf16[32,96], index: 1, kind: input, shape index: {}]   ;;  %s1308_s0 = inlined_call_operand.vmem [shape: f32[512,32], index: 0, kind: input, shape index: {}]   ;;  %s1309_s2 = inlined_call_operand.vmem [shape: f32[1,96], index: 2, kind: input, shape index: {}]   ;;  %s1310_s3 = inlined_call_operand.vmem [shape: f32[512,96], index: 3, kind: output, shape index: {}]  }
   0x1   :  { %v730_v0 = vld [vmem:[%s1307_s1 + $0x8] sm:$0xff]   ;;  %v731_v1 = vld [vmem:[%s1307_s1] sm:$0xff]   ;;  %v17_v7 = vld [vmem:[%s1308_s0 + $0x10] sm:$0xff] }
   0x2   :  { %658 = vmatprep.subr.bf16.mxu0 %v730_v0  ;;  %726 = vmatprep.subr.bf16.mxu1 %v730_v0  ;;  %v15_v2 = vld [vmem:[%s1308_s0] sm:$0xff]  ;;  %v16_v3 = vld [vmem:[%s1308_s0 + $0x8] sm:$0xff]  ;;  %v18_v8 = vld [vmem:[%s1308_s0 + $0x18] sm:$0xff] }
   0x3   :  { %v47_v4 = vld [vmem:[%s1308_s0 + $0x100] sm:$0xff]  ;;  %659 = vmatpush3.bf16.msra.mxu0 %v730_v0  ;;  %728 = vmatpush3.bf16.msra.mxu1 %v730_v0  ;;  %v79_v5 = vpack.c.bf16 %v16_v3, %v15_v2  ;;  %v48_v6 = vld [vmem:[%s1308_s0 + $0x108] sm:$0xff]  ;;  %v49_v10 = vld [vmem:[%s1308_s0 + $0x110] sm:$0xff]  ;;  %v80_v16 = vpack.c.bf16 %v18_v8, %v17_v7 }
   0x4   :  { %660 = vmatprep.subr.bf16.mxu0 %v731_v1  ;;  %727 = vmatprep.subr.bf16.mxu1 %v731_v1  ;;  %v95_v9 = vpack.c.bf16 %v48_v6, %v47_v4  ;;  %v50_v11 = vld [vmem:[%s1308_s0 + $0x118] sm:$0xff]  ;;  %v19_v12 = vld [vmem:[%s1308_s0 + $0x20] sm:$0xff]  ;;  %v20_v13 = vld [vmem:[%s1308_s0 + $0x28] sm:$0xff] }
   0x5   :  { %662 = vmatprep.mubr.msk.bf16.mxu0 %vm134_vm0, %v79_v5  ;;  %v51_v14 = vld [vmem:[%s1308_s0 + $0x120] sm:$0xff]  ;;  %v52_v15 = vld [vmem:[%s1308_s0 + $0x128] sm:$0xff]  ;;  %v96_v17 = vpack.c.bf16 %v50_v11, %v49_v10  ;;  %v81_v18 = vpack.c.bf16 %v20_v13, %v19_v12  ;;  %v21_v20 = vld [vmem:[%s1308_s0 + $0x30] sm:$0xff] }
   0x6   :  { %694 = vmatprep.mubr.msk.bf16.mxu1 %vm134_vm0, %v95_v9  ;;  %v97_v19 = vpack.c.bf16 %v52_v15, %v51_v14  ;;  %v22_v21 = vld [vmem:[%s1308_s0 + $0x38] sm:$0xff]  ;;  %v53_v22 = vld [vmem:[%s1308_s0 + $0x130] sm:$0xff]  ;;  %v23_v24 = vld [vmem:[%s1308_s0 + $0x40] sm:$0xff] }
   0x7   :  { %661 = vmatpush3.bf16.msra.mxu0 %v731_v1  ;;  %729 = vmatpush3.bf16.msra.mxu1 %v731_v1  ;;  %v54_v23 = vld [vmem:[%s1308_s0 + $0x138] sm:$0xff]  ;;  %v24_v25 = vld [vmem:[%s1308_s0 + $0x48] sm:$0xff]  ;;  %v55_v26 = vld [vmem:[%s1308_s0 + $0x140] sm:$0xff]  ;;  %v82_v28 = vpack.c.bf16 %v22_v21, %v21_v20 }
   0x8   :  { %v56_v27 = vld [vmem:[%s1308_s0 + $0x148] sm:$0xff]  ;;  %v98_v29 = vpack.c.bf16 %v54_v23, %v53_v22  ;;  %v83_v30 = vpack.c.bf16 %v24_v25, %v23_v24  ;;  %v25_v32 = vld [vmem:[%s1308_s0 + $0x50] sm:$0xff]  ;;  %v26_v33 = vld [vmem:[%s1308_s0 + $0x58] sm:$0xff] }
   0x9   :  { %v99_v31 = vpack.c.bf16 %v56_v27, %v55_v26  ;;  %v57_v34 = vld [vmem:[%s1308_s0 + $0x150] sm:$0xff]  ;;  %v58_v35 = vld [vmem:[%s1308_s0 + $0x158] sm:$0xff]  ;;  %v27_v36 = vld [vmem:[%s1308_s0 + $0x60] sm:$0xff]  ;;  %v84_v40 = vpack.c.bf16 %v26_v33, %v25_v32 }
   0xa   :  { %663 = vmatmul.mubr.msk.bf16.vlgmr.msra.gmra.mxu0 %vm134_vm0, %v80_v16  ;;  %695 = vmatmul.mubr.msk.bf16.vlgmr.msra.gmra.mxu1 %vm134_vm0, %v96_v17  ;;  %v28_v37 = vld [vmem:[%s1308_s0 + $0x68] sm:$0xff]  ;;  %v59_v38 = vld [vmem:[%s1308_s0 + $0x160] sm:$0xff]  ;;  %v100_v41 = vpack.c.bf16 %v58_v35, %v57_v34  ;;  %v29_v44 = vld [vmem:[%s1308_s0 + $0x70] sm:$0xff] }
   0xb   :  { %666 = vmatprep.mubr.msk.bf16.mxu0 %vm134_vm0, %v81_v18  ;;  %698 = vmatprep.mubr.msk.bf16.mxu1 %vm134_vm0, %v97_v19  ;;  %v60_v39 = vld [vmem:[%s1308_s0 + $0x168] sm:$0xff]  ;;  %v85_v42 = vpack.c.bf16 %v28_v37, %v27_v36  ;;  %v30_v45 = vld [vmem:[%s1308_s0 + $0x78] sm:$0xff]  ;;  %v61_v46 = vld [vmem:[%s1308_s0 + $0x170] sm:$0xff] }
   0xc   :  { %v101_v43 = vpack.c.bf16 %v60_v39, %v59_v38  ;;  %v62_v47 = vld [vmem:[%s1308_s0 + $0x178] sm:$0xff]  ;;  %v31_v48 = vld [vmem:[%s1308_s0 + $0x80] sm:$0xff]  ;;  %v32_v49 = vld [vmem:[%s1308_s0 + $0x88] sm:$0xff]  ;;  %v86_v52 = vpack.c.bf16 %v30_v45, %v29_v44 }
   0xd   :  { %v63_v50 = vld [vmem:[%s1308_s0 + $0x180] sm:$0xff]  ;;  %v64_v51 = vld [vmem:[%s1308_s0 + $0x188] sm:$0xff]  ;;  %v102_v53 = vpack.c.bf16 %v62_v47, %v61_v46  ;;  %v87_v54 = vpack.c.bf16 %v32_v49, %v31_v48  ;;  %v33_v56 = vld [vmem:[%s1308_s0 + $0x90] sm:$0xff] }
   0xe   :  { %v103_v55 = vpack.c.bf16 %v64_v51, %v63_v50  ;;  %v34_v57 = vld [vmem:[%s1308_s0 + $0x98] sm:$0xff]  ;;  %v65_v58 = vld [vmem:[%s1308_s0 + $0x190] sm:$0xff]  ;;  %v35_v60 = vld [vmem:[%s1308_s0 + $0xa0] sm:$0xff] }
   0xf   :  { %v66_v59 = vld [vmem:[%s1308_s0 + $0x198] sm:$0xff]  ;;  %v36_v61 = vld [vmem:[%s1308_s0 + $0xa8] sm:$0xff]  ;;  %v67_v62 = vld [vmem:[%s1308_s0 + $0x1a0] sm:$0xff]  ;;  %v88_v0 = vpack.c.bf16 %v34_v57, %v33_v56 }
  0x10   :  { %v68_v63 = vld [vmem:[%s1308_s0 + $0x1a8] sm:$0xff]  ;;  %v104_v1 = vpack.c.bf16 %v66_v59, %v65_v58  ;;  %v89_v2 = vpack.c.bf16 %v36_v61, %v35_v60  ;;  %v37_v4 = vld [vmem:[%s1308_s0 + $0xb0] sm:$0xff]  ;;  %v38_v5 = vld [vmem:[%s1308_s0 + $0xb8] sm:$0xff] }
  0x11   :  { %v105_v3 = vpack.c.bf16 %v68_v63, %v67_v62  ;;  %v69_v6 = vld [vmem:[%s1308_s0 + $0x1b0] sm:$0xff]  ;;  %v70_v7 = vld [vmem:[%s1308_s0 + $0x1b8] sm:$0xff]  ;;  %v39_v8 = vld [vmem:[%s1308_s0 + $0xc0] sm:$0xff]  ;;  %v90_v12 = vpack.c.bf16 %v38_v5, %v37_v4 }
  0x12   :  { %667 = vmatmul.mubr.msk.bf16.gmra.mxu0 %vm134_vm0, %v82_v28  ;;  %699 = vmatmul.mubr.msk.bf16.gmra.mxu1 %vm134_vm0, %v98_v29  ;;  %v40_v9 = vld [vmem:[%s1308_s0 + $0xc8] sm:$0xff]  ;;  %v71_v10 = vld [vmem:[%s1308_s0 + $0x1c0] sm:$0xff]  ;;  %v106_v13 = vpack.c.bf16 %v70_v7, %v69_v6  ;;  %v41_v16 = vld [vmem:[%s1308_s0 + $0xd0] sm:$0xff] }
  0x13   :  { %670 = vmatprep.mubr.msk.bf16.mxu0 %vm134_vm0, %v83_v30  ;;  %702 = vmatprep.mubr.msk.bf16.mxu1 %vm134_vm0, %v99_v31  ;;  %v72_v11 = vld [vmem:[%s1308_s0 + $0x1c8] sm:$0xff]  ;;  %v91_v14 = vpack.c.bf16 %v40_v9, %v39_v8  ;;  %v42_v17 = vld [vmem:[%s1308_s0 + $0xd8] sm:$0xff]  ;;  %v73_v18 = vld [vmem:[%s1308_s0 + $0x1d0] sm:$0xff] }
  0x14   :  { %v107_v15 = vpack.c.bf16 %v72_v11, %v71_v10  ;;  %v74_v19 = vld [vmem:[%s1308_s0 + $0x1d8] sm:$0xff]  ;;  %v43_v20 = vld [vmem:[%s1308_s0 + $0xe0] sm:$0xff]  ;;  %v44_v21 = vld [vmem:[%s1308_s0 + $0xe8] sm:$0xff]  ;;  %v92_v24 = vpack.c.bf16 %v42_v17, %v41_v16 }
  0x15   :  { %v75_v22 = vld [vmem:[%s1308_s0 + $0x1e0] sm:$0xff]  ;;  %v76_v23 = vld [vmem:[%s1308_s0 + $0x1e8] sm:$0xff]  ;;  %v108_v25 = vpack.c.bf16 %v74_v19, %v73_v18  ;;  %v93_v26 = vpack.c.bf16 %v44_v21, %v43_v20  ;;  %v45_v28 = vld [vmem:[%s1308_s0 + $0xf0] sm:$0xff] }
  0x16   :  { %v109_v27 = vpack.c.bf16 %v76_v23, %v75_v22  ;;  %v46_v29 = vld [vmem:[%s1308_s0 + $0xf8] sm:$0xff]  ;;  %v77_v30 = vld [vmem:[%s1308_s0 + $0x1f0] sm:$0xff]  ;;  %v985_v34 = vld [vmem:[%s1309_s2] ss:$0 sm:$0xff] }
  0x17   :  { %v78_v31 = vld [vmem:[%s1308_s0 + $0x1f8] sm:$0xff]  ;;  %v94_v32 = vpack.c.bf16 %v46_v29, %v45_v28 }
  0x18   :  { %v110_v33 = vpack.c.bf16 %v78_v31, %v77_v30 }
  0x1a   :  { %671 = vmatmul.mubr.msk.bf16.gmra.mxu0 %vm134_vm0, %v84_v40  ;;  %703 = vmatmul.mubr.msk.bf16.gmra.mxu1 %vm134_vm0, %v100_v41 }
  0x1b   :  { %674 = vmatprep.mubr.msk.bf16.mxu0 %vm134_vm0, %v85_v42  ;;  %706 = vmatprep.mubr.msk.bf16.mxu1 %vm134_vm0, %v101_v43 }
  0x22   :  { %675 = vmatmul.mubr.msk.bf16.gmra.mxu0 %vm134_vm0, %v86_v52  ;;  %707 = vmatmul.mubr.msk.bf16.gmra.mxu1 %vm134_vm0, %v102_v53 }
  0x23   :  { %678 = vmatprep.mubr.msk.bf16.mxu0 %vm134_vm0, %v87_v54  ;;  %710 = vmatprep.mubr.msk.bf16.mxu1 %vm134_vm0, %v103_v55 }
  0x2a   :  { %679 = vmatmul.mubr.msk.bf16.gmra.mxu0 %vm134_vm0, %v88_v0  ;;  %711 = vmatmul.mubr.msk.bf16.gmra.mxu1 %vm134_vm0, %v104_v1 }
  0x2b   :  { %682 = vmatprep.mubr.msk.bf16.mxu0 %vm134_vm0, %v89_v2  ;;  %714 = vmatprep.mubr.msk.bf16.mxu1 %vm134_vm0, %v105_v3 }
  0x32   :  { %683 = vmatmul.mubr.msk.bf16.gmra.mxu0 %vm134_vm0, %v90_v12  ;;  %715 = vmatmul.mubr.msk.bf16.gmra.mxu1 %vm134_vm0, %v106_v13 }
  0x33   :  { %686 = vmatprep.mubr.msk.bf16.mxu0 %vm134_vm0, %v91_v14  ;;  %718 = vmatprep.mubr.msk.bf16.mxu1 %vm134_vm0, %v107_v15 }
  0x3a   :  { %687 = vmatmul.mubr.msk.bf16.gmra.mxu0 %vm134_vm0, %v92_v24  ;;  %719 = vmatmul.mubr.msk.bf16.gmra.mxu1 %vm134_vm0, %v108_v25 }
  0x3b   :  { %690 = vmatprep.mubr.msk.bf16.mxu0 %vm134_vm0, %v93_v26  ;;  %722 = vmatprep.mubr.msk.bf16.mxu1 %vm134_vm0, %v109_v27 }
  0x42   :  { %691 = vmatmul.mubr.msk.bf16.gmra.mxu0 %vm134_vm0, %v94_v32  ;;  %723 = vmatmul.mubr.msk.bf16.gmra.mxu1 %vm134_vm0, %v110_v33 }
  0xca   :  { %v664_v35 = vpop.f32.mrf.mxu0  ;;  %v696_v36 = vpop.f32.mrf.mxu1 }
  0xcb   :  { %v274_v37 = vadd.f32 %v664_v35, %v985_v34  ;;  %v402_v38 = vadd.f32 %v696_v36, %v985_v34 }
  0xcc   :  { %v265_v39 = vpop.f32.mrf.mxu0  ;;  %v393_v40 = vpop.f32.mrf.mxu1 }
  0xcd   :  { %523 = vst.msk [vmem:[%s1310_s3 + $0x10] sm:$0xff] %vm520_vm1, %v274_v37  ;;  %555 = vst.msk [vmem:[%s1310_s3 + $0x110] sm:$0xff] %vm520_vm1, %v402_v38  ;;  %v266_v41 = vadd.f32 %v985_v34, %v265_v39  ;;  %v394_v42 = vadd.f32 %v985_v34, %v393_v40 }
  0xce   :  { %v665_v43 = vpop.f32.mrf.mxu0  ;;  %v697_v44 = vpop.f32.mrf.mxu1 }
  0xcf   :  { %521 = vst.msk [vmem:[%s1310_s3] sm:$0xff] %vm520_vm1, %v266_v41  ;;  %553 = vst.msk [vmem:[%s1310_s3 + $0x100] sm:$0xff] %vm520_vm1, %v394_v42  ;;  %v277_v45 = vadd.f32 %v665_v43, %v985_v34  ;;  %v405_v46 = vadd.f32 %v697_v44, %v985_v34 }
  0xd0   :  { %v268_v47 = vpop.f32.mrf.mxu0  ;;  %v396_v48 = vpop.f32.mrf.mxu1 }
  0xd1   :  { %524 = vst.msk [vmem:[%s1310_s3 + $0x18] sm:$0xff] %vm520_vm1, %v277_v45  ;;  %556 = vst.msk [vmem:[%s1310_s3 + $0x118] sm:$0xff] %vm520_vm1, %v405_v46  ;;  %v269_v49 = vadd.f32 %v985_v34, %v268_v47  ;;  %v397_v50 = vadd.f32 %v985_v34, %v396_v48 }
  0xd2   :  { %v668_v51 = vpop.f32.mrf.mxu0  ;;  %v700_v52 = vpop.f32.mrf.mxu1 }
  0xd3   :  { %522 = vst.msk [vmem:[%s1310_s3 + $0x8] sm:$0xff] %vm520_vm1, %v269_v49  ;;  %554 = vst.msk [vmem:[%s1310_s3 + $0x108] sm:$0xff] %vm520_vm1, %v397_v50  ;;  %v290_v53 = vadd.f32 %v668_v51, %v985_v34  ;;  %v418_v54 = vadd.f32 %v700_v52, %v985_v34 }
  0xd4   :  { %v281_v55 = vpop.f32.mrf.mxu0  ;;  %v409_v56 = vpop.f32.mrf.mxu1 }
  0xd5   :  { %527 = vst.msk [vmem:[%s1310_s3 + $0x30] sm:$0xff] %vm520_vm1, %v290_v53  ;;  %559 = vst.msk [vmem:[%s1310_s3 + $0x130] sm:$0xff] %vm520_vm1, %v418_v54  ;;  %v282_v57 = vadd.f32 %v985_v34, %v281_v55  ;;  %v410_v58 = vadd.f32 %v985_v34, %v409_v56 }
  0xd6   :  { %v669_v59 = vpop.f32.mrf.mxu0  ;;  %v701_v60 = vpop.f32.mrf.mxu1 }
  0xd7   :  { %525 = vst.msk [vmem:[%s1310_s3 + $0x20] sm:$0xff] %vm520_vm1, %v282_v57  ;;  %557 = vst.msk [vmem:[%s1310_s3 + $0x120] sm:$0xff] %vm520_vm1, %v410_v58  ;;  %v293_v61 = vadd.f32 %v669_v59, %v985_v34  ;;  %v421_v62 = vadd.f32 %v701_v60, %v985_v34 }
  0xd8   :  { %v284_v63 = vpop.f32.mrf.mxu0  ;;  %v412_v0 = vpop.f32.mrf.mxu1 }
  0xd9   :  { %528 = vst.msk [vmem:[%s1310_s3 + $0x38] sm:$0xff] %vm520_vm1, %v293_v61  ;;  %560 = vst.msk [vmem:[%s1310_s3 + $0x138] sm:$0xff] %vm520_vm1, %v421_v62  ;;  %v285_v1 = vadd.f32 %v985_v34, %v284_v63  ;;  %v413_v2 = vadd.f32 %v985_v34, %v412_v0 }
  0xda   :  { %v672_v3 = vpop.f32.mrf.mxu0  ;;  %v704_v4 = vpop.f32.mrf.mxu1 }
  0xdb   :  { %526 = vst.msk [vmem:[%s1310_s3 + $0x28] sm:$0xff] %vm520_vm1, %v285_v1  ;;  %558 = vst.msk [vmem:[%s1310_s3 + $0x128] sm:$0xff] %vm520_vm1, %v413_v2  ;;  %v306_v5 = vadd.f32 %v672_v3, %v985_v34  ;;  %v434_v6 = vadd.f32 %v704_v4, %v985_v34 }
  0xdc   :  { %v297_v7 = vpop.f32.mrf.mxu0  ;;  %v425_v8 = vpop.f32.mrf.mxu1 }
  0xdd   :  { %531 = vst.msk [vmem:[%s1310_s3 + $0x50] sm:$0xff] %vm520_vm1, %v306_v5  ;;  %563 = vst.msk [vmem:[%s1310_s3 + $0x150] sm:$0xff] %vm520_vm1, %v434_v6  ;;  %v298_v9 = vadd.f32 %v985_v34, %v297_v7  ;;  %v426_v10 = vadd.f32 %v985_v34, %v425_v8 }
  0xde   :  { %v673_v11 = vpop.f32.mrf.mxu0  ;;  %v705_v12 = vpop.f32.mrf.mxu1 }
  0xdf   :  { %529 = vst.msk [vmem:[%s1310_s3 + $0x40] sm:$0xff] %vm520_vm1, %v298_v9  ;;  %561 = vst.msk [vmem:[%s1310_s3 + $0x140] sm:$0xff] %vm520_vm1, %v426_v10  ;;  %v309_v13 = vadd.f32 %v673_v11, %v985_v34  ;;  %v437_v14 = vadd.f32 %v705_v12, %v985_v34 }
  0xe0   :  { %v300_v15 = vpop.f32.mrf.mxu0  ;;  %v428_v16 = vpop.f32.mrf.mxu1 }
  0xe1   :  { %532 = vst.msk [vmem:[%s1310_s3 + $0x58] sm:$0xff] %vm520_vm1, %v309_v13  ;;  %564 = vst.msk [vmem:[%s1310_s3 + $0x158] sm:$0xff] %vm520_vm1, %v437_v14  ;;  %v301_v17 = vadd.f32 %v985_v34, %v300_v15  ;;  %v429_v18 = vadd.f32 %v985_v34, %v428_v16 }
  0xe2   :  { %v676_v19 = vpop.f32.mrf.mxu0  ;;  %v708_v20 = vpop.f32.mrf.mxu1 }
  0xe3   :  { %530 = vst.msk [vmem:[%s1310_s3 + $0x48] sm:$0xff] %vm520_vm1, %v301_v17  ;;  %562 = vst.msk [vmem:[%s1310_s3 + $0x148] sm:$0xff] %vm520_vm1, %v429_v18  ;;  %v322_v21 = vadd.f32 %v676_v19, %v985_v34  ;;  %v450_v22 = vadd.f32 %v708_v20, %v985_v34 }
  0xe4   :  { %v313_v23 = vpop.f32.mrf.mxu0  ;;  %v441_v24 = vpop.f32.mrf.mxu1 }
  0xe5   :  { %535 = vst.msk [vmem:[%s1310_s3 + $0x70] sm:$0xff] %vm520_vm1, %v322_v21  ;;  %567 = vst.msk [vmem:[%s1310_s3 + $0x170] sm:$0xff] %vm520_vm1, %v450_v22  ;;  %v314_v25 = vadd.f32 %v985_v34, %v313_v23  ;;  %v442_v26 = vadd.f32 %v985_v34, %v441_v24 }
  0xe6   :  { %v677_v27 = vpop.f32.mrf.mxu0  ;;  %v709_v28 = vpop.f32.mrf.mxu1 }
  0xe7   :  { %533 = vst.msk [vmem:[%s1310_s3 + $0x60] sm:$0xff] %vm520_vm1, %v314_v25  ;;  %565 = vst.msk [vmem:[%s1310_s3 + $0x160] sm:$0xff] %vm520_vm1, %v442_v26  ;;  %v325_v29 = vadd.f32 %v677_v27, %v985_v34  ;;  %v453_v30 = vadd.f32 %v709_v28, %v985_v34 }
  0xe8   :  { %v316_v31 = vpop.f32.mrf.mxu0  ;;  %v444_v32 = vpop.f32.mrf.mxu1 }
  0xe9   :  { %536 = vst.msk [vmem:[%s1310_s3 + $0x78] sm:$0xff] %vm520_vm1, %v325_v29  ;;  %568 = vst.msk [vmem:[%s1310_s3 + $0x178] sm:$0xff] %vm520_vm1, %v453_v30  ;;  %v317_v33 = vadd.f32 %v985_v34, %v316_v31  ;;  %v445_v35 = vadd.f32 %v985_v34, %v444_v32 }
  0xea   :  { %v680_v36 = vpop.f32.mrf.mxu0  ;;  %v712_v37 = vpop.f32.mrf.mxu1 }
  0xeb   :  { %534 = vst.msk [vmem:[%s1310_s3 + $0x68] sm:$0xff] %vm520_vm1, %v317_v33  ;;  %566 = vst.msk [vmem:[%s1310_s3 + $0x168] sm:$0xff] %vm520_vm1, %v445_v35  ;;  %v338_v38 = vadd.f32 %v680_v36, %v985_v34  ;;  %v466_v39 = vadd.f32 %v712_v37, %v985_v34 }
  0xec   :  { %v329_v40 = vpop.f32.mrf.mxu0  ;;  %v457_v41 = vpop.f32.mrf.mxu1 }
  0xed   :  { %539 = vst.msk [vmem:[%s1310_s3 + $0x90] sm:$0xff] %vm520_vm1, %v338_v38  ;;  %571 = vst.msk [vmem:[%s1310_s3 + $0x190] sm:$0xff] %vm520_vm1, %v466_v39  ;;  %v330_v42 = vadd.f32 %v985_v34, %v329_v40  ;;  %v458_v43 = vadd.f32 %v985_v34, %v457_v41 }
  0xee   :  { %v681_v44 = vpop.f32.mrf.mxu0  ;;  %v713_v45 = vpop.f32.mrf.mxu1 }
  0xef   :  { %537 = vst.msk [vmem:[%s1310_s3 + $0x80] sm:$0xff] %vm520_vm1, %v330_v42  ;;  %569 = vst.msk [vmem:[%s1310_s3 + $0x180] sm:$0xff] %vm520_vm1, %v458_v43  ;;  %v341_v46 = vadd.f32 %v681_v44, %v985_v34  ;;  %v469_v47 = vadd.f32 %v713_v45, %v985_v34 }
  0xf0   :  { %v332_v48 = vpop.f32.mrf.mxu0  ;;  %v460_v49 = vpop.f32.mrf.mxu1 }
  0xf1   :  { %540 = vst.msk [vmem:[%s1310_s3 + $0x98] sm:$0xff] %vm520_vm1, %v341_v46  ;;  %572 = vst.msk [vmem:[%s1310_s3 + $0x198] sm:$0xff] %vm520_vm1, %v469_v47  ;;  %v333_v50 = vadd.f32 %v985_v34, %v332_v48  ;;  %v461_v51 = vadd.f32 %v985_v34, %v460_v49 }
  0xf2   :  { %v684_v52 = vpop.f32.mrf.mxu0  ;;  %v716_v53 = vpop.f32.mrf.mxu1 }
  0xf3   :  { %538 = vst.msk [vmem:[%s1310_s3 + $0x88] sm:$0xff] %vm520_vm1, %v333_v50  ;;  %570 = vst.msk [vmem:[%s1310_s3 + $0x188] sm:$0xff] %vm520_vm1, %v461_v51  ;;  %v354_v54 = vadd.f32 %v684_v52, %v985_v34  ;;  %v482_v55 = vadd.f32 %v716_v53, %v985_v34 }
  0xf4   :  { %v345_v56 = vpop.f32.mrf.mxu0  ;;  %v473_v57 = vpop.f32.mrf.mxu1 }
  0xf5   :  { %543 = vst.msk [vmem:[%s1310_s3 + $0xb0] sm:$0xff] %vm520_vm1, %v354_v54  ;;  %575 = vst.msk [vmem:[%s1310_s3 + $0x1b0] sm:$0xff] %vm520_vm1, %v482_v55  ;;  %v346_v58 = vadd.f32 %v985_v34, %v345_v56  ;;  %v474_v59 = vadd.f32 %v985_v34, %v473_v57 }
  0xf6   :  { %v685_v60 = vpop.f32.mrf.mxu0  ;;  %v717_v61 = vpop.f32.mrf.mxu1 }
  0xf7   :  { %541 = vst.msk [vmem:[%s1310_s3 + $0xa0] sm:$0xff] %vm520_vm1, %v346_v58  ;;  %573 = vst.msk [vmem:[%s1310_s3 + $0x1a0] sm:$0xff] %vm520_vm1, %v474_v59  ;;  %v357_v62 = vadd.f32 %v685_v60, %v985_v34  ;;  %v485_v63 = vadd.f32 %v717_v61, %v985_v34 }
  0xf8   :  { %v348_v0 = vpop.f32.mrf.mxu0  ;;  %v476_v1 = vpop.f32.mrf.mxu1 }
  0xf9   :  { %544 = vst.msk [vmem:[%s1310_s3 + $0xb8] sm:$0xff] %vm520_vm1, %v357_v62  ;;  %576 = vst.msk [vmem:[%s1310_s3 + $0x1b8] sm:$0xff] %vm520_vm1, %v485_v63  ;;  %v349_v2 = vadd.f32 %v985_v34, %v348_v0  ;;  %v477_v3 = vadd.f32 %v985_v34, %v476_v1 }
  0xfa   :  { %v688_v4 = vpop.f32.mrf.mxu0  ;;  %v720_v5 = vpop.f32.mrf.mxu1 }
  0xfb   :  { %542 = vst.msk [vmem:[%s1310_s3 + $0xa8] sm:$0xff] %vm520_vm1, %v349_v2  ;;  %574 = vst.msk [vmem:[%s1310_s3 + $0x1a8] sm:$0xff] %vm520_vm1, %v477_v3  ;;  %v370_v6 = vadd.f32 %v688_v4, %v985_v34  ;;  %v498_v7 = vadd.f32 %v720_v5, %v985_v34 }
  0xfc   :  { %v361_v8 = vpop.f32.mrf.mxu0  ;;  %v489_v9 = vpop.f32.mrf.mxu1 }
  0xfd   :  { %547 = vst.msk [vmem:[%s1310_s3 + $0xd0] sm:$0xff] %vm520_vm1, %v370_v6  ;;  %579 = vst.msk [vmem:[%s1310_s3 + $0x1d0] sm:$0xff] %vm520_vm1, %v498_v7  ;;  %v362_v10 = vadd.f32 %v985_v34, %v361_v8  ;;  %v490_v11 = vadd.f32 %v985_v34, %v489_v9 }
  0xfe   :  { %v689_v12 = vpop.f32.mrf.mxu0  ;;  %v721_v13 = vpop.f32.mrf.mxu1 }
  0xff   :  { %545 = vst.msk [vmem:[%s1310_s3 + $0xc0] sm:$0xff] %vm520_vm1, %v362_v10  ;;  %577 = vst.msk [vmem:[%s1310_s3 + $0x1c0] sm:$0xff] %vm520_vm1, %v490_v11  ;;  %v373_v14 = vadd.f32 %v689_v12, %v985_v34  ;;  %v501_v15 = vadd.f32 %v721_v13, %v985_v34 }
 0x100   :  { %v364_v16 = vpop.f32.mrf.mxu0  ;;  %v492_v17 = vpop.f32.mrf.mxu1 }
 0x101   :  { %548 = vst.msk [vmem:[%s1310_s3 + $0xd8] sm:$0xff] %vm520_vm1, %v373_v14  ;;  %580 = vst.msk [vmem:[%s1310_s3 + $0x1d8] sm:$0xff] %vm520_vm1, %v501_v15  ;;  %v365_v18 = vadd.f32 %v985_v34, %v364_v16  ;;  %v493_v19 = vadd.f32 %v985_v34, %v492_v17 }
 0x102   :  { %v692_v20 = vpop.f32.mrf.mxu0  ;;  %v724_v21 = vpop.f32.mrf.mxu1 }
 0x103   :  { %546 = vst.msk [vmem:[%s1310_s3 + $0xc8] sm:$0xff] %vm520_vm1, %v365_v18  ;;  %578 = vst.msk [vmem:[%s1310_s3 + $0x1c8] sm:$0xff] %vm520_vm1, %v493_v19  ;;  %v386_v22 = vadd.f32 %v692_v20, %v985_v34  ;;  %v514_v23 = vadd.f32 %v724_v21, %v985_v34 }
 0x104   :  { %v377_v24 = vpop.f32.mrf.mxu0  ;;  %v505_v25 = vpop.f32.mrf.mxu1 }
 0x105   :  { %551 = vst.msk [vmem:[%s1310_s3 + $0xf0] sm:$0xff] %vm520_vm1, %v386_v22  ;;  %583 = vst.msk [vmem:[%s1310_s3 + $0x1f0] sm:$0xff] %vm520_vm1, %v514_v23  ;;  %v378_v26 = vadd.f32 %v985_v34, %v377_v24  ;;  %v506_v27 = vadd.f32 %v985_v34, %v505_v25 }
 0x106   :  { %v693_v28 = vpop.f32.mrf.mxu0  ;;  %v725_v29 = vpop.f32.mrf.mxu1 }
 0x107   :  { %549 = vst.msk [vmem:[%s1310_s3 + $0xe0] sm:$0xff] %vm520_vm1, %v378_v26  ;;  %581 = vst.msk [vmem:[%s1310_s3 + $0x1e0] sm:$0xff] %vm520_vm1, %v506_v27  ;;  %v389_v30 = vadd.f32 %v693_v28, %v985_v34  ;;  %v517_v31 = vadd.f32 %v725_v29, %v985_v34 }
 0x108   :  { %v380_v32 = vpop.f32.mrf.mxu0  ;;  %v508_v33 = vpop.f32.mrf.mxu1 }
 0x109   :  { %552 = vst.msk [vmem:[%s1310_s3 + $0xf8] sm:$0xff] %vm520_vm1, %v389_v30  ;;  %584 = vst.msk [vmem:[%s1310_s3 + $0x1f8] sm:$0xff] %vm520_vm1, %v517_v31  ;;  %v381_v35 = vadd.f32 %v985_v34, %v380_v32  ;;  %v509_v36 = vadd.f32 %v985_v34, %v508_v33 }
 0x10b   :  { %550 = vst.msk [vmem:[%s1310_s3 + $0xe8] sm:$0xff] %vm520_vm1, %v381_v35  ;;  %582 = vst.msk [vmem:[%s1310_s3 + $0x1e8] sm:$0xff] %vm520_vm1, %v509_v36 }

// kernel: unet_mid_block_forward.22
= control target key start
LH: loop header
LB: loop body
LE: loop exit
PB: predicated region body
PF: predicated region fallthrough
CT: control target
= control target key end

     0   :  { %s1893_s12 = smov 0   ;;  %s2394_s0 = inlined_call_operand.vmem [shape: f32[4,256,16], index: 0, kind: input, shape index: {}]   ;;  %s2395_s1 = inlined_call_operand.vmem [shape: f32[4,256,16], index: 1, kind: input, shape index: {}]   ;;  %s2396_s2 = inlined_call_operand.vmem [shape: f32[4,256,16], index: 2, kind: input, shape index: {}]   ;;  %s2397_s3 = inlined_call_operand.vmem [shape: f32[4,256,16], index: 3, kind: output, shape index: {}]  }
   0x1 LB: > { %s1462_s13 = sadd.s32 4294967295, %s1871_s12   ;;  %p1466_p0 = scmp.ge.s32.totalorder %s1871_s12, 1  ;;  %s1871_s12 = sphi %s1893_s12, %s13_s12  }
   0x2   : > { %p157_p1 = scmp.lt.s32.totalorder %s1871_s12, 5 }
   0x4   : > { %p158_p2 = pnand %p1466_p0, %p157_p1 }
   0x6   : > { %161 = sbr.rel (%p158_p2) target bundleno = 771 (0x303), region = 32 }
   0xb   : > { %p191_p3 = scmp.lt.s32.totalorder %s1462_s13, 3  ;;  %vm340_vm0 = vcmask 130048  }
   0xd   : > { %s2438_s13 = smov (!%p191_p3, %s1462_s13), 3 }
   0xe   : > { %s1901_s14 = sshll.u32 %s2438_s13, 8 }
   0xf   : > { %s1907_s17 = scalar_lea.vmem %s2395_s1, %s1901_s14  ;;  %s1926_s20 = scalar_lea.vmem %s2394_s0, %s1901_s14 }
  0x10   : > { %v274_v0 = vld [vmem:[%s1907_s17 + $0xf0] sm:$0xff]  ;;  %v275_v1 = vld [vmem:[%s1907_s17 + $0xf8] sm:$0xff]  ;;  %v272_v5 = vld [vmem:[%s1907_s17 + $0xe0] sm:$0xff]  ;;  %s2035_s23 = scalar_lea.vmem %s2396_s2, %s1901_s14  ;;  %s2325_s26 = scalar_lea.vmem %s2397_s3, %s1901_s14 }
  0x11   : > { %v258_v2 = vld [vmem:[%s1907_s17 + $0x70] sm:$0xff]  ;;  %v339_v3 = vpack.c.bf16 %v275_v1, %v274_v0  ;;  %v259_v4 = vld [vmem:[%s1907_s17 + $0x78] sm:$0xff]  ;;  %v273_v6 = vld [vmem:[%s1907_s17 + $0xe8] sm:$0xff] }
  0x12   : > { %v331_v7 = vpack.c.bf16 %v259_v4, %v258_v2  ;;  %v338_v8 = vpack.c.bf16 %v273_v6, %v272_v5  ;;  %v256_v9 = vld [vmem:[%s1907_s17 + $0x60] sm:$0xff]  ;;  %v257_v10 = vld [vmem:[%s1907_s17 + $0x68] sm:$0xff]  ;;  %v270_v13 = vld [vmem:[%s1907_s17 + $0xd0] sm:$0xff] }
  0x13   : > { %1657 = vmatprep.subr.msk.bf16.mxu0 %vm340_vm0, %v339_v3  ;;  %v330_v12 = vpack.c.bf16 %v257_v10, %v256_v9  ;;  %v271_v14 = vld [vmem:[%s1907_s17 + $0xd8] sm:$0xff]  ;;  %v212_v17 = vld [vmem:[%s1926_s20] sm:$0xff]  ;;  %v254_v18 = vld [vmem:[%s1907_s17 + $0x50] sm:$0xff] }
  0x14   : > { %v411_v11 = vsel %vm340_vm0, %v331_v7, 0  ;;  %v337_v16 = vpack.c.bf16 %v271_v14, %v270_v13  ;;  %v255_v19 = vld [vmem:[%s1907_s17 + $0x58] sm:$0xff]  ;;  %v213_v20 = vld [vmem:[%s1926_s20 + $0x8] sm:$0xff]  ;;  %v268_v23 = vld [vmem:[%s1907_s17 + $0xc0] sm:$0xff] }
  0x15   : > { %1498 = vmatpush3.bf16.xpose.msra.mxu0 %v411_v11  ;;  %v408_v15 = vsel %vm340_vm0, %v330_v12, 0  ;;  %v308_v21 = vpack.c.bf16 %v213_v20, %v212_v17  ;;  %v329_v22 = vpack.c.bf16 %v255_v19, %v254_v18  ;;  %v269_v24 = vld [vmem:[%s1907_s17 + $0xc8] sm:$0xff]  ;;  %v252_v27 = vld [vmem:[%s1907_s17 + $0x40] sm:$0xff]  ;;  %v266_v30 = vld [vmem:[%s1907_s17 + $0xb0] sm:$0xff] }
  0x16   : > { %1658 = vmatprep.subr.msk.bf16.mxu0 %vm340_vm0, %v338_v8  ;;  %v336_v26 = vpack.c.bf16 %v269_v24, %v268_v23  ;;  %v253_v28 = vld [vmem:[%s1907_s17 + $0x48] sm:$0xff]  ;;  %v267_v31 = vld [vmem:[%s1907_s17 + $0xb8] sm:$0xff]  ;;  %v250_v34 = vld [vmem:[%s1907_s17 + $0x30] sm:$0xff] }
  0x17   : > { %1513 = vmatprep.mubr.msk.bf16.mxu0 %vm340_vm0, %v308_v21  ;;  %v405_v25 = vsel %vm340_vm0, %v329_v22, 0  ;;  %v328_v29 = vpack.c.bf16 %v253_v28, %v252_v27  ;;  %v335_v33 = vpack.c.bf16 %v267_v31, %v266_v30  ;;  %v251_v35 = vld [vmem:[%s1907_s17 + $0x38] sm:$0xff]  ;;  %v264_v37 = vld [vmem:[%s1907_s17 + $0xa0] sm:$0xff]  ;;  %v265_v38 = vld [vmem:[%s1907_s17 + $0xa8] sm:$0xff] }
  0x18   : > { %v327_v36 = vpack.c.bf16 %v251_v35, %v250_v34  ;;  %v334_v40 = vpack.c.bf16 %v265_v38, %v264_v37  ;;  %v248_v41 = vld [vmem:[%s1907_s17 + $0x20] sm:$0xff]  ;;  %v249_v42 = vld [vmem:[%s1907_s17 + $0x28] sm:$0xff]  ;;  %v262_v44 = vld [vmem:[%s1907_s17 + $0x90] sm:$0xff] }
  0x19   : > { %v402_v32 = vsel %vm340_vm0, %v328_v29, 0  ;;  %v326_v43 = vpack.c.bf16 %v249_v42, %v248_v41  ;;  %v263_v45 = vld [vmem:[%s1907_s17 + $0x98] sm:$0xff]  ;;  %v246_v48 = vld [vmem:[%s1907_s17 + $0x10] sm:$0xff]  ;;  %v260_v51 = vld [vmem:[%s1907_s17 + $0x80] sm:$0xff] }
  0x1a   : > { %v399_v39 = vsel %vm340_vm0, %v327_v36, 0  ;;  %v333_v47 = vpack.c.bf16 %v263_v45, %v262_v44  ;;  %v247_v49 = vld [vmem:[%s1907_s17 + $0x18] sm:$0xff]  ;;  %v261_v52 = vld [vmem:[%s1907_s17 + $0x88] sm:$0xff]  ;;  %v244_v55 = vld [vmem:[%s1907_s17] sm:$0xff] }
  0x1b   : > { %v396_v46 = vsel %vm340_vm0, %v326_v43, 0  ;;  %v325_v50 = vpack.c.bf16 %v247_v49, %v246_v48  ;;  %v332_v54 = vpack.c.bf16 %v261_v52, %v260_v51  ;;  %v245_v56 = vld [vmem:[%s1907_s17 + $0x8] sm:$0xff]  ;;  %v214_v59 = vld [vmem:[%s1926_s20 + $0x10] sm:$0xff]  ;;  %v215_v60 = vld [vmem:[%s1926_s20 + $0x18] sm:$0xff] }
  0x1c   : > { %v324_v57 = vpack.c.bf16 %v245_v56, %v244_v55  ;;  %v309_v61 = vpack.c.bf16 %v215_v60, %v214_v59  ;;  %v216_v62 = vld [vmem:[%s1926_s20 + $0x20] sm:$0xff]  ;;  %v217_v63 = vld [vmem:[%s1926_s20 + $0x28] sm:$0xff]  ;;  %v218_v1 = vld [vmem:[%s1926_s20 + $0x30] sm:$0xff] }
  0x1d   : > { %1500 = vmatpush3.bf16.xpose.msra.mxu0 %v408_v15  ;;  %v393_v53 = vsel %vm340_vm0, %v325_v50, 0  ;;  %v310_v0 = vpack.c.bf16 %v217_v63, %v216_v62  ;;  %v219_v2 = vld [vmem:[%s1926_s20 + $0x38] sm:$0xff]  ;;  %v220_v4 = vld [vmem:[%s1926_s20 + $0x40] sm:$0xff]  ;;  %v221_v5 = vld [vmem:[%s1926_s20 + $0x48] sm:$0xff] }
  0x1e   : > { %1659 = vmatprep.subr.msk.bf16.mxu0 %vm340_vm0, %v337_v16  ;;  %v390_v58 = vsel %vm340_vm0, %v324_v57, 0  ;;  %v311_v3 = vpack.c.bf16 %v219_v2, %v218_v1  ;;  %v312_v6 = vpack.c.bf16 %v221_v5, %v220_v4  ;;  %v222_v7 = vld [vmem:[%s1926_s20 + $0x50] sm:$0xff]  ;;  %v223_v8 = vld [vmem:[%s1926_s20 + $0x58] sm:$0xff]  ;;  %v224_v10 = vld [vmem:[%s1926_s20 + $0x60] sm:$0xff] }
  0x1f   : > { %v313_v9 = vpack.c.bf16 %v223_v8, %v222_v7  ;;  %v225_v11 = vld [vmem:[%s1926_s20 + $0x68] sm:$0xff]  ;;  %v226_v13 = vld [vmem:[%s1926_s20 + $0x70] sm:$0xff]  ;;  %v227_v14 = vld [vmem:[%s1926_s20 + $0x78] sm:$0xff] }
  0x20   : > { %v314_v12 = vpack.c.bf16 %v225_v11, %v224_v10  ;;  %v315_v15 = vpack.c.bf16 %v227_v14, %v226_v13  ;;  %v228_v16 = vld [vmem:[%s1926_s20 + $0x80] sm:$0xff]  ;;  %v229_v17 = vld [vmem:[%s1926_s20 + $0x88] sm:$0xff]  ;;  %v230_v19 = vld [vmem:[%s1926_s20 + $0x90] sm:$0xff] }
  0x21   : > { %v316_v18 = vpack.c.bf16 %v229_v17, %v228_v16  ;;  %v231_v20 = vld [vmem:[%s1926_s20 + $0x98] sm:$0xff]  ;;  %v232_v22 = vld [vmem:[%s1926_s20 + $0xa0] sm:$0xff]  ;;  %v233_v23 = vld [vmem:[%s1926_s20 + $0xa8] sm:$0xff] }
  0x22   : > { %v318_v24 = vpack.c.bf16 %v233_v23, %v232_v22  ;;  %v236_v28 = vld [vmem:[%s1926_s20 + $0xc0] sm:$0xff]  ;;  %v237_v29 = vld [vmem:[%s1926_s20 + $0xc8] sm:$0xff]  ;;  %v238_v31 = vld [vmem:[%s1926_s20 + $0xd0] sm:$0xff] }
  0x23   : > { %v320_v30 = vpack.c.bf16 %v237_v29, %v236_v28  ;;  %v240_v34 = vld [vmem:[%s1926_s20 + $0xe0] sm:$0xff]  ;;  %v241_v35 = vld [vmem:[%s1926_s20 + $0xe8] sm:$0xff]  ;;  %v242_v37 = vld [vmem:[%s1926_s20 + $0xf0] sm:$0xff] }
  0x24   : > { %v322_v36 = vpack.c.bf16 %v241_v35, %v240_v34  ;;  %v243_v38 = vld [vmem:[%s1926_s20 + $0xf8] sm:$0xff]  ;;  %v306_v45 = vld [vmem:[%s2035_s23 + $0xf0] sm:$0xff]  ;;  %v304_v51 = vld [vmem:[%s2035_s23 + $0xe0] sm:$0xff] }
  0x25   : > { %1502 = vmatpush3.bf16.xpose.msra.mxu0 %v405_v25  ;;  %v234_v25 = vld [vmem:[%s1926_s20 + $0xb0] sm:$0xff]  ;;  %v291_v50 = vld [vmem:[%s2035_s23 + $0x78] sm:$0xff]  ;;  %v305_v52 = vld [vmem:[%s2035_s23 + $0xe8] sm:$0xff] }
  0x26   : > { %1660 = vmatprep.subr.msk.bf16.mxu0 %vm340_vm0, %v336_v26  ;;  %v235_v26 = vld [vmem:[%s1926_s20 + $0xb8] sm:$0xff]  ;;  %v1124_v55 = vpack.c.bf16 %v305_v52, %v304_v51  ;;  %v288_v56 = vld [vmem:[%s2035_s23 + $0x60] sm:$0xff]  ;;  %v289_v57 = vld [vmem:[%s2035_s23 + $0x68] sm:$0xff] }
  0x27   : > { %v319_v27 = vpack.c.bf16 %v235_v26, %v234_v25  ;;  %v302_v8 = vld [vmem:[%s2035_s23 + $0xd0] sm:$0xff]  ;;  %v287_v13 = vld [vmem:[%s2035_s23 + $0x58] sm:$0xff]  ;;  %v284_v23 = vld [vmem:[%s2035_s23 + $0x40] sm:$0xff] }
  0x28   : > { %v282_v34 = vld [vmem:[%s2035_s23 + $0x30] sm:$0xff]  ;;  %v283_v35 = vld [vmem:[%s2035_s23 + $0x38] sm:$0xff] }
  0x2d   : > { %1504 = vmatpush3.bf16.xpose.msra.mxu0 %v402_v32  ;;  %v239_v32 = vld [vmem:[%s1926_s20 + $0xd8] sm:$0xff] }
  0x2e   : > { %1661 = vmatprep.subr.msk.bf16.mxu0 %vm340_vm0, %v335_v33  ;;  %v321_v33 = vpack.c.bf16 %v239_v32, %v238_v31  ;;  %v299_v31 = vld [vmem:[%s2035_s23 + $0xb8] sm:$0xff] }
  0x35   : > { %1506 = vmatpush3.bf16.xpose.msra.mxu0 %v399_v39  ;;  %v323_v39 = vpack.c.bf16 %v243_v38, %v242_v37  ;;  %v1113_v37 = vpack.c.bf16 %v283_v35, %v282_v34 }
  0x36   : > { %1662 = vmatprep.subr.msk.bf16.mxu0 %vm340_vm0, %v334_v40 }
  0x3d   : > { %1508 = vmatpush3.bf16.xpose.msra.mxu0 %v396_v46  ;;  %v307_v46 = vld [vmem:[%s2035_s23 + $0xf8] sm:$0xff] }
  0x3e   : > { %1663 = vmatprep.subr.msk.bf16.mxu0 %vm340_vm0, %v333_v47  ;;  %v290_v47 = vld [vmem:[%s2035_s23 + $0x70] sm:$0xff]  ;;  %v1125_v49 = vpack.c.bf16 %v307_v46, %v306_v45 }
  0x40   : > { %1545 = vmatprep.subr.bf16.mxu1 %v1125_v49 }
  0x45   : > { %1510 = vmatpush3.bf16.xpose.msra.mxu0 %v393_v53 }
  0x46   : > { %1664 = vmatprep.subr.msk.bf16.mxu0 %vm340_vm0, %v332_v54  ;;  %v1117_v54 = vpack.c.bf16 %v291_v50, %v290_v47  ;;  %v280_v47 = vld [vmem:[%s2035_s23 + $0x20] sm:$0xff] }
  0x48   : > { %1546 = vmatpush3.bf16.msra.mxu1 %v1117_v54  ;;  %v294_v54 = vld [vmem:[%s2035_s23 + $0x90] sm:$0xff] }
  0x49   : > { %1547 = vmatprep.subr.bf16.mxu1 %v1124_v55  ;;  %v295_v55 = vld [vmem:[%s2035_s23 + $0x98] sm:$0xff] }
  0x4d   : > { %1512 = vmatpush3.bf16.xpose.msra.mxu0 %v390_v58 }
  0x54   : > { %1514 = vmatmul.mubr.msk.bf16.vlgmr.msra.gmra.mxu0 %vm340_vm0, %v308_v21  ;;  %v317_v21 = vpack.c.bf16 %v231_v20, %v230_v19  ;;  %v300_v19 = vld [vmem:[%s2035_s23 + $0xc0] sm:$0xff]  ;;  %v301_v20 = vld [vmem:[%s2035_s23 + $0xc8] sm:$0xff] }
  0x55   : > { %1515 = vmatprep.mubr.msk.bf16.mxu0 %vm340_vm0, %v309_v61  ;;  %v1122_v22 = vpack.c.bf16 %v301_v20, %v300_v19 }
  0x5c   : > { %1516 = vmatmul.mubr.msk.bf16.gmra.mxu0 %vm340_vm0, %v309_v61  ;;  %v1116_v61 = vpack.c.bf16 %v289_v57, %v288_v56  ;;  %v1119_v57 = vpack.c.bf16 %v295_v55, %v294_v54 }
  0x5d   : > { %1517 = vmatprep.mubr.msk.bf16.mxu0 %vm340_vm0, %v310_v0 }
  0x5e   : > { %1548 = vmatpush3.bf16.msra.mxu1 %v1116_v61  ;;  %v279_v61 = vld [vmem:[%s2035_s23 + $0x18] sm:$0xff] }
  0x64   : > { %1518 = vmatmul.mubr.msk.bf16.gmra.mxu0 %vm340_vm0, %v310_v0 }
  0x65   : > { %1519 = vmatprep.mubr.msk.bf16.mxu0 %vm340_vm0, %v311_v3 }
  0x6c   : > { %1520 = vmatmul.mubr.msk.bf16.gmra.mxu0 %vm340_vm0, %v311_v3 }
  0x6d   : > { %1521 = vmatprep.mubr.msk.bf16.mxu0 %vm340_vm0, %v312_v6 }
  0x74   : > { %1522 = vmatmul.mubr.msk.bf16.gmra.mxu0 %vm340_vm0, %v312_v6 }
  0x75   : > { %1523 = vmatprep.mubr.msk.bf16.mxu0 %vm340_vm0, %v313_v9 }
  0x7c   : > { %1524 = vmatmul.mubr.msk.bf16.gmra.mxu0 %vm340_vm0, %v313_v9  ;;  %v303_v9 = vld [vmem:[%s2035_s23 + $0xd8] sm:$0xff] }
  0x7d   : > { %1525 = vmatprep.mubr.msk.bf16.mxu0 %vm340_vm0, %v314_v12  ;;  %v1123_v11 = vpack.c.bf16 %v303_v9, %v302_v8  ;;  %v293_v8 = vld [vmem:[%s2035_s23 + $0x88] sm:$0xff] }
  0x7f   : > { %1549 = vmatprep.subr.bf16.mxu1 %v1123_v11  ;;  %v276_v11 = vld [vmem:[%s2035_s23] sm:$0xff] }
  0x84   : > { %1526 = vmatmul.mubr.msk.bf16.gmra.mxu0 %vm340_vm0, %v314_v12  ;;  %v286_v12 = vld [vmem:[%s2035_s23 + $0x50] sm:$0xff] }
  0x85   : > { %1527 = vmatprep.mubr.msk.bf16.mxu0 %vm340_vm0, %v315_v15 }
  0x8c   : > { %1528 = vmatmul.mubr.msk.bf16.gmra.mxu0 %vm340_vm0, %v315_v15  ;;  %v1115_v15 = vpack.c.bf16 %v287_v13, %v286_v12  ;;  %v277_v12 = vld [vmem:[%s2035_s23 + $0x8] sm:$0xff] }
  0x8d   : > { %1529 = vmatprep.mubr.msk.bf16.mxu0 %vm340_vm0, %v316_v18 }
  0x8e   : > { %1550 = vmatpush3.bf16.msra.mxu1 %v1115_v15 }
  0x8f   : > { %1551 = vmatprep.subr.bf16.mxu1 %v1122_v22 }
  0x94   : > { %1530 = vmatmul.mubr.msk.bf16.gmra.mxu0 %vm340_vm0, %v316_v18 }
  0x95   : > { %1531 = vmatprep.mubr.msk.bf16.mxu0 %vm340_vm0, %v317_v21 }
  0x9c   : > { %1532 = vmatmul.mubr.msk.bf16.gmra.mxu0 %vm340_vm0, %v317_v21 }
  0x9d   : > { %1533 = vmatprep.mubr.msk.bf16.mxu0 %vm340_vm0, %v318_v24 }
  0xa4   : > { %1534 = vmatmul.mubr.msk.bf16.gmra.mxu0 %vm340_vm0, %v318_v24  ;;  %v285_v24 = vld [vmem:[%s2035_s23 + $0x48] sm:$0xff] }
  0xa5   : > { %1535 = vmatprep.mubr.msk.bf16.mxu0 %vm340_vm0, %v319_v27  ;;  %v1114_v26 = vpack.c.bf16 %v285_v24, %v284_v23 }
  0xa7   : > { %1552 = vmatpush3.bf16.msra.mxu1 %v1114_v26 }
  0xac   : > { %1536 = vmatmul.mubr.msk.bf16.gmra.mxu0 %vm340_vm0, %v319_v27 }
  0xad   : > { %1537 = vmatprep.mubr.msk.bf16.mxu0 %vm340_vm0, %v320_v30 }
  0xb4   : > { %1538 = vmatmul.mubr.msk.bf16.gmra.mxu0 %vm340_vm0, %v320_v30  ;;  %v298_v30 = vld [vmem:[%s2035_s23 + $0xb0] sm:$0xff] }
  0xb5   : > { %1539 = vmatprep.mubr.msk.bf16.mxu0 %vm340_vm0, %v321_v33 }
  0xbc   : > { %1540 = vmatmul.mubr.msk.bf16.gmra.mxu0 %vm340_vm0, %v321_v33  ;;  %v1121_v33 = vpack.c.bf16 %v299_v31, %v298_v30 }
  0xbd   : > { %1541 = vmatprep.mubr.msk.bf16.mxu0 %vm340_vm0, %v322_v36 }
  0xbe   : > { %1553 = vmatprep.subr.bf16.mxu1 %v1121_v33 }
  0xbf   : > { %1554 = vmatpush3.bf16.msra.mxu1 %v1113_v37 }
  0xc4   : > { %1542 = vmatmul.mubr.msk.bf16.gmra.mxu0 %vm340_vm0, %v322_v36 }
  0xc5   : > { %1543 = vmatprep.mubr.msk.bf16.mxu0 %vm340_vm0, %v323_v39 }
  0xcc   : > { %1544 = vmatmul.mubr.msk.bf16.gmra.mxu0 %vm340_vm0, %v323_v39 }
 0x114   : > { %v471_v40 = vpop.f32.mrf.mxu0 }
 0x115   : > { %v2027_v42 = vmul.f32 0.25, %v471_v40 }
 0x116   : > { %v473_v41 = vpop.f32.mrf.mxu0 }
 0x117   : > { %v2029_v43 = vmul.f32 0.25, %v473_v41  ;;  %v296_v41 = vld [vmem:[%s2035_s23 + $0xa0] sm:$0xff] }
 0x118   : > { %v475_v44 = vpop.f32.mrf.mxu0 }
 0x119   : > { %v694_v48 = vmax.f32 %v2027_v42, %v2029_v43  ;;  %v2047_v58 = vmul.f32 0.25, %v475_v44  ;;  %v297_v44 = vld [vmem:[%s2035_s23 + $0xa8] sm:$0xff] }
 0x11a   : > { %v477_v53 = vpop.f32.mrf.mxu0  ;;  %v1120_v46 = vpack.c.bf16 %v297_v44, %v296_v41 }
 0x11b   : > { %v2049_v59 = vmul.f32 0.25, %v477_v53  ;;  %695 = vmax.xlane.f32.xlu0 %v694_v48  ;;  %v281_v48 = vld [vmem:[%s2035_s23 + $0x28] sm:$0xff] }
 0x11c   : > { %v481_v60 = vpop.f32.mrf.mxu0  ;;  %v1112_v50 = vpack.c.bf16 %v281_v48, %v280_v47  ;;  %1555 = vmatprep.subr.bf16.mxu1 %v1120_v46 }
 0x11d   : > { %v697_v62 = vmax.f32 %v2047_v58, %v2049_v59  ;;  %v2053_v0 = vmul.f32 0.25, %v481_v60  ;;  %v278_v60 = vld [vmem:[%s2035_s23 + $0x10] sm:$0xff] }
 0x11e   : > { %v483_v63 = vpop.f32.mrf.mxu0  ;;  %1556 = vmatpush3.bf16.msra.mxu1 %v1112_v50 }
 0x11f   : > { %v2055_v1 = vmul.f32 0.25, %v483_v63  ;;  %698 = vmax.xlane.f32.xlu0 %v697_v62  ;;  %v1111_v63 = vpack.c.bf16 %v279_v61, %v278_v60  ;;  %1557 = vmatprep.subr.bf16.mxu1 %v1119_v57 }
 0x120   : > { %v485_v2 = vpop.f32.mrf.mxu0 }
 0x121   : > { %v700_v3 = vmax.f32 %v2053_v0, %v2055_v1  ;;  %v2059_v5 = vmul.f32 0.25, %v485_v2 }
 0x122   : > { %v487_v4 = vpop.f32.mrf.mxu0  ;;  %1558 = vmatpush3.bf16.msra.mxu1 %v1111_v63 }
 0x123   : > { %v2061_v6 = vmul.f32 0.25, %v487_v4  ;;  %701 = vmax.xlane.f32.xlu1 %v700_v3 }
 0x124   : > { %v491_v7 = vpop.f32.mrf.mxu0 }
 0x125   : > { %v703_v10 = vmax.f32 %v2059_v5, %v2061_v6  ;;  %v2069_v16 = vmul.f32 0.25, %v491_v7  ;;  %v292_v7 = vld [vmem:[%s2035_s23 + $0x80] sm:$0xff] }
 0x126   : > { %v493_v14 = vpop.f32.mrf.mxu0 }
 0x127   : > { %v2071_v17 = vmul.f32 0.25, %v493_v14  ;;  %704 = vmax.xlane.f32.xlu1 %v703_v10  ;;  %v1118_v10 = vpack.c.bf16 %v293_v8, %v292_v7  ;;  %v1110_v14 = vpack.c.bf16 %v277_v12, %v276_v11 }
 0x128   : > { %v495_v18 = vpop.f32.mrf.mxu0 }
 0x129   : > { %v706_v21 = vmax.f32 %v2069_v16, %v2071_v17  ;;  %v2079_v27 = vmul.f32 0.25, %v495_v18  ;;  %1559 = vmatprep.subr.bf16.mxu1 %v1118_v10 }
 0x12a   : > { %v497_v25 = vpop.f32.mrf.mxu0  ;;  %1560 = vmatpush3.bf16.msra.mxu1 %v1110_v14 }
 0x12b   : > { %v2081_v28 = vmul.f32 0.25, %v497_v25  ;;  %707 = vmax.xlane.f32.xlu0 %v706_v21 }
 0x12c   : > { %v501_v29 = vpop.f32.mrf.mxu0 }
 0x12d   : > { %v709_v32 = vmax.f32 %v2079_v27, %v2081_v28  ;;  %v2089_v38 = vmul.f32 0.25, %v501_v29 }
 0x12e   : > { %v503_v36 = vpop.f32.mrf.mxu0 }
 0x12f   : > { %v2091_v39 = vmul.f32 0.25, %v503_v36  ;;  %710 = vmax.xlane.f32.xlu1 %v709_v32 }
 0x130   : > { %v505_v40 = vpop.f32.mrf.mxu0 }
 0x131   : > { %v712_v45 = vmax.f32 %v2089_v38, %v2091_v39  ;;  %v2099_v51 = vmul.f32 0.25, %v505_v40 }
 0x132   : > { %v507_v49 = vpop.f32.mrf.mxu0 }
 0x133   : > { %v2101_v52 = vmul.f32 0.25, %v507_v49  ;;  %713 = vmax.xlane.f32.xlu0 %v712_v45 }
 0x134   : > { %v511_v53 = vpop.f32.mrf.mxu0 }
 0x135   : > { %v715_v56 = vmax.f32 %v2099_v51, %v2101_v52  ;;  %v2109_v2 = vmul.f32 0.25, %v511_v53 }
 0x136   : > { %v513_v62 = vpop.f32.mrf.mxu0 }
 0x137   : > { %v2111_v3 = vmul.f32 0.25, %v513_v62  ;;  %716 = vmax.xlane.f32.xlu1 %v715_v56 }
 0x138   : > { %v515_v4 = vpop.f32.mrf.mxu0 }
 0x139   : > { %v718_v9 = vmax.f32 %v2109_v2, %v2111_v3  ;;  %v2119_v15 = vmul.f32 0.25, %v515_v4 }
 0x13a   : > { %v517_v13 = vpop.f32.mrf.mxu0 }
 0x13b   : > { %v2121_v18 = vmul.f32 0.25, %v517_v13  ;;  %719 = vmax.xlane.f32.xlu0 %v718_v9 }
 0x13c   : > { %v521_v19 = vpop.f32.mrf.mxu0 }
 0x13d   : > { %v721_v20 = vmax.f32 %v2119_v15, %v2121_v18  ;;  %v2125_v22 = vmul.f32 0.25, %v521_v19 }
 0x13e   : > { %v523_v21 = vpop.f32.mrf.mxu0 }
 0x13f   : > { %v2127_v23 = vmul.f32 0.25, %v523_v21  ;;  %722 = vmax.xlane.f32.xlu1 %v721_v20 }
 0x140   : > { %v525_v24 = vpop.f32.mrf.mxu0 }
 0x141   : > { %v724_v25 = vmax.f32 %v2125_v22, %v2127_v23  ;;  %v2131_v29 = vmul.f32 0.25, %v525_v24 }
 0x142   : > { %v527_v26 = vpop.f32.mrf.mxu0 }
 0x143   : > { %v2133_v30 = vmul.f32 0.25, %v527_v26  ;;  %725 = vmax.xlane.f32.xlu0 %v724_v25 }
 0x144   : > { %v531_v31 = vpop.f32.mrf.mxu0 }
 0x145   : > { %v727_v32 = vmax.f32 %v2131_v29, %v2133_v30  ;;  %v2137_v34 = vmul.f32 0.25, %v531_v31 }
 0x146   : > { %v533_v33 = vpop.f32.mrf.mxu0 }
 0x147   : > { %v2139_v35 = vmul.f32 0.25, %v533_v33  ;;  %728 = vmax.xlane.f32.xlu1 %v727_v32 }
 0x148   : > { %v535_v36 = vpop.f32.mrf.mxu0 }
 0x149   : > { %v730_v37 = vmax.f32 %v2137_v34, %v2139_v35  ;;  %v2143_v41 = vmul.f32 0.25, %v535_v36 }
 0x14a   : > { %v537_v40 = vpop.f32.mrf.mxu0 }
 0x14b   : > { %v2145_v44 = vmul.f32 0.25, %v537_v40  ;;  %731 = vmax.xlane.f32.xlu0 %v730_v37 }
 0x14c   : > { %v541_v45 = vpop.f32.mrf.mxu0 }
 0x14d   : > { %v733_v46 = vmax.f32 %v2143_v41, %v2145_v44  ;;  %v2149_v48 = vmul.f32 0.25, %v541_v45 }
 0x14e   : > { %v543_v47 = vpop.f32.mrf.mxu0 }
 0x14f   : > { %v2151_v49 = vmul.f32 0.25, %v543_v47  ;;  %734 = vmax.xlane.f32.xlu1 %v733_v46 }
 0x150   : > { %v545_v50 = vpop.f32.mrf.mxu0 }
 0x151   : > { %v736_v53 = vmax.f32 %v2149_v48, %v2151_v49  ;;  %v2155_v55 = vmul.f32 0.25, %v545_v50 }
 0x152   : > { %v547_v54 = vpop.f32.mrf.mxu0 }
 0x153   : > { %v2157_v56 = vmul.f32 0.25, %v547_v54  ;;  %737 = vmax.xlane.f32.xlu0 %v736_v53 }
 0x154   : > { %v551_v57 = vpop.f32.mrf.mxu0 }
 0x155   : > { %v739_v60 = vmax.f32 %v2155_v55, %v2157_v56  ;;  %v2161_v62 = vmul.f32 0.25, %v551_v57 }
 0x156   : > { %v553_v61 = vpop.f32.mrf.mxu0 }
 0x157   : > { %v2163_v63 = vmul.f32 0.25, %v553_v61  ;;  %740 = vmax.xlane.f32.xlu1 %v739_v60 }
 0x158   : > { %v555_v4 = vpop.f32.mrf.mxu0 }
 0x159   : > { %v742_v7 = vmax.f32 %v2161_v62, %v2163_v63  ;;  %v2167_v9 = vmul.f32 0.25, %v555_v4 }
 0x15a   : > { %v557_v8 = vpop.f32.mrf.mxu0 }
 0x15b   : > { %v2169_v10 = vmul.f32 0.25, %v557_v8  ;;  %743 = vmax.xlane.f32.xlu0 %v742_v7 }
 0x15c   : > { %v561_v11 = vpop.f32.mrf.mxu0 }
 0x15d   : > { %v745_v12 = vmax.f32 %v2167_v9, %v2169_v10  ;;  %v2173_v14 = vmul.f32 0.25, %v561_v11 }
 0x15e   : > { %v563_v13 = vpop.f32.mrf.mxu0 }
 0x15f   : > { %v2175_v19 = vmul.f32 0.25, %v563_v13  ;;  %746 = vmax.xlane.f32.xlu1 %v745_v12 }
 0x160   : > { %v565_v20 = vpop.f32.mrf.mxu0 }
 0x161   : > { %v748_v21 = vmax.f32 %v2173_v14, %v2175_v19  ;;  %v2179_v25 = vmul.f32 0.25, %v565_v20 }
 0x162   : > { %v567_v24 = vpop.f32.mrf.mxu0 }
 0x163   : > { %v2181_v26 = vmul.f32 0.25, %v567_v24  ;;  %749 = vmax.xlane.f32.xlu0 %v748_v21 }
 0x164   : > { %v571_v31 = vpop.f32.mrf.mxu0 }
 0x165   : > { %v751_v32 = vmax.f32 %v2179_v25, %v2181_v26  ;;  %v2185_v36 = vmul.f32 0.25, %v571_v31 }
 0x166   : > { %v573_v33 = vpop.f32.mrf.mxu0 }
 0x167   : > { %v2187_v37 = vmul.f32 0.25, %v573_v33  ;;  %752 = vmax.xlane.f32.xlu1 %v751_v32 }
 0x168   : > { %v575_v40 = vpop.f32.mrf.mxu0 }
 0x169   : > { %v754_v45 = vmax.f32 %v2185_v36, %v2187_v37  ;;  %v2191_v47 = vmul.f32 0.25, %v575_v40 }
 0x16a   : > { %v577_v46 = vpop.f32.mrf.mxu0 }
 0x16b   : > { %v2193_v50 = vmul.f32 0.25, %v577_v46  ;;  %755 = vmax.xlane.f32.xlu0 %v754_v45 }
 0x16c   : > { %v581_v53 = vpop.f32.mrf.mxu0 }
 0x16d   : > { %v757_v54 = vmax.f32 %v2191_v47, %v2193_v50  ;;  %v2197_v60 = vmul.f32 0.25, %v581_v53 }
 0x16e   : > { %v583_v57 = vpop.f32.mrf.mxu0 }
 0x16f   : > { %v2199_v61 = vmul.f32 0.25, %v583_v57  ;;  %758 = vmax.xlane.f32.xlu1 %v757_v54 }
 0x170   : > { %v585_v4 = vpop.f32.mrf.mxu0 }
 0x171   : > { %v760_v7 = vmax.f32 %v2197_v60, %v2199_v61  ;;  %v2203_v11 = vmul.f32 0.25, %v585_v4 }
 0x172   : > { %v587_v8 = vpop.f32.mrf.mxu0 }
 0x173   : > { %v2205_v12 = vmul.f32 0.25, %v587_v8  ;;  %761 = vmax.xlane.f32.xlu0 %v760_v7 }
 0x174   : > { %v591_v13 = vpop.f32.mrf.mxu0 }
 0x175   : > { %v763_v20 = vmax.f32 %v2203_v11, %v2205_v12  ;;  %v2209_v24 = vmul.f32 0.25, %v591_v13 }
 0x176   : > { %v593_v21 = vpop.f32.mrf.mxu0 }
 0x177   : > { %v2211_v31 = vmul.f32 0.25, %v593_v21  ;;  %764 = vmax.xlane.f32.xlu1 %v763_v20 }
 0x178   : > { %v595_v32 = vpop.f32.mrf.mxu0 }
 0x179   : > { %v766_v33 = vmax.f32 %v2209_v24, %v2211_v31  ;;  %v2215_v45 = vmul.f32 0.25, %v595_v32 }
 0x17a   : > { %v597_v40 = vpop.f32.mrf.mxu0 }
 0x17b   : > { %2411 = vst [vmem:[#allocation2_spill] sm:$0xff] %v2215_v45  ;;  %v2217_v46 = vmul.f32 0.25, %v597_v40  ;;  %767 = vmax.xlane.f32.xlu0 %v766_v33 }
 0x17c   : > { %v601_v53 = vpop.f32.mrf.mxu0 }
 0x17d   : > { %2412 = vst [vmem:[#allocation3_spill] sm:$0xff] %v2217_v46  ;;  %v769_v54 = vmax.f32 %v2215_v45, %v2217_v46  ;;  %v2221_v4 = vmul.f32 0.25, %v601_v53 }
 0x17e   : > { %v603_v57 = vpop.f32.mrf.mxu0 }
 0x17f   : > { %2413 = vst [vmem:[#allocation4_spill] sm:$0xff] %v2221_v4  ;;  %v2223_v7 = vmul.f32 0.25, %v603_v57  ;;  %770 = vmax.xlane.f32.xlu1 %v769_v54 }
 0x180   : > { %v605_v8 = vpop.f32.mrf.mxu0 }
 0x181   : > { %2414 = vst [vmem:[#allocation5_spill] sm:$0xff] %v2223_v7  ;;  %v772_v13 = vmax.f32 %v2221_v4, %v2223_v7  ;;  %v2227_v21 = vmul.f32 0.25, %v605_v8 }
 0x182   : > { %v607_v20 = vpop.f32.mrf.mxu0 }
 0x183   : > { %2415 = vst [vmem:[#allocation6_spill] sm:$0xff] %v2227_v21  ;;  %v2229_v32 = vmul.f32 0.25, %v607_v20  ;;  %773 = vmax.xlane.f32.xlu0 %v772_v13 }
 0x184   : > { %v611_v33 = vpop.f32.mrf.mxu0 }
 0x185   : > { %2416 = vst [vmem:[#allocation7_spill] sm:$0xff] %v2229_v32  ;;  %v775_v40 = vmax.f32 %v2227_v21, %v2229_v32  ;;  %v2233_v53 = vmul.f32 0.25, %v611_v33 }
 0x186   : > { %v613_v46 = vpop.f32.mrf.mxu0 }
 0x187   : > { %2417 = vst [vmem:[#allocation8_spill] sm:$0xff] %v2233_v53  ;;  %v2235_v57 = vmul.f32 0.25, %v613_v46  ;;  %776 = vmax.xlane.f32.xlu1 %v775_v40 }
 0x188   : > { %v615_v54 = vpop.f32.mrf.mxu0 }
 0x189   : > { %2418 = vst [vmem:[#allocation9_spill] sm:$0xff] %v2235_v57  ;;  %v778_v7 = vmax.f32 %v2233_v53, %v2235_v57  ;;  %v2239_v8 = vmul.f32 0.25, %v615_v54 }
 0x18a   : > { %v617_v4 = vpop.f32.mrf.mxu0 }
 0x18b   : > { %2419 = vst [vmem:[#allocation10_spill] sm:$0xff] %v2239_v8  ;;  %v2241_v20 = vmul.f32 0.25, %v617_v4  ;;  %779 = vmax.xlane.f32.xlu0 %v778_v7 }
 0x18c   : > { %v621_v13 = vpop.f32.mrf.mxu0 }
 0x18d   : > { %2420 = vst [vmem:[#allocation11_spill] sm:$0xff] %v2241_v20  ;;  %v781_v32 = vmax.f32 %v2239_v8, %v2241_v20  ;;  %v2245_v33 = vmul.f32 0.25, %v621_v13 }
 0x18e   : > { %v623_v21 = vpop.f32.mrf.mxu0 }
 0x18f   : > { %2421 = vst [vmem:[#allocation12_spill] sm:$0xff] %v2245_v33  ;;  %v2247_v46 = vmul.f32 0.25, %v623_v21  ;;  %782 = vmax.xlane.f32.xlu1 %v781_v32 }
 0x190   : > { %v625_v40 = vpop.f32.mrf.mxu0 }
 0x191   : > { %2422 = vst [vmem:[#allocation13_spill] sm:$0xff] %v2247_v46  ;;  %v784_v57 = vmax.f32 %v2245_v33, %v2247_v46  ;;  %v2251_v54 = vmul.f32 0.25, %v625_v40 }
 0x192   : > { %v627_v53 = vpop.f32.mrf.mxu0 }
 0x193   : > { %v2253_v4 = vmul.f32 0.25, %v627_v53  ;;  %785 = vmax.xlane.f32.xlu0 %v784_v57 }
 0x195   : > { %2423 = vst [vmem:[#allocation14_spill] sm:$0xff] %v2253_v4  ;;  %v787_v7 = vmax.f32 %v2251_v54, %v2253_v4 }
 0x197   : > { %788 = vmax.xlane.f32.xlu1 %v787_v7 }
 0x1a4   : > { %v696_v20 = vpop.xlane.xlu0 %695 }
 0x1a5   : > { %v790_v13 = vsub.f32 %v2027_v42, %v696_v20  ;;  %v791_v21 = vsub.f32 %v2029_v43, %v696_v20 }
 0x1a7   : > { %v854_v32 = vmul.f32 1.442695, %v790_v13  ;;  %v856_v8 = vmul.f32 1.442695, %v791_v21 }
 0x1a8   : > { %v699_v45 = vpop.xlane.xlu0 %698 }
 0x1a9   : > { %1673 = vpow2.f32 %v854_v32  ;;  %v792_v46 = vsub.f32 %v2047_v58, %v699_v45  ;;  %v793_v40 = vsub.f32 %v2049_v59, %v699_v45 }
 0x1aa   : > { %1675 = vpow2.f32 %v856_v8 }
 0x1ab   : > { %v858_v53 = vmul.f32 1.442695, %v792_v46  ;;  %v860_v57 = vmul.f32 1.442695, %v793_v40 }
 0x1ac   : > { %v702_v33 = vpop.xlane.xlu1 %701 }
 0x1ad   : > { %1677 = vpow2.f32 %v858_v53  ;;  %v794_v7 = vsub.f32 %v2053_v0, %v702_v33  ;;  %v795_v4 = vsub.f32 %v2055_v1, %v702_v33 }
 0x1ae   : > { %1679 = vpow2.f32 %v860_v57 }
 0x1af   : > { %v862_v42 = vmul.f32 1.442695, %v794_v7  ;;  %v864_v43 = vmul.f32 1.442695, %v795_v4 }
 0x1b0   : > { %v705_v20 = vpop.xlane.xlu1 %704 }
 0x1b1   : > { %1681 = vpow2.f32 %v862_v42  ;;  %v796_v13 = vsub.f32 %v2059_v5, %v705_v20  ;;  %v797_v58 = vsub.f32 %v2061_v6, %v705_v20 }
 0x1b2   : > { %1683 = vpow2.f32 %v864_v43 }
 0x1b3   : > { %v866_v59 = vmul.f32 1.442695, %v796_v13  ;;  %v868_v45 = vmul.f32 1.442695, %v797_v58 }
 0x1b4   : > { %v708_v8 = vpop.xlane.xlu0 %707 }
 0x1b5   : > { %1685 = vpow2.f32 %v866_v59  ;;  %v798_v46 = vsub.f32 %v2069_v16, %v708_v8  ;;  %v799_v0 = vsub.f32 %v2071_v17, %v708_v8 }
 0x1b6   : > { %v1674_v21 = vpop.eup %1673  ;;  %1687 = vpow2.f32 %v868_v45 }
 0x1b7   : > { %v1676_v1 = vpop.eup %1675  ;;  %v870_v33 = vmul.f32 1.442695, %v798_v46  ;;  %v872_v4 = vmul.f32 1.442695, %v799_v0 }
 0x1b8   : > { %v711_v32 = vpop.xlane.xlu1 %710  ;;  %v982_v40 = vadd.f32 %v1676_v1, %v1674_v21 }
 0x1b9   : > { %1689 = vpow2.f32 %v870_v33  ;;  %v800_v5 = vsub.f32 %v2079_v27, %v711_v32  ;;  %v801_v6 = vsub.f32 %v2081_v28, %v711_v32 }
 0x1ba   : > { %v1678_v53 = vpop.eup %1677  ;;  %1691 = vpow2.f32 %v872_v4  ;;  %983 = vadd.xlane.f32.xlu0 %v982_v40 }
 0x1bb   : > { %v1680_v57 = vpop.eup %1679  ;;  %v874_v7 = vmul.f32 1.442695, %v800_v5  ;;  %v876_v16 = vmul.f32 1.442695, %v801_v6  ;;  %v1078_v42 = vpack.c.bf16 %v1678_v53, %v1674_v21 }
 0x1bc   : > { %v714_v17 = vpop.xlane.xlu0 %713  ;;  %v1079_v43 = vpack.c.bf16 %v1680_v57, %v1676_v1  ;;  %v985_v20 = vadd.f32 %v1680_v57, %v1678_v53 }
 0x1bd   : > { %1693 = vpow2.f32 %v874_v7  ;;  %v802_v13 = vsub.f32 %v2089_v38, %v714_v17  ;;  %v803_v58 = vsub.f32 %v2091_v39, %v714_v17 }
 0x1be   : > { %v1682_v59 = vpop.eup %1681  ;;  %1695 = vpow2.f32 %v876_v16  ;;  %1158 = vmatprep.mubr.bf16.mxu1 %v1079_v43  ;;  %986 = vadd.xlane.f32.xlu1 %v985_v20 }
 0x1bf   : > { %v1684_v27 = vpop.eup %1683  ;;  %v878_v28 = vmul.f32 1.442695, %v802_v13  ;;  %v880_v45 = vmul.f32 1.442695, %v803_v58  ;;  %1159 = vmatmul.mubr.bf16.vlgmr.msra.gmra.mxu1 %v1078_v42 }
 0x1c0   : > { %v717_v8 = vpop.xlane.xlu1 %716  ;;  %v988_v46 = vadd.f32 %v1684_v27, %v1682_v59 }
 0x1c1   : > { %1697 = vpow2.f32 %v878_v28  ;;  %v804_v0 = vsub.f32 %v2099_v51, %v717_v8  ;;  %v805_v21 = vsub.f32 %v2101_v52, %v717_v8 }
 0x1c2   : > { %v1686_v1 = vpop.eup %1685  ;;  %1699 = vpow2.f32 %v880_v45  ;;  %989 = vadd.xlane.f32.xlu0 %v988_v46 }
 0x1c3   : > { %v1688_v38 = vpop.eup %1687  ;;  %v882_v39 = vmul.f32 1.442695, %v804_v0  ;;  %v884_v33 = vmul.f32 1.442695, %v805_v21  ;;  %v1080_v4 = vpack.c.bf16 %v1686_v1, %v1682_v59 }
 0x1c4   : > { %v720_v32 = vpop.xlane.xlu0 %719  ;;  %v1081_v40 = vpack.c.bf16 %v1688_v38, %v1684_v27  ;;  %v991_v5 = vadd.f32 %v1688_v38, %v1686_v1 }
 0x1c5   : > { %1701 = vpow2.f32 %v882_v39  ;;  %v806_v6 = vsub.f32 %v2109_v2, %v720_v32  ;;  %v807_v53 = vsub.f32 %v2111_v3, %v720_v32 }
 0x1c6   : > { %v1690_v57 = vpop.eup %1689  ;;  %1703 = vpow2.f32 %v884_v33  ;;  %1166 = vmatprep.mubr.bf16.mxu1 %v1081_v40  ;;  %992 = vadd.xlane.f32.xlu1 %v991_v5 }
 0x1c7   : > { %v1692_v51 = vpop.eup %1691  ;;  %v886_v52 = vmul.f32 1.442695, %v806_v6  ;;  %v888_v7 = vmul.f32 1.442695, %v807_v53  ;;  %1167 = vmatmul.mubr.bf16.gmra.mxu1 %v1080_v4 }
 0x1c8   : > { %v723_v16 = vpop.xlane.xlu1 %722  ;;  %v994_v42 = vadd.f32 %v1692_v51, %v1690_v57 }
 0x1c9   : > { %1705 = vpow2.f32 %v886_v52  ;;  %v808_v17 = vsub.f32 %v2119_v15, %v723_v16  ;;  %v809_v43 = vsub.f32 %v2121_v18, %v723_v16 }
 0x1ca   : > { %v1694_v20 = vpop.eup %1693  ;;  %1707 = vpow2.f32 %v888_v7  ;;  %995 = vadd.xlane.f32.xlu0 %v994_v42 }
 0x1cb   : > { %v1696_v2 = vpop.eup %1695  ;;  %v890_v3 = vmul.f32 1.442695, %v808_v17  ;;  %v892_v13 = vmul.f32 1.442695, %v809_v43  ;;  %v1082_v58 = vpack.c.bf16 %v1694_v20, %v1690_v57 }
 0x1cc   : > { %v726_v59 = vpop.xlane.xlu0 %725  ;;  %v1083_v27 = vpack.c.bf16 %v1696_v2, %v1692_v51  ;;  %v997_v28 = vadd.f32 %v1696_v2, %v1694_v20 }
 0x1cd   : > { %1709 = vpow2.f32 %v890_v3  ;;  %v810_v45 = vsub.f32 %v2125_v22, %v726_v59  ;;  %v811_v8 = vsub.f32 %v2127_v23, %v726_v59 }
 0x1ce   : > { %v1698_v46 = vpop.eup %1697  ;;  %1711 = vpow2.f32 %v892_v13  ;;  %1174 = vmatprep.mubr.bf16.mxu1 %v1083_v27  ;;  %998 = vadd.xlane.f32.xlu1 %v997_v28 }
 0x1cf   : > { %v1700_v15 = vpop.eup %1699  ;;  %v894_v18 = vmul.f32 1.442695, %v810_v45  ;;  %v896_v0 = vmul.f32 1.442695, %v811_v8  ;;  %1175 = vmatmul.mubr.bf16.gmra.mxu1 %v1082_v58 }
 0x1d0   : > { %v729_v21 = vpop.xlane.xlu1 %728  ;;  %v1000_v1 = vadd.f32 %v1700_v15, %v1698_v46 }
 0x1d1   : > { %1713 = vpow2.f32 %v894_v18  ;;  %v812_v38 = vsub.f32 %v2131_v29, %v729_v21  ;;  %v813_v39 = vsub.f32 %v2133_v30, %v729_v21 }
 0x1d2   : > { %v1702_v33 = vpop.eup %1701  ;;  %1715 = vpow2.f32 %v896_v0  ;;  %1001 = vadd.xlane.f32.xlu0 %v1000_v1 }
 0x1d3   : > { %v1704_v22 = vpop.eup %1703  ;;  %v898_v23 = vmul.f32 1.442695, %v812_v38  ;;  %v900_v4 = vmul.f32 1.442695, %v813_v39  ;;  %v1084_v32 = vpack.c.bf16 %v1702_v33, %v1698_v46 }
 0x1d4   : > { %v732_v40 = vpop.xlane.xlu0 %731  ;;  %v1085_v5 = vpack.c.bf16 %v1704_v22, %v1700_v15  ;;  %v1003_v6 = vadd.f32 %v1704_v22, %v1702_v33 }
 0x1d5   : > { %1717 = vpow2.f32 %v898_v23  ;;  %v814_v53 = vsub.f32 %v2137_v34, %v732_v40  ;;  %v815_v57 = vsub.f32 %v2139_v35, %v732_v40 }
 0x1d6   : > { %v1706_v51 = vpop.eup %1705  ;;  %1719 = vpow2.f32 %v900_v4  ;;  %1182 = vmatprep.mubr.bf16.mxu1 %v1085_v5  ;;  %1004 = vadd.xlane.f32.xlu1 %v1003_v6 }
 0x1d7   : > { %v1708_v29 = vpop.eup %1707  ;;  %v902_v30 = vmul.f32 1.442695, %v814_v53  ;;  %v904_v52 = vmul.f32 1.442695, %v815_v57  ;;  %1183 = vmatmul.mubr.bf16.gmra.mxu1 %v1084_v32 }
 0x1d8   : > { %v735_v7 = vpop.xlane.xlu1 %734  ;;  %v1006_v16 = vadd.f32 %v1708_v29, %v1706_v51 }
 0x1d9   : > { %1721 = vpow2.f32 %v902_v30  ;;  %v816_v42 = vsub.f32 %v2143_v41, %v735_v7  ;;  %v817_v17 = vsub.f32 %v2145_v44, %v735_v7 }
 0x1da   : > { %v1710_v43 = vpop.eup %1709  ;;  %1723 = vpow2.f32 %v904_v52  ;;  %1007 = vadd.xlane.f32.xlu0 %v1006_v16 }
 0x1db   : > { %v1712_v34 = vpop.eup %1711  ;;  %v906_v35 = vmul.f32 1.442695, %v816_v42  ;;  %v908_v20 = vmul.f32 1.442695, %v817_v17  ;;  %v1086_v2 = vpack.c.bf16 %v1710_v43, %v1706_v51 }
 0x1dc   : > { %v738_v3 = vpop.xlane.xlu0 %737  ;;  %v1087_v13 = vpack.c.bf16 %v1712_v34, %v1708_v29  ;;  %v1009_v58 = vadd.f32 %v1712_v34, %v1710_v43 }
 0x1dd   : > { %1725 = vpow2.f32 %v906_v35  ;;  %v818_v59 = vsub.f32 %v2149_v48, %v738_v3  ;;  %v819_v27 = vsub.f32 %v2151_v49, %v738_v3 }
 0x1de   : > { %v1714_v28 = vpop.eup %1713  ;;  %1727 = vpow2.f32 %v908_v20  ;;  %1190 = vmatprep.mubr.bf16.mxu1 %v1087_v13  ;;  %1010 = vadd.xlane.f32.xlu1 %v1009_v58 }
 0x1df   : > { %v1716_v41 = vpop.eup %1715  ;;  %v910_v44 = vmul.f32 1.442695, %v818_v59  ;;  %v912_v45 = vmul.f32 1.442695, %v819_v27  ;;  %1191 = vmatmul.mubr.bf16.gmra.mxu1 %v1086_v2 }
 0x1e0   : > { %v741_v8 = vpop.xlane.xlu1 %740  ;;  %v1012_v46 = vadd.f32 %v1716_v41, %v1714_v28 }
 0x1e1   : > { %1729 = vpow2.f32 %v910_v44  ;;  %v820_v15 = vsub.f32 %v2155_v55, %v741_v8  ;;  %v821_v18 = vsub.f32 %v2157_v56, %v741_v8 }
 0x1e2   : > { %v1718_v0 = vpop.eup %1717  ;;  %1731 = vpow2.f32 %v912_v45  ;;  %1013 = vadd.xlane.f32.xlu0 %v1012_v46 }
 0x1e3   : > { %v1720_v48 = vpop.eup %1719  ;;  %v914_v49 = vmul.f32 1.442695, %v820_v15  ;;  %v916_v21 = vmul.f32 1.442695, %v821_v18  ;;  %v1088_v1 = vpack.c.bf16 %v1718_v0, %v1714_v28 }
 0x1e4   : > { %v744_v38 = vpop.xlane.xlu0 %743  ;;  %v1089_v39 = vpack.c.bf16 %v1720_v48, %v1716_v41  ;;  %v1015_v33 = vadd.f32 %v1720_v48, %v1718_v0 }
 0x1e5   : > { %1733 = vpow2.f32 %v914_v49  ;;  %v822_v22 = vsub.f32 %v2161_v62, %v744_v38  ;;  %v823_v23 = vsub.f32 %v2163_v63, %v744_v38 }
 0x1e6   : > { %v1722_v4 = vpop.eup %1721  ;;  %1735 = vpow2.f32 %v916_v21  ;;  %1198 = vmatprep.mubr.bf16.mxu1 %v1089_v39  ;;  %1016 = vadd.xlane.f32.xlu1 %v1015_v33 }
 0x1e7   : > { %v1724_v55 = vpop.eup %1723  ;;  %v918_v56 = vmul.f32 1.442695, %v822_v22  ;;  %v920_v32 = vmul.f32 1.442695, %v823_v23  ;;  %1199 = vmatmul.mubr.bf16.gmra.mxu1 %v1088_v1 }
 0x1e8   : > { %v747_v40 = vpop.xlane.xlu1 %746  ;;  %v1018_v5 = vadd.f32 %v1724_v55, %v1722_v4 }
 0x1e9   : > { %1737 = vpow2.f32 %v918_v56  ;;  %v824_v6 = vsub.f32 %v2167_v9, %v747_v40  ;;  %v825_v53 = vsub.f32 %v2169_v10, %v747_v40 }
 0x1ea   : > { %v1726_v57 = vpop.eup %1725  ;;  %1739 = vpow2.f32 %v920_v32  ;;  %1019 = vadd.xlane.f32.xlu0 %v1018_v5 }
 0x1eb   : > { %v1728_v62 = vpop.eup %1727  ;;  %v922_v63 = vmul.f32 1.442695, %v824_v6  ;;  %v924_v51 = vmul.f32 1.442695, %v825_v53  ;;  %v1090_v29 = vpack.c.bf16 %v1726_v57, %v1722_v4 }
 0x1ec   : > { %v750_v30 = vpop.xlane.xlu0 %749  ;;  %v1091_v52 = vpack.c.bf16 %v1728_v62, %v1724_v55  ;;  %v1021_v7 = vadd.f32 %v1728_v62, %v1726_v57 }
 0x1ed   : > { %1741 = vpow2.f32 %v922_v63  ;;  %v826_v16 = vsub.f32 %v2173_v14, %v750_v30  ;;  %v827_v42 = vsub.f32 %v2175_v19, %v750_v30 }
 0x1ee   : > { %v1730_v17 = vpop.eup %1729  ;;  %1743 = vpow2.f32 %v924_v51  ;;  %1206 = vmatprep.mubr.bf16.mxu1 %v1091_v52  ;;  %1022 = vadd.xlane.f32.xlu1 %v1021_v7 }
 0x1ef   : > { %v1732_v9 = vpop.eup %1731  ;;  %v926_v10 = vmul.f32 1.442695, %v826_v16  ;;  %v928_v43 = vmul.f32 1.442695, %v827_v42  ;;  %1207 = vmatmul.mubr.bf16.gmra.mxu1 %v1090_v29  ;;  %v2424_v42 = vld [vmem:[#allocation2_spill] sm:$0xff] }
 0x1f0   : > { %v753_v34 = vpop.xlane.xlu1 %752  ;;  %v1024_v35 = vadd.f32 %v1732_v9, %v1730_v17 }
 0x1f1   : > { %1745 = vpow2.f32 %v926_v10  ;;  %v828_v20 = vsub.f32 %v2179_v25, %v753_v34  ;;  %v829_v2 = vsub.f32 %v2181_v26, %v753_v34 }
 0x1f2   : > { %v1734_v3 = vpop.eup %1733  ;;  %1747 = vpow2.f32 %v928_v43  ;;  %1025 = vadd.xlane.f32.xlu0 %v1024_v35 }
 0x1f3   : > { %v1736_v14 = vpop.eup %1735  ;;  %v930_v19 = vmul.f32 1.442695, %v828_v20  ;;  %v932_v13 = vmul.f32 1.442695, %v829_v2  ;;  %v1092_v58 = vpack.c.bf16 %v1734_v3, %v1730_v17 }
 0x1f4   : > { %v756_v59 = vpop.xlane.xlu0 %755  ;;  %v1093_v27 = vpack.c.bf16 %v1736_v14, %v1732_v9  ;;  %v1027_v28 = vadd.f32 %v1736_v14, %v1734_v3  ;;  %v2425_v9 = vld [vmem:[#allocation3_spill] sm:$0xff]  ;;  %v2426_v14 = vld [vmem:[#allocation4_spill] sm:$0xff] }
 0x1f5   : > { %1749 = vpow2.f32 %v930_v19  ;;  %v830_v41 = vsub.f32 %v2185_v36, %v756_v59  ;;  %v831_v44 = vsub.f32 %v2187_v37, %v756_v59 }
 0x1f6   : > { %v1738_v45 = vpop.eup %1737  ;;  %1751 = vpow2.f32 %v932_v13  ;;  %1214 = vmatprep.mubr.bf16.mxu1 %v1093_v27  ;;  %1028 = vadd.xlane.f32.xlu1 %v1027_v28  ;;  %v2427_v13 = vld [vmem:[#allocation5_spill] sm:$0xff] }
 0x1f7   : > { %v1740_v25 = vpop.eup %1739  ;;  %v934_v26 = vmul.f32 1.442695, %v830_v41  ;;  %v936_v8 = vmul.f32 1.442695, %v831_v44  ;;  %1215 = vmatmul.mubr.bf16.gmra.mxu1 %v1092_v58 }
 0x1f8   : > { %v759_v46 = vpop.xlane.xlu1 %758  ;;  %v1030_v15 = vadd.f32 %v1740_v25, %v1738_v45 }
 0x1f9   : > { %1753 = vpow2.f32 %v934_v26  ;;  %v832_v18 = vsub.f32 %v2191_v47, %v759_v46  ;;  %v833_v0 = vsub.f32 %v2193_v50, %v759_v46 }
 0x1fa   : > { %v1742_v48 = vpop.eup %1741  ;;  %1755 = vpow2.f32 %v936_v8  ;;  %1031 = vadd.xlane.f32.xlu0 %v1030_v15  ;;  %v2429_v8 = vld [vmem:[#allocation7_spill] sm:$0xff] }
 0x1fb   : > { %v1744_v36 = vpop.eup %1743  ;;  %v938_v37 = vmul.f32 1.442695, %v832_v18  ;;  %v940_v49 = vmul.f32 1.442695, %v833_v0  ;;  %v1094_v21 = vpack.c.bf16 %v1742_v48, %v1738_v45 }
 0x1fc   : > { %v762_v1 = vpop.xlane.xlu0 %761  ;;  %v1095_v38 = vpack.c.bf16 %v1744_v36, %v1740_v25  ;;  %v1033_v39 = vadd.f32 %v1744_v36, %v1742_v48  ;;  %v2428_v25 = vld [vmem:[#allocation6_spill] sm:$0xff] }
 0x1fd   : > { %1757 = vpow2.f32 %v938_v37  ;;  %v834_v33 = vsub.f32 %v2197_v60, %v762_v1  ;;  %v835_v22 = vsub.f32 %v2199_v61, %v762_v1  ;;  %v2430_v1 = vld [vmem:[#allocation8_spill] sm:$0xff] }
 0x1fe   : > { %v1746_v23 = vpop.eup %1745  ;;  %1759 = vpow2.f32 %v940_v49  ;;  %1222 = vmatprep.mubr.bf16.mxu1 %v1095_v38  ;;  %1034 = vadd.xlane.f32.xlu1 %v1033_v39  ;;  %v2431_v39 = vld [vmem:[#allocation9_spill] sm:$0xff] }
 0x1ff   : > { %v1748_v47 = vpop.eup %1747  ;;  %v942_v50 = vmul.f32 1.442695, %v834_v33  ;;  %v944_v4 = vmul.f32 1.442695, %v835_v22  ;;  %1223 = vmatmul.mubr.bf16.gmra.mxu1 %v1094_v21 }
 0x200   : > { %v765_v55 = vpop.xlane.xlu1 %764  ;;  %v1036_v56 = vadd.f32 %v1748_v47, %v1746_v23 }
 0x201   : > { %1761 = vpow2.f32 %v942_v50  ;;  %v836_v32 = vsub.f32 %v2203_v11, %v765_v55  ;;  %v837_v40 = vsub.f32 %v2205_v12, %v765_v55 }
 0x202   : > { %v1750_v5 = vpop.eup %1749  ;;  %1763 = vpow2.f32 %v944_v4  ;;  %1037 = vadd.xlane.f32.xlu0 %v1036_v56  ;;  %v2432_v56 = vld [vmem:[#allocation10_spill] sm:$0xff] }
 0x203   : > { %v1752_v60 = vpop.eup %1751  ;;  %v946_v61 = vmul.f32 1.442695, %v836_v32  ;;  %v948_v6 = vmul.f32 1.442695, %v837_v40  ;;  %v1096_v53 = vpack.c.bf16 %v1750_v5, %v1746_v23  ;;  %v2433_v40 = vld [vmem:[#allocation11_spill] sm:$0xff] }
 0x204   : > { %v768_v57 = vpop.xlane.xlu0 %767  ;;  %v1097_v62 = vpack.c.bf16 %v1752_v60, %v1748_v47  ;;  %v1039_v63 = vadd.f32 %v1752_v60, %v1750_v5 }
 0x205   : > { %1765 = vpow2.f32 %v946_v61  ;;  %v838_v51 = vsub.f32 %v2209_v24, %v768_v57  ;;  %v839_v29 = vsub.f32 %v2211_v31, %v768_v57 }
 0x206   : > { %v1754_v30 = vpop.eup %1753  ;;  %1767 = vpow2.f32 %v948_v6  ;;  %1230 = vmatprep.mubr.bf16.mxu1 %v1097_v62  ;;  %1040 = vadd.xlane.f32.xlu1 %v1039_v63 }
 0x207   : > { %v1756_v11 = vpop.eup %1755  ;;  %v950_v12 = vmul.f32 1.442695, %v838_v51  ;;  %v952_v52 = vmul.f32 1.442695, %v839_v29  ;;  %1231 = vmatmul.mubr.bf16.gmra.mxu1 %v1096_v53  ;;  %v2434_v29 = vld [vmem:[#allocation12_spill] sm:$0xff] }
 0x208   : > { %v771_v7 = vpop.xlane.xlu1 %770  ;;  %v1042_v16 = vadd.f32 %v1756_v11, %v1754_v30 }
 0x209   : > { %1769 = vpow2.f32 %v950_v12  ;;  %v840_v17 = vsub.f32 %v2424_v42, %v771_v7  ;;  %v841_v10 = vsub.f32 %v2425_v9, %v771_v7 }
 0x20a   : > { %v1758_v43 = vpop.eup %1757  ;;  %1771 = vpow2.f32 %v952_v52  ;;  %1043 = vadd.xlane.f32.xlu0 %v1042_v16 }
 0x20b   : > { %v1760_v24 = vpop.eup %1759  ;;  %v954_v31 = vmul.f32 1.442695, %v840_v17  ;;  %v956_v34 = vmul.f32 1.442695, %v841_v10  ;;  %v1098_v35 = vpack.c.bf16 %v1758_v43, %v1754_v30 }
 0x20c   : > { %v774_v20 = vpop.xlane.xlu0 %773  ;;  %v1099_v2 = vpack.c.bf16 %v1760_v24, %v1756_v11  ;;  %v1045_v3 = vadd.f32 %v1760_v24, %v1758_v43  ;;  %v2435_v11 = vld [vmem:[#allocation13_spill] sm:$0xff]  ;;  %v2436_v43 = vld [vmem:[#allocation14_spill] sm:$0xff] }
 0x20d   : > { %1773 = vpow2.f32 %v954_v31  ;;  %v842_v19 = vsub.f32 %v2426_v14, %v774_v20  ;;  %v843_v58 = vsub.f32 %v2427_v13, %v774_v20 }
 0x20e   : > { %v1762_v59 = vpop.eup %1761  ;;  %1775 = vpow2.f32 %v956_v34  ;;  %1238 = vmatprep.mubr.bf16.mxu1 %v1099_v2  ;;  %1046 = vadd.xlane.f32.xlu1 %v1045_v3 }
 0x20f   : > { %v1764_v27 = vpop.eup %1763  ;;  %v958_v28 = vmul.f32 1.442695, %v842_v19  ;;  %v960_v41 = vmul.f32 1.442695, %v843_v58  ;;  %1239 = vmatmul.mubr.bf16.gmra.mxu1 %v1098_v35 }
 0x210   : > { %v777_v44 = vpop.xlane.xlu1 %776  ;;  %v1048_v45 = vadd.f32 %v1764_v27, %v1762_v59 }
 0x211   : > { %1777 = vpow2.f32 %v958_v28  ;;  %v844_v26 = vsub.f32 %v2428_v25, %v777_v44  ;;  %v845_v46 = vsub.f32 %v2429_v8, %v777_v44 }
 0x212   : > { %v1766_v15 = vpop.eup %1765  ;;  %1779 = vpow2.f32 %v960_v41  ;;  %1049 = vadd.xlane.f32.xlu0 %v1048_v45 }
 0x213   : > { %v1768_v18 = vpop.eup %1767  ;;  %v962_v0 = vmul.f32 1.442695, %v844_v26  ;;  %v964_v48 = vmul.f32 1.442695, %v845_v46  ;;  %v1100_v36 = vpack.c.bf16 %v1766_v15, %v1762_v59 }
 0x214   : > { %v780_v37 = vpop.xlane.xlu0 %779  ;;  %v1101_v49 = vpack.c.bf16 %v1768_v18, %v1764_v27  ;;  %v1051_v21 = vadd.f32 %v1768_v18, %v1766_v15 }
 0x215   : > { %1781 = vpow2.f32 %v962_v0  ;;  %v846_v38 = vsub.f32 %v2430_v1, %v780_v37  ;;  %v847_v33 = vsub.f32 %v2431_v39, %v780_v37 }
 0x216   : > { %v1770_v22 = vpop.eup %1769  ;;  %1783 = vpow2.f32 %v964_v48  ;;  %1246 = vmatprep.mubr.bf16.mxu1 %v1101_v49  ;;  %1052 = vadd.xlane.f32.xlu1 %v1051_v21 }
 0x217   : > { %v1772_v23 = vpop.eup %1771  ;;  %v966_v47 = vmul.f32 1.442695, %v846_v38  ;;  %v968_v50 = vmul.f32 1.442695, %v847_v33  ;;  %1247 = vmatmul.mubr.bf16.gmra.mxu1 %v1100_v36 }
 0x218   : > { %v783_v4 = vpop.xlane.xlu1 %782  ;;  %v1054_v55 = vadd.f32 %v1772_v23, %v1770_v22 }
 0x219   : > { %1785 = vpow2.f32 %v966_v47  ;;  %v848_v32 = vsub.f32 %v2432_v56, %v783_v4  ;;  %v849_v5 = vsub.f32 %v2433_v40, %v783_v4 }
 0x21a   : > { %v1774_v60 = vpop.eup %1773  ;;  %1787 = vpow2.f32 %v968_v50  ;;  %1055 = vadd.xlane.f32.xlu0 %v1054_v55 }
 0x21b   : > { %v1776_v61 = vpop.eup %1775  ;;  %v970_v6 = vmul.f32 1.442695, %v848_v32  ;;  %v972_v53 = vmul.f32 1.442695, %v849_v5  ;;  %v1102_v57 = vpack.c.bf16 %v1774_v60, %v1770_v22 }
 0x21c   : > { %v786_v62 = vpop.xlane.xlu0 %785  ;;  %v1103_v63 = vpack.c.bf16 %v1776_v61, %v1772_v23  ;;  %v1057_v51 = vadd.f32 %v1776_v61, %v1774_v60 }
 0x21d   : > { %1789 = vpow2.f32 %v970_v6  ;;  %v850_v30 = vsub.f32 %v2434_v29, %v786_v62  ;;  %v851_v12 = vsub.f32 %v2435_v11, %v786_v62 }
 0x21e   : > { %v1778_v52 = vpop.eup %1777  ;;  %1791 = vpow2.f32 %v972_v53  ;;  %1254 = vmatprep.mubr.bf16.mxu1 %v1103_v63  ;;  %1058 = vadd.xlane.f32.xlu1 %v1057_v51 }
 0x21f   : > { %v1780_v7 = vpop.eup %1779  ;;  %v974_v16 = vmul.f32 1.442695, %v850_v30  ;;  %v976_v42 = vmul.f32 1.442695, %v851_v12  ;;  %1255 = vmatmul.mubr.bf16.gmra.mxu1 %v1102_v57 }
 0x220   : > { %v789_v17 = vpop.xlane.xlu1 %788  ;;  %v1060_v9 = vadd.f32 %v1780_v7, %v1778_v52 }
 0x221   : > { %1793 = vpow2.f32 %v974_v16  ;;  %v852_v10 = vsub.f32 %v2251_v54, %v789_v17  ;;  %v853_v24 = vsub.f32 %v2436_v43, %v789_v17 }
 0x222   : > { %v1782_v31 = vpop.eup %1781  ;;  %1795 = vpow2.f32 %v976_v42  ;;  %1061 = vadd.xlane.f32.xlu0 %v1060_v9 }
 0x223   : > { %v1784_v34 = vpop.eup %1783  ;;  %v978_v35 = vmul.f32 1.442695, %v852_v10  ;;  %v980_v20 = vmul.f32 1.442695, %v853_v24  ;;  %v1104_v2 = vpack.c.bf16 %v1782_v31, %v1778_v52 }
 0x224   : > { %v1105_v3 = vpack.c.bf16 %v1784_v34, %v1780_v7  ;;  %v1063_v14 = vadd.f32 %v1784_v34, %v1782_v31 }
 0x225   : > { %1797 = vpow2.f32 %v978_v35 }
 0x226   : > { %v1786_v19 = vpop.eup %1785  ;;  %1799 = vpow2.f32 %v980_v20  ;;  %1262 = vmatprep.mubr.bf16.mxu1 %v1105_v3  ;;  %1064 = vadd.xlane.f32.xlu1 %v1063_v14 }
 0x227   : > { %v1788_v13 = vpop.eup %1787  ;;  %1263 = vmatmul.mubr.bf16.gmra.mxu1 %v1104_v2 }
 0x228   : > { %v1066_v58 = vadd.f32 %v1788_v13, %v1786_v19 }
 0x22a   : > { %v1790_v54 = vpop.eup %1789  ;;  %1067 = vadd.xlane.f32.xlu0 %v1066_v58 }
 0x22b   : > { %v1792_v59 = vpop.eup %1791  ;;  %v1106_v27 = vpack.c.bf16 %v1790_v54, %v1786_v19 }
 0x22c   : > { %v1107_v28 = vpack.c.bf16 %v1792_v59, %v1788_v13  ;;  %v1069_v41 = vadd.f32 %v1792_v59, %v1790_v54 }
 0x22e   : > { %v1794_v44 = vpop.eup %1793  ;;  %1270 = vmatprep.mubr.bf16.mxu1 %v1107_v28  ;;  %1070 = vadd.xlane.f32.xlu1 %v1069_v41 }
 0x22f   : > { %v1796_v45 = vpop.eup %1795  ;;  %1271 = vmatmul.mubr.bf16.gmra.mxu1 %v1106_v27 }
 0x230   : > { %v1072_v25 = vadd.f32 %v1796_v45, %v1794_v44 }
 0x232   : > { %v1798_v26 = vpop.eup %1797  ;;  %1073 = vadd.xlane.f32.xlu0 %v1072_v25 }
 0x233   : > { %v1800_v8 = vpop.eup %1799  ;;  %v1108_v46 = vpack.c.bf16 %v1798_v26, %v1794_v44 }
 0x234   : > { %v1109_v15 = vpack.c.bf16 %v1800_v8, %v1796_v45  ;;  %v1075_v18 = vadd.f32 %v1800_v8, %v1798_v26 }
 0x236   : > { %1278 = vmatprep.mubr.bf16.mxu1 %v1109_v15  ;;  %1076 = vadd.xlane.f32.xlu1 %v1075_v18 }
 0x237   : > { %1279 = vmatmul.mubr.bf16.gmra.mxu1 %v1108_v46 }
 0x243   : > { %v984_v0 = vpop.xlane.xlu0 %983 }
 0x244   : > { %1801 = vrcp.f32 %v984_v0 }
 0x247   : > { %v987_v48 = vpop.xlane.xlu1 %986 }
 0x248   : > { %1803 = vrcp.f32 %v987_v48 }
 0x24b   : > { %v990_v36 = vpop.xlane.xlu0 %989 }
 0x24c   : > { %1805 = vrcp.f32 %v990_v36 }
 0x24f   : > { %v993_v37 = vpop.xlane.xlu1 %992 }
 0x250   : > { %1807 = vrcp.f32 %v993_v37 }
 0x251   : > { %v1802_v38 = vpop.eup %1801 }
 0x253   : > { %v996_v39 = vpop.xlane.xlu0 %995 }
 0x254   : > { %1809 = vrcp.f32 %v996_v39 }
 0x255   : > { %v1804_v50 = vpop.eup %1803 }
 0x257   : > { %v999_v4 = vpop.xlane.xlu1 %998 }
 0x258   : > { %1811 = vrcp.f32 %v999_v4 }
 0x259   : > { %v1806_v5 = vpop.eup %1805 }
 0x25b   : > { %v1002_v60 = vpop.xlane.xlu0 %1001 }
 0x25c   : > { %1813 = vrcp.f32 %v1002_v60 }
 0x25d   : > { %v1808_v62 = vpop.eup %1807 }
 0x25f   : > { %v1005_v63 = vpop.xlane.xlu1 %1004 }
 0x260   : > { %1815 = vrcp.f32 %v1005_v63 }
 0x261   : > { %v1810_v12 = vpop.eup %1809 }
 0x263   : > { %v1008_v52 = vpop.xlane.xlu0 %1007 }
 0x264   : > { %1817 = vrcp.f32 %v1008_v52 }
 0x265   : > { %v1812_v9 = vpop.eup %1811 }
 0x267   : > { %v1011_v10 = vpop.xlane.xlu1 %1010 }
 0x268   : > { %1819 = vrcp.f32 %v1011_v10 }
 0x269   : > { %v1814_v35 = vpop.eup %1813 }
 0x26b   : > { %v1014_v20 = vpop.xlane.xlu0 %1013 }
 0x26c   : > { %1821 = vrcp.f32 %v1014_v20 }
 0x26d   : > { %v1816_v13 = vpop.eup %1815 }
 0x26f   : > { %v1017_v58 = vpop.xlane.xlu1 %1016 }
 0x270   : > { %1823 = vrcp.f32 %v1017_v58 }
 0x271   : > { %v1818_v41 = vpop.eup %1817 }
 0x273   : > { %v1020_v44 = vpop.xlane.xlu0 %1019 }
 0x274   : > { %1825 = vrcp.f32 %v1020_v44 }
 0x275   : > { %v1820_v46 = vpop.eup %1819 }
 0x277   : > { %v1023_v15 = vpop.xlane.xlu1 %1022 }
 0x278   : > { %1827 = vrcp.f32 %v1023_v15 }
 0x279   : > { %v1822_v37 = vpop.eup %1821 }
 0x27f   : > { %v1561_v49 = vpop.f32.mrf.mxu1 }
 0x281   : > { %v1562_v21 = vpop.f32.mrf.mxu1 }
 0x282   : > { %v1563_v1 = vadd.f32 %v1562_v21, %v1561_v49  ;;  %v1026_v49 = vpop.xlane.xlu0 %1025 }
 0x283   : > { %v1564_v33 = vpop.f32.mrf.mxu1  ;;  %1829 = vrcp.f32 %v1026_v49 }
 0x284   : > { %v1288_v22 = vmul.f32 %v1802_v38, %v1563_v1 }
 0x285   : > { %v1565_v23 = vpop.f32.mrf.mxu1 }
 0x286   : > { %1351 = vst.msk [vmem:[%s2325_s26] sm:$0xff] %vm340_vm0, %v1288_v22  ;;  %v1566_v47 = vadd.f32 %v1565_v23, %v1564_v33  ;;  %v1824_v33 = vpop.eup %1823  ;;  %v1029_v22 = vpop.xlane.xlu1 %1028 }
 0x287   : > { %v1567_v55 = vpop.f32.mrf.mxu1  ;;  %1831 = vrcp.f32 %v1029_v22 }
 0x288   : > { %v1290_v56 = vmul.f32 %v1804_v50, %v1566_v47 }
 0x289   : > { %v1568_v32 = vpop.f32.mrf.mxu1 }
 0x28a   : > { %1352 = vst.msk [vmem:[%s2325_s26 + $0x8] sm:$0xff] %vm340_vm0, %v1290_v56  ;;  %v1569_v40 = vadd.f32 %v1568_v32, %v1567_v55  ;;  %v1826_v55 = vpop.eup %1825  ;;  %v1032_v56 = vpop.xlane.xlu0 %1031 }
 0x28b   : > { %v1570_v61 = vpop.f32.mrf.mxu1  ;;  %1833 = vrcp.f32 %v1032_v56 }
 0x28c   : > { %v1292_v6 = vmul.f32 %v1806_v5, %v1569_v40 }
 0x28d   : > { %v1571_v53 = vpop.f32.mrf.mxu1 }
 0x28e   : > { %1353 = vst.msk [vmem:[%s2325_s26 + $0x10] sm:$0xff] %vm340_vm0, %v1292_v6  ;;  %v1572_v57 = vadd.f32 %v1571_v53, %v1570_v61  ;;  %v1828_v61 = vpop.eup %1827  ;;  %v1035_v6 = vpop.xlane.xlu1 %1034 }
 0x28f   : > { %v1573_v51 = vpop.f32.mrf.mxu1  ;;  %1835 = vrcp.f32 %v1035_v6 }
 0x290   : > { %v1294_v29 = vmul.f32 %v1808_v62, %v1572_v57 }
 0x291   : > { %v1574_v30 = vpop.f32.mrf.mxu1 }
 0x292   : > { %1354 = vst.msk [vmem:[%s2325_s26 + $0x18] sm:$0xff] %vm340_vm0, %v1294_v29  ;;  %v1575_v11 = vadd.f32 %v1574_v30, %v1573_v51  ;;  %v1830_v51 = vpop.eup %1829  ;;  %v1038_v29 = vpop.xlane.xlu0 %1037 }
 0x293   : > { %v1576_v7 = vpop.f32.mrf.mxu1  ;;  %1837 = vrcp.f32 %v1038_v29 }
 0x294   : > { %v1296_v16 = vmul.f32 %v1810_v12, %v1575_v11 }
 0x295   : > { %v1577_v42 = vpop.f32.mrf.mxu1 }
 0x296   : > { %1355 = vst.msk [vmem:[%s2325_s26 + $0x20] sm:$0xff] %vm340_vm0, %v1296_v16  ;;  %v1578_v17 = vadd.f32 %v1577_v42, %v1576_v7  ;;  %v1832_v7 = vpop.eup %1831  ;;  %v1041_v16 = vpop.xlane.xlu1 %1040 }
 0x297   : > { %v1579_v43 = vpop.f32.mrf.mxu1  ;;  %1839 = vrcp.f32 %v1041_v16 }
 0x298   : > { %v1298_v24 = vmul.f32 %v1812_v9, %v1578_v17 }
 0x299   : > { %v1580_v31 = vpop.f32.mrf.mxu1 }
 0x29a   : > { %1356 = vst.msk [vmem:[%s2325_s26 + $0x28] sm:$0xff] %vm340_vm0, %v1298_v24  ;;  %v1581_v34 = vadd.f32 %v1580_v31, %v1579_v43  ;;  %v1834_v43 = vpop.eup %1833  ;;  %v1044_v24 = vpop.xlane.xlu0 %1043 }
 0x29b   : > { %v1582_v2 = vpop.f32.mrf.mxu1  ;;  %1841 = vrcp.f32 %v1044_v24 }
 0x29c   : > { %v1300_v3 = vmul.f32 %v1814_v35, %v1581_v34 }
 0x29d   : > { %v1583_v14 = vpop.f32.mrf.mxu1 }
 0x29e   : > { %1357 = vst.msk [vmem:[%s2325_s26 + $0x30] sm:$0xff] %vm340_vm0, %v1300_v3  ;;  %v1584_v19 = vadd.f32 %v1583_v14, %v1582_v2  ;;  %v1836_v2 = vpop.eup %1835  ;;  %v1047_v3 = vpop.xlane.xlu1 %1046 }
 0x29f   : > { %v1585_v54 = vpop.f32.mrf.mxu1  ;;  %1843 = vrcp.f32 %v1047_v3 }
 0x2a0   : > { %v1302_v59 = vmul.f32 %v1816_v13, %v1584_v19 }
 0x2a1   : > { %v1586_v27 = vpop.f32.mrf.mxu1 }
 0x2a2   : > { %1358 = vst.msk [vmem:[%s2325_s26 + $0x38] sm:$0xff] %vm340_vm0, %v1302_v59  ;;  %v1587_v28 = vadd.f32 %v1586_v27, %v1585_v54  ;;  %v1838_v54 = vpop.eup %1837  ;;  %v1050_v59 = vpop.xlane.xlu0 %1049 }
 0x2a3   : > { %v1588_v45 = vpop.f32.mrf.mxu1  ;;  %1845 = vrcp.f32 %v1050_v59 }
 0x2a4   : > { %v1304_v25 = vmul.f32 %v1818_v41, %v1587_v28 }
 0x2a5   : > { %v1589_v26 = vpop.f32.mrf.mxu1 }
 0x2a6   : > { %1359 = vst.msk [vmem:[%s2325_s26 + $0x40] sm:$0xff] %vm340_vm0, %v1304_v25  ;;  %v1590_v8 = vadd.f32 %v1589_v26, %v1588_v45  ;;  %v1840_v45 = vpop.eup %1839  ;;  %v1053_v25 = vpop.xlane.xlu1 %1052 }
 0x2a7   : > { %v1591_v18 = vpop.f32.mrf.mxu1  ;;  %1847 = vrcp.f32 %v1053_v25 }
 0x2a8   : > { %v1306_v0 = vmul.f32 %v1820_v46, %v1590_v8 }
 0x2a9   : > { %v1592_v48 = vpop.f32.mrf.mxu1 }
 0x2aa   : > { %1360 = vst.msk [vmem:[%s2325_s26 + $0x48] sm:$0xff] %vm340_vm0, %v1306_v0  ;;  %v1593_v36 = vadd.f32 %v1592_v48, %v1591_v18  ;;  %v1842_v18 = vpop.eup %1841  ;;  %v1056_v0 = vpop.xlane.xlu0 %1055 }
 0x2ab   : > { %v1594_v21 = vpop.f32.mrf.mxu1  ;;  %1849 = vrcp.f32 %v1056_v0 }
 0x2ac   : > { %v1308_v1 = vmul.f32 %v1822_v37, %v1593_v36 }
 0x2ad   : > { %v1595_v38 = vpop.f32.mrf.mxu1 }
 0x2ae   : > { %1361 = vst.msk [vmem:[%s2325_s26 + $0x50] sm:$0xff] %vm340_vm0, %v1308_v1  ;;  %v1596_v39 = vadd.f32 %v1595_v38, %v1594_v21  ;;  %v1844_v21 = vpop.eup %1843  ;;  %v1059_v1 = vpop.xlane.xlu1 %1058 }
 0x2af   : > { %v1597_v23 = vpop.f32.mrf.mxu1  ;;  %1851 = vrcp.f32 %v1059_v1 }
 0x2b0   : > { %v1310_v47 = vmul.f32 %v1824_v33, %v1596_v39 }
 0x2b1   : > { %v1598_v50 = vpop.f32.mrf.mxu1 }
 0x2b2   : > { %1362 = vst.msk [vmem:[%s2325_s26 + $0x58] sm:$0xff] %vm340_vm0, %v1310_v47  ;;  %v1599_v4 = vadd.f32 %v1598_v50, %v1597_v23  ;;  %v1846_v23 = vpop.eup %1845  ;;  %v1062_v47 = vpop.xlane.xlu0 %1061 }
 0x2b3   : > { %v1600_v32 = vpop.f32.mrf.mxu1  ;;  %1853 = vrcp.f32 %v1062_v47 }
 0x2b4   : > { %v1312_v40 = vmul.f32 %v1826_v55, %v1599_v4 }
 0x2b5   : > { %v1601_v5 = vpop.f32.mrf.mxu1 }
 0x2b6   : > { %1363 = vst.msk [vmem:[%s2325_s26 + $0x60] sm:$0xff] %vm340_vm0, %v1312_v40  ;;  %v1602_v60 = vadd.f32 %v1601_v5, %v1600_v32  ;;  %v1848_v32 = vpop.eup %1847  ;;  %v1065_v40 = vpop.xlane.xlu1 %1064 }
 0x2b7   : > { %v1603_v53 = vpop.f32.mrf.mxu1  ;;  %1855 = vrcp.f32 %v1065_v40 }
 0x2b8   : > { %v1314_v57 = vmul.f32 %v1828_v61, %v1602_v60 }
 0x2b9   : > { %v1604_v62 = vpop.f32.mrf.mxu1 }
 0x2ba   : > { %1364 = vst.msk [vmem:[%s2325_s26 + $0x68] sm:$0xff] %vm340_vm0, %v1314_v57  ;;  %v1605_v63 = vadd.f32 %v1604_v62, %v1603_v53  ;;  %v1850_v53 = vpop.eup %1849  ;;  %v1068_v57 = vpop.xlane.xlu0 %1067 }
 0x2bb   : > { %v1606_v30 = vpop.f32.mrf.mxu1  ;;  %1857 = vrcp.f32 %v1068_v57 }
 0x2bc   : > { %v1316_v11 = vmul.f32 %v1830_v51, %v1605_v63 }
 0x2bd   : > { %v1607_v12 = vpop.f32.mrf.mxu1 }
 0x2be   : > { %1365 = vst.msk [vmem:[%s2325_s26 + $0x70] sm:$0xff] %vm340_vm0, %v1316_v11  ;;  %v1608_v52 = vadd.f32 %v1607_v12, %v1606_v30  ;;  %v1852_v30 = vpop.eup %1851  ;;  %v1071_v11 = vpop.xlane.xlu1 %1070 }
 0x2bf   : > { %v1609_v42 = vpop.f32.mrf.mxu1  ;;  %1859 = vrcp.f32 %v1071_v11 }
 0x2c0   : > { %v1318_v17 = vmul.f32 %v1832_v7, %v1608_v52 }
 0x2c1   : > { %v1610_v9 = vpop.f32.mrf.mxu1 }
 0x2c2   : > { %1366 = vst.msk [vmem:[%s2325_s26 + $0x78] sm:$0xff] %vm340_vm0, %v1318_v17  ;;  %v1611_v10 = vadd.f32 %v1610_v9, %v1609_v42  ;;  %v1854_v42 = vpop.eup %1853  ;;  %v1074_v17 = vpop.xlane.xlu0 %1073 }
 0x2c3   : > { %v1612_v31 = vpop.f32.mrf.mxu1  ;;  %1861 = vrcp.f32 %v1074_v17 }
 0x2c4   : > { %v1320_v34 = vmul.f32 %v1834_v43, %v1611_v10 }
 0x2c5   : > { %v1613_v35 = vpop.f32.mrf.mxu1 }
 0x2c6   : > { %1367 = vst.msk [vmem:[%s2325_s26 + $0x80] sm:$0xff] %vm340_vm0, %v1320_v34  ;;  %v1614_v20 = vadd.f32 %v1613_v35, %v1612_v31  ;;  %v1856_v31 = vpop.eup %1855  ;;  %v1077_v34 = vpop.xlane.xlu1 %1076 }
 0x2c7   : > { %v1615_v14 = vpop.f32.mrf.mxu1  ;;  %1863 = vrcp.f32 %v1077_v34 }
 0x2c8   : > { %v1322_v19 = vmul.f32 %v1836_v2, %v1614_v20 }
 0x2c9   : > { %v1616_v13 = vpop.f32.mrf.mxu1 }
 0x2ca   : > { %1368 = vst.msk [vmem:[%s2325_s26 + $0x88] sm:$0xff] %vm340_vm0, %v1322_v19  ;;  %v1617_v58 = vadd.f32 %v1616_v13, %v1615_v14  ;;  %v1858_v14 = vpop.eup %1857 }
 0x2cb   : > { %v1618_v27 = vpop.f32.mrf.mxu1 }
 0x2cc   : > { %v1324_v28 = vmul.f32 %v1838_v54, %v1617_v58  ;;  %v1860_v59 = vpop.eup %1859 }
 0x2cd   : > { %v1619_v41 = vpop.f32.mrf.mxu1 }
 0x2ce   : > { %1369 = vst.msk [vmem:[%s2325_s26 + $0x90] sm:$0xff] %vm340_vm0, %v1324_v28  ;;  %v1620_v44 = vadd.f32 %v1619_v41, %v1618_v27 }
 0x2cf   : > { %v1621_v26 = vpop.f32.mrf.mxu1 }
 0x2d0   : > { %v1326_v8 = vmul.f32 %v1840_v45, %v1620_v44  ;;  %v1862_v45 = vpop.eup %1861 }
 0x2d1   : > { %v1622_v46 = vpop.f32.mrf.mxu1 }
 0x2d2   : > { %1370 = vst.msk [vmem:[%s2325_s26 + $0x98] sm:$0xff] %vm340_vm0, %v1326_v8  ;;  %v1623_v15 = vadd.f32 %v1622_v46, %v1621_v26 }
 0x2d3   : > { %v1624_v48 = vpop.f32.mrf.mxu1 }
 0x2d4   : > { %v1328_v36 = vmul.f32 %v1842_v18, %v1623_v15  ;;  %v1864_v15 = vpop.eup %1863 }
 0x2d5   : > { %v1625_v37 = vpop.f32.mrf.mxu1 }
 0x2d6   : > { %1371 = vst.msk [vmem:[%s2325_s26 + $0xa0] sm:$0xff] %vm340_vm0, %v1328_v36  ;;  %v1626_v49 = vadd.f32 %v1625_v37, %v1624_v48 }
 0x2d7   : > { %v1627_v38 = vpop.f32.mrf.mxu1 }
 0x2d8   : > { %v1330_v39 = vmul.f32 %v1844_v21, %v1626_v49 }
 0x2d9   : > { %v1628_v33 = vpop.f32.mrf.mxu1 }
 0x2da   : > { %1372 = vst.msk [vmem:[%s2325_s26 + $0xa8] sm:$0xff] %vm340_vm0, %v1330_v39  ;;  %v1629_v22 = vadd.f32 %v1628_v33, %v1627_v38 }
 0x2db   : > { %v1630_v50 = vpop.f32.mrf.mxu1 }
 0x2dc   : > { %v1332_v4 = vmul.f32 %v1846_v23, %v1629_v22 }
 0x2dd   : > { %v1631_v55 = vpop.f32.mrf.mxu1 }
 0x2de   : > { %1373 = vst.msk [vmem:[%s2325_s26 + $0xb0] sm:$0xff] %vm340_vm0, %v1332_v4  ;;  %v1632_v56 = vadd.f32 %v1631_v55, %v1630_v50 }
 0x2df   : > { %v1633_v5 = vpop.f32.mrf.mxu1 }
 0x2e0   : > { %v1334_v60 = vmul.f32 %v1848_v32, %v1632_v56 }
 0x2e1   : > { %v1634_v61 = vpop.f32.mrf.mxu1 }
 0x2e2   : > { %1374 = vst.msk [vmem:[%s2325_s26 + $0xb8] sm:$0xff] %vm340_vm0, %v1334_v60  ;;  %v1635_v6 = vadd.f32 %v1634_v61, %v1633_v5 }
 0x2e3   : > { %v1636_v62 = vpop.f32.mrf.mxu1 }
 0x2e4   : > { %v1336_v63 = vmul.f32 %v1850_v53, %v1635_v6 }
 0x2e5   : > { %v1637_v51 = vpop.f32.mrf.mxu1 }
 0x2e6   : > { %1375 = vst.msk [vmem:[%s2325_s26 + $0xc0] sm:$0xff] %vm340_vm0, %v1336_v63  ;;  %v1638_v29 = vadd.f32 %v1637_v51, %v1636_v62 }
 0x2e7   : > { %v1639_v12 = vpop.f32.mrf.mxu1 }
 0x2e8   : > { %v1338_v52 = vmul.f32 %v1852_v30, %v1638_v29 }
 0x2e9   : > { %v1640_v7 = vpop.f32.mrf.mxu1 }
 0x2ea   : > { %1376 = vst.msk [vmem:[%s2325_s26 + $0xc8] sm:$0xff] %vm340_vm0, %v1338_v52  ;;  %v1641_v16 = vadd.f32 %v1640_v7, %v1639_v12 }
 0x2eb   : > { %v1642_v9 = vpop.f32.mrf.mxu1 }
 0x2ec   : > { %v1340_v10 = vmul.f32 %v1854_v42, %v1641_v16 }
 0x2ed   : > { %v1643_v43 = vpop.f32.mrf.mxu1 }
 0x2ee   : > { %1377 = vst.msk [vmem:[%s2325_s26 + $0xd0] sm:$0xff] %vm340_vm0, %v1340_v10  ;;  %v1644_v24 = vadd.f32 %v1643_v43, %v1642_v9 }
 0x2ef   : > { %v1645_v35 = vpop.f32.mrf.mxu1 }
 0x2f0   : > { %v1342_v20 = vmul.f32 %v1856_v31, %v1644_v24 }
 0x2f1   : > { %v1646_v2 = vpop.f32.mrf.mxu1 }
 0x2f2   : > { %1378 = vst.msk [vmem:[%s2325_s26 + $0xd8] sm:$0xff] %vm340_vm0, %v1342_v20  ;;  %v1647_v3 = vadd.f32 %v1646_v2, %v1645_v35 }
 0x2f3   : > { %v1648_v19 = vpop.f32.mrf.mxu1 }
 0x2f4   : > { %v1344_v13 = vmul.f32 %v1858_v14, %v1647_v3 }
 0x2f5   : > { %v1649_v58 = vpop.f32.mrf.mxu1 }
 0x2f6   : > { %1379 = vst.msk [vmem:[%s2325_s26 + $0xe0] sm:$0xff] %vm340_vm0, %v1344_v13  ;;  %v1650_v54 = vadd.f32 %v1649_v58, %v1648_v19 }
 0x2f7   : > { %v1651_v27 = vpop.f32.mrf.mxu1 }
 0x2f8   : > { %v1346_v28 = vmul.f32 %v1860_v59, %v1650_v54 }
 0x2f9   : > { %v1652_v41 = vpop.f32.mrf.mxu1 }
 0x2fa   : > { %1380 = vst.msk [vmem:[%s2325_s26 + $0xe8] sm:$0xff] %vm340_vm0, %v1346_v28  ;;  %v1653_v44 = vadd.f32 %v1652_v41, %v1651_v27 }
 0x2fb   : > { %v1654_v25 = vpop.f32.mrf.mxu1 }
 0x2fc   : > { %v1348_v26 = vmul.f32 %v1862_v45, %v1653_v44 }
 0x2fd   : > { %v1655_v8 = vpop.f32.mrf.mxu1 }
 0x2fe   : > { %1381 = vst.msk [vmem:[%s2325_s26 + $0xf0] sm:$0xff] %vm340_vm0, %v1348_v26  ;;  %v1656_v46 = vadd.f32 %v1655_v8, %v1654_v25 }
 0x300   : > { %v1350_v18 = vmul.f32 %v1864_v15, %v1656_v46 }
 0x302   : > { %1382 = vst.msk [vmem:[%s2325_s26 + $0xf8] sm:$0xff] %vm340_vm0, %v1350_v18 }
 0x303 PF: > { %s13_s12 = sadd.s32 1, %s1871_s12  }
 0x304   : > { %p10_p4 = scmp.ge.s32.totalorder %s13_s12, 6  }
 0x306   :  { %12 = sbr.rel (!%p10_p4) target bundleno = 1 (0x1), region = 68 }

// kernel: unet_mid_block_forward.25
= control target key start
LH: loop header
LB: loop body
LE: loop exit
PB: predicated region body
PF: predicated region fallthrough
CT: control target
= control target key end

     0   :  { %vm41_vm0 = vcmask 1043456   ;;  %v112_v0 = vmov 0.0   ;;  %vm113_vm1 = vmmov 0   ;;  %vm37_vm2 = vcmask 195584   ;;  %s155_s1 = inlined_call_operand.vmem [shape: bf16[24,64], index: 1, kind: input, shape index: {}]   ;;  %s156_s0 = inlined_call_operand.vmem [shape: f32[16,24], index: 0, kind: input, shape index: {}]   ;;  %s157_s2 = inlined_call_operand.vmem [shape: f32[1,64], index: 2, kind: input, shape index: {}]   ;;  %s158_s3 = inlined_call_operand.vmem [shape: f32[16,64], index: 3, kind: output, shape index: {}]  }
   0x1   :  { %100 = vmatprep.subr.bf16.mxu0 %v112_v0  ;;  %v110_v1 = vld [vmem:[%s155_s1 + $0x8] ss:$0 sps:$4 sm:$0xff]   ;;  %104 = vmatprep.mubr.msk.bf16.mxu0 %vm113_vm1, %v112_v0  ;;  %v111_v3 = vld [vmem:[%s155_s1] sm:$0xff]   ;;  %vm86_vm3 = vcmask 523264  }
   0x2   :  { %v43_v2 = vsel %vm41_vm0, %v110_v1, 0  ;;  %v15_v4 = vld [vmem:[%s156_s0] sm:$0xff]  ;;  %v16_v5 = vld [vmem:[%s156_s0 + $0x8] sm:$0xff] }
   0x3   :  { %101 = vmatpush3.bf16.msra.mxu0 %v43_v2  ;;  %v17_v6 = vpack.c.bf16 %v16_v5, %v15_v4  ;;  %v93_v7 = vld [vmem:[%s157_s2] ss:$0 sm:$0xff] }
   0x4   :  { %102 = vmatprep.subr.bf16.mxu0 %v112_v0 }
   0x7   :  { %103 = vmatpush3.bf16.msra.mxu0 %v111_v3 }
   0xa   :  { %105 = vmatmul.mubr.msk.bf16.vlgmr.msra.gmra.mxu0 %vm37_vm2, %v17_v6 }
  0xca   :  { %v79_v8 = vpop.f32.mrf.mxu0 }
  0xcb   :  { %v80_v9 = vadd.f32 %v93_v7, %v79_v8 }
  0xcc   :  { %v106_v10 = vpop.f32.mrf.mxu0 }
  0xcd   :  { %87 = vst.msk [vmem:[%s158_s3] sm:$0xff] %vm86_vm3, %v80_v9 }
  0xce   :  { %v82_v11 = vpop.f32.mrf.mxu0 }
  0xcf   :  { %v83_v12 = vadd.f32 %v93_v7, %v82_v11 }
  0xd0   :  { %v107_v13 = vpop.f32.mrf.mxu0 }
  0xd1   :  { %88 = vst.msk [vmem:[%s158_s3 + $0x8] sm:$0xff] %vm86_vm3, %v83_v12 }

// kernel: unet_mid_block_forward.26
= control target key start
LH: loop header
LB: loop body
LE: loop exit
PB: predicated region body
PF: predicated region fallthrough
CT: control target
= control target key end

     0   :  { %s1511_s12 = smov 0   ;;  %s1872_s0 = inlined_call_operand.vmem [shape: f32[4,256,16], index: 0, kind: input, shape index: {}]   ;;  %s1873_s1 = inlined_call_operand.vmem [shape: f32[4,8,16], index: 1, kind: input, shape index: {}]   ;;  %s1874_s2 = inlined_call_operand.vmem [shape: f32[4,8,16], index: 2, kind: input, shape index: {}]   ;;  %s1875_s3 = inlined_call_operand.vmem [shape: f32[4,256,16], index: 3, kind: output, shape index: {}]  }
   0x1 LB: > { %s1196_s13 = sadd.s32 4294967295, %s1489_s12   ;;  %p1200_p0 = scmp.ge.s32.totalorder %s1489_s12, 1  ;;  %s1489_s12 = sphi %s1511_s12, %s13_s12  }
   0x2   : > { %p155_p1 = scmp.lt.s32.totalorder %s1489_s12, 5 }
   0x4   : > { %p156_p2 = pnand %p1200_p0, %p155_p1 }
   0x5   : > { %p187_p3 = scmp.lt.s32.totalorder (!%p156_p2), %s1196_s13, 3 }
   0x6   : > { %159 = sbr.rel (%p156_p2) target bundleno = 647 (0x287), region = 32 }
   0xb   : > { %s1877_s13 = smov (!%p187_p3, %s1196_s13), 3  ;;  %vm257_vm0 = vcmask 130048   ;;  %vm502_vm1 = vcmask 64512   ;;  %vm856_vm2 = vcmask 1043456  }
   0xc   : > { %s1241_s14 = sshll.u32 %s1877_s13, 8  ;;  %s1203_s15 = sshll.u32 %s1877_s13, 3 }
   0xd   : > { %s1528_s18 = scalar_lea.vmem %s1872_s0, %s1241_s14  ;;  %s195_s21 = scalar_lea.vmem %s1873_s1, %s1203_s15 }
   0xe   : > { %v238_v0 = vld [vmem:[%s195_s21] sm:$0xff]  ;;  %v207_v2 = vld [vmem:[%s1528_s18 + $0x8] sm:$0xff]  ;;  %v208_v6 = vld [vmem:[%s1528_s18 + $0x10] sm:$0xff]  ;;  %s199_s24 = scalar_lea.vmem %s1874_s2, %s1203_s15  ;;  %s1803_s27 = scalar_lea.vmem %s1875_s3, %s1241_s14 }
   0xf   : > { %v206_v1 = vld [vmem:[%s1528_s18] sm:$0xff]  ;;  %v256_v3 = vpack.c.bf16 %v238_v0, %v238_v0  ;;  %v209_v7 = vld [vmem:[%s1528_s18 + $0x18] sm:$0xff]  ;;  %v211_v9 = vld [vmem:[%s1528_s18 + $0x28] sm:$0xff] }
  0x10   : > { %v240_v4 = vpack.c.bf16 %v207_v2, %v206_v1  ;;  %v210_v8 = vld [vmem:[%s1528_s18 + $0x20] sm:$0xff]  ;;  %v241_v10 = vpack.c.bf16 %v209_v7, %v208_v6  ;;  %v212_v12 = vld [vmem:[%s1528_s18 + $0x30] sm:$0xff]  ;;  %v213_v13 = vld [vmem:[%s1528_s18 + $0x38] sm:$0xff] }
  0x11   : > { %1345 = vmatprep.subr.msk.bf16.mxu0 %vm257_vm0, %v256_v3  ;;  %v307_v5 = vsel %vm257_vm0, %v256_v3, 0  ;;  %v242_v11 = vpack.c.bf16 %v211_v9, %v210_v8  ;;  %v214_v14 = vld [vmem:[%s1528_s18 + $0x40] sm:$0xff]  ;;  %v215_v15 = vld [vmem:[%s1528_s18 + $0x48] sm:$0xff]  ;;  %v243_v16 = vpack.c.bf16 %v213_v13, %v212_v12  ;;  %v216_v18 = vld [vmem:[%s1528_s18 + $0x50] sm:$0xff] }
  0x12   : > { %1279 = vmatprep.mubr.msk.bf16.mxu0 %vm257_vm0, %v240_v4  ;;  %1278 = vmatpush3.bf16.xpose.msra.mxu0 %v307_v5  ;;  %v244_v17 = vpack.c.bf16 %v215_v15, %v214_v14  ;;  %v217_v19 = vld [vmem:[%s1528_s18 + $0x58] sm:$0xff]  ;;  %v218_v20 = vld [vmem:[%s1528_s18 + $0x60] sm:$0xff]  ;;  %v219_v21 = vld [vmem:[%s1528_s18 + $0x68] sm:$0xff] }
  0x13   : > { %v245_v22 = vpack.c.bf16 %v217_v19, %v216_v18  ;;  %v246_v23 = vpack.c.bf16 %v219_v21, %v218_v20  ;;  %v220_v24 = vld [vmem:[%s1528_s18 + $0x70] sm:$0xff]  ;;  %v221_v25 = vld [vmem:[%s1528_s18 + $0x78] sm:$0xff]  ;;  %v222_v26 = vld [vmem:[%s1528_s18 + $0x80] sm:$0xff] }
  0x14   : > { %v223_v27 = vld [vmem:[%s1528_s18 + $0x88] sm:$0xff]  ;;  %v247_v28 = vpack.c.bf16 %v221_v25, %v220_v24  ;;  %v224_v30 = vld [vmem:[%s1528_s18 + $0x90] sm:$0xff]  ;;  %v225_v31 = vld [vmem:[%s1528_s18 + $0x98] sm:$0xff] }
  0x15   : > { %v248_v29 = vpack.c.bf16 %v223_v27, %v222_v26  ;;  %v226_v32 = vld [vmem:[%s1528_s18 + $0xa0] sm:$0xff]  ;;  %v227_v33 = vld [vmem:[%s1528_s18 + $0xa8] sm:$0xff]  ;;  %v249_v34 = vpack.c.bf16 %v225_v31, %v224_v30  ;;  %v228_v36 = vld [vmem:[%s1528_s18 + $0xb0] sm:$0xff] }
  0x16   : > { %v250_v35 = vpack.c.bf16 %v227_v33, %v226_v32  ;;  %v229_v37 = vld [vmem:[%s1528_s18 + $0xb8] sm:$0xff]  ;;  %v230_v38 = vld [vmem:[%s1528_s18 + $0xc0] sm:$0xff]  ;;  %v231_v39 = vld [vmem:[%s1528_s18 + $0xc8] sm:$0xff] }
  0x17   : > { %v251_v40 = vpack.c.bf16 %v229_v37, %v228_v36  ;;  %v252_v41 = vpack.c.bf16 %v231_v39, %v230_v38  ;;  %v232_v42 = vld [vmem:[%s1528_s18 + $0xd0] sm:$0xff]  ;;  %v233_v43 = vld [vmem:[%s1528_s18 + $0xd8] sm:$0xff]  ;;  %v234_v44 = vld [vmem:[%s1528_s18 + $0xe0] sm:$0xff] }
  0x18   : > { %v235_v45 = vld [vmem:[%s1528_s18 + $0xe8] sm:$0xff]  ;;  %v253_v46 = vpack.c.bf16 %v233_v43, %v232_v42  ;;  %v236_v48 = vld [vmem:[%s1528_s18 + $0xf0] sm:$0xff]  ;;  %v237_v49 = vld [vmem:[%s1528_s18 + $0xf8] sm:$0xff] }
  0x19   : > { %1280 = vmatmul.mubr.msk.bf16.vlgmr.msra.gmra.mxu0 %vm257_vm0, %v241_v10  ;;  %v254_v47 = vpack.c.bf16 %v235_v45, %v234_v44  ;;  %v255_v50 = vpack.c.bf16 %v237_v49, %v236_v48  ;;  %v239_v37 = vld [vmem:[%s199_s24] sm:$0xff] }
  0x1a   : > { %1283 = vmatprep.mubr.msk.bf16.mxu0 %vm257_vm0, %v242_v11  ;;  %v807_v39 = vpack.c.bf16 %v239_v37, %v239_v37 }
  0x1c   : > { %v858_v44 = vsel %vm856_vm2, %v807_v39, 0  ;;  %1346 = vmatprep.subr.msk.bf16.mxu1 %vm856_vm2, %v807_v39 }
  0x1d   : > { %1312 = vmatpush3.bf16.msra.mxu1 %v858_v44 }
  0x21   : > { %1284 = vmatmul.mubr.msk.bf16.gmra.mxu0 %vm257_vm0, %v243_v16 }
  0x22   : > { %1287 = vmatprep.mubr.msk.bf16.mxu0 %vm257_vm0, %v244_v17 }
  0x29   : > { %1288 = vmatmul.mubr.msk.bf16.gmra.mxu0 %vm257_vm0, %v245_v22 }
  0x2a   : > { %1291 = vmatprep.mubr.msk.bf16.mxu0 %vm257_vm0, %v246_v23 }
  0x31   : > { %1292 = vmatmul.mubr.msk.bf16.gmra.mxu0 %vm257_vm0, %v247_v28 }
  0x32   : > { %1295 = vmatprep.mubr.msk.bf16.mxu0 %vm257_vm0, %v248_v29 }
  0x39   : > { %1296 = vmatmul.mubr.msk.bf16.gmra.mxu0 %vm257_vm0, %v249_v34 }
  0x3a   : > { %1299 = vmatprep.mubr.msk.bf16.mxu0 %vm257_vm0, %v250_v35 }
  0x41   : > { %1300 = vmatmul.mubr.msk.bf16.gmra.mxu0 %vm257_vm0, %v251_v40 }
  0x42   : > { %1303 = vmatprep.mubr.msk.bf16.mxu0 %vm257_vm0, %v252_v41 }
  0x49   : > { %1304 = vmatmul.mubr.msk.bf16.gmra.mxu0 %vm257_vm0, %v253_v46 }
  0x4a   : > { %1307 = vmatprep.mubr.msk.bf16.mxu0 %vm257_vm0, %v254_v47 }
  0x51   : > { %1308 = vmatmul.mubr.msk.bf16.gmra.mxu0 %vm257_vm0, %v255_v50 }
  0xd9   : > { %v1281_v51 = vpop.f32.mrf.mxu0 }
  0xda   : > { %v1585_v52 = vmul.f32 0.25, %v1281_v51 }
  0xdb   : > { %v343_v53 = vpop.f32.mrf.mxu0 }
  0xdc   : > { %v1587_v54 = vmul.f32 0.25, %v343_v53  ;;  %v509_v55 = vsel %vm502_vm1, %v1585_v52, -inf }
  0xdd   : > { %510 = vmax.xlane.f32.xlu1 %v509_v55  ;;  %v1282_v56 = vpop.f32.mrf.mxu0 }
  0xde   : > { %v1591_v57 = vmul.f32 0.25, %v1282_v56  ;;  %v503_v58 = vsel %vm502_vm1, %v1587_v54, -inf }
  0xdf   : > { %504 = vmax.xlane.f32.xlu0 %v503_v58  ;;  %v346_v59 = vpop.f32.mrf.mxu0 }
  0xe0   : > { %v1595_v60 = vmul.f32 0.25, %v346_v59  ;;  %v512_v61 = vsel %vm502_vm1, %v1591_v57, -inf }
  0xe1   : > { %513 = vmax.xlane.f32.xlu1 %v512_v61  ;;  %v1285_v62 = vpop.f32.mrf.mxu0 }
  0xe2   : > { %v506_v63 = vsel %vm502_vm1, %v1595_v60, -inf  ;;  %v1603_v3 = vmul.f32 0.25, %v1285_v62 }
  0xe3   : > { %507 = vmax.xlane.f32.xlu0 %v506_v63  ;;  %v359_v0 = vpop.f32.mrf.mxu0 }
  0xe4   : > { %v1601_v1 = vmul.f32 0.25, %v359_v0  ;;  %v521_v9 = vsel %vm502_vm1, %v1603_v3, -inf }
  0xe5   : > { %v1286_v2 = vpop.f32.mrf.mxu0 }
  0xe6   : > { %v515_v4 = vsel %vm502_vm1, %v1601_v1, -inf  ;;  %v1609_v8 = vmul.f32 0.25, %v1286_v2 }
  0xe7   : > { %516 = vmax.xlane.f32.xlu0 %v515_v4  ;;  %v362_v5 = vpop.f32.mrf.mxu0 }
  0xe8   : > { %v1607_v6 = vmul.f32 0.25, %v362_v5  ;;  %v524_v15 = vsel %vm502_vm1, %v1609_v8, -inf }
  0xe9   : > { %v1289_v7 = vpop.f32.mrf.mxu0 }
  0xea   : > { %v518_v10 = vsel %vm502_vm1, %v1607_v6, -inf  ;;  %v1617_v14 = vmul.f32 0.25, %v1289_v7 }
  0xeb   : > { %522 = vmax.xlane.f32.xlu0 %v521_v9  ;;  %519 = vmax.xlane.f32.xlu1 %v518_v10  ;;  %v375_v11 = vpop.f32.mrf.mxu0 }
  0xec   : > { %v1615_v12 = vmul.f32 0.25, %v375_v11  ;;  %v533_v21 = vsel %vm502_vm1, %v1617_v14, -inf }
  0xed   : > { %v1290_v13 = vpop.f32.mrf.mxu0 }
  0xee   : > { %v527_v16 = vsel %vm502_vm1, %v1615_v12, -inf  ;;  %v1625_v20 = vmul.f32 0.25, %v1290_v13 }
  0xef   : > { %525 = vmax.xlane.f32.xlu1 %v524_v15  ;;  %528 = vmax.xlane.f32.xlu0 %v527_v16  ;;  %v378_v17 = vpop.f32.mrf.mxu0 }
  0xf0   : > { %v1623_v18 = vmul.f32 0.25, %v378_v17  ;;  %v536_v27 = vsel %vm502_vm1, %v1625_v20, -inf }
  0xf1   : > { %v1293_v19 = vpop.f32.mrf.mxu0 }
  0xf2   : > { %v530_v22 = vsel %vm502_vm1, %v1623_v18, -inf  ;;  %v1633_v26 = vmul.f32 0.25, %v1293_v19 }
  0xf3   : > { %534 = vmax.xlane.f32.xlu0 %v533_v21  ;;  %531 = vmax.xlane.f32.xlu1 %v530_v22  ;;  %v391_v23 = vpop.f32.mrf.mxu0 }
  0xf4   : > { %v1631_v24 = vmul.f32 0.25, %v391_v23  ;;  %v545_v33 = vsel %vm502_vm1, %v1633_v26, -inf }
  0xf5   : > { %v1294_v25 = vpop.f32.mrf.mxu0 }
  0xf6   : > { %v539_v28 = vsel %vm502_vm1, %v1631_v24, -inf  ;;  %v1641_v32 = vmul.f32 0.25, %v1294_v25 }
  0xf7   : > { %537 = vmax.xlane.f32.xlu1 %v536_v27  ;;  %540 = vmax.xlane.f32.xlu0 %v539_v28  ;;  %v394_v29 = vpop.f32.mrf.mxu0 }
  0xf8   : > { %v1639_v30 = vmul.f32 0.25, %v394_v29  ;;  %v548_v41 = vsel %vm502_vm1, %v1641_v32, -inf }
  0xf9   : > { %v1297_v31 = vpop.f32.mrf.mxu0 }
  0xfa   : > { %v542_v34 = vsel %vm502_vm1, %v1639_v30, -inf  ;;  %v1654_v40 = vmul.f32 0.25, %v1297_v31 }
  0xfb   : > { %546 = vmax.xlane.f32.xlu0 %v545_v33  ;;  %543 = vmax.xlane.f32.xlu1 %v542_v34  ;;  %v407_v35 = vpop.f32.mrf.mxu0 }
  0xfc   : > { %v1652_v36 = vmul.f32 0.25, %v407_v35  ;;  %v557_v48 = vsel %vm502_vm1, %v1654_v40, -inf }
  0xfd   : > { %v1298_v38 = vpop.f32.mrf.mxu0 }
  0xfe   : > { %v551_v42 = vsel %vm502_vm1, %v1652_v36, -inf  ;;  %v1662_v47 = vmul.f32 0.25, %v1298_v38 }
  0xff   : > { %549 = vmax.xlane.f32.xlu1 %v548_v41  ;;  %552 = vmax.xlane.f32.xlu0 %v551_v42  ;;  %v410_v43 = vpop.f32.mrf.mxu0 }
 0x100   : > { %v1660_v45 = vmul.f32 0.25, %v410_v43  ;;  %v560_v56 = vsel %vm502_vm1, %v1662_v47, -inf }
 0x101   : > { %v1301_v46 = vpop.f32.mrf.mxu0 }
 0x102   : > { %v554_v49 = vsel %vm502_vm1, %v1660_v45, -inf  ;;  %v1670_v55 = vmul.f32 0.25, %v1301_v46 }
 0x103   : > { %558 = vmax.xlane.f32.xlu0 %v557_v48  ;;  %555 = vmax.xlane.f32.xlu1 %v554_v49  ;;  %v423_v50 = vpop.f32.mrf.mxu0 }
 0x104   : > { %v1668_v51 = vmul.f32 0.25, %v423_v50  ;;  %v569_v0 = vsel %vm502_vm1, %v1670_v55, -inf }
 0x105   : > { %v1302_v53 = vpop.f32.mrf.mxu0 }
 0x106   : > { %v563_v58 = vsel %vm502_vm1, %v1668_v51, -inf  ;;  %v1678_v63 = vmul.f32 0.25, %v1302_v53 }
 0x107   : > { %561 = vmax.xlane.f32.xlu1 %v560_v56  ;;  %564 = vmax.xlane.f32.xlu0 %v563_v58  ;;  %v426_v59 = vpop.f32.mrf.mxu0 }
 0x108   : > { %v1676_v61 = vmul.f32 0.25, %v426_v59  ;;  %v572_v10 = vsel %vm502_vm1, %v1678_v63, -inf }
 0x109   : > { %v1305_v62 = vpop.f32.mrf.mxu0 }
 0x10a   : > { %v566_v2 = vsel %vm502_vm1, %v1676_v61, -inf  ;;  %v1686_v9 = vmul.f32 0.25, %v1305_v62 }
 0x10b   : > { %570 = vmax.xlane.f32.xlu0 %v569_v0  ;;  %567 = vmax.xlane.f32.xlu1 %v566_v2  ;;  %v439_v4 = vpop.f32.mrf.mxu0 }
 0x10c   : > { %v1684_v5 = vmul.f32 0.25, %v439_v4  ;;  %v581_v19 = vsel %vm502_vm1, %v1686_v9, -inf }
 0x10d   : > { %v1306_v7 = vpop.f32.mrf.mxu0 }
 0x10e   : > { %v575_v11 = vsel %vm502_vm1, %v1684_v5, -inf  ;;  %v1694_v17 = vmul.f32 0.25, %v1306_v7 }
 0x10f   : > { %573 = vmax.xlane.f32.xlu1 %v572_v10  ;;  %576 = vmax.xlane.f32.xlu0 %v575_v11  ;;  %v442_v13 = vpop.f32.mrf.mxu0 }
 0x110   : > { %v1692_v15 = vmul.f32 0.25, %v442_v13  ;;  %v584_v28 = vsel %vm502_vm1, %v1694_v17, -inf }
 0x111   : > { %v1309_v16 = vpop.f32.mrf.mxu0 }
 0x112   : > { %v578_v21 = vsel %vm502_vm1, %v1692_v15, -inf  ;;  %v1702_v27 = vmul.f32 0.25, %v1309_v16 }
 0x113   : > { %582 = vmax.xlane.f32.xlu0 %v581_v19  ;;  %579 = vmax.xlane.f32.xlu1 %v578_v21  ;;  %v455_v22 = vpop.f32.mrf.mxu0 }
 0x114   : > { %v1700_v23 = vmul.f32 0.25, %v455_v22  ;;  %v593_v35 = vsel %vm502_vm1, %v1702_v27, -inf }
 0x115   : > { %v1310_v25 = vpop.f32.mrf.mxu0 }
 0x116   : > { %v587_v29 = vsel %vm502_vm1, %v1700_v23, -inf  ;;  %v1710_v34 = vmul.f32 0.25, %v1310_v25 }
 0x117   : > { %585 = vmax.xlane.f32.xlu1 %v584_v28  ;;  %588 = vmax.xlane.f32.xlu0 %v587_v29  ;;  %v458_v31 = vpop.f32.mrf.mxu0 }
 0x118   : > { %v1708_v33 = vmul.f32 0.25, %v458_v31  ;;  %v596_v38 = vsel %vm502_vm1, %v1710_v34, -inf }
 0x11a   : > { %v590_v37 = vsel %vm502_vm1, %v1708_v33, -inf }
 0x11b   : > { %594 = vmax.xlane.f32.xlu0 %v593_v35  ;;  %591 = vmax.xlane.f32.xlu1 %v590_v37 }
 0x11f   : > { %597 = vmax.xlane.f32.xlu1 %v596_v38 }
 0x166   : > { %v511_v39 = vpop.xlane.xlu1 %510 }
 0x167   : > { %v601_v41 = vsub.f32 %v1585_v52, %v511_v39 }
 0x168   : > { %v505_v42 = vpop.xlane.xlu0 %504 }
 0x169   : > { %v635_v43 = vmul.f32 1.442695, %v601_v41  ;;  %v599_v44 = vsub.f32 %v1587_v54, %v505_v42 }
 0x16a   : > { %v514_v46 = vpop.xlane.xlu1 %513 }
 0x16b   : > { %1355 = vpow2.f32 %v635_v43  ;;  %v631_v48 = vmul.f32 1.442695, %v599_v44  ;;  %v602_v49 = vsub.f32 %v1591_v57, %v514_v46 }
 0x16c   : > { %v508_v50 = vpop.xlane.xlu0 %507 }
 0x16d   : > { %1357 = vpow2.f32 %v631_v48  ;;  %v637_v53 = vmul.f32 1.442695, %v602_v49  ;;  %v600_v56 = vsub.f32 %v1595_v60, %v508_v50 }
 0x16f   : > { %1359 = vpow2.f32 %v637_v53  ;;  %v633_v58 = vmul.f32 1.442695, %v600_v56 }
 0x170   : > { %v517_v59 = vpop.xlane.xlu0 %516 }
 0x171   : > { %1361 = vpow2.f32 %v633_v58  ;;  %v603_v52 = vsub.f32 %v1601_v1, %v517_v59 }
 0x173   : > { %v639_v62 = vmul.f32 1.442695, %v603_v52 }
 0x174   : > { %v523_v0 = vpop.xlane.xlu0 %522  ;;  %v520_v2 = vpop.xlane.xlu1 %519 }
 0x175   : > { %v605_v54 = vsub.f32 %v1603_v3, %v523_v0  ;;  %v604_v4 = vsub.f32 %v1607_v6, %v520_v2  ;;  %1363 = vpow2.f32 %v639_v62 }
 0x177   : > { %v643_v7 = vmul.f32 1.442695, %v605_v54  ;;  %v641_v57 = vmul.f32 1.442695, %v604_v4 }
 0x178   : > { %v1356_v10 = vpop.eup %1355  ;;  %v526_v11 = vpop.xlane.xlu1 %525 }
 0x179   : > { %v529_v13 = vpop.xlane.xlu0 %528  ;;  %1365 = vpow2.f32 %v643_v7  ;;  %v606_v60 = vsub.f32 %v1609_v8, %v526_v11  ;;  %v701_v1 = vsel %vm502_vm1, %v1356_v10, 0.0 }
 0x17a   : > { %v607_v16 = vsub.f32 %v1615_v12, %v529_v13  ;;  %v1358_v19 = vpop.eup %1357  ;;  %1367 = vpow2.f32 %v641_v57  ;;  %702 = vadd.xlane.f32.xlu0 %v701_v1 }
 0x17b   : > { %v645_v21 = vmul.f32 1.442695, %v606_v60  ;;  %v695_v28 = vsel %vm502_vm1, %v1358_v19, 0.0 }
 0x17c   : > { %v1360_v3 = vpop.eup %1359  ;;  %v647_v22 = vmul.f32 1.442695, %v607_v16  ;;  %v532_v25 = vpop.xlane.xlu1 %531 }
 0x17d   : > { %v535_v6 = vpop.xlane.xlu0 %534  ;;  %1369 = vpow2.f32 %v645_v21  ;;  %v608_v31 = vsub.f32 %v1623_v18, %v532_v25  ;;  %v704_v8 = vsel %vm502_vm1, %v1360_v3, 0.0  ;;  %v792_v42 = vpack.c.bf16 %v1360_v3, %v1356_v10 }
 0x17e   : > { %v609_v29 = vsub.f32 %v1617_v14, %v535_v6  ;;  %v1362_v12 = vpop.eup %1361  ;;  %696 = vadd.xlane.f32.xlu0 %v695_v28  ;;  %705 = vadd.xlane.f32.xlu1 %v704_v8  ;;  %1371 = vpow2.f32 %v647_v22 }
 0x17f   : > { %v649_v37 = vmul.f32 1.442695, %v608_v31  ;;  %v791_v38 = vpack.c.bf16 %v1362_v12, %v1358_v19  ;;  %v698_v14 = vsel %vm502_vm1, %v1362_v12, 0.0 }
 0x180   : > { %v651_v35 = vmul.f32 1.442695, %v609_v29  ;;  %v538_v39 = vpop.xlane.xlu1 %537 }
 0x181   : > { %v541_v41 = vpop.xlane.xlu0 %540  ;;  %v610_v43 = vsub.f32 %v1625_v20, %v538_v39  ;;  %1313 = vmatprep.mubr.msk.bf16.mxu1 %vm502_vm1, %v791_v38 }
 0x182   : > { %1373 = vpow2.f32 %v651_v35  ;;  %v611_v44 = vsub.f32 %v1631_v24, %v541_v41  ;;  %1314 = vmatmul.mubr.msk.bf16.vlgmr.msra.gmra.mxu1 %vm502_vm1, %v792_v42  ;;  %699 = vadd.xlane.f32.xlu1 %v698_v14  ;;  %v1364_v50 = vpop.eup %1363 }
 0x183   : > { %1375 = vpow2.f32 %v649_v37  ;;  %v653_v18 = vmul.f32 1.442695, %v610_v43 }
 0x184   : > { %v655_v46 = vmul.f32 1.442695, %v611_v44  ;;  %v544_v49 = vpop.xlane.xlu1 %543 }
 0x185   : > { %v547_v48 = vpop.xlane.xlu0 %546  ;;  %1377 = vpow2.f32 %v653_v18  ;;  %v612_v20 = vsub.f32 %v1639_v30, %v544_v49  ;;  %v707_v30 = vsel %vm502_vm1, %v1364_v50, 0.0 }
 0x186   : > { %v613_v53 = vsub.f32 %v1633_v26, %v547_v48  ;;  %v1366_v56 = vpop.eup %1365  ;;  %1379 = vpow2.f32 %v655_v46 }
 0x187   : > { %v1368_v24 = vpop.eup %1367  ;;  %v657_v59 = vmul.f32 1.442695, %v612_v20  ;;  %v713_v52 = vsel %vm502_vm1, %v1366_v56, 0.0 }
 0x188   : > { %v659_v58 = vmul.f32 1.442695, %v613_v53  ;;  %v550_v62 = vpop.xlane.xlu1 %549  ;;  %714 = vadd.xlane.f32.xlu0 %v713_v52  ;;  %v793_v2 = vpack.c.bf16 %v1368_v24, %v1364_v50  ;;  %v710_v6 = vsel %vm502_vm1, %v1368_v24, 0.0 }
 0x189   : > { %v553_v0 = vpop.xlane.xlu0 %552  ;;  %v614_v54 = vsub.f32 %v1641_v32, %v550_v62 }
 0x18a   : > { %1381 = vpow2.f32 %v659_v58  ;;  %v615_v4 = vsub.f32 %v1652_v36, %v553_v0  ;;  %v1370_v7 = vpop.eup %1369  ;;  %1317 = vmatprep.mubr.msk.bf16.mxu1 %vm502_vm1, %v793_v2 }
 0x18b   : > { %1383 = vpow2.f32 %v657_v59  ;;  %v661_v26 = vmul.f32 1.442695, %v614_v54  ;;  %v716_v57 = vsel %vm502_vm1, %v1370_v7, 0.0  ;;  %v794_v10 = vpack.c.bf16 %v1370_v7, %v1366_v56  ;;  %v1372_v16 = vpop.eup %1371 }
 0x18c   : > { %v663_v11 = vmul.f32 1.442695, %v615_v4  ;;  %v556_v60 = vpop.xlane.xlu1 %555  ;;  %708 = vadd.xlane.f32.xlu0 %v707_v30  ;;  %717 = vadd.xlane.f32.xlu1 %v716_v57  ;;  %v719_v12 = vsel %vm502_vm1, %v1372_v16, 0.0 }
 0x18d   : > { %v559_v13 = vpop.xlane.xlu0 %558  ;;  %1385 = vpow2.f32 %v661_v26  ;;  %v616_v36 = vsub.f32 %v1660_v45, %v556_v60  ;;  %1318 = vmatmul.mubr.msk.bf16.gmra.mxu1 %vm502_vm1, %v794_v10 }
 0x18e   : > { %v617_v32 = vsub.f32 %v1654_v40, %v559_v13  ;;  %1387 = vpow2.f32 %v663_v11 }
 0x18f   : > { %v1374_v1 = vpop.eup %1373  ;;  %v665_v3 = vmul.f32 1.442695, %v616_v36 }
 0x190   : > { %v1376_v19 = vpop.eup %1375  ;;  %v667_v21 = vmul.f32 1.442695, %v617_v32  ;;  %v725_v22 = vsel %vm502_vm1, %v1374_v1, 0.0  ;;  %v562_v25 = vpop.xlane.xlu1 %561  ;;  %711 = vadd.xlane.f32.xlu1 %v710_v6 }
 0x191   : > { %v565_v28 = vpop.xlane.xlu0 %564  ;;  %726 = vadd.xlane.f32.xlu0 %v725_v22  ;;  %v795_v29 = vpack.c.bf16 %v1376_v19, %v1372_v16  ;;  %v618_v40 = vsub.f32 %v1662_v47, %v562_v25  ;;  %v722_v48 = vsel %vm502_vm1, %v1376_v19, 0.0 }
 0x192   : > { %1389 = vpow2.f32 %v667_v21  ;;  %v619_v45 = vsub.f32 %v1668_v51, %v565_v28  ;;  %v1378_v31 = vpop.eup %1377 }
 0x193   : > { %1391 = vpow2.f32 %v665_v3  ;;  %1321 = vmatprep.mubr.msk.bf16.mxu1 %vm502_vm1, %v795_v29  ;;  %v669_v8 = vmul.f32 1.442695, %v618_v40  ;;  %v728_v35 = vsel %vm502_vm1, %v1378_v31, 0.0  ;;  %v796_v37 = vpack.c.bf16 %v1378_v31, %v1374_v1  ;;  %v1380_v42 = vpop.eup %1379 }
 0x194   : > { %v671_v38 = vmul.f32 1.442695, %v619_v45  ;;  %v568_v41 = vpop.xlane.xlu1 %567  ;;  %729 = vadd.xlane.f32.xlu1 %v728_v35  ;;  %v731_v24 = vsel %vm502_vm1, %v1380_v42, 0.0 }
 0x195   : > { %v571_v39 = vpop.xlane.xlu0 %570  ;;  %720 = vadd.xlane.f32.xlu0 %v719_v12  ;;  %1393 = vpow2.f32 %v669_v8  ;;  %v620_v51 = vsub.f32 %v1676_v61, %v568_v41  ;;  %1322 = vmatmul.mubr.msk.bf16.gmra.mxu1 %vm502_vm1, %v796_v37 }
 0x196   : > { %v621_v47 = vsub.f32 %v1670_v55, %v571_v39  ;;  %1395 = vpow2.f32 %v671_v38 }
 0x197   : > { %v1382_v43 = vpop.eup %1381  ;;  %v673_v18 = vmul.f32 1.442695, %v620_v51 }
 0x198   : > { %v1384_v44 = vpop.eup %1383  ;;  %v675_v14 = vmul.f32 1.442695, %v621_v47  ;;  %v737_v46 = vsel %vm502_vm1, %v1382_v43, 0.0  ;;  %v574_v49 = vpop.xlane.xlu1 %573  ;;  %723 = vadd.xlane.f32.xlu1 %v722_v48 }
 0x199   : > { %v577_v50 = vpop.xlane.xlu0 %576  ;;  %738 = vadd.xlane.f32.xlu0 %v737_v46  ;;  %v797_v53 = vpack.c.bf16 %v1384_v44, %v1380_v42  ;;  %v622_v55 = vsub.f32 %v1678_v63, %v574_v49  ;;  %v734_v57 = vsel %vm502_vm1, %v1384_v44, 0.0 }
 0x19a   : > { %1397 = vpow2.f32 %v675_v14  ;;  %v623_v61 = vsub.f32 %v1684_v5, %v577_v50  ;;  %v1386_v20 = vpop.eup %1385 }
 0x19b   : > { %1399 = vpow2.f32 %v673_v18  ;;  %1325 = vmatprep.mubr.msk.bf16.mxu1 %vm502_vm1, %v797_v53  ;;  %v677_v56 = vmul.f32 1.442695, %v622_v55  ;;  %v740_v58 = vsel %vm502_vm1, %v1386_v20, 0.0  ;;  %v798_v59 = vpack.c.bf16 %v1386_v20, %v1382_v43  ;;  %v1388_v2 = vpop.eup %1387 }
 0x19c   : > { %v679_v52 = vmul.f32 1.442695, %v623_v61  ;;  %v580_v0 = vpop.xlane.xlu1 %579  ;;  %741 = vadd.xlane.f32.xlu1 %v740_v58  ;;  %v743_v16 = vsel %vm502_vm1, %v1388_v2, 0.0 }
 0x19d   : > { %v583_v62 = vpop.xlane.xlu0 %582  ;;  %732 = vadd.xlane.f32.xlu0 %v731_v24  ;;  %1401 = vpow2.f32 %v677_v56  ;;  %v624_v5 = vsub.f32 %v1692_v15, %v580_v0  ;;  %1326 = vmatmul.mubr.msk.bf16.gmra.mxu1 %vm502_vm1, %v798_v59 }
 0x19e   : > { %v625_v63 = vsub.f32 %v1686_v9, %v583_v62  ;;  %1403 = vpow2.f32 %v679_v52 }
 0x19f   : > { %v1390_v54 = vpop.eup %1389  ;;  %v681_v26 = vmul.f32 1.442695, %v624_v5 }
 0x1a0   : > { %v1392_v4 = vpop.eup %1391  ;;  %v683_v7 = vmul.f32 1.442695, %v625_v63  ;;  %v749_v30 = vsel %vm502_vm1, %v1390_v54, 0.0  ;;  %v586_v10 = vpop.xlane.xlu1 %585  ;;  %735 = vadd.xlane.f32.xlu1 %v734_v57 }
 0x1a1   : > { %750 = vadd.xlane.f32.xlu0 %v749_v30  ;;  %v589_v11 = vpop.xlane.xlu0 %588  ;;  %v799_v13 = vpack.c.bf16 %v1392_v4, %v1388_v2  ;;  %v626_v9 = vsub.f32 %v1694_v17, %v586_v10  ;;  %v746_v25 = vsel %vm502_vm1, %v1392_v4, 0.0 }
 0x1a2   : > { %1405 = vpow2.f32 %v683_v7  ;;  %v627_v15 = vsub.f32 %v1700_v23, %v589_v11  ;;  %v1394_v60 = vpop.eup %1393 }
 0x1a3   : > { %1407 = vpow2.f32 %v681_v26  ;;  %1329 = vmatprep.mubr.msk.bf16.mxu1 %vm502_vm1, %v799_v13  ;;  %v685_v32 = vmul.f32 1.442695, %v626_v9  ;;  %v752_v1 = vsel %vm502_vm1, %v1394_v60, 0.0  ;;  %v800_v19 = vpack.c.bf16 %v1394_v60, %v1390_v54  ;;  %v1396_v22 = vpop.eup %1395 }
 0x1a4   : > { %v687_v36 = vmul.f32 1.442695, %v627_v15  ;;  %753 = vadd.xlane.f32.xlu1 %v752_v1  ;;  %v592_v3 = vpop.xlane.xlu1 %591 }
 0x1a5   : > { %744 = vadd.xlane.f32.xlu0 %v743_v16  ;;  %v595_v21 = vpop.xlane.xlu0 %594  ;;  %1409 = vpow2.f32 %v685_v32  ;;  %v628_v23 = vsub.f32 %v1708_v33, %v592_v3  ;;  %1330 = vmatmul.mubr.msk.bf16.gmra.mxu1 %vm502_vm1, %v800_v19  ;;  %v755_v33 = vsel %vm502_vm1, %v1396_v22, 0.0 }
 0x1a6   : > { %v629_v17 = vsub.f32 %v1702_v27, %v595_v21  ;;  %1411 = vpow2.f32 %v687_v36 }
 0x1a7   : > { %v1398_v6 = vpop.eup %1397  ;;  %v689_v40 = vmul.f32 1.442695, %v628_v23 }
 0x1a8   : > { %v1400_v28 = vpop.eup %1399  ;;  %v691_v29 = vmul.f32 1.442695, %v629_v17  ;;  %v761_v45 = vsel %vm502_vm1, %v1398_v6, 0.0  ;;  %747 = vadd.xlane.f32.xlu1 %v746_v25  ;;  %v598_v31 = vpop.xlane.xlu1 %597 }
 0x1a9   : > { %762 = vadd.xlane.f32.xlu0 %v761_v45  ;;  %v801_v8 = vpack.c.bf16 %v1400_v28, %v1396_v22  ;;  %v630_v12 = vsub.f32 %v1710_v34, %v598_v31  ;;  %1413 = vpow2.f32 %v689_v40  ;;  %v758_v47 = vsel %vm502_vm1, %v1400_v28, 0.0 }
 0x1aa   : > { %v1402_v27 = vpop.eup %1401  ;;  %1415 = vpow2.f32 %v691_v29 }
 0x1ab   : > { %1333 = vmatprep.mubr.msk.bf16.mxu1 %vm502_vm1, %v801_v8  ;;  %v693_v35 = vmul.f32 1.442695, %v630_v12  ;;  %v764_v37 = vsel %vm502_vm1, %v1402_v27, 0.0  ;;  %v802_v38 = vpack.c.bf16 %v1402_v27, %v1398_v6  ;;  %v1404_v39 = vpop.eup %1403 }
 0x1ac   : > { %765 = vadd.xlane.f32.xlu1 %v764_v37  ;;  %v767_v44 = vsel %vm502_vm1, %v1404_v39, 0.0 }
 0x1ad   : > { %756 = vadd.xlane.f32.xlu0 %v755_v33  ;;  %1417 = vpow2.f32 %v693_v35  ;;  %1334 = vmatmul.mubr.msk.bf16.gmra.mxu1 %vm502_vm1, %v802_v38 }
 0x1af   : > { %v1406_v41 = vpop.eup %1405 }
 0x1b0   : > { %v1408_v42 = vpop.eup %1407  ;;  %v773_v34 = vsel %vm502_vm1, %v1406_v41, 0.0  ;;  %759 = vadd.xlane.f32.xlu1 %v758_v47 }
 0x1b1   : > { %774 = vadd.xlane.f32.xlu0 %v773_v34  ;;  %v803_v51 = vpack.c.bf16 %v1408_v42, %v1404_v39  ;;  %v770_v50 = vsel %vm502_vm1, %v1408_v42, 0.0 }
 0x1b2   : > { %v1410_v43 = vpop.eup %1409 }
 0x1b3   : > { %1337 = vmatprep.mubr.msk.bf16.mxu1 %vm502_vm1, %v803_v51  ;;  %v776_v14 = vsel %vm502_vm1, %v1410_v43, 0.0  ;;  %v804_v18 = vpack.c.bf16 %v1410_v43, %v1406_v41  ;;  %v1412_v46 = vpop.eup %1411 }
 0x1b4   : > { %777 = vadd.xlane.f32.xlu1 %v776_v14  ;;  %v779_v49 = vsel %vm502_vm1, %v1412_v46, 0.0 }
 0x1b5   : > { %768 = vadd.xlane.f32.xlu0 %v767_v44  ;;  %1338 = vmatmul.mubr.msk.bf16.gmra.mxu1 %vm502_vm1, %v804_v18 }
 0x1b6   : > { %v1414_v48 = vpop.eup %1413 }
 0x1b7   : > { %v1416_v53 = vpop.eup %1415  ;;  %v805_v55 = vpack.c.bf16 %v1414_v48, %v1412_v46  ;;  %v782_v56 = vsel %vm502_vm1, %v1414_v48, 0.0 }
 0x1b8   : > { %771 = vadd.xlane.f32.xlu1 %v770_v50  ;;  %v785_v20 = vsel %vm502_vm1, %v1416_v53, 0.0 }
 0x1b9   : > { %780 = vadd.xlane.f32.xlu0 %v779_v49  ;;  %1341 = vmatprep.mubr.msk.bf16.mxu1 %vm502_vm1, %v805_v55 }
 0x1ba   : > { %v1418_v61 = vpop.eup %1417 }
 0x1bb   : > { %v806_v24 = vpack.c.bf16 %v1418_v61, %v1416_v53  ;;  %v788_v58 = vsel %vm502_vm1, %v1418_v61, 0.0 }
 0x1bc   : > { %783 = vadd.xlane.f32.xlu1 %v782_v56 }
 0x1bd   : > { %786 = vadd.xlane.f32.xlu0 %v785_v20  ;;  %1342 = vmatmul.mubr.msk.bf16.gmra.mxu1 %vm502_vm1, %v806_v24 }
 0x1c0   : > { %789 = vadd.xlane.f32.xlu1 %v788_v58 }
 0x203   : > { %v703_v59 = vpop.xlane.xlu0 %702 }
 0x204   : > { %1419 = vrcp.f32 %v703_v59 }
 0x207   : > { %v706_v52 = vpop.xlane.xlu1 %705  ;;  %v697_v62 = vpop.xlane.xlu0 %696 }
 0x208   : > { %1421 = vrcp.f32 %v697_v62 }
 0x209   : > { %1423 = vrcp.f32 %v706_v52 }
 0x20b   : > { %v700_v0 = vpop.xlane.xlu1 %699 }
 0x20c   : > { %1425 = vrcp.f32 %v700_v0 }
 0x211   : > { %v715_v2 = vpop.xlane.xlu0 %714  ;;  %v1420_v9 = vpop.eup %1419 }
 0x212   : > { %1427 = vrcp.f32 %v715_v2 }
 0x215   : > { %v718_v63 = vpop.xlane.xlu1 %717  ;;  %v709_v5 = vpop.xlane.xlu0 %708 }
 0x216   : > { %1429 = vrcp.f32 %v709_v5  ;;  %v1422_v32 = vpop.eup %1421 }
 0x217   : > { %1431 = vrcp.f32 %v718_v63  ;;  %v1424_v19 = vpop.eup %1423 }
 0x219   : > { %v712_v54 = vpop.xlane.xlu1 %711  ;;  %v1426_v17 = vpop.eup %1425 }
 0x21a   : > { %v727_v4 = vpop.xlane.xlu0 %726  ;;  %1433 = vrcp.f32 %v712_v54 }
 0x21b   : > { %1435 = vrcp.f32 %v727_v4 }
 0x21d   : > { %v730_v7 = vpop.xlane.xlu1 %729 }
 0x21e   : > { %v721_v26 = vpop.xlane.xlu0 %720 }
 0x21f   : > { %1437 = vrcp.f32 %v721_v26  ;;  %v1428_v28 = vpop.eup %1427 }
 0x220   : > { %1439 = vrcp.f32 %v730_v7 }
 0x221   : > { %v724_v30 = vpop.xlane.xlu1 %723 }
 0x222   : > { %v739_v57 = vpop.xlane.xlu0 %738  ;;  %1441 = vrcp.f32 %v724_v30 }
 0x223   : > { %v1430_v31 = vpop.eup %1429  ;;  %1443 = vrcp.f32 %v739_v57 }
 0x224   : > { %v1432_v33 = vpop.eup %1431 }
 0x225   : > { %v742_v10 = vpop.xlane.xlu1 %741 }
 0x226   : > { %v733_v11 = vpop.xlane.xlu0 %732 }
 0x227   : > { %1445 = vrcp.f32 %v733_v11  ;;  %v1434_v38 = vpop.eup %1433 }
 0x228   : > { %1447 = vrcp.f32 %v742_v10  ;;  %v1436_v34 = vpop.eup %1435 }
 0x229   : > { %v736_v13 = vpop.xlane.xlu1 %735 }
 0x22a   : > { %v751_v60 = vpop.xlane.xlu0 %750  ;;  %1449 = vrcp.f32 %v736_v13 }
 0x22b   : > { %1451 = vrcp.f32 %v751_v60 }
 0x22c   : > { %v1438_v44 = vpop.eup %1437 }
 0x22d   : > { %v754_v3 = vpop.xlane.xlu1 %753  ;;  %v1440_v46 = vpop.eup %1439 }
 0x22e   : > { %v745_v6 = vpop.xlane.xlu0 %744 }
 0x22f   : > { %1453 = vrcp.f32 %v745_v6  ;;  %v1442_v53 = vpop.eup %1441 }
 0x230   : > { %1455 = vrcp.f32 %v754_v3  ;;  %v1444_v56 = vpop.eup %1443 }
 0x231   : > { %v748_v29 = vpop.xlane.xlu1 %747 }
 0x232   : > { %v763_v8 = vpop.xlane.xlu0 %762  ;;  %1457 = vrcp.f32 %v748_v29 }
 0x233   : > { %1459 = vrcp.f32 %v763_v8 }
 0x234   : > { %v1446_v59 = vpop.eup %1445 }
 0x235   : > { %v766_v39 = vpop.xlane.xlu1 %765  ;;  %v1448_v2 = vpop.eup %1447 }
 0x236   : > { %v757_v47 = vpop.xlane.xlu0 %756 }
 0x237   : > { %1461 = vrcp.f32 %v757_v47  ;;  %v1450_v4 = vpop.eup %1449 }
 0x238   : > { %1463 = vrcp.f32 %v766_v39  ;;  %v1452_v30 = vpop.eup %1451 }
 0x239   : > { %v760_v48 = vpop.xlane.xlu1 %759 }
 0x23a   : > { %v775_v55 = vpop.xlane.xlu0 %774  ;;  %1465 = vrcp.f32 %v760_v48 }
 0x23b   : > { %1467 = vrcp.f32 %v775_v55 }
 0x23c   : > { %v1454_v13 = vpop.eup %1453 }
 0x23d   : > { %v778_v52 = vpop.xlane.xlu1 %777 }
 0x23e   : > { %v769_v63 = vpop.xlane.xlu0 %768 }
 0x23f   : > { %1469 = vrcp.f32 %v769_v63 }
 0x240   : > { %1471 = vrcp.f32 %v778_v52 }
 0x241   : > { %v772_v57 = vpop.xlane.xlu1 %771 }
 0x242   : > { %v1315_v15 = vpop.f32.mrf.mxu1  ;;  %1473 = vrcp.f32 %v772_v57 }
 0x243   : > { %v1026_v16 = vmul.f32 %v1420_v9, %v1315_v15  ;;  %v781_v9 = vpop.xlane.xlu0 %780 }
 0x244   : > { %v894_v36 = vpop.f32.mrf.mxu1 }
 0x245   : > { %1087 = vst.msk [vmem:[%s1803_s27 + $0x10] sm:$0xff] %vm257_vm0, %v1026_v16  ;;  %v1022_v1 = vmul.f32 %v1422_v32, %v894_v36  ;;  %v1456_v16 = vpop.eup %1455 }
 0x246   : > { %v1316_v21 = vpop.f32.mrf.mxu1 }
 0x247   : > { %1085 = vst.msk [vmem:[%s1803_s27] sm:$0xff] %vm257_vm0, %v1022_v1  ;;  %v1028_v22 = vmul.f32 %v1424_v19, %v1316_v21  ;;  %v1458_v1 = vpop.eup %1457  ;;  %v784_v19 = vpop.xlane.xlu1 %783 }
 0x248   : > { %v897_v23 = vpop.f32.mrf.mxu1 }
 0x249   : > { %1088 = vst.msk [vmem:[%s1803_s27 + $0x18] sm:$0xff] %vm257_vm0, %v1028_v22  ;;  %v1024_v25 = vmul.f32 %v1426_v17, %v897_v23  ;;  %v1460_v22 = vpop.eup %1459  ;;  %v787_v17 = vpop.xlane.xlu0 %786 }
 0x24a   : > { %1475 = vrcp.f32 %v787_v17 }
 0x24b   : > { %1086 = vst.msk [vmem:[%s1803_s27 + $0x8] sm:$0xff] %vm257_vm0, %v1024_v25  ;;  %v1462_v25 = vpop.eup %1461  ;;  %1477 = vrcp.f32 %v781_v9 }
 0x24d   : > { %v1319_v40 = vpop.f32.mrf.mxu1 }
 0x24e   : > { %v1034_v45 = vmul.f32 %v1428_v28, %v1319_v40  ;;  %v1464_v40 = vpop.eup %1463 }
 0x24f   : > { %v910_v12 = vpop.f32.mrf.mxu1 }
 0x250   : > { %1091 = vst.msk [vmem:[%s1803_s27 + $0x30] sm:$0xff] %vm257_vm0, %v1034_v45  ;;  %v1030_v27 = vmul.f32 %v1430_v31, %v910_v12  ;;  %v790_v45 = vpop.xlane.xlu1 %789  ;;  %v1466_v12 = vpop.eup %1465 }
 0x251   : > { %v1320_v35 = vpop.f32.mrf.mxu1  ;;  %1479 = vrcp.f32 %v790_v45 }
 0x252   : > { %1089 = vst.msk [vmem:[%s1803_s27 + $0x20] sm:$0xff] %vm257_vm0, %v1030_v27  ;;  %v1036_v37 = vmul.f32 %v1432_v33, %v1320_v35  ;;  %v1468_v35 = vpop.eup %1467  ;;  %1481 = vrcp.f32 %v784_v19 }
 0x253   : > { %v913_v41 = vpop.f32.mrf.mxu1  ;;  %v1470_v39 = vpop.eup %1469 }
 0x254   : > { %1092 = vst.msk [vmem:[%s1803_s27 + $0x38] sm:$0xff] %vm257_vm0, %v1036_v37  ;;  %v1032_v42 = vmul.f32 %v1434_v38, %v913_v41 }
 0x255   : > { %v1323_v51 = vpop.f32.mrf.mxu1 }
 0x256   : > { %1090 = vst.msk [vmem:[%s1803_s27 + $0x28] sm:$0xff] %vm257_vm0, %v1032_v42  ;;  %v1042_v43 = vmul.f32 %v1436_v34, %v1323_v51  ;;  %v1472_v34 = vpop.eup %1471 }
 0x257   : > { %v926_v14 = vpop.f32.mrf.mxu1 }
 0x258   : > { %1095 = vst.msk [vmem:[%s1803_s27 + $0x50] sm:$0xff] %vm257_vm0, %v1042_v43  ;;  %v1038_v18 = vmul.f32 %v1438_v44, %v926_v14  ;;  %v1474_v43 = vpop.eup %1473 }
 0x259   : > { %v1324_v49 = vpop.f32.mrf.mxu1 }
 0x25a   : > { %1093 = vst.msk [vmem:[%s1803_s27 + $0x40] sm:$0xff] %vm257_vm0, %v1038_v18  ;;  %v1044_v50 = vmul.f32 %v1440_v46, %v1324_v49  ;;  %v1476_v18 = vpop.eup %1475 }
 0x25b   : > { %v929_v61 = vpop.f32.mrf.mxu1  ;;  %v1478_v49 = vpop.eup %1477 }
 0x25c   : > { %1096 = vst.msk [vmem:[%s1803_s27 + $0x58] sm:$0xff] %vm257_vm0, %v1044_v50  ;;  %v1040_v20 = vmul.f32 %v1442_v53, %v929_v61 }
 0x25d   : > { %v1327_v24 = vpop.f32.mrf.mxu1 }
 0x25e   : > { %1094 = vst.msk [vmem:[%s1803_s27 + $0x48] sm:$0xff] %vm257_vm0, %v1040_v20  ;;  %v1050_v58 = vmul.f32 %v1444_v56, %v1327_v24  ;;  %v1480_v55 = vpop.eup %1479 }
 0x25f   : > { %v942_v62 = vpop.f32.mrf.mxu1  ;;  %v1482_v56 = vpop.eup %1481 }
 0x260   : > { %1099 = vst.msk [vmem:[%s1803_s27 + $0x70] sm:$0xff] %vm257_vm0, %v1050_v58  ;;  %v1046_v0 = vmul.f32 %v1446_v59, %v942_v62 }
 0x261   : > { %v1328_v5 = vpop.f32.mrf.mxu1 }
 0x262   : > { %1097 = vst.msk [vmem:[%s1803_s27 + $0x60] sm:$0xff] %vm257_vm0, %v1046_v0  ;;  %v1052_v54 = vmul.f32 %v1448_v2, %v1328_v5 }
 0x263   : > { %v945_v7 = vpop.f32.mrf.mxu1 }
 0x264   : > { %1100 = vst.msk [vmem:[%s1803_s27 + $0x78] sm:$0xff] %vm257_vm0, %v1052_v54  ;;  %v1048_v26 = vmul.f32 %v1450_v4, %v945_v7 }
 0x265   : > { %v1331_v10 = vpop.f32.mrf.mxu1 }
 0x266   : > { %1098 = vst.msk [vmem:[%s1803_s27 + $0x68] sm:$0xff] %vm257_vm0, %v1048_v26  ;;  %v1058_v11 = vmul.f32 %v1452_v30, %v1331_v10 }
 0x267   : > { %v958_v15 = vpop.f32.mrf.mxu1 }
 0x268   : > { %1103 = vst.msk [vmem:[%s1803_s27 + $0x90] sm:$0xff] %vm257_vm0, %v1058_v11  ;;  %v1054_v60 = vmul.f32 %v1454_v13, %v958_v15 }
 0x269   : > { %v1332_v32 = vpop.f32.mrf.mxu1 }
 0x26a   : > { %1101 = vst.msk [vmem:[%s1803_s27 + $0x80] sm:$0xff] %vm257_vm0, %v1054_v60  ;;  %v1060_v36 = vmul.f32 %v1456_v16, %v1332_v32 }
 0x26b   : > { %v961_v21 = vpop.f32.mrf.mxu1 }
 0x26c   : > { %1104 = vst.msk [vmem:[%s1803_s27 + $0x98] sm:$0xff] %vm257_vm0, %v1060_v36  ;;  %v1056_v3 = vmul.f32 %v1458_v1, %v961_v21 }
 0x26d   : > { %v1335_v23 = vpop.f32.mrf.mxu1 }
 0x26e   : > { %1102 = vst.msk [vmem:[%s1803_s27 + $0x88] sm:$0xff] %vm257_vm0, %v1056_v3  ;;  %v1066_v6 = vmul.f32 %v1460_v22, %v1335_v23 }
 0x26f   : > { %v974_v28 = vpop.f32.mrf.mxu1 }
 0x270   : > { %1107 = vst.msk [vmem:[%s1803_s27 + $0xb0] sm:$0xff] %vm257_vm0, %v1066_v6  ;;  %v1062_v29 = vmul.f32 %v1462_v25, %v974_v28 }
 0x271   : > { %v1336_v31 = vpop.f32.mrf.mxu1 }
 0x272   : > { %1105 = vst.msk [vmem:[%s1803_s27 + $0xa0] sm:$0xff] %vm257_vm0, %v1062_v29  ;;  %v1068_v8 = vmul.f32 %v1464_v40, %v1336_v31 }
 0x273   : > { %v977_v27 = vpop.f32.mrf.mxu1 }
 0x274   : > { %1108 = vst.msk [vmem:[%s1803_s27 + $0xb8] sm:$0xff] %vm257_vm0, %v1068_v8  ;;  %v1064_v33 = vmul.f32 %v1466_v12, %v977_v27 }
 0x275   : > { %v1339_v37 = vpop.f32.mrf.mxu1 }
 0x276   : > { %1106 = vst.msk [vmem:[%s1803_s27 + $0xa8] sm:$0xff] %vm257_vm0, %v1064_v33  ;;  %v1074_v38 = vmul.f32 %v1468_v35, %v1339_v37 }
 0x277   : > { %v990_v41 = vpop.f32.mrf.mxu1 }
 0x278   : > { %1111 = vst.msk [vmem:[%s1803_s27 + $0xd0] sm:$0xff] %vm257_vm0, %v1074_v38  ;;  %v1070_v42 = vmul.f32 %v1470_v39, %v990_v41 }
 0x279   : > { %v1340_v47 = vpop.f32.mrf.mxu1 }
 0x27a   : > { %1109 = vst.msk [vmem:[%s1803_s27 + $0xc0] sm:$0xff] %vm257_vm0, %v1070_v42  ;;  %v1076_v51 = vmul.f32 %v1472_v34, %v1340_v47 }
 0x27b   : > { %v993_v44 = vpop.f32.mrf.mxu1 }
 0x27c   : > { %1112 = vst.msk [vmem:[%s1803_s27 + $0xd8] sm:$0xff] %vm257_vm0, %v1076_v51  ;;  %v1072_v14 = vmul.f32 %v1474_v43, %v993_v44 }
 0x27d   : > { %v1343_v46 = vpop.f32.mrf.mxu1 }
 0x27e   : > { %1110 = vst.msk [vmem:[%s1803_s27 + $0xc8] sm:$0xff] %vm257_vm0, %v1072_v14  ;;  %v1082_v48 = vmul.f32 %v1476_v18, %v1343_v46 }
 0x27f   : > { %v1006_v50 = vpop.f32.mrf.mxu1 }
 0x280   : > { %1115 = vst.msk [vmem:[%s1803_s27 + $0xf0] sm:$0xff] %vm257_vm0, %v1082_v48  ;;  %v1078_v53 = vmul.f32 %v1478_v49, %v1006_v50 }
 0x281   : > { %v1344_v61 = vpop.f32.mrf.mxu1 }
 0x282   : > { %1113 = vst.msk [vmem:[%s1803_s27 + $0xe0] sm:$0xff] %vm257_vm0, %v1078_v53  ;;  %v1084_v20 = vmul.f32 %v1480_v55, %v1344_v61 }
 0x283   : > { %v1009_v24 = vpop.f32.mrf.mxu1 }
 0x284   : > { %1116 = vst.msk [vmem:[%s1803_s27 + $0xf8] sm:$0xff] %vm257_vm0, %v1084_v20  ;;  %v1080_v58 = vmul.f32 %v1482_v56, %v1009_v24 }
 0x286   : > { %1114 = vst.msk [vmem:[%s1803_s27 + $0xe8] sm:$0xff] %vm257_vm0, %v1080_v58 }
 0x287 PF: > { %s13_s12 = sadd.s32 1, %s1489_s12  }
 0x288   : > { %p10_p4 = scmp.ge.s32.totalorder %s13_s12, 6  }
 0x28a   :  { %12 = sbr.rel (!%p10_p4) target bundleno = 1 (0x1), region = 68 }

// kernel: unet_mid_block_forward.29
= control target key start
LH: loop header
LB: loop body
LE: loop exit
PB: predicated region body
PF: predicated region fallthrough
CT: control target
= control target key end

     0   :  { %vm471_vm0 = vcmask 261120   ;;  %s1254_s1 = inlined_call_operand.vmem [shape: bf16[128,32], index: 1, kind: input, shape index: {}]   ;;  %s1255_s0 = inlined_call_operand.vmem [shape: f32[512,128], index: 0, kind: input, shape index: {}]   ;;  %s1256_s2 = inlined_call_operand.vmem [shape: f32[1,32], index: 2, kind: input, shape index: {}]   ;;  %s1257_s3 = inlined_call_operand.vmem [shape: f32[512,32], index: 3, kind: output, shape index: {}]  }
   0x1   :  { %v685_v0 = vld [vmem:[%s1254_s1 + $0x38] sm:$0xff]   ;;  %v686_v1 = vld [vmem:[%s1254_s1 + $0x30] sm:$0xff]   ;;  %v687_v2 = vld [vmem:[%s1254_s1 + $0x28] sm:$0xff]  }
   0x2   :  { %589 = vmatprep.subr.bf16.mxu0 %v685_v0  ;;  %669 = vmatprep.subr.bf16.mxu1 %v685_v0  ;;  %v688_v3 = vld [vmem:[%s1254_s1 + $0x20] sm:$0xff]   ;;  %v16_v5 = vld [vmem:[%s1255_s0 + $0x8] sm:$0xff]  ;;  %v689_v10 = vld [vmem:[%s1254_s1 + $0x18] sm:$0xff]  }
   0x3   :  { %590 = vmatpush3.bf16.msra.mxu0 %v685_v0  ;;  %677 = vmatpush3.bf16.msra.mxu1 %v685_v0  ;;  %v15_v4 = vld [vmem:[%s1255_s0] sm:$0xff]  ;;  %v48_v8 = vld [vmem:[%s1255_s0 + $0x108] sm:$0xff]  ;;  %v690_v11 = vld [vmem:[%s1254_s1 + $0x10] sm:$0xff]  }
   0x4   :  { %591 = vmatprep.subr.bf16.mxu0 %v686_v1  ;;  %670 = vmatprep.subr.bf16.mxu1 %v686_v1  ;;  %v47_v6 = vld [vmem:[%s1255_s0 + $0x100] sm:$0xff]  ;;  %v79_v7 = vpack.c.bf16 %v16_v5, %v15_v4  ;;  %v691_v12 = vld [vmem:[%s1254_s1 + $0x8] sm:$0xff]   ;;  %v17_v14 = vld [vmem:[%s1255_s0 + $0x10] sm:$0xff] }
   0x5   :  { %v95_v9 = vpack.c.bf16 %v48_v8, %v47_v6  ;;  %v692_v13 = vld [vmem:[%s1254_s1] sm:$0xff]   ;;  %v18_v15 = vld [vmem:[%s1255_s0 + $0x18] sm:$0xff]  ;;  %v49_v16 = vld [vmem:[%s1255_s0 + $0x110] sm:$0xff] }
   0x6   :  { %605 = vmatprep.mubr.bf16.mxu0 %v79_v7  ;;  %v50_v17 = vld [vmem:[%s1255_s0 + $0x118] sm:$0xff]  ;;  %v19_v18 = vld [vmem:[%s1255_s0 + $0x20] sm:$0xff]  ;;  %v20_v19 = vld [vmem:[%s1255_s0 + $0x28] sm:$0xff]  ;;  %v80_v22 = vpack.c.bf16 %v18_v15, %v17_v14 }
   0x7   :  { %592 = vmatpush3.bf16.msra.mxu0 %v686_v1  ;;  %678 = vmatpush3.bf16.msra.mxu1 %v686_v1  ;;  %v51_v20 = vld [vmem:[%s1255_s0 + $0x120] sm:$0xff]  ;;  %v52_v21 = vld [vmem:[%s1255_s0 + $0x128] sm:$0xff]  ;;  %v96_v23 = vpack.c.bf16 %v50_v17, %v49_v16  ;;  %v81_v24 = vpack.c.bf16 %v20_v19, %v19_v18  ;;  %v21_v26 = vld [vmem:[%s1255_s0 + $0x30] sm:$0xff] }
   0x8   :  { %593 = vmatprep.subr.bf16.mxu0 %v687_v2  ;;  %671 = vmatprep.subr.bf16.mxu1 %v687_v2  ;;  %v97_v25 = vpack.c.bf16 %v52_v21, %v51_v20  ;;  %v22_v27 = vld [vmem:[%s1255_s0 + $0x38] sm:$0xff]  ;;  %v53_v28 = vld [vmem:[%s1255_s0 + $0x130] sm:$0xff]  ;;  %v23_v30 = vld [vmem:[%s1255_s0 + $0x40] sm:$0xff] }
   0x9   :  { %637 = vmatprep.mubr.bf16.mxu1 %v95_v9  ;;  %v54_v29 = vld [vmem:[%s1255_s0 + $0x138] sm:$0xff]  ;;  %v24_v31 = vld [vmem:[%s1255_s0 + $0x48] sm:$0xff]  ;;  %v55_v32 = vld [vmem:[%s1255_s0 + $0x140] sm:$0xff]  ;;  %v82_v34 = vpack.c.bf16 %v22_v27, %v21_v26 }
   0xa   :  { %v56_v33 = vld [vmem:[%s1255_s0 + $0x148] sm:$0xff]  ;;  %v98_v35 = vpack.c.bf16 %v54_v29, %v53_v28  ;;  %v83_v36 = vpack.c.bf16 %v24_v31, %v23_v30  ;;  %v25_v38 = vld [vmem:[%s1255_s0 + $0x50] sm:$0xff]  ;;  %v26_v39 = vld [vmem:[%s1255_s0 + $0x58] sm:$0xff] }
   0xb   :  { %594 = vmatpush3.bf16.msra.mxu0 %v687_v2  ;;  %679 = vmatpush3.bf16.msra.mxu1 %v687_v2  ;;  %v99_v37 = vpack.c.bf16 %v56_v33, %v55_v32  ;;  %v57_v40 = vld [vmem:[%s1255_s0 + $0x150] sm:$0xff]  ;;  %v58_v41 = vld [vmem:[%s1255_s0 + $0x158] sm:$0xff]  ;;  %v27_v42 = vld [vmem:[%s1255_s0 + $0x60] sm:$0xff]  ;;  %v84_v46 = vpack.c.bf16 %v26_v39, %v25_v38 }
   0xc   :  { %595 = vmatprep.subr.bf16.mxu0 %v688_v3  ;;  %672 = vmatprep.subr.bf16.mxu1 %v688_v3  ;;  %v28_v43 = vld [vmem:[%s1255_s0 + $0x68] sm:$0xff]  ;;  %v59_v44 = vld [vmem:[%s1255_s0 + $0x160] sm:$0xff]  ;;  %v100_v47 = vpack.c.bf16 %v58_v41, %v57_v40  ;;  %v29_v50 = vld [vmem:[%s1255_s0 + $0x70] sm:$0xff] }
   0xd   :  { %v60_v45 = vld [vmem:[%s1255_s0 + $0x168] sm:$0xff]  ;;  %v85_v48 = vpack.c.bf16 %v28_v43, %v27_v42  ;;  %v30_v51 = vld [vmem:[%s1255_s0 + $0x78] sm:$0xff]  ;;  %v61_v52 = vld [vmem:[%s1255_s0 + $0x170] sm:$0xff] }
   0xe   :  { %v101_v49 = vpack.c.bf16 %v60_v45, %v59_v44  ;;  %v62_v53 = vld [vmem:[%s1255_s0 + $0x178] sm:$0xff]  ;;  %v31_v54 = vld [vmem:[%s1255_s0 + $0x80] sm:$0xff]  ;;  %v32_v55 = vld [vmem:[%s1255_s0 + $0x88] sm:$0xff]  ;;  %v86_v58 = vpack.c.bf16 %v30_v51, %v29_v50 }
   0xf   :  { %596 = vmatpush3.bf16.msra.mxu0 %v688_v3  ;;  %680 = vmatpush3.bf16.msra.mxu1 %v688_v3  ;;  %v63_v56 = vld [vmem:[%s1255_s0 + $0x180] sm:$0xff]  ;;  %v64_v57 = vld [vmem:[%s1255_s0 + $0x188] sm:$0xff]  ;;  %v102_v59 = vpack.c.bf16 %v62_v53, %v61_v52  ;;  %v87_v60 = vpack.c.bf16 %v32_v55, %v31_v54  ;;  %v33_v62 = vld [vmem:[%s1255_s0 + $0x90] sm:$0xff] }
  0x10   :  { %597 = vmatprep.subr.bf16.mxu0 %v689_v10  ;;  %673 = vmatprep.subr.bf16.mxu1 %v689_v10  ;;  %v103_v61 = vpack.c.bf16 %v64_v57, %v63_v56  ;;  %v34_v63 = vld [vmem:[%s1255_s0 + $0x98] sm:$0xff]  ;;  %v65_v0 = vld [vmem:[%s1255_s0 + $0x190] sm:$0xff]  ;;  %v35_v2 = vld [vmem:[%s1255_s0 + $0xa0] sm:$0xff] }
  0x11   :  { %v66_v1 = vld [vmem:[%s1255_s0 + $0x198] sm:$0xff]  ;;  %v36_v3 = vld [vmem:[%s1255_s0 + $0xa8] sm:$0xff]  ;;  %v67_v4 = vld [vmem:[%s1255_s0 + $0x1a0] sm:$0xff]  ;;  %v88_v6 = vpack.c.bf16 %v34_v63, %v33_v62 }
  0x12   :  { %v68_v5 = vld [vmem:[%s1255_s0 + $0x1a8] sm:$0xff]  ;;  %v104_v7 = vpack.c.bf16 %v66_v1, %v65_v0  ;;  %v89_v8 = vpack.c.bf16 %v36_v3, %v35_v2  ;;  %v39_v14 = vld [vmem:[%s1255_s0 + $0xc0] sm:$0xff] }
  0x13   :  { %598 = vmatpush3.bf16.msra.mxu0 %v689_v10  ;;  %681 = vmatpush3.bf16.msra.mxu1 %v689_v10  ;;  %v105_v9 = vpack.c.bf16 %v68_v5, %v67_v4  ;;  %v37_v10 = vld [vmem:[%s1255_s0 + $0xb0] sm:$0xff]  ;;  %v40_v15 = vld [vmem:[%s1255_s0 + $0xc8] sm:$0xff]  ;;  %v71_v16 = vld [vmem:[%s1255_s0 + $0x1c0] sm:$0xff] }
  0x14   :  { %599 = vmatprep.subr.bf16.mxu0 %v690_v11  ;;  %674 = vmatprep.subr.bf16.mxu1 %v690_v11  ;;  %v72_v17 = vld [vmem:[%s1255_s0 + $0x1c8] sm:$0xff]  ;;  %v91_v20 = vpack.c.bf16 %v40_v15, %v39_v14  ;;  %v43_v26 = vld [vmem:[%s1255_s0 + $0xe0] sm:$0xff] }
  0x15   :  { %v107_v21 = vpack.c.bf16 %v72_v17, %v71_v16  ;;  %v44_v27 = vld [vmem:[%s1255_s0 + $0xe8] sm:$0xff]  ;;  %v75_v28 = vld [vmem:[%s1255_s0 + $0x1e0] sm:$0xff] }
  0x16   :  { %v76_v29 = vld [vmem:[%s1255_s0 + $0x1e8] sm:$0xff]  ;;  %v93_v32 = vpack.c.bf16 %v44_v27, %v43_v26  ;;  %v932_v40 = vld [vmem:[%s1256_s2] ss:$0 sm:$0xff] }
  0x17   :  { %600 = vmatpush3.bf16.msra.mxu0 %v690_v11  ;;  %682 = vmatpush3.bf16.msra.mxu1 %v690_v11  ;;  %v38_v11 = vld [vmem:[%s1255_s0 + $0xb8] sm:$0xff]  ;;  %v109_v33 = vpack.c.bf16 %v76_v29, %v75_v28 }
  0x18   :  { %601 = vmatprep.subr.bf16.mxu0 %v691_v12  ;;  %675 = vmatprep.subr.bf16.mxu1 %v691_v12  ;;  %v90_v18 = vpack.c.bf16 %v38_v11, %v37_v10 }
  0x1b   :  { %602 = vmatpush3.bf16.msra.mxu0 %v691_v12  ;;  %683 = vmatpush3.bf16.msra.mxu1 %v691_v12  ;;  %v69_v12 = vld [vmem:[%s1255_s0 + $0x1b0] sm:$0xff] }
  0x1c   :  { %603 = vmatprep.subr.bf16.mxu0 %v692_v13  ;;  %676 = vmatprep.subr.bf16.mxu1 %v692_v13 }
  0x1f   :  { %604 = vmatpush3.bf16.msra.mxu0 %v692_v13  ;;  %684 = vmatpush3.bf16.msra.mxu1 %v692_v13  ;;  %v70_v13 = vld [vmem:[%s1255_s0 + $0x1b8] sm:$0xff] }
  0x20   :  { %v106_v19 = vpack.c.bf16 %v70_v13, %v69_v12 }
  0x22   :  { %606 = vmatmul.mubr.bf16.vlgmr.msra.gmra.mxu0 %v80_v22  ;;  %638 = vmatmul.mubr.bf16.vlgmr.msra.gmra.mxu1 %v96_v23  ;;  %v41_v22 = vld [vmem:[%s1255_s0 + $0xd0] sm:$0xff]  ;;  %v42_v23 = vld [vmem:[%s1255_s0 + $0xd8] sm:$0xff] }
  0x23   :  { %609 = vmatprep.mubr.bf16.mxu0 %v81_v24  ;;  %641 = vmatprep.mubr.bf16.mxu1 %v97_v25  ;;  %v73_v24 = vld [vmem:[%s1255_s0 + $0x1d0] sm:$0xff]  ;;  %v74_v25 = vld [vmem:[%s1255_s0 + $0x1d8] sm:$0xff]  ;;  %v92_v30 = vpack.c.bf16 %v42_v23, %v41_v22 }
  0x24   :  { %v108_v31 = vpack.c.bf16 %v74_v25, %v73_v24 }
  0x2a   :  { %610 = vmatmul.mubr.bf16.gmra.mxu0 %v82_v34  ;;  %642 = vmatmul.mubr.bf16.gmra.mxu1 %v98_v35  ;;  %v45_v34 = vld [vmem:[%s1255_s0 + $0xf0] sm:$0xff]  ;;  %v46_v35 = vld [vmem:[%s1255_s0 + $0xf8] sm:$0xff] }
  0x2b   :  { %613 = vmatprep.mubr.bf16.mxu0 %v83_v36  ;;  %645 = vmatprep.mubr.bf16.mxu1 %v99_v37  ;;  %v77_v36 = vld [vmem:[%s1255_s0 + $0x1f0] sm:$0xff]  ;;  %v78_v37 = vld [vmem:[%s1255_s0 + $0x1f8] sm:$0xff]  ;;  %v94_v38 = vpack.c.bf16 %v46_v35, %v45_v34 }
  0x2c   :  { %v110_v39 = vpack.c.bf16 %v78_v37, %v77_v36 }
  0x32   :  { %614 = vmatmul.mubr.bf16.gmra.mxu0 %v84_v46  ;;  %646 = vmatmul.mubr.bf16.gmra.mxu1 %v100_v47 }
  0x33   :  { %617 = vmatprep.mubr.bf16.mxu0 %v85_v48  ;;  %649 = vmatprep.mubr.bf16.mxu1 %v101_v49 }
  0x3a   :  { %618 = vmatmul.mubr.bf16.gmra.mxu0 %v86_v58  ;;  %650 = vmatmul.mubr.bf16.gmra.mxu1 %v102_v59 }
  0x3b   :  { %621 = vmatprep.mubr.bf16.mxu0 %v87_v60  ;;  %653 = vmatprep.mubr.bf16.mxu1 %v103_v61 }
  0x42   :  { %622 = vmatmul.mubr.bf16.gmra.mxu0 %v88_v6  ;;  %654 = vmatmul.mubr.bf16.gmra.mxu1 %v104_v7 }
  0x43   :  { %625 = vmatprep.mubr.bf16.mxu0 %v89_v8  ;;  %657 = vmatprep.mubr.bf16.mxu1 %v105_v9 }
  0x4a   :  { %626 = vmatmul.mubr.bf16.gmra.mxu0 %v90_v18  ;;  %658 = vmatmul.mubr.bf16.gmra.mxu1 %v106_v19 }
  0x4b   :  { %629 = vmatprep.mubr.bf16.mxu0 %v91_v20  ;;  %661 = vmatprep.mubr.bf16.mxu1 %v107_v21 }
  0x52   :  { %630 = vmatmul.mubr.bf16.gmra.mxu0 %v92_v30  ;;  %662 = vmatmul.mubr.bf16.gmra.mxu1 %v108_v31 }
  0x53   :  { %633 = vmatprep.mubr.bf16.mxu0 %v93_v32  ;;  %665 = vmatprep.mubr.bf16.mxu1 %v109_v33 }
  0x5a   :  { %634 = vmatmul.mubr.bf16.gmra.mxu0 %v94_v38  ;;  %666 = vmatmul.mubr.bf16.gmra.mxu1 %v110_v39 }
  0xe2   :  { %v607_v41 = vpop.f32.mrf.mxu0  ;;  %v639_v42 = vpop.f32.mrf.mxu1 }
  0xe3   :  { %v225_v43 = vadd.f32 %v607_v41, %v932_v40  ;;  %v353_v44 = vadd.f32 %v639_v42, %v932_v40 }
  0xe4   :  { %v216_v45 = vpop.f32.mrf.mxu0  ;;  %v344_v46 = vpop.f32.mrf.mxu1 }
  0xe5   :  { %474 = vst.msk [vmem:[%s1257_s3 + $0x10] sm:$0xff] %vm471_vm0, %v225_v43  ;;  %506 = vst.msk [vmem:[%s1257_s3 + $0x110] sm:$0xff] %vm471_vm0, %v353_v44  ;;  %v217_v47 = vadd.f32 %v932_v40, %v216_v45  ;;  %v345_v48 = vadd.f32 %v932_v40, %v344_v46 }
  0xe6   :  { %v608_v49 = vpop.f32.mrf.mxu0  ;;  %v640_v50 = vpop.f32.mrf.mxu1 }
  0xe7   :  { %472 = vst.msk [vmem:[%s1257_s3] sm:$0xff] %vm471_vm0, %v217_v47  ;;  %504 = vst.msk [vmem:[%s1257_s3 + $0x100] sm:$0xff] %vm471_vm0, %v345_v48  ;;  %v228_v51 = vadd.f32 %v608_v49, %v932_v40  ;;  %v356_v52 = vadd.f32 %v640_v50, %v932_v40 }
  0xe8   :  { %v219_v53 = vpop.f32.mrf.mxu0  ;;  %v347_v54 = vpop.f32.mrf.mxu1 }
  0xe9   :  { %475 = vst.msk [vmem:[%s1257_s3 + $0x18] sm:$0xff] %vm471_vm0, %v228_v51  ;;  %507 = vst.msk [vmem:[%s1257_s3 + $0x118] sm:$0xff] %vm471_vm0, %v356_v52  ;;  %v220_v55 = vadd.f32 %v932_v40, %v219_v53  ;;  %v348_v56 = vadd.f32 %v932_v40, %v347_v54 }
  0xea   :  { %v611_v57 = vpop.f32.mrf.mxu0  ;;  %v643_v58 = vpop.f32.mrf.mxu1 }
  0xeb   :  { %473 = vst.msk [vmem:[%s1257_s3 + $0x8] sm:$0xff] %vm471_vm0, %v220_v55  ;;  %505 = vst.msk [vmem:[%s1257_s3 + $0x108] sm:$0xff] %vm471_vm0, %v348_v56  ;;  %v241_v59 = vadd.f32 %v611_v57, %v932_v40  ;;  %v369_v60 = vadd.f32 %v643_v58, %v932_v40 }
  0xec   :  { %v232_v61 = vpop.f32.mrf.mxu0  ;;  %v360_v62 = vpop.f32.mrf.mxu1 }
  0xed   :  { %478 = vst.msk [vmem:[%s1257_s3 + $0x30] sm:$0xff] %vm471_vm0, %v241_v59  ;;  %510 = vst.msk [vmem:[%s1257_s3 + $0x130] sm:$0xff] %vm471_vm0, %v369_v60  ;;  %v233_v63 = vadd.f32 %v932_v40, %v232_v61  ;;  %v361_v0 = vadd.f32 %v932_v40, %v360_v62 }
  0xee   :  { %v612_v1 = vpop.f32.mrf.mxu0  ;;  %v644_v2 = vpop.f32.mrf.mxu1 }
  0xef   :  { %476 = vst.msk [vmem:[%s1257_s3 + $0x20] sm:$0xff] %vm471_vm0, %v233_v63  ;;  %508 = vst.msk [vmem:[%s1257_s3 + $0x120] sm:$0xff] %vm471_vm0, %v361_v0  ;;  %v244_v3 = vadd.f32 %v612_v1, %v932_v40  ;;  %v372_v4 = vadd.f32 %v644_v2, %v932_v40 }
  0xf0   :  { %v235_v5 = vpop.f32.mrf.mxu0  ;;  %v363_v6 = vpop.f32.mrf.mxu1 }
  0xf1   :  { %479 = vst.msk [vmem:[%s1257_s3 + $0x38] sm:$0xff] %vm471_vm0, %v244_v3  ;;  %511 = vst.msk [vmem:[%s1257_s3 + $0x138] sm:$0xff] %vm471_vm0, %v372_v4  ;;  %v236_v7 = vadd.f32 %v932_v40, %v235_v5  ;;  %v364_v8 = vadd.f32 %v932_v40, %v363_v6 }
  0xf2   :  { %v615_v9 = vpop.f32.mrf.mxu0  ;;  %v647_v10 = vpop.f32.mrf.mxu1 }
  0xf3   :  { %477 = vst.msk [vmem:[%s1257_s3 + $0x28] sm:$0xff] %vm471_vm0, %v236_v7  ;;  %509 = vst.msk [vmem:[%s1257_s3 + $0x128] sm:$0xff] %vm471_vm0, %v364_v8  ;;  %v257_v11 = vadd.f32 %v615_v9, %v932_v40  ;;  %v385_v12 = vadd.f32 %v647_v10, %v932_v40 }
  0xf4   :  { %v248_v13 = vpop.f32.mrf.mxu0  ;;  %v376_v14 = vpop.f32.mrf.mxu1 }
  0xf5   :  { %482 = vst.msk [vmem:[%s1257_s3 + $0x50] sm:$0xff] %vm471_vm0, %v257_v11  ;;  %514 = vst.msk [vmem:[%s1257_s3 + $0x150] sm:$0xff] %vm471_vm0, %v385_v12  ;;  %v249_v15 = vadd.f32 %v932_v40, %v248_v13  ;;  %v377_v16 = vadd.f32 %v932_v40, %v376_v14 }
  0xf6   :  { %v616_v17 = vpop.f32.mrf.mxu0  ;;  %v648_v18 = vpop.f32.mrf.mxu1 }
  0xf7   :  { %480 = vst.msk [vmem:[%s1257_s3 + $0x40] sm:$0xff] %vm471_vm0, %v249_v15  ;;  %512 = vst.msk [vmem:[%s1257_s3 + $0x140] sm:$0xff] %vm471_vm0, %v377_v16  ;;  %v260_v19 = vadd.f32 %v616_v17, %v932_v40  ;;  %v388_v20 = vadd.f32 %v648_v18, %v932_v40 }
  0xf8   :  { %v251_v21 = vpop.f32.mrf.mxu0  ;;  %v379_v22 = vpop.f32.mrf.mxu1 }
  0xf9   :  { %483 = vst.msk [vmem:[%s1257_s3 + $0x58] sm:$0xff] %vm471_vm0, %v260_v19  ;;  %515 = vst.msk [vmem:[%s1257_s3 + $0x158] sm:$0xff] %vm471_vm0, %v388_v20  ;;  %v252_v23 = vadd.f32 %v932_v40, %v251_v21  ;;  %v380_v24 = vadd.f32 %v932_v40, %v379_v22 }
  0xfa   :  { %v619_v25 = vpop.f32.mrf.mxu0  ;;  %v651_v26 = vpop.f32.mrf.mxu1 }
  0xfb   :  { %481 = vst.msk [vmem:[%s1257_s3 + $0x48] sm:$0xff] %vm471_vm0, %v252_v23  ;;  %513 = vst.msk [vmem:[%s1257_s3 + $0x148] sm:$0xff] %vm471_vm0, %v380_v24  ;;  %v273_v27 = vadd.f32 %v619_v25, %v932_v40  ;;  %v401_v28 = vadd.f32 %v651_v26, %v932_v40 }
  0xfc   :  { %v264_v29 = vpop.f32.mrf.mxu0  ;;  %v392_v30 = vpop.f32.mrf.mxu1 }
  0xfd   :  { %486 = vst.msk [vmem:[%s1257_s3 + $0x70] sm:$0xff] %vm471_vm0, %v273_v27  ;;  %518 = vst.msk [vmem:[%s1257_s3 + $0x170] sm:$0xff] %vm471_vm0, %v401_v28  ;;  %v265_v31 = vadd.f32 %v932_v40, %v264_v29  ;;  %v393_v32 = vadd.f32 %v932_v40, %v392_v30 }
  0xfe   :  { %v620_v33 = vpop.f32.mrf.mxu0  ;;  %v652_v34 = vpop.f32.mrf.mxu1 }
  0xff   :  { %484 = vst.msk [vmem:[%s1257_s3 + $0x60] sm:$0xff] %vm471_vm0, %v265_v31  ;;  %516 = vst.msk [vmem:[%s1257_s3 + $0x160] sm:$0xff] %vm471_vm0, %v393_v32  ;;  %v276_v35 = vadd.f32 %v620_v33, %v932_v40  ;;  %v404_v36 = vadd.f32 %v652_v34, %v932_v40 }
 0x100   :  { %v267_v37 = vpop.f32.mrf.mxu0  ;;  %v395_v38 = vpop.f32.mrf.mxu1 }
 0x101   :  { %487 = vst.msk [vmem:[%s1257_s3 + $0x78] sm:$0xff] %vm471_vm0, %v276_v35  ;;  %519 = vst.msk [vmem:[%s1257_s3 + $0x178] sm:$0xff] %vm471_vm0, %v404_v36  ;;  %v268_v39 = vadd.f32 %v932_v40, %v267_v37  ;;  %v396_v41 = vadd.f32 %v932_v40, %v395_v38 }
 0x102   :  { %v623_v42 = vpop.f32.mrf.mxu0  ;;  %v655_v43 = vpop.f32.mrf.mxu1 }
 0x103   :  { %485 = vst.msk [vmem:[%s1257_s3 + $0x68] sm:$0xff] %vm471_vm0, %v268_v39  ;;  %517 = vst.msk [vmem:[%s1257_s3 + $0x168] sm:$0xff] %vm471_vm0, %v396_v41  ;;  %v289_v44 = vadd.f32 %v623_v42, %v932_v40  ;;  %v417_v45 = vadd.f32 %v655_v43, %v932_v40 }
 0x104   :  { %v280_v46 = vpop.f32.mrf.mxu0  ;;  %v408_v47 = vpop.f32.mrf.mxu1 }
 0x105   :  { %490 = vst.msk [vmem:[%s1257_s3 + $0x90] sm:$0xff] %vm471_vm0, %v289_v44  ;;  %522 = vst.msk [vmem:[%s1257_s3 + $0x190] sm:$0xff] %vm471_vm0, %v417_v45  ;;  %v281_v48 = vadd.f32 %v932_v40, %v280_v46  ;;  %v409_v49 = vadd.f32 %v932_v40, %v408_v47 }
 0x106   :  { %v624_v50 = vpop.f32.mrf.mxu0  ;;  %v656_v51 = vpop.f32.mrf.mxu1 }
 0x107   :  { %488 = vst.msk [vmem:[%s1257_s3 + $0x80] sm:$0xff] %vm471_vm0, %v281_v48  ;;  %520 = vst.msk [vmem:[%s1257_s3 + $0x180] sm:$0xff] %vm471_vm0, %v409_v49  ;;  %v292_v52 = vadd.f32 %v624_v50, %v932_v40  ;;  %v420_v53 = vadd.f32 %v656_v51, %v932_v40 }
 0x108   :  { %v283_v54 = vpop.f32.mrf.mxu0  ;;  %v411_v55 = vpop.f32.mrf.mxu1 }
 0x109   :  { %491 = vst.msk [vmem:[%s1257_s3 + $0x98] sm:$0xff] %vm471_vm0, %v292_v52  ;;  %523 = vst.msk [vmem:[%s1257_s3 + $0x198] sm:$0xff] %vm471_vm0, %v420_v53  ;;  %v284_v56 = vadd.f32 %v932_v40, %v283_v54  ;;  %v412_v57 = vadd.f32 %v932_v40, %v411_v55 }
 0x10a   :  { %v627_v58 = vpop.f32.mrf.mxu0  ;;  %v659_v59 = vpop.f32.mrf.mxu1 }
 0x10b   :  { %489 = vst.msk [vmem:[%s1257_s3 + $0x88] sm:$0xff] %vm471_vm0, %v284_v56  ;;  %521 = vst.msk [vmem:[%s1257_s3 + $0x188] sm:$0xff] %vm471_vm0, %v412_v57  ;;  %v305_v60 = vadd.f32 %v627_v58, %v932_v40  ;;  %v433_v61 = vadd.f32 %v659_v59, %v932_v40 }
 0x10c   :  { %v296_v62 = vpop.f32.mrf.mxu0  ;;  %v424_v63 = vpop.f32.mrf.mxu1 }
 0x10d   :  { %494 = vst.msk [vmem:[%s1257_s3 + $0xb0] sm:$0xff] %vm471_vm0, %v305_v60  ;;  %526 = vst.msk [vmem:[%s1257_s3 + $0x1b0] sm:$0xff] %vm471_vm0, %v433_v61  ;;  %v297_v0 = vadd.f32 %v932_v40, %v296_v62  ;;  %v425_v1 = vadd.f32 %v932_v40, %v424_v63 }
 0x10e   :  { %v628_v2 = vpop.f32.mrf.mxu0  ;;  %v660_v3 = vpop.f32.mrf.mxu1 }
 0x10f   :  { %492 = vst.msk [vmem:[%s1257_s3 + $0xa0] sm:$0xff] %vm471_vm0, %v297_v0  ;;  %524 = vst.msk [vmem:[%s1257_s3 + $0x1a0] sm:$0xff] %vm471_vm0, %v425_v1  ;;  %v308_v4 = vadd.f32 %v628_v2, %v932_v40  ;;  %v436_v5 = vadd.f32 %v660_v3, %v932_v40 }
 0x110   :  { %v299_v6 = vpop.f32.mrf.mxu0  ;;  %v427_v7 = vpop.f32.mrf.mxu1 }
 0x111   :  { %495 = vst.msk [vmem:[%s1257_s3 + $0xb8] sm:$0xff] %vm471_vm0, %v308_v4  ;;  %527 = vst.msk [vmem:[%s1257_s3 + $0x1b8] sm:$0xff] %vm471_vm0, %v436_v5  ;;  %v300_v8 = vadd.f32 %v932_v40, %v299_v6  ;;  %v428_v9 = vadd.f32 %v932_v40, %v427_v7 }
 0x112   :  { %v631_v10 = vpop.f32.mrf.mxu0  ;;  %v663_v11 = vpop.f32.mrf.mxu1 }
 0x113   :  { %493 = vst.msk [vmem:[%s1257_s3 + $0xa8] sm:$0xff] %vm471_vm0, %v300_v8  ;;  %525 = vst.msk [vmem:[%s1257_s3 + $0x1a8] sm:$0xff] %vm471_vm0, %v428_v9  ;;  %v321_v12 = vadd.f32 %v631_v10, %v932_v40  ;;  %v449_v13 = vadd.f32 %v663_v11, %v932_v40 }
 0x114   :  { %v312_v14 = vpop.f32.mrf.mxu0  ;;  %v440_v15 = vpop.f32.mrf.mxu1 }
 0x115   :  { %498 = vst.msk [vmem:[%s1257_s3 + $0xd0] sm:$0xff] %vm471_vm0, %v321_v12  ;;  %530 = vst.msk [vmem:[%s1257_s3 + $0x1d0] sm:$0xff] %vm471_vm0, %v449_v13  ;;  %v313_v16 = vadd.f32 %v932_v40, %v312_v14  ;;  %v441_v17 = vadd.f32 %v932_v40, %v440_v15 }
 0x116   :  { %v632_v18 = vpop.f32.mrf.mxu0  ;;  %v664_v19 = vpop.f32.mrf.mxu1 }
 0x117   :  { %496 = vst.msk [vmem:[%s1257_s3 + $0xc0] sm:$0xff] %vm471_vm0, %v313_v16  ;;  %528 = vst.msk [vmem:[%s1257_s3 + $0x1c0] sm:$0xff] %vm471_vm0, %v441_v17  ;;  %v324_v20 = vadd.f32 %v632_v18, %v932_v40  ;;  %v452_v21 = vadd.f32 %v664_v19, %v932_v40 }
 0x118   :  { %v315_v22 = vpop.f32.mrf.mxu0  ;;  %v443_v23 = vpop.f32.mrf.mxu1 }
 0x119   :  { %499 = vst.msk [vmem:[%s1257_s3 + $0xd8] sm:$0xff] %vm471_vm0, %v324_v20  ;;  %531 = vst.msk [vmem:[%s1257_s3 + $0x1d8] sm:$0xff] %vm471_vm0, %v452_v21  ;;  %v316_v24 = vadd.f32 %v932_v40, %v315_v22  ;;  %v444_v25 = vadd.f32 %v932_v40, %v443_v23 }
 0x11a   :  { %v635_v26 = vpop.f32.mrf.mxu0  ;;  %v667_v27 = vpop.f32.mrf.mxu1 }
 0x11b   :  { %497 = vst.msk [vmem:[%s1257_s3 + $0xc8] sm:$0xff] %vm471_vm0, %v316_v24  ;;  %529 = vst.msk [vmem:[%s1257_s3 + $0x1c8] sm:$0xff] %vm471_vm0, %v444_v25  ;;  %v337_v28 = vadd.f32 %v635_v26, %v932_v40  ;;  %v465_v29 = vadd.f32 %v667_v27, %v932_v40 }
 0x11c   :  { %v328_v30 = vpop.f32.mrf.mxu0  ;;  %v456_v31 = vpop.f32.mrf.mxu1 }
 0x11d   :  { %502 = vst.msk [vmem:[%s1257_s3 + $0xf0] sm:$0xff] %vm471_vm0, %v337_v28  ;;  %534 = vst.msk [vmem:[%s1257_s3 + $0x1f0] sm:$0xff] %vm471_vm0, %v465_v29  ;;  %v329_v32 = vadd.f32 %v932_v40, %v328_v30  ;;  %v457_v33 = vadd.f32 %v932_v40, %v456_v31 }
 0x11e   :  { %v636_v34 = vpop.f32.mrf.mxu0  ;;  %v668_v35 = vpop.f32.mrf.mxu1 }
 0x11f   :  { %500 = vst.msk [vmem:[%s1257_s3 + $0xe0] sm:$0xff] %vm471_vm0, %v329_v32  ;;  %532 = vst.msk [vmem:[%s1257_s3 + $0x1e0] sm:$0xff] %vm471_vm0, %v457_v33  ;;  %v340_v36 = vadd.f32 %v636_v34, %v932_v40  ;;  %v468_v37 = vadd.f32 %v668_v35, %v932_v40 }
 0x120   :  { %v331_v38 = vpop.f32.mrf.mxu0  ;;  %v459_v39 = vpop.f32.mrf.mxu1 }
 0x121   :  { %503 = vst.msk [vmem:[%s1257_s3 + $0xf8] sm:$0xff] %vm471_vm0, %v340_v36  ;;  %535 = vst.msk [vmem:[%s1257_s3 + $0x1f8] sm:$0xff] %vm471_vm0, %v468_v37  ;;  %v332_v41 = vadd.f32 %v932_v40, %v331_v38  ;;  %v460_v42 = vadd.f32 %v932_v40, %v459_v39 }
 0x123   :  { %501 = vst.msk [vmem:[%s1257_s3 + $0xe8] sm:$0xff] %vm471_vm0, %v332_v41  ;;  %533 = vst.msk [vmem:[%s1257_s3 + $0x1e8] sm:$0xff] %vm471_vm0, %v460_v42 }

// kernel: unet_mid_block_forward.28
= control target key start
LH: loop header
LB: loop body
LE: loop exit
PB: predicated region body
PF: predicated region fallthrough
CT: control target
= control target key end

     0   :  { %v1224_v1 = vmov 0   ;;  %vm147_vm0 = vcmask 261120   ;;  %s2273_s1 = inlined_call_operand.vmem [shape: bf16[32,256], index: 1, kind: input, shape index: {}]   ;;  %s2274_s0 = inlined_call_operand.vmem [shape: f32[512,32], index: 0, kind: input, shape index: {}]   ;;  %s2275_s2 = inlined_call_operand.vmem [shape: f32[1,256], index: 2, kind: input, shape index: {}]   ;;  %s2276_s3 = inlined_call_operand.vmem [shape: f32[512,128], index: 3, kind: output, shape index: {}]  }
   0x1   :  { %v1090_v0 = vld [vmem:[%s2273_s1 + $0x14] ss:$8 sps:$4 sm:$0xff]   ;;  %276 = vmatprep.mubr.bf16.mxu0 %v1224_v1  ;;  %436 = vmatprep.mubr.bf16.mxu1 %v1224_v1  ;;  %v1092_v2 = vld [vmem:[%s2273_s1 + $0x10] ss:$8 sps:$4 sm:$0xff]   ;;  %v1093_v3 = vld [vmem:[%s2273_s1 + $0x4] ss:$8 sps:$4 sm:$0xff]  }
   0x2   :  { %256 = vmatprep.subr.bf16.mxu0 %v1090_v0  ;;  %1085 = vmatprep.subr.bf16.mxu1 %v1090_v0  ;;  %v1095_v4 = vld [vmem:[%s2273_s1] ss:$8 sps:$4 sm:$0xff]   ;;  %v17_v11 = vld [vmem:[%s2274_s0 + $0x10] sm:$0xff]  ;;  %v18_v12 = vld [vmem:[%s2274_s0 + $0x18] sm:$0xff] }
   0x3   :  { %v15_v5 = vld [vmem:[%s2274_s0] sm:$0xff]  ;;  %257 = vmatpush1.bf16.msra.mxu0 %v1092_v2  ;;  %1087 = vmatpush1.bf16.msra.mxu1 %v1092_v2  ;;  %v16_v6 = vld [vmem:[%s2274_s0 + $0x8] sm:$0xff]  ;;  %v49_v13 = vld [vmem:[%s2274_s0 + $0x110] sm:$0xff]  ;;  %v80_v15 = vpack.c.bf16 %v18_v12, %v17_v11 }
   0x4   :  { %v47_v7 = vld [vmem:[%s2274_s0 + $0x100] sm:$0xff]  ;;  %v48_v8 = vld [vmem:[%s2274_s0 + $0x108] sm:$0xff]  ;;  %258 = vmatprep.subr.bf16.mxu0 %v1093_v3  ;;  %1086 = vmatprep.subr.bf16.mxu1 %v1093_v3  ;;  %v79_v9 = vpack.c.bf16 %v16_v6, %v15_v5  ;;  %v50_v14 = vld [vmem:[%s2274_s0 + $0x118] sm:$0xff] }
   0x5   :  { %v95_v10 = vpack.c.bf16 %v48_v8, %v47_v7  ;;  %v96_v16 = vpack.c.bf16 %v50_v14, %v49_v13  ;;  %v19_v17 = vld [vmem:[%s2274_s0 + $0x20] sm:$0xff]  ;;  %v20_v18 = vld [vmem:[%s2274_s0 + $0x28] sm:$0xff]  ;;  %v21_v23 = vld [vmem:[%s2274_s0 + $0x30] sm:$0xff] }
   0x6   :  { %v51_v19 = vld [vmem:[%s2274_s0 + $0x120] sm:$0xff]  ;;  %v52_v20 = vld [vmem:[%s2274_s0 + $0x128] sm:$0xff]  ;;  %v81_v21 = vpack.c.bf16 %v20_v18, %v19_v17  ;;  %v22_v24 = vld [vmem:[%s2274_s0 + $0x38] sm:$0xff] }
   0x7   :  { %259 = vmatpush1.bf16.msra.mxu0 %v1095_v4  ;;  %1088 = vmatpush1.bf16.msra.mxu1 %v1095_v4  ;;  %v97_v22 = vpack.c.bf16 %v52_v20, %v51_v19  ;;  %v53_v25 = vld [vmem:[%s2274_s0 + $0x130] sm:$0xff]  ;;  %v54_v26 = vld [vmem:[%s2274_s0 + $0x138] sm:$0xff]  ;;  %v82_v27 = vpack.c.bf16 %v22_v24, %v21_v23  ;;  %v23_v29 = vld [vmem:[%s2274_s0 + $0x40] sm:$0xff] }
   0x8   :  { %v98_v28 = vpack.c.bf16 %v54_v26, %v53_v25  ;;  %v24_v30 = vld [vmem:[%s2274_s0 + $0x48] sm:$0xff]  ;;  %v55_v31 = vld [vmem:[%s2274_s0 + $0x140] sm:$0xff]  ;;  %v25_v35 = vld [vmem:[%s2274_s0 + $0x50] sm:$0xff] }
   0x9   :  { %v56_v32 = vld [vmem:[%s2274_s0 + $0x148] sm:$0xff]  ;;  %v83_v33 = vpack.c.bf16 %v24_v30, %v23_v29  ;;  %v26_v36 = vld [vmem:[%s2274_s0 + $0x58] sm:$0xff]  ;;  %v57_v37 = vld [vmem:[%s2274_s0 + $0x150] sm:$0xff] }
   0xa   :  { %1053 = vmatmul.mubr.msk.bf16.vlgmr.msra.gmra.mxu0 %vm147_vm0, %v79_v9  ;;  %1069 = vmatmul.mubr.msk.bf16.vlgmr.msra.gmra.mxu1 %vm147_vm0, %v95_v10  ;;  %v99_v34 = vpack.c.bf16 %v56_v32, %v55_v31  ;;  %v58_v38 = vld [vmem:[%s2274_s0 + $0x158] sm:$0xff]  ;;  %v84_v39 = vpack.c.bf16 %v26_v36, %v25_v35  ;;  %v27_v41 = vld [vmem:[%s2274_s0 + $0x60] sm:$0xff]  ;;  %v28_v42 = vld [vmem:[%s2274_s0 + $0x68] sm:$0xff] }
   0xb   :  { %286 = vmatprep.mubr.bf16.mxu0 %v1224_v1  ;;  %446 = vmatprep.mubr.bf16.mxu1 %v1224_v1  ;;  %v100_v40 = vpack.c.bf16 %v58_v38, %v57_v37  ;;  %v59_v43 = vld [vmem:[%s2274_s0 + $0x160] sm:$0xff]  ;;  %v60_v44 = vld [vmem:[%s2274_s0 + $0x168] sm:$0xff]  ;;  %v85_v45 = vpack.c.bf16 %v28_v42, %v27_v41  ;;  %v29_v47 = vld [vmem:[%s2274_s0 + $0x70] sm:$0xff]  ;;  %v117_v38 = vlaneseq }
   0xc   :  { %v101_v46 = vpack.c.bf16 %v60_v44, %v59_v43  ;;  %v30_v48 = vld [vmem:[%s2274_s0 + $0x78] sm:$0xff]  ;;  %v61_v49 = vld [vmem:[%s2274_s0 + $0x170] sm:$0xff]  ;;  %v31_v53 = vld [vmem:[%s2274_s0 + $0x80] sm:$0xff] }
   0xd   :  { %v62_v50 = vld [vmem:[%s2274_s0 + $0x178] sm:$0xff]  ;;  %v86_v51 = vpack.c.bf16 %v30_v48, %v29_v47  ;;  %v32_v54 = vld [vmem:[%s2274_s0 + $0x88] sm:$0xff]  ;;  %v63_v55 = vld [vmem:[%s2274_s0 + $0x180] sm:$0xff] }
   0xe   :  { %v102_v52 = vpack.c.bf16 %v62_v50, %v61_v49  ;;  %v64_v56 = vld [vmem:[%s2274_s0 + $0x188] sm:$0xff]  ;;  %v87_v57 = vpack.c.bf16 %v32_v54, %v31_v53  ;;  %v33_v59 = vld [vmem:[%s2274_s0 + $0x90] sm:$0xff]  ;;  %v34_v60 = vld [vmem:[%s2274_s0 + $0x98] sm:$0xff] }
   0xf   :  { %v103_v58 = vpack.c.bf16 %v64_v56, %v63_v55  ;;  %v65_v61 = vld [vmem:[%s2274_s0 + $0x190] sm:$0xff]  ;;  %v66_v62 = vld [vmem:[%s2274_s0 + $0x198] sm:$0xff]  ;;  %v88_v63 = vpack.c.bf16 %v34_v60, %v33_v59  ;;  %v35_v2 = vld [vmem:[%s2274_s0 + $0xa0] sm:$0xff] }
  0x10   :  { %v104_v0 = vpack.c.bf16 %v66_v62, %v65_v61  ;;  %v36_v3 = vld [vmem:[%s2274_s0 + $0xa8] sm:$0xff]  ;;  %v67_v4 = vld [vmem:[%s2274_s0 + $0x1a0] sm:$0xff]  ;;  %v37_v8 = vld [vmem:[%s2274_s0 + $0xb0] sm:$0xff] }
  0x11   :  { %v68_v5 = vld [vmem:[%s2274_s0 + $0x1a8] sm:$0xff]  ;;  %v89_v6 = vpack.c.bf16 %v36_v3, %v35_v2  ;;  %v38_v9 = vld [vmem:[%s2274_s0 + $0xb8] sm:$0xff]  ;;  %v69_v10 = vld [vmem:[%s2274_s0 + $0x1b0] sm:$0xff] }
  0x12   :  { %1054 = vmatmul.mubr.msk.bf16.gmra.mxu0 %vm147_vm0, %v80_v15  ;;  %1070 = vmatmul.mubr.msk.bf16.gmra.mxu1 %vm147_vm0, %v96_v16  ;;  %v105_v7 = vpack.c.bf16 %v68_v5, %v67_v4  ;;  %v70_v11 = vld [vmem:[%s2274_s0 + $0x1b8] sm:$0xff]  ;;  %v90_v12 = vpack.c.bf16 %v38_v9, %v37_v8  ;;  %v39_v14 = vld [vmem:[%s2274_s0 + $0xc0] sm:$0xff]  ;;  %v40_v15 = vld [vmem:[%s2274_s0 + $0xc8] sm:$0xff] }
  0x13   :  { %296 = vmatprep.mubr.bf16.mxu0 %v1224_v1  ;;  %456 = vmatprep.mubr.bf16.mxu1 %v1224_v1  ;;  %v106_v13 = vpack.c.bf16 %v70_v11, %v69_v10  ;;  %v71_v16 = vld [vmem:[%s2274_s0 + $0x1c0] sm:$0xff]  ;;  %v72_v17 = vld [vmem:[%s2274_s0 + $0x1c8] sm:$0xff]  ;;  %v91_v18 = vpack.c.bf16 %v40_v15, %v39_v14  ;;  %v41_v20 = vld [vmem:[%s2274_s0 + $0xd0] sm:$0xff] }
  0x14   :  { %v107_v19 = vpack.c.bf16 %v72_v17, %v71_v16  ;;  %v74_v23 = vld [vmem:[%s2274_s0 + $0x1d8] sm:$0xff]  ;;  %v43_v26 = vld [vmem:[%s2274_s0 + $0xe0] sm:$0xff]  ;;  %v76_v29 = vld [vmem:[%s2274_s0 + $0x1e8] sm:$0xff] }
  0x15   :  { %v45_v32 = vld [vmem:[%s2274_s0 + $0xf0] sm:$0xff]  ;;  %v78_v35 = vld [vmem:[%s2274_s0 + $0x1f8] sm:$0xff] }
  0x1a   :  { %1055 = vmatmul.mubr.msk.bf16.gmra.mxu0 %vm147_vm0, %v81_v21  ;;  %1071 = vmatmul.mubr.msk.bf16.gmra.mxu1 %vm147_vm0, %v97_v22  ;;  %v42_v21 = vld [vmem:[%s2274_s0 + $0xd8] sm:$0xff]  ;;  %v73_v22 = vld [vmem:[%s2274_s0 + $0x1d0] sm:$0xff] }
  0x1b   :  { %306 = vmatprep.mubr.bf16.mxu0 %v1224_v1  ;;  %466 = vmatprep.mubr.bf16.mxu1 %v1224_v1  ;;  %v92_v24 = vpack.c.bf16 %v42_v21, %v41_v20  ;;  %v108_v25 = vpack.c.bf16 %v74_v23, %v73_v22 }
  0x22   :  { %1056 = vmatmul.mubr.msk.bf16.gmra.mxu0 %vm147_vm0, %v82_v27  ;;  %1072 = vmatmul.mubr.msk.bf16.gmra.mxu1 %vm147_vm0, %v98_v28  ;;  %v44_v27 = vld [vmem:[%s2274_s0 + $0xe8] sm:$0xff]  ;;  %v75_v28 = vld [vmem:[%s2274_s0 + $0x1e0] sm:$0xff] }
  0x23   :  { %316 = vmatprep.mubr.bf16.mxu0 %v1224_v1  ;;  %476 = vmatprep.mubr.bf16.mxu1 %v1224_v1  ;;  %v93_v30 = vpack.c.bf16 %v44_v27, %v43_v26  ;;  %v109_v31 = vpack.c.bf16 %v76_v29, %v75_v28 }
  0x2a   :  { %1057 = vmatmul.mubr.msk.bf16.gmra.mxu0 %vm147_vm0, %v83_v33  ;;  %1073 = vmatmul.mubr.msk.bf16.gmra.mxu1 %vm147_vm0, %v99_v34  ;;  %v46_v33 = vld [vmem:[%s2274_s0 + $0xf8] sm:$0xff]  ;;  %v77_v34 = vld [vmem:[%s2274_s0 + $0x1f0] sm:$0xff] }
  0x2b   :  { %326 = vmatprep.mubr.bf16.mxu0 %v1224_v1  ;;  %486 = vmatprep.mubr.bf16.mxu1 %v1224_v1  ;;  %v94_v36 = vpack.c.bf16 %v46_v33, %v45_v32  ;;  %v110_v37 = vpack.c.bf16 %v78_v35, %v77_v34 }
  0x32   :  { %1058 = vmatmul.mubr.msk.bf16.gmra.mxu0 %vm147_vm0, %v84_v39  ;;  %1074 = vmatmul.mubr.msk.bf16.gmra.mxu1 %vm147_vm0, %v100_v40  ;;  %v115_v40 = vld [vmem:[%s2275_s2] sm:$0x3] }
  0x33   :  { %336 = vmatprep.mubr.bf16.mxu0 %v1224_v1  ;;  %496 = vmatprep.mubr.bf16.mxu1 %v1224_v1 }
  0x3a   :  { %1059 = vmatmul.mubr.msk.bf16.gmra.mxu0 %vm147_vm0, %v85_v45  ;;  %1075 = vmatmul.mubr.msk.bf16.gmra.mxu1 %vm147_vm0, %v101_v46 }
  0x3b   :  { %346 = vmatprep.mubr.bf16.mxu0 %v1224_v1  ;;  %506 = vmatprep.mubr.bf16.mxu1 %v1224_v1 }
  0x42   :  { %1060 = vmatmul.mubr.msk.bf16.gmra.mxu0 %vm147_vm0, %v86_v51  ;;  %1076 = vmatmul.mubr.msk.bf16.gmra.mxu1 %vm147_vm0, %v102_v52 }
  0x43   :  { %356 = vmatprep.mubr.bf16.mxu0 %v1224_v1  ;;  %516 = vmatprep.mubr.bf16.mxu1 %v1224_v1 }
  0x4a   :  { %1061 = vmatmul.mubr.msk.bf16.gmra.mxu0 %vm147_vm0, %v87_v57  ;;  %1077 = vmatmul.mubr.msk.bf16.gmra.mxu1 %vm147_vm0, %v103_v58 }
  0x4b   :  { %366 = vmatprep.mubr.bf16.mxu0 %v1224_v1  ;;  %526 = vmatprep.mubr.bf16.mxu1 %v1224_v1 }
  0x52   :  { %1062 = vmatmul.mubr.msk.bf16.gmra.mxu0 %vm147_vm0, %v88_v63  ;;  %1078 = vmatmul.mubr.msk.bf16.gmra.mxu1 %vm147_vm0, %v104_v0 }
  0x53   :  { %376 = vmatprep.mubr.bf16.mxu0 %v1224_v1  ;;  %536 = vmatprep.mubr.bf16.mxu1 %v1224_v1 }
  0x5a   :  { %1063 = vmatmul.mubr.msk.bf16.gmra.mxu0 %vm147_vm0, %v89_v6  ;;  %1079 = vmatmul.mubr.msk.bf16.gmra.mxu1 %vm147_vm0, %v105_v7 }
  0x5b   :  { %386 = vmatprep.mubr.bf16.mxu0 %v1224_v1  ;;  %546 = vmatprep.mubr.bf16.mxu1 %v1224_v1 }
  0x62   :  { %1064 = vmatmul.mubr.msk.bf16.gmra.mxu0 %vm147_vm0, %v90_v12  ;;  %1080 = vmatmul.mubr.msk.bf16.gmra.mxu1 %vm147_vm0, %v106_v13 }
  0x63   :  { %396 = vmatprep.mubr.bf16.mxu0 %v1224_v1  ;;  %556 = vmatprep.mubr.bf16.mxu1 %v1224_v1 }
  0x6a   :  { %1065 = vmatmul.mubr.msk.bf16.gmra.mxu0 %vm147_vm0, %v91_v18  ;;  %1081 = vmatmul.mubr.msk.bf16.gmra.mxu1 %vm147_vm0, %v107_v19 }
  0x6b   :  { %406 = vmatprep.mubr.bf16.mxu0 %v1224_v1  ;;  %566 = vmatprep.mubr.bf16.mxu1 %v1224_v1 }
  0x72   :  { %1066 = vmatmul.mubr.msk.bf16.gmra.mxu0 %vm147_vm0, %v92_v24  ;;  %1082 = vmatmul.mubr.msk.bf16.gmra.mxu1 %vm147_vm0, %v108_v25 }
  0x73   :  { %416 = vmatprep.mubr.bf16.mxu0 %v1224_v1  ;;  %576 = vmatprep.mubr.bf16.mxu1 %v1224_v1 }
  0x7a   :  { %1067 = vmatmul.mubr.msk.bf16.gmra.mxu0 %vm147_vm0, %v93_v30  ;;  %1083 = vmatmul.mubr.msk.bf16.gmra.mxu1 %vm147_vm0, %v109_v31 }
  0x7b   :  { %426 = vmatprep.mubr.bf16.mxu0 %v1224_v1  ;;  %586 = vmatprep.mubr.bf16.mxu1 %v1224_v1  ;;  %v118_v1 = vshrl.u32 %v117_v38, 7 }
  0x7d   :  { %v123_v39 = vsub.s32 1, %v118_v1  ;;  %v119_v5 = vsub.s32 0, %v118_v1 }
  0x7f   :  { %v1516_v41 = vrot.slane %v115_v40, %v123_v39  ;;  %v1559_v14 = vrot.slane %v115_v40, %v119_v5 }
  0x82   :  { %1068 = vmatmul.mubr.msk.bf16.gmra.mxu0 %vm147_vm0, %v94_v36  ;;  %1084 = vmatmul.mubr.msk.bf16.gmra.mxu1 %vm147_vm0, %v110_v37 }
  0xca   :  { %v278_v42 = vpop.f32.mrf.mxu0  ;;  %v1518_v43 = vpop.f32.mrf.mxu1 }
  0xcb   :  { %v279_v26 = vadd.f32 %v278_v42, %v1559_v14  ;;  %v439_v36 = vadd.f32 %v1518_v43, %v1559_v14 }
  0xcc   :  { %v280_v44 = vpop.f32.mrf.mxu0  ;;  %v440_v45 = vpop.f32.mrf.mxu1 }
  0xcd   :  { %v281_v46 = vadd.f32 %v280_v44, %v1516_v41  ;;  %v441_v47 = vadd.f32 %v440_v45, %v1516_v41 }
  0xce   :  { %v1522_v48 = vpop.f32.mrf.mxu0  ;;  %v1524_v49 = vpop.f32.mrf.mxu1 }
  0xcf   :  { %v661_v50 = vmul.f32 0.70710677, %v281_v46  ;;  %v693_v51 = vmul.f32 0.70710677, %v441_v47  ;;  %v597_v23 = vmul.f32 0.5, %v281_v46  ;;  %v629_v27 = vmul.f32 0.5, %v441_v47 }
  0xd0   :  { %v284_v52 = vpop.f32.mrf.mxu0  ;;  %v444_v53 = vpop.f32.mrf.mxu1 }
  0xd1   :  { %1096 = verf.f32 %v661_v50  ;;  %v285_v54 = vadd.f32 %v284_v52, %v1516_v41  ;;  %v1528_v55 = vadd.f32 %v444_v53, %v1516_v41  ;;  %v283_v53 = vadd.f32 %v1522_v48, %v1559_v14 }
  0xd2   :  { %1098 = verf.f32 %v693_v51  ;;  %v1530_v56 = vpop.f32.mrf.mxu0  ;;  %v1532_v57 = vpop.f32.mrf.mxu1 }
  0xd3   :  { %v662_v58 = vmul.f32 0.70710677, %v285_v54  ;;  %v694_v59 = vmul.f32 0.70710677, %v1528_v55  ;;  %v598_v42 = vmul.f32 0.5, %v285_v54  ;;  %v630_v47 = vmul.f32 0.5, %v1528_v55 }
  0xd4   :  { %v290_v60 = vpop.f32.mrf.mxu0  ;;  %v450_v61 = vpop.f32.mrf.mxu1  ;;  %v443_v54 = vadd.f32 %v1524_v49, %v1559_v14 }
  0xd5   :  { %1100 = verf.f32 %v662_v58  ;;  %v1536_v62 = vadd.f32 %v290_v60, %v1516_v41  ;;  %v1539_v63 = vadd.f32 %v450_v61, %v1516_v41 }
  0xd6   :  { %1102 = verf.f32 %v694_v59  ;;  %v1541_v0 = vpop.f32.mrf.mxu0  ;;  %v1543_v2 = vpop.f32.mrf.mxu1 }
  0xd7   :  { %v663_v3 = vmul.f32 0.70710677, %v1536_v62  ;;  %v695_v4 = vmul.f32 0.70710677, %v1539_v63  ;;  %v599_v5 = vmul.f32 0.5, %v1536_v62 }
  0xd8   :  { %v294_v6 = vpop.f32.mrf.mxu0  ;;  %v454_v7 = vpop.f32.mrf.mxu1 }
  0xd9   :  { %1104 = verf.f32 %v663_v3  ;;  %v1548_v8 = vadd.f32 %v294_v6, %v1516_v41  ;;  %v1551_v9 = vadd.f32 %v454_v7, %v1516_v41 }
  0xda   :  { %1106 = verf.f32 %v695_v4  ;;  %v1553_v10 = vpop.f32.mrf.mxu0  ;;  %v1555_v11 = vpop.f32.mrf.mxu1 }
  0xdb   :  { %v664_v12 = vmul.f32 0.70710677, %v1548_v8  ;;  %v696_v13 = vmul.f32 0.70710677, %v1551_v9 }
  0xdc   :  { %v300_v15 = vpop.f32.mrf.mxu0  ;;  %v460_v16 = vpop.f32.mrf.mxu1 }
  0xdd   :  { %1108 = verf.f32 %v664_v12  ;;  %v1562_v17 = vadd.f32 %v300_v15, %v1516_v41  ;;  %v1565_v18 = vadd.f32 %v460_v16, %v1516_v41  ;;  %v631_v12 = vmul.f32 0.5, %v1539_v63 }
  0xde   :  { %v1097_v19 = vpop.eup %1096  ;;  %1110 = verf.f32 %v696_v13  ;;  %v1567_v20 = vpop.f32.mrf.mxu0  ;;  %v449_v63 = vadd.f32 %v1532_v57, %v1559_v14 }
  0xdf   :  { %v1569_v21 = vpop.f32.mrf.mxu1  ;;  %v1099_v22 = vpop.eup %1098  ;;  %v789_v24 = vadd.f32 1.0, %v1097_v19  ;;  %v665_v25 = vmul.f32 0.70710677, %v1562_v17  ;;  %v697_v29 = vmul.f32 0.70710677, %v1565_v18 }
  0xe0   :  { %v821_v28 = vadd.f32 1.0, %v1099_v22  ;;  %v304_v30 = vpop.f32.mrf.mxu0  ;;  %v289_v22 = vadd.f32 %v1530_v56, %v1559_v14 }
  0xe1   :  { %v464_v31 = vpop.f32.mrf.mxu1  ;;  %v853_v32 = vmul.f32 %v789_v24, %v597_v23  ;;  %1112 = verf.f32 %v665_v25  ;;  %v1575_v33 = vadd.f32 %v304_v30, %v1516_v41 }
  0xe2   :  { %v1578_v34 = vadd.f32 %v464_v31, %v1516_v41  ;;  %v1101_v35 = vpop.eup %1100  ;;  %v885_v37 = vmul.f32 %v821_v28, %v629_v27  ;;  %1114 = verf.f32 %v697_v29  ;;  %v1582_v38 = vpop.f32.mrf.mxu0  ;;  %v600_v31 = vmul.f32 0.5, %v1548_v8 }
  0xe3   :  { %v1584_v1 = vpop.f32.mrf.mxu1  ;;  %v1103_v39 = vpop.eup %1102  ;;  %v917_v40 = vmul.f32 %v853_v32, %v279_v26  ;;  %v790_v44 = vadd.f32 1.0, %v1101_v35  ;;  %v666_v45 = vmul.f32 0.70710677, %v1575_v33  ;;  %v453_v8 = vadd.f32 %v1543_v2, %v1559_v14 }
  0xe4   :  { %v949_v46 = vmul.f32 %v885_v37, %v439_v36  ;;  %v822_v50 = vadd.f32 1.0, %v1103_v39  ;;  %v698_v51 = vmul.f32 0.70710677, %v1578_v34  ;;  %v310_v52 = vpop.f32.mrf.mxu0  ;;  %v632_v36 = vmul.f32 0.5, %v1551_v9 }
  0xe5   :  { %v470_v43 = vpop.f32.mrf.mxu1  ;;  %981 = vst [vmem:[%s2276_s3] sm:$0xff] %v917_v40  ;;  %v854_v58 = vmul.f32 %v790_v44, %v598_v42  ;;  %1116 = verf.f32 %v666_v45  ;;  %v1600_v60 = vadd.f32 %v310_v52, %v1516_v41  ;;  %v293_v42 = vadd.f32 %v1541_v0, %v1559_v14 }
  0xe6   :  { %v1105_v59 = vpop.eup %1104  ;;  %1013 = vst [vmem:[%s2276_s3 + $0x100] sm:$0xff] %v949_v46  ;;  %v886_v55 = vmul.f32 %v822_v50, %v630_v47  ;;  %1118 = verf.f32 %v698_v51  ;;  %v1603_v61 = vadd.f32 %v470_v43, %v1516_v41  ;;  %v1605_v3 = vpop.f32.mrf.mxu0  ;;  %v601_v43 = vmul.f32 0.5, %v1562_v17 }
  0xe7   :  { %v1607_v48 = vpop.f32.mrf.mxu1  ;;  %v1107_v49 = vpop.eup %1106  ;;  %v918_v4 = vmul.f32 %v854_v58, %v283_v53  ;;  %v791_v6 = vadd.f32 1.0, %v1105_v59  ;;  %v667_v15 = vmul.f32 0.70710677, %v1600_v60  ;;  %v633_v58 = vmul.f32 0.5, %v1565_v18 }
  0xe8   :  { %v950_v7 = vmul.f32 %v886_v55, %v443_v54  ;;  %v823_v13 = vadd.f32 1.0, %v1107_v49  ;;  %v314_v16 = vpop.f32.mrf.mxu0  ;;  %v699_v24 = vmul.f32 0.70710677, %v1603_v61  ;;  %v459_v17 = vadd.f32 %v1555_v11, %v1559_v14 }
  0xe9   :  { %v474_v19 = vpop.f32.mrf.mxu1  ;;  %982 = vst [vmem:[%s2276_s3 + $0x8] sm:$0xff] %v918_v4  ;;  %v855_v23 = vmul.f32 %v791_v6, %v599_v5  ;;  %v1619_v62 = vadd.f32 %v314_v16, %v1516_v41  ;;  %1120 = verf.f32 %v667_v15  ;;  %v299_v5 = vadd.f32 %v1553_v10, %v1559_v14 }
  0xea   :  { %v1109_v25 = vpop.eup %1108  ;;  %1014 = vst [vmem:[%s2276_s3 + $0x108] sm:$0xff] %v950_v7  ;;  %v887_v26 = vmul.f32 %v823_v13, %v631_v12  ;;  %v1627_v27 = vadd.f32 %v474_v19, %v1516_v41  ;;  %v1629_v56 = vpop.f32.mrf.mxu0  ;;  %1122 = verf.f32 %v699_v24 }
  0xeb   :  { %v1631_v28 = vpop.f32.mrf.mxu1  ;;  %v1111_v29 = vpop.eup %1110  ;;  %v919_v30 = vmul.f32 %v855_v23, %v289_v22  ;;  %v792_v32 = vadd.f32 1.0, %v1109_v25  ;;  %v668_v57 = vmul.f32 0.70710677, %v1619_v62  ;;  %v602_v22 = vmul.f32 0.5, %v1575_v33 }
  0xec   :  { %v951_v35 = vmul.f32 %v887_v26, %v449_v63  ;;  %v824_v37 = vadd.f32 1.0, %v1111_v29  ;;  %v320_v39 = vpop.f32.mrf.mxu0  ;;  %v700_v45 = vmul.f32 0.70710677, %v1627_v27  ;;  %v634_v25 = vmul.f32 0.5, %v1578_v34 }
  0xed   :  { %v480_v40 = vpop.f32.mrf.mxu1  ;;  %983 = vst [vmem:[%s2276_s3 + $0x10] sm:$0xff] %v919_v30  ;;  %v856_v44 = vmul.f32 %v792_v32, %v600_v31  ;;  %1124 = verf.f32 %v668_v57  ;;  %v1648_v47 = vadd.f32 %v320_v39, %v1516_v41  ;;  %v303_v31 = vadd.f32 %v1567_v20, %v1559_v14 }
  0xee   :  { %v1113_v46 = vpop.eup %1112  ;;  %1015 = vst [vmem:[%s2276_s3 + $0x110] sm:$0xff] %v951_v35  ;;  %v888_v9 = vmul.f32 %v824_v37, %v632_v36  ;;  %v1651_v50 = vadd.f32 %v480_v40, %v1516_v41  ;;  %v1653_v0 = vpop.f32.mrf.mxu0  ;;  %1126 = verf.f32 %v700_v45  ;;  %v463_v33 = vadd.f32 %v1569_v21, %v1559_v14 }
  0xef   :  { %v1655_v51 = vpop.f32.mrf.mxu1  ;;  %v1115_v2 = vpop.eup %1114  ;;  %v920_v52 = vmul.f32 %v856_v44, %v293_v42  ;;  %v793_v53 = vadd.f32 1.0, %v1113_v46  ;;  %v669_v55 = vmul.f32 0.70710677, %v1648_v47  ;;  %v309_v40 = vadd.f32 %v1582_v38, %v1559_v14 }
  0xf0   :  { %v952_v54 = vmul.f32 %v888_v9, %v453_v8  ;;  %v825_v59 = vadd.f32 1.0, %v1115_v2  ;;  %v324_v49 = vpop.f32.mrf.mxu0  ;;  %v701_v7 = vmul.f32 0.70710677, %v1651_v50  ;;  %v603_v44 = vmul.f32 0.5, %v1600_v60 }
  0xf1   :  { %v484_v4 = vpop.f32.mrf.mxu1  ;;  %984 = vst [vmem:[%s2276_s3 + $0x18] sm:$0xff] %v920_v52  ;;  %v857_v6 = vmul.f32 %v793_v53, %v601_v43  ;;  %1128 = verf.f32 %v669_v55  ;;  %v1672_v13 = vadd.f32 %v324_v49, %v1516_v41  ;;  %v635_v52 = vmul.f32 0.5, %v1603_v61 }
  0xf2   :  { %v1117_v12 = vpop.eup %1116  ;;  %1016 = vst [vmem:[%s2276_s3 + $0x118] sm:$0xff] %v952_v54  ;;  %v889_v18 = vmul.f32 %v825_v59, %v633_v58  ;;  %v1675_v15 = vadd.f32 %v484_v4, %v1516_v41  ;;  %v1677_v10 = vpop.f32.mrf.mxu0  ;;  %1130 = verf.f32 %v701_v7  ;;  %v469_v60 = vadd.f32 %v1584_v1, %v1559_v14 }
  0xf3   :  { %v1679_v16 = vpop.f32.mrf.mxu1  ;;  %v1119_v11 = vpop.eup %1118  ;;  %v921_v19 = vmul.f32 %v857_v6, %v299_v5  ;;  %v794_v23 = vadd.f32 1.0, %v1117_v12  ;;  %v670_v26 = vmul.f32 0.70710677, %v1672_v13  ;;  %v313_v4 = vadd.f32 %v1605_v3, %v1559_v14 }
  0xf4   :  { %v953_v24 = vmul.f32 %v889_v18, %v459_v17  ;;  %v826_v63 = vadd.f32 1.0, %v1119_v11  ;;  %v330_v29 = vpop.f32.mrf.mxu0  ;;  %v702_v35 = vmul.f32 0.70710677, %v1675_v15  ;;  %v604_v1 = vmul.f32 0.5, %v1619_v62 }
  0xf5   :  { %v490_v30 = vpop.f32.mrf.mxu1  ;;  %985 = vst [vmem:[%s2276_s3 + $0x20] sm:$0xff] %v921_v19  ;;  %v858_v32 = vmul.f32 %v794_v23, %v602_v22  ;;  %1132 = verf.f32 %v670_v26  ;;  %v1696_v36 = vadd.f32 %v330_v29, %v1516_v41  ;;  %v636_v22 = vmul.f32 0.5, %v1627_v27 }
  0xf6   :  { %1017 = vst [vmem:[%s2276_s3 + $0x120] sm:$0xff] %v953_v24  ;;  %v890_v34 = vmul.f32 %v826_v63, %v634_v25  ;;  %v1699_v37 = vadd.f32 %v490_v30, %v1516_v41  ;;  %v1701_v57 = vpop.f32.mrf.mxu0  ;;  %v1121_v21 = vpop.eup %1120  ;;  %1134 = verf.f32 %v702_v35  ;;  %v473_v3 = vadd.f32 %v1607_v48, %v1559_v14 }
  0xf7   :  { %v1703_v20 = vpop.f32.mrf.mxu1  ;;  %v922_v39 = vmul.f32 %v858_v32, %v303_v31  ;;  %v1123_v42 = vpop.eup %1122  ;;  %v795_v45 = vadd.f32 1.0, %v1121_v21  ;;  %v671_v46 = vmul.f32 0.70710677, %v1696_v36  ;;  %v319_v29 = vadd.f32 %v1629_v56, %v1559_v14 }
  0xf8   :  { %v954_v8 = vmul.f32 %v890_v34, %v463_v33  ;;  %v334_v9 = vpop.f32.mrf.mxu0  ;;  %v827_v43 = vadd.f32 1.0, %v1123_v42  ;;  %v703_v53 = vmul.f32 0.70710677, %v1699_v37  ;;  %v479_v48 = vadd.f32 %v1631_v28, %v1559_v14 }
  0xf9   :  { %v494_v2 = vpop.f32.mrf.mxu1  ;;  %986 = vst [vmem:[%s2276_s3 + $0x28] sm:$0xff] %v922_v39  ;;  %v1715_v38 = vadd.f32 %v334_v9, %v1516_v41  ;;  %v859_v54 = vmul.f32 %v795_v45, %v603_v44  ;;  %1136 = verf.f32 %v671_v46  ;;  %v605_v32 = vmul.f32 0.5, %v1648_v47 }
  0xfa   :  { %1018 = vst [vmem:[%s2276_s3 + $0x128] sm:$0xff] %v954_v8  ;;  %v1723_v58 = vadd.f32 %v494_v2, %v1516_v41  ;;  %v1725_v59 = vpop.f32.mrf.mxu0  ;;  %v1125_v55 = vpop.eup %1124  ;;  %v891_v49 = vmul.f32 %v827_v43, %v635_v52  ;;  %1138 = verf.f32 %v703_v53  ;;  %v637_v42 = vmul.f32 0.5, %v1651_v50 }
  0xfb   :  { %v1727_v61 = vpop.f32.mrf.mxu1  ;;  %v672_v5 = vmul.f32 0.70710677, %v1715_v38  ;;  %v1127_v17 = vpop.eup %1126  ;;  %v923_v6 = vmul.f32 %v859_v54, %v309_v40  ;;  %v796_v7 = vadd.f32 1.0, %v1125_v55  ;;  %v323_v2 = vadd.f32 %v1653_v0, %v1559_v14 }
  0xfc   :  { %v704_v12 = vmul.f32 0.70710677, %v1723_v58  ;;  %v340_v18 = vpop.f32.mrf.mxu0  ;;  %v955_v19 = vmul.f32 %v891_v49, %v469_v60  ;;  %v828_v23 = vadd.f32 1.0, %v1127_v17  ;;  %v483_v52 = vadd.f32 %v1655_v51, %v1559_v14 }
  0xfd   :  { %v500_v11 = vpop.f32.mrf.mxu1  ;;  %1140 = verf.f32 %v672_v5  ;;  %987 = vst [vmem:[%s2276_s3 + $0x30] sm:$0xff] %v923_v6  ;;  %v860_v24 = vmul.f32 %v796_v7, %v604_v1  ;;  %v1741_v62 = vadd.f32 %v340_v18, %v1516_v41  ;;  %v606_v60 = vmul.f32 0.5, %v1672_v13 }
  0xfe   :  { %1142 = verf.f32 %v704_v12  ;;  %v1743_v25 = vpop.f32.mrf.mxu0  ;;  %v1129_v26 = vpop.eup %1128  ;;  %1019 = vst [vmem:[%s2276_s3 + $0x130] sm:$0xff] %v955_v19  ;;  %v892_v27 = vmul.f32 %v828_v23, %v636_v22  ;;  %v1755_v30 = vadd.f32 %v500_v11, %v1516_v41  ;;  %v638_v17 = vmul.f32 0.5, %v1675_v15 }
  0xff   :  { %v1745_v63 = vpop.f32.mrf.mxu1  ;;  %v1131_v31 = vpop.eup %1130  ;;  %v924_v33 = vmul.f32 %v860_v24, %v313_v4  ;;  %v797_v35 = vadd.f32 1.0, %v1129_v26  ;;  %v673_v34 = vmul.f32 0.70710677, %v1741_v62  ;;  %v329_v11 = vadd.f32 %v1677_v10, %v1559_v14 }
 0x100   :  { %v344_v21 = vpop.f32.mrf.mxu0  ;;  %v956_v40 = vmul.f32 %v892_v27, %v473_v3  ;;  %v829_v8 = vadd.f32 1.0, %v1131_v31  ;;  %v705_v56 = vmul.f32 0.70710677, %v1755_v30  ;;  %v489_v19 = vadd.f32 %v1679_v16, %v1559_v14 }
 0x101   :  { %v504_v39 = vpop.f32.mrf.mxu1  ;;  %988 = vst [vmem:[%s2276_s3 + $0x38] sm:$0xff] %v924_v33  ;;  %v861_v28 = vmul.f32 %v797_v35, %v605_v32  ;;  %1144 = verf.f32 %v673_v34  ;;  %v1765_v44 = vadd.f32 %v344_v21, %v1516_v41  ;;  %v607_v3 = vmul.f32 0.5, %v1696_v36 }
 0x102   :  { %v1768_v47 = vadd.f32 %v504_v39, %v1516_v41  ;;  %v1770_v45 = vpop.f32.mrf.mxu0  ;;  %v1133_v50 = vpop.eup %1132  ;;  %1020 = vst [vmem:[%s2276_s3 + $0x138] sm:$0xff] %v956_v40  ;;  %v893_v9 = vmul.f32 %v829_v8, %v637_v42  ;;  %1146 = verf.f32 %v705_v56  ;;  %v639_v31 = vmul.f32 0.5, %v1699_v37 }
 0x103   :  { %v1772_v46 = vpop.f32.mrf.mxu1  ;;  %v1135_v43 = vpop.eup %1134  ;;  %v925_v53 = vmul.f32 %v861_v28, %v319_v29  ;;  %v798_v54 = vadd.f32 1.0, %v1133_v50  ;;  %v674_v55 = vmul.f32 0.70710677, %v1765_v44  ;;  %v608_v40 = vmul.f32 0.5, %v1715_v38 }
 0x104   :  { %v350_v49 = vpop.f32.mrf.mxu0  ;;  %v957_v5 = vmul.f32 %v893_v9, %v479_v48  ;;  %v830_v6 = vadd.f32 1.0, %v1135_v43  ;;  %v706_v1 = vmul.f32 0.70710677, %v1768_v47  ;;  %v640_v56 = vmul.f32 0.5, %v1723_v58 }
 0x105   :  { %v510_v4 = vpop.f32.mrf.mxu1  ;;  %989 = vst [vmem:[%s2276_s3 + $0x40] sm:$0xff] %v925_v53  ;;  %v862_v0 = vmul.f32 %v798_v54, %v606_v60  ;;  %1148 = verf.f32 %v674_v55  ;;  %v1789_v51 = vadd.f32 %v350_v49, %v1516_v41  ;;  %v333_v43 = vadd.f32 %v1701_v57, %v1559_v14 }
 0x106   :  { %v1792_v13 = vadd.f32 %v510_v4, %v1516_v41  ;;  %v1794_v7 = vpop.f32.mrf.mxu0  ;;  %v1137_v15 = vpop.eup %1136  ;;  %1021 = vst [vmem:[%s2276_s3 + $0x140] sm:$0xff] %v957_v5  ;;  %v894_v18 = vmul.f32 %v830_v6, %v638_v17  ;;  %1150 = verf.f32 %v706_v1  ;;  %v493_v38 = vadd.f32 %v1703_v20, %v1559_v14 }
 0x107   :  { %v1796_v12 = vpop.f32.mrf.mxu1  ;;  %v1139_v22 = vpop.eup %1138  ;;  %v926_v23 = vmul.f32 %v862_v0, %v323_v2  ;;  %v799_v24 = vadd.f32 1.0, %v1137_v15  ;;  %v675_v26 = vmul.f32 0.70710677, %v1789_v51  ;;  %v609_v6 = vmul.f32 0.5, %v1741_v62 }
 0x108   :  { %v354_v27 = vpop.f32.mrf.mxu0  ;;  %v958_v48 = vmul.f32 %v894_v18, %v483_v52  ;;  %v831_v33 = vadd.f32 1.0, %v1139_v22  ;;  %v707_v32 = vmul.f32 0.70710677, %v1792_v13 }
 0x109   :  { %v514_v29 = vpop.f32.mrf.mxu1  ;;  %990 = vst [vmem:[%s2276_s3 + $0x48] sm:$0xff] %v926_v23  ;;  %v863_v16 = vmul.f32 %v799_v24, %v607_v3  ;;  %1152 = verf.f32 %v675_v26  ;;  %v1813_v36 = vadd.f32 %v354_v27, %v1516_v41  ;;  %v499_v27 = vadd.f32 %v1727_v61, %v1559_v14 }
 0x10a   :  { %v1141_v10 = vpop.eup %1140  ;;  %v1816_v35 = vadd.f32 %v514_v29, %v1516_v41  ;;  %v1818_v34 = vpop.f32.mrf.mxu0  ;;  %1022 = vst [vmem:[%s2276_s3 + $0x148] sm:$0xff] %v958_v48  ;;  %v895_v39 = vmul.f32 %v831_v33, %v639_v31  ;;  %1154 = verf.f32 %v707_v32  ;;  %v343_v48 = vadd.f32 %v1743_v25, %v1559_v14 }
 0x10b   :  { %v1820_v21 = vpop.f32.mrf.mxu1  ;;  %v1143_v37 = vpop.eup %1142  ;;  %v800_v42 = vadd.f32 1.0, %v1141_v10  ;;  %v927_v8 = vmul.f32 %v863_v16, %v329_v11  ;;  %v676_v50 = vmul.f32 0.70710677, %v1813_v36  ;;  %v339_v11 = vadd.f32 %v1725_v59, %v1559_v14 }
 0x10c   :  { %v832_v28 = vadd.f32 1.0, %v1143_v37  ;;  %v360_v9 = vpop.f32.mrf.mxu0  ;;  %v959_v52 = vmul.f32 %v895_v39, %v489_v19  ;;  %v708_v60 = vmul.f32 0.70710677, %v1816_v35  ;;  %v641_v19 = vmul.f32 0.5, %v1755_v30 }
 0x10d   :  { %v520_v2 = vpop.f32.mrf.mxu1  ;;  %v864_v53 = vmul.f32 %v800_v42, %v608_v40  ;;  %991 = vst [vmem:[%s2276_s3 + $0x50] sm:$0xff] %v927_v8  ;;  %1156 = verf.f32 %v676_v50  ;;  %v1837_v54 = vadd.f32 %v360_v9, %v1516_v41  ;;  %v610_v32 = vmul.f32 0.5, %v1765_v44 }
 0x10e   :  { %v896_v58 = vmul.f32 %v832_v28, %v640_v56  ;;  %v1839_v55 = vpop.f32.mrf.mxu0  ;;  %v1145_v57 = vpop.eup %1144  ;;  %1023 = vst [vmem:[%s2276_s3 + $0x150] sm:$0xff] %v959_v52  ;;  %1158 = verf.f32 %v708_v60  ;;  %v1847_v5 = vadd.f32 %v520_v2, %v1516_v41  ;;  %v642_v42 = vmul.f32 0.5, %v1768_v47 }
 0x10f   :  { %v1841_v49 = vpop.f32.mrf.mxu1  ;;  %v928_v4 = vmul.f32 %v864_v53, %v333_v43  ;;  %v1147_v20 = vpop.eup %1146  ;;  %v801_v1 = vadd.f32 1.0, %v1145_v57  ;;  %v677_v0 = vmul.f32 0.70710677, %v1837_v54  ;;  %v503_v9 = vadd.f32 %v1745_v63, %v1559_v14 }
 0x110   :  { %v960_v17 = vmul.f32 %v896_v58, %v493_v38  ;;  %v364_v15 = vpop.f32.mrf.mxu0  ;;  %v833_v22 = vadd.f32 1.0, %v1147_v20  ;;  %v709_v23 = vmul.f32 0.70710677, %v1847_v5  ;;  %v349_v52 = vadd.f32 %v1770_v45, %v1559_v14 }
 0x111   :  { %v524_v18 = vpop.f32.mrf.mxu1  ;;  %992 = vst [vmem:[%s2276_s3 + $0x58] sm:$0xff] %v928_v4  ;;  %v865_v62 = vmul.f32 %v801_v1, %v609_v6  ;;  %1160 = verf.f32 %v677_v0  ;;  %v1862_v3 = vadd.f32 %v364_v15, %v1516_v41  ;;  %v611_v60 = vmul.f32 0.5, %v1789_v51 }
 0x112   :  { %1024 = vst [vmem:[%s2276_s3 + $0x158] sm:$0xff] %v960_v17  ;;  %v1865_v24 = vadd.f32 %v524_v18, %v1516_v41  ;;  %v1867_v26 = vpop.f32.mrf.mxu0  ;;  %v1149_v30 = vpop.eup %1148  ;;  %v897_v29 = vmul.f32 %v833_v22, %v641_v19  ;;  %1162 = verf.f32 %v709_v23  ;;  %v643_v17 = vmul.f32 0.5, %v1792_v13 }
 0x113   :  { %v1869_v59 = vpop.f32.mrf.mxu1  ;;  %v1151_v31 = vpop.eup %1150  ;;  %v929_v33 = vmul.f32 %v865_v62, %v339_v11  ;;  %v802_v10 = vadd.f32 1.0, %v1149_v30  ;;  %v678_v16 = vmul.f32 0.70710677, %v1862_v3  ;;  %v509_v18 = vadd.f32 %v1772_v46, %v1559_v14 }
 0x114   :  { %v370_v37 = vpop.f32.mrf.mxu0  ;;  %v961_v40 = vmul.f32 %v897_v29, %v499_v27  ;;  %v834_v8 = vadd.f32 1.0, %v1151_v31  ;;  %v710_v61 = vmul.f32 0.70710677, %v1865_v24  ;;  %v353_v19 = vadd.f32 %v1794_v7, %v1559_v14 }
 0x115   :  { %v530_v39 = vpop.f32.mrf.mxu1  ;;  %993 = vst [vmem:[%s2276_s3 + $0x60] sm:$0xff] %v929_v33  ;;  %v866_v25 = vmul.f32 %v802_v10, %v610_v32  ;;  %1164 = verf.f32 %v678_v16  ;;  %v1883_v56 = vadd.f32 %v370_v37, %v1516_v41  ;;  %v612_v62 = vmul.f32 0.5, %v1813_v36 }
 0x116   :  { %v1886_v44 = vadd.f32 %v530_v39, %v1516_v41  ;;  %v1888_v28 = vpop.f32.mrf.mxu0  ;;  %v1153_v47 = vpop.eup %1152  ;;  %1025 = vst [vmem:[%s2276_s3 + $0x160] sm:$0xff] %v961_v40  ;;  %v898_v2 = vmul.f32 %v834_v8, %v642_v42  ;;  %1166 = verf.f32 %v710_v61  ;;  %v644_v33 = vmul.f32 0.5, %v1816_v35 }
 0x117   :  { %v1890_v50 = vpop.f32.mrf.mxu1  ;;  %v1155_v43 = vpop.eup %1154  ;;  %v930_v53 = vmul.f32 %v866_v25, %v343_v48  ;;  %v803_v38 = vadd.f32 1.0, %v1153_v47  ;;  %v679_v58 = vmul.f32 0.70710677, %v1883_v56  ;;  %v513_v39 = vadd.f32 %v1796_v12, %v1559_v14 }
 0x118   :  { %v374_v57 = vpop.f32.mrf.mxu0  ;;  %v962_v20 = vmul.f32 %v898_v2, %v503_v9  ;;  %v835_v6 = vadd.f32 1.0, %v1155_v43  ;;  %v711_v63 = vmul.f32 0.70710677, %v1886_v44  ;;  %v359_v42 = vadd.f32 %v1818_v34, %v1559_v14 }
 0x119   :  { %v534_v4 = vpop.f32.mrf.mxu1  ;;  %994 = vst [vmem:[%s2276_s3 + $0x68] sm:$0xff] %v930_v53  ;;  %v867_v45 = vmul.f32 %v803_v38, %v611_v60  ;;  %1168 = verf.f32 %v679_v58  ;;  %v1907_v1 = vadd.f32 %v374_v57, %v1516_v41  ;;  %v613_v25 = vmul.f32 0.5, %v1837_v54 }
 0x11a   :  { %v1910_v51 = vadd.f32 %v534_v4, %v1516_v41  ;;  %v1912_v0 = vpop.f32.mrf.mxu0  ;;  %v1157_v13 = vpop.eup %1156  ;;  %1026 = vst [vmem:[%s2276_s3 + $0x168] sm:$0xff] %v962_v20  ;;  %v899_v11 = vmul.f32 %v835_v6, %v643_v17  ;;  %1170 = verf.f32 %v711_v63  ;;  %v645_v53 = vmul.f32 0.5, %v1847_v5 }
 0x11b   :  { %v1914_v15 = vpop.f32.mrf.mxu1  ;;  %v1159_v22 = vpop.eup %1158  ;;  %v931_v23 = vmul.f32 %v867_v45, %v349_v52  ;;  %v804_v30 = vadd.f32 1.0, %v1157_v13  ;;  %v680_v27 = vmul.f32 0.70710677, %v1907_v1  ;;  %v519_v4 = vadd.f32 %v1820_v21, %v1559_v14 }
 0x11c   :  { %v380_v29 = vpop.f32.mrf.mxu0  ;;  %v963_v31 = vmul.f32 %v899_v11, %v509_v18  ;;  %v836_v32 = vadd.f32 1.0, %v1159_v22  ;;  %v712_v46 = vmul.f32 0.70710677, %v1910_v51  ;;  %v363_v17 = vadd.f32 %v1839_v55, %v1559_v14 }
 0x11d   :  { %v540_v48 = vpop.f32.mrf.mxu1  ;;  %995 = vst [vmem:[%s2276_s3 + $0x70] sm:$0xff] %v931_v23  ;;  %v868_v7 = vmul.f32 %v804_v30, %v612_v62  ;;  %1172 = verf.f32 %v680_v27  ;;  %v1931_v10 = vadd.f32 %v380_v29, %v1516_v41  ;;  %v614_v45 = vmul.f32 0.5, %v1862_v3 }
 0x11e   :  { %v1934_v36 = vadd.f32 %v540_v48, %v1516_v41  ;;  %v1936_v16 = vpop.f32.mrf.mxu0  ;;  %v1161_v35 = vpop.eup %1160  ;;  %1027 = vst [vmem:[%s2276_s3 + $0x170] sm:$0xff] %v963_v31  ;;  %v900_v40 = vmul.f32 %v836_v32, %v644_v33  ;;  %1174 = verf.f32 %v712_v46  ;;  %v646_v23 = vmul.f32 0.5, %v1865_v24 }
 0x11f   :  { %v1938_v37 = vpop.f32.mrf.mxu1  ;;  %v1163_v8 = vpop.eup %1162  ;;  %v932_v61 = vmul.f32 %v868_v7, %v353_v19  ;;  %v805_v47 = vadd.f32 1.0, %v1161_v35  ;;  %v681_v9 = vmul.f32 0.70710677, %v1931_v10  ;;  %v523_v48 = vadd.f32 %v1841_v49, %v1559_v14 }
 0x120   :  { %v384_v2 = vpop.f32.mrf.mxu0  ;;  %v964_v43 = vmul.f32 %v900_v40, %v513_v39  ;;  %v837_v60 = vadd.f32 1.0, %v1163_v8  ;;  %v713_v12 = vmul.f32 0.70710677, %v1934_v36  ;;  %v369_v33 = vadd.f32 %v1867_v26, %v1559_v14 }
 0x121   :  { %v544_v52 = vpop.f32.mrf.mxu1  ;;  %996 = vst [vmem:[%s2276_s3 + $0x78] sm:$0xff] %v932_v61  ;;  %v869_v34 = vmul.f32 %v805_v47, %v613_v25  ;;  %1176 = verf.f32 %v681_v9  ;;  %v1955_v38 = vadd.f32 %v384_v2, %v1516_v41  ;;  %v615_v7 = vmul.f32 0.5, %v1883_v56 }
 0x122   :  { %v1958_v54 = vadd.f32 %v544_v52, %v1516_v41  ;;  %v1960_v58 = vpop.f32.mrf.mxu0  ;;  %v1165_v5 = vpop.eup %1164  ;;  %1028 = vst [vmem:[%s2276_s3 + $0x178] sm:$0xff] %v964_v43  ;;  %v901_v20 = vmul.f32 %v837_v60, %v645_v53  ;;  %1178 = verf.f32 %v713_v12  ;;  %v647_v61 = vmul.f32 0.5, %v1886_v44 }
 0x123   :  { %v1962_v57 = vpop.f32.mrf.mxu1  ;;  %v1167_v6 = vpop.eup %1166  ;;  %v933_v63 = vmul.f32 %v869_v34, %v359_v42  ;;  %v806_v13 = vadd.f32 1.0, %v1165_v5  ;;  %v682_v18 = vmul.f32 0.70710677, %v1955_v38  ;;  %v529_v52 = vadd.f32 %v1869_v59, %v1559_v14 }
 0x124   :  { %v390_v11 = vpop.f32.mrf.mxu0  ;;  %v965_v22 = vmul.f32 %v901_v20, %v519_v4  ;;  %v838_v62 = vadd.f32 1.0, %v1167_v6  ;;  %v714_v21 = vmul.f32 0.70710677, %v1958_v54  ;;  %v373_v53 = vadd.f32 %v1888_v28, %v1559_v14 }
 0x125   :  { %v550_v19 = vpop.f32.mrf.mxu1  ;;  %997 = vst [vmem:[%s2276_s3 + $0x80] sm:$0xff] %v933_v63  ;;  %v870_v55 = vmul.f32 %v806_v13, %v614_v45  ;;  %1180 = verf.f32 %v682_v18  ;;  %v1979_v30 = vadd.f32 %v390_v11, %v1516_v41  ;;  %v616_v34 = vmul.f32 0.5, %v1907_v1 }
 0x126   :  { %v1982_v3 = vadd.f32 %v550_v19, %v1516_v41  ;;  %v1984_v27 = vpop.f32.mrf.mxu0  ;;  %v1169_v24 = vpop.eup %1168  ;;  %1029 = vst [vmem:[%s2276_s3 + $0x180] sm:$0xff] %v965_v22  ;;  %v902_v31 = vmul.f32 %v838_v62, %v646_v23  ;;  %1182 = verf.f32 %v714_v21  ;;  %v648_v63 = vmul.f32 0.5, %v1910_v51 }
 0x127   :  { %v1986_v29 = vpop.f32.mrf.mxu1  ;;  %v1171_v32 = vpop.eup %1170  ;;  %v934_v46 = vmul.f32 %v870_v55, %v363_v17  ;;  %v807_v35 = vadd.f32 1.0, %v1169_v24  ;;  %v683_v39 = vmul.f32 0.70710677, %v1979_v30  ;;  %v533_v19 = vadd.f32 %v1890_v50, %v1559_v14 }
 0x128   :  { %v394_v40 = vpop.f32.mrf.mxu0  ;;  %v966_v8 = vmul.f32 %v902_v31, %v523_v48  ;;  %v839_v25 = vadd.f32 1.0, %v1171_v32  ;;  %v715_v49 = vmul.f32 0.70710677, %v1982_v3  ;;  %v379_v23 = vadd.f32 %v1912_v0, %v1559_v14 }
 0x129   :  { %v554_v42 = vpop.f32.mrf.mxu1  ;;  %998 = vst [vmem:[%s2276_s3 + $0x88] sm:$0xff] %v934_v46  ;;  %v871_v26 = vmul.f32 %v807_v35, %v615_v7  ;;  %1184 = verf.f32 %v683_v39  ;;  %v2003_v47 = vadd.f32 %v394_v40, %v1516_v41  ;;  %v617_v55 = vmul.f32 0.5, %v1931_v10 }
 0x12a   :  { %v2006_v56 = vadd.f32 %v554_v42, %v1516_v41  ;;  %v2008_v9 = vpop.f32.mrf.mxu0  ;;  %v1173_v44 = vpop.eup %1172  ;;  %1030 = vst [vmem:[%s2276_s3 + $0x188] sm:$0xff] %v966_v8  ;;  %v903_v43 = vmul.f32 %v839_v25, %v647_v61  ;;  %1186 = verf.f32 %v715_v49  ;;  %v649_v46 = vmul.f32 0.5, %v1934_v36 }
 0x12b   :  { %v2010_v2 = vpop.f32.mrf.mxu1  ;;  %v1175_v60 = vpop.eup %1174  ;;  %v935_v12 = vmul.f32 %v871_v26, %v369_v33  ;;  %v808_v5 = vadd.f32 1.0, %v1173_v44  ;;  %v684_v4 = vmul.f32 0.70710677, %v2003_v47  ;;  %v539_v42 = vadd.f32 %v1914_v15, %v1559_v14 }
 0x12c   :  { %v400_v20 = vpop.f32.mrf.mxu0  ;;  %v967_v6 = vmul.f32 %v903_v43, %v529_v52  ;;  %v840_v45 = vadd.f32 1.0, %v1175_v60  ;;  %v716_v59 = vmul.f32 0.70710677, %v2006_v56  ;;  %v383_v61 = vadd.f32 %v1936_v16, %v1559_v14 }
 0x12d   :  { %v560_v17 = vpop.f32.mrf.mxu1  ;;  %999 = vst [vmem:[%s2276_s3 + $0x90] sm:$0xff] %v935_v12  ;;  %v872_v28 = vmul.f32 %v808_v5, %v616_v34  ;;  %1188 = verf.f32 %v684_v4  ;;  %v2027_v13 = vadd.f32 %v400_v20, %v1516_v41  ;;  %v618_v26 = vmul.f32 0.5, %v1955_v38 }
 0x12e   :  { %v2030_v1 = vadd.f32 %v560_v17, %v1516_v41  ;;  %v2032_v18 = vpop.f32.mrf.mxu0  ;;  %v1177_v51 = vpop.eup %1176  ;;  %1031 = vst [vmem:[%s2276_s3 + $0x190] sm:$0xff] %v967_v6  ;;  %v904_v22 = vmul.f32 %v840_v45, %v648_v63  ;;  %1190 = verf.f32 %v716_v59  ;;  %v650_v12 = vmul.f32 0.5, %v1958_v54 }
 0x12f   :  { %v2034_v11 = vpop.f32.mrf.mxu1  ;;  %v1179_v62 = vpop.eup %1178  ;;  %v936_v21 = vmul.f32 %v872_v28, %v373_v53  ;;  %v809_v24 = vadd.f32 1.0, %v1177_v51  ;;  %v685_v48 = vmul.f32 0.70710677, %v2027_v13  ;;  %v543_v17 = vadd.f32 %v1938_v37, %v1559_v14 }
 0x130   :  { %v404_v31 = vpop.f32.mrf.mxu0  ;;  %v968_v32 = vmul.f32 %v904_v22, %v533_v19  ;;  %v841_v7 = vadd.f32 1.0, %v1179_v62  ;;  %v717_v50 = vmul.f32 0.70710677, %v2030_v1  ;;  %v389_v63 = vadd.f32 %v1960_v58, %v1559_v14 }
 0x131   :  { %v564_v33 = vpop.f32.mrf.mxu1  ;;  %1000 = vst [vmem:[%s2276_s3 + $0x98] sm:$0xff] %v936_v21  ;;  %v873_v0 = vmul.f32 %v809_v24, %v617_v55  ;;  %1192 = verf.f32 %v685_v48  ;;  %v2051_v35 = vadd.f32 %v404_v31, %v1516_v41  ;;  %v619_v28 = vmul.f32 0.5, %v1979_v30 }
 0x132   :  { %v2054_v10 = vadd.f32 %v564_v33, %v1516_v41  ;;  %v2056_v39 = vpop.f32.mrf.mxu0  ;;  %v1181_v36 = vpop.eup %1180  ;;  %1032 = vst [vmem:[%s2276_s3 + $0x198] sm:$0xff] %v968_v32  ;;  %v905_v8 = vmul.f32 %v841_v7, %v649_v46  ;;  %1194 = verf.f32 %v717_v50  ;;  %v651_v21 = vmul.f32 0.5, %v1982_v3 }
 0x133   :  { %v2058_v40 = vpop.f32.mrf.mxu1  ;;  %v1183_v25 = vpop.eup %1182  ;;  %v937_v49 = vmul.f32 %v873_v0, %v379_v23  ;;  %v810_v44 = vadd.f32 1.0, %v1181_v36  ;;  %v686_v52 = vmul.f32 0.70710677, %v2051_v35  ;;  %v549_v33 = vadd.f32 %v1962_v57, %v1559_v14 }
 0x134   :  { %v410_v43 = vpop.f32.mrf.mxu0  ;;  %v969_v60 = vmul.f32 %v905_v8, %v539_v42  ;;  %v842_v34 = vadd.f32 1.0, %v1183_v25  ;;  %v718_v15 = vmul.f32 0.70710677, %v2054_v10  ;;  %v393_v46 = vadd.f32 %v1984_v27, %v1559_v14 }
 0x135   :  { %v570_v53 = vpop.f32.mrf.mxu1  ;;  %1001 = vst [vmem:[%s2276_s3 + $0xa0] sm:$0xff] %v937_v49  ;;  %v874_v16 = vmul.f32 %v810_v44, %v618_v26  ;;  %1196 = verf.f32 %v686_v52  ;;  %v2075_v5 = vadd.f32 %v410_v43, %v1516_v41  ;;  %v620_v0 = vmul.f32 0.5, %v2003_v47 }
 0x136   :  { %v2078_v38 = vadd.f32 %v570_v53, %v1516_v41  ;;  %v2080_v4 = vpop.f32.mrf.mxu0  ;;  %v1185_v54 = vpop.eup %1184  ;;  %1033 = vst [vmem:[%s2276_s3 + $0x1a0] sm:$0xff] %v969_v60  ;;  %v906_v6 = vmul.f32 %v842_v34, %v650_v12  ;;  %1198 = verf.f32 %v718_v15  ;;  %v652_v49 = vmul.f32 0.5, %v2006_v56 }
 0x137   :  { %v2082_v20 = vpop.f32.mrf.mxu1  ;;  %v1187_v45 = vpop.eup %1186  ;;  %v938_v59 = vmul.f32 %v874_v16, %v383_v61  ;;  %v811_v51 = vadd.f32 1.0, %v1185_v54  ;;  %v687_v19 = vmul.f32 0.70710677, %v2075_v5  ;;  %v553_v53 = vadd.f32 %v1986_v29, %v1559_v14 }
 0x138   :  { %v414_v22 = vpop.f32.mrf.mxu0  ;;  %v970_v62 = vmul.f32 %v906_v6, %v543_v17  ;;  %v843_v55 = vadd.f32 1.0, %v1187_v45  ;;  %v719_v37 = vmul.f32 0.70710677, %v2078_v38  ;;  %v399_v12 = vadd.f32 %v2008_v9, %v1559_v14 }
 0x139   :  { %v574_v23 = vpop.f32.mrf.mxu1  ;;  %1002 = vst [vmem:[%s2276_s3 + $0xa8] sm:$0xff] %v938_v59  ;;  %v875_v58 = vmul.f32 %v811_v51, %v619_v28  ;;  %1200 = verf.f32 %v687_v19  ;;  %v2099_v24 = vadd.f32 %v414_v22, %v1516_v41  ;;  %v621_v16 = vmul.f32 0.5, %v2027_v13 }
 0x13a   :  { %v2102_v30 = vadd.f32 %v574_v23, %v1516_v41  ;;  %v2104_v48 = vpop.f32.mrf.mxu0  ;;  %v1189_v3 = vpop.eup %1188  ;;  %1034 = vst [vmem:[%s2276_s3 + $0x1a8] sm:$0xff] %v970_v62  ;;  %v907_v32 = vmul.f32 %v843_v55, %v651_v21  ;;  %1202 = verf.f32 %v719_v37  ;;  %v653_v59 = vmul.f32 0.5, %v2030_v1 }
 0x13b   :  { %v2106_v31 = vpop.f32.mrf.mxu1  ;;  %v1191_v7 = vpop.eup %1190  ;;  %v939_v50 = vmul.f32 %v875_v58, %v389_v63  ;;  %v812_v36 = vadd.f32 1.0, %v1189_v3  ;;  %v688_v42 = vmul.f32 0.70710677, %v2099_v24  ;;  %v559_v23 = vadd.f32 %v2010_v2, %v1559_v14 }
 0x13c   :  { %v420_v8 = vpop.f32.mrf.mxu0  ;;  %v971_v25 = vmul.f32 %v907_v32, %v549_v33  ;;  %v844_v26 = vadd.f32 1.0, %v1191_v7  ;;  %v720_v57 = vmul.f32 0.70710677, %v2102_v30  ;;  %v403_v21 = vadd.f32 %v2032_v18, %v1559_v14 }
 0x13d   :  { %v580_v61 = vpop.f32.mrf.mxu1  ;;  %1003 = vst [vmem:[%s2276_s3 + $0xb0] sm:$0xff] %v939_v50  ;;  %v876_v27 = vmul.f32 %v812_v36, %v620_v0  ;;  %1204 = verf.f32 %v688_v42  ;;  %v2123_v44 = vadd.f32 %v420_v8, %v1516_v41  ;;  %v622_v58 = vmul.f32 0.5, %v2051_v35 }
 0x13e   :  { %v2126_v47 = vadd.f32 %v580_v61, %v1516_v41  ;;  %v2128_v52 = vpop.f32.mrf.mxu0  ;;  %v1193_v56 = vpop.eup %1192  ;;  %1035 = vst [vmem:[%s2276_s3 + $0x1b0] sm:$0xff] %v971_v25  ;;  %v908_v60 = vmul.f32 %v844_v26, %v652_v49  ;;  %1206 = verf.f32 %v720_v57  ;;  %v654_v50 = vmul.f32 0.5, %v2054_v10 }
 0x13f   :  { %v2130_v43 = vpop.f32.mrf.mxu1  ;;  %v1195_v34 = vpop.eup %1194  ;;  %v940_v15 = vmul.f32 %v876_v27, %v393_v46  ;;  %v813_v54 = vadd.f32 1.0, %v1193_v56  ;;  %v689_v17 = vmul.f32 0.70710677, %v2123_v44  ;;  %v563_v61 = vadd.f32 %v2034_v11, %v1559_v14 }
 0x140   :  { %v424_v6 = vpop.f32.mrf.mxu0  ;;  %v972_v45 = vmul.f32 %v908_v60, %v553_v53  ;;  %v845_v28 = vadd.f32 1.0, %v1195_v34  ;;  %v721_v29 = vmul.f32 0.70710677, %v2126_v47  ;;  %v409_v49 = vadd.f32 %v2056_v39, %v1559_v14 }
 0x141   :  { %v584_v63 = vpop.f32.mrf.mxu1  ;;  %1004 = vst [vmem:[%s2276_s3 + $0xb8] sm:$0xff] %v940_v15  ;;  %v877_v9 = vmul.f32 %v813_v54, %v621_v16  ;;  %1208 = verf.f32 %v689_v17  ;;  %v2147_v51 = vadd.f32 %v424_v6, %v1516_v41  ;;  %v623_v27 = vmul.f32 0.5, %v2075_v5 }
 0x142   :  { %v2150_v13 = vadd.f32 %v584_v63, %v1516_v41  ;;  %v2152_v19 = vpop.f32.mrf.mxu0  ;;  %v1197_v1 = vpop.eup %1196  ;;  %1036 = vst [vmem:[%s2276_s3 + $0x1b8] sm:$0xff] %v972_v45  ;;  %v909_v62 = vmul.f32 %v845_v28, %v653_v59  ;;  %1210 = verf.f32 %v721_v29  ;;  %v655_v15 = vmul.f32 0.5, %v2078_v38 }
 0x143   :  { %v2154_v22 = vpop.f32.mrf.mxu1  ;;  %v1199_v55 = vpop.eup %1198  ;;  %v941_v37 = vmul.f32 %v877_v9, %v399_v12  ;;  %v814_v3 = vadd.f32 1.0, %v1197_v1  ;;  %v690_v33 = vmul.f32 0.70710677, %v2147_v51  ;;  %v569_v38 = vadd.f32 %v2058_v40, %v1559_v14 }
 0x144   :  { %v430_v32 = vpop.f32.mrf.mxu0  ;;  %v973_v7 = vmul.f32 %v909_v62, %v559_v23  ;;  %v846_v0 = vadd.f32 1.0, %v1199_v55  ;;  %v722_v2 = vmul.f32 0.70710677, %v2150_v13  ;;  %v624_v59 = vmul.f32 0.5, %v2099_v24 }
 0x145   :  { %v590_v46 = vpop.f32.mrf.mxu1  ;;  %1005 = vst [vmem:[%s2276_s3 + $0xc0] sm:$0xff] %v941_v37  ;;  %v878_v18 = vmul.f32 %v814_v3, %v622_v58  ;;  %1212 = verf.f32 %v690_v33  ;;  %v2171_v36 = vadd.f32 %v430_v32, %v1516_v41  ;;  %v413_v40 = vadd.f32 %v2080_v4, %v1559_v14 }
 0x146   :  { %v2174_v35 = vadd.f32 %v590_v46, %v1516_v41  ;;  %v2176_v42 = vpop.f32.mrf.mxu0  ;;  %v1201_v10 = vpop.eup %1200  ;;  %1037 = vst [vmem:[%s2276_s3 + $0x1c0] sm:$0xff] %v973_v7  ;;  %v910_v25 = vmul.f32 %v846_v0, %v654_v50  ;;  %1214 = verf.f32 %v722_v2  ;;  %v573_v24 = vadd.f32 %v2082_v20, %v1559_v14 }
 0x147   :  { %v2178_v8 = vpop.f32.mrf.mxu1  ;;  %v1203_v26 = vpop.eup %1202  ;;  %v942_v57 = vmul.f32 %v878_v18, %v403_v21  ;;  %v815_v56 = vadd.f32 1.0, %v1201_v10  ;;  %v691_v53 = vmul.f32 0.70710677, %v2171_v36  ;;  %v625_v58 = vmul.f32 0.5, %v2123_v44 }
 0x148   :  { %v434_v60 = vpop.f32.mrf.mxu0  ;;  %v974_v34 = vmul.f32 %v910_v25, %v563_v61  ;;  %v847_v16 = vadd.f32 1.0, %v1203_v26  ;;  %v723_v11 = vmul.f32 0.70710677, %v2174_v35  ;;  %v657_v4 = vmul.f32 0.5, %v2126_v47 }
 0x149   :  { %v594_v12 = vpop.f32.mrf.mxu1  ;;  %1006 = vst [vmem:[%s2276_s3 + $0xc8] sm:$0xff] %v942_v57  ;;  %v879_v39 = vmul.f32 %v815_v56, %v623_v27  ;;  %1216 = verf.f32 %v691_v53  ;;  %v2195_v54 = vadd.f32 %v434_v60, %v1516_v41  ;;  %v419_v46 = vadd.f32 %v2104_v48, %v1559_v14 }
 0x14a   :  { %v2198_v5 = vadd.f32 %v594_v12, %v1516_v41  ;;  %v1205_v17 = vpop.eup %1204  ;;  %1038 = vst [vmem:[%s2276_s3 + $0x1c8] sm:$0xff] %v974_v34  ;;  %v911_v6 = vmul.f32 %v847_v16, %v655_v15  ;;  %1218 = verf.f32 %v723_v11  ;;  %v656_v41 = vmul.f32 0.5, %v2102_v30 }
 0x14b   :  { %v1207_v63 = vpop.eup %1206  ;;  %v943_v45 = vmul.f32 %v879_v39, %v409_v49  ;;  %v816_v28 = vadd.f32 1.0, %v1205_v17  ;;  %v692_v29 = vmul.f32 0.70710677, %v2195_v54  ;;  %v579_v44 = vadd.f32 %v2106_v31, %v1559_v14 }
 0x14c   :  { %v975_v9 = vmul.f32 %v911_v6, %v569_v38  ;;  %v848_v1 = vadd.f32 1.0, %v1207_v63  ;;  %v724_v23 = vmul.f32 0.70710677, %v2198_v5  ;;  %v626_v2 = vmul.f32 0.5, %v2147_v51 }
 0x14d   :  { %1007 = vst [vmem:[%s2276_s3 + $0xd0] sm:$0xff] %v943_v45  ;;  %v880_v62 = vmul.f32 %v816_v28, %v624_v59  ;;  %1220 = verf.f32 %v692_v29  ;;  %v658_v61 = vmul.f32 0.5, %v2150_v13  ;;  %v423_v48 = vadd.f32 %v2128_v52, %v1559_v14 }
 0x14e   :  { %v1209_v21 = vpop.eup %1208  ;;  %1039 = vst [vmem:[%s2276_s3 + $0x1d0] sm:$0xff] %v975_v9  ;;  %v912_v30 = vmul.f32 %v848_v1, %v656_v41  ;;  %1222 = verf.f32 %v724_v23  ;;  %v583_v31 = vadd.f32 %v2130_v43, %v1559_v14  ;;  %v627_v27 = vmul.f32 0.5, %v2171_v36 }
 0x14f   :  { %v1211_v55 = vpop.eup %1210  ;;  %v944_v37 = vmul.f32 %v880_v62, %v413_v40  ;;  %v817_v3 = vadd.f32 1.0, %v1209_v21  ;;  %v659_v60 = vmul.f32 0.5, %v2174_v35  ;;  %v429_v52 = vadd.f32 %v2152_v19, %v1559_v14 }
 0x150   :  { %v976_v33 = vmul.f32 %v912_v30, %v573_v24  ;;  %v849_v32 = vadd.f32 1.0, %v1211_v55  ;;  %v589_v43 = vadd.f32 %v2154_v22, %v1559_v14  ;;  %v628_v11 = vmul.f32 0.5, %v2195_v54 }
 0x151   :  { %1008 = vst [vmem:[%s2276_s3 + $0xd8] sm:$0xff] %v944_v37  ;;  %v881_v7 = vmul.f32 %v817_v3, %v625_v58  ;;  %v660_v38 = vmul.f32 0.5, %v2198_v5  ;;  %v433_v19 = vadd.f32 %v2176_v42, %v1559_v14  ;;  %v593_v22 = vadd.f32 %v2178_v8, %v1559_v14 }
 0x152   :  { %v1213_v20 = vpop.eup %1212  ;;  %1040 = vst [vmem:[%s2276_s3 + $0x1d8] sm:$0xff] %v976_v33  ;;  %v913_v50 = vmul.f32 %v849_v32, %v657_v4 }
 0x153   :  { %v1215_v0 = vpop.eup %1214  ;;  %v945_v47 = vmul.f32 %v881_v7, %v419_v46  ;;  %v818_v18 = vadd.f32 1.0, %v1213_v20 }
 0x154   :  { %v977_v10 = vmul.f32 %v913_v50, %v579_v44  ;;  %v850_v25 = vadd.f32 1.0, %v1215_v0 }
 0x155   :  { %1009 = vst [vmem:[%s2276_s3 + $0xe0] sm:$0xff] %v945_v47  ;;  %v882_v49 = vmul.f32 %v818_v18, %v626_v2 }
 0x156   :  { %v1217_v26 = vpop.eup %1216  ;;  %1041 = vst [vmem:[%s2276_s3 + $0x1e0] sm:$0xff] %v977_v10  ;;  %v914_v51 = vmul.f32 %v850_v25, %v658_v61 }
 0x157   :  { %v1219_v57 = vpop.eup %1218  ;;  %v946_v13 = vmul.f32 %v882_v49, %v423_v48  ;;  %v819_v56 = vadd.f32 1.0, %v1217_v26 }
 0x158   :  { %v978_v53 = vmul.f32 %v914_v51, %v583_v31  ;;  %v851_v12 = vadd.f32 1.0, %v1219_v57 }
 0x159   :  { %1010 = vst [vmem:[%s2276_s3 + $0xe8] sm:$0xff] %v946_v13  ;;  %v883_v34 = vmul.f32 %v819_v56, %v627_v27 }
 0x15a   :  { %v1221_v15 = vpop.eup %1220  ;;  %1042 = vst [vmem:[%s2276_s3 + $0x1e8] sm:$0xff] %v978_v53  ;;  %v915_v36 = vmul.f32 %v851_v12, %v659_v60 }
 0x15b   :  { %v1223_v16 = vpop.eup %1222  ;;  %v947_v35 = vmul.f32 %v883_v34, %v429_v52  ;;  %v820_v39 = vadd.f32 1.0, %v1221_v15 }
 0x15c   :  { %v979_v17 = vmul.f32 %v915_v36, %v589_v43  ;;  %v852_v6 = vadd.f32 1.0, %v1223_v16 }
 0x15d   :  { %1011 = vst [vmem:[%s2276_s3 + $0xf0] sm:$0xff] %v947_v35  ;;  %v884_v63 = vmul.f32 %v820_v39, %v628_v11 }
 0x15e   :  { %1043 = vst [vmem:[%s2276_s3 + $0x1f0] sm:$0xff] %v979_v17  ;;  %v916_v54 = vmul.f32 %v852_v6, %v660_v38 }
 0x15f   :  { %v948_v45 = vmul.f32 %v884_v63, %v433_v19 }
 0x160   :  { %v980_v59 = vmul.f32 %v916_v54, %v593_v22 }
 0x161   :  { %1012 = vst [vmem:[%s2276_s3 + $0xf8] sm:$0xff] %v948_v45 }
 0x162   :  { %1044 = vst [vmem:[%s2276_s3 + $0x1f8] sm:$0xff] %v980_v59 }

</bundles_post_ra>
